<compile_context>
chip_gen: v7x
topology: tpu7x:2x2x1
jax: 0.10.0
libtpu: 0.0.40
codegen_flags: <defaults>
</compile_context>

<pallas_src>
import math

import jax
import jax.numpy as jnp
from jax.experimental import pallas as pl
from jax.experimental.pallas import tpu as pltpu

# Problem sizes (consistent with the module: graph_hidden_size=32, attn_head=4).
N = 16                  # nodes per graph
F = 32                  # graph_hidden_size (in_feats)
H = 4                   # attn_head
D = F // H              # out_feats per head
FFN_DIM = 4 * F
LN_EPS = 1e-5

B = 32                  # graphs in the batch
B_TILE = 16             # graphs per grid step
R = B_TILE * N          # node rows per grid step (= 256, fills the MXU M dim)


def _layernorm(x, gamma, beta):
    mu = jnp.mean(x, axis=-1, keepdims=True)
    xc = x - mu
    var = jnp.mean(xc * xc, axis=-1, keepdims=True)
    inv = jax.lax.rsqrt(var + LN_EPS)
    return xc * inv * gamma + beta


def gat_kernel(feat_ref, bias_ref, wq_ref, wk_ref, wv_ref,
               ln1g_ref, ln1b_ref, ln2g_ref, ln2b_ref,
               w1_ref, b1_ref, pa_ref, w2_ref, b2_ref,
               out_ref):
    x = feat_ref[...]                     # (R, F) node slab = B_TILE graphs
    bias = bias_ref[...]                  # (R, R) block-diagonal additive mask

    scale = 1.0 / math.sqrt(D * H)        # 1/sqrt(in_feats), matches the module
    q = jnp.dot(x, wq_ref[...], preferred_element_type=jnp.float32) * scale
    k = jnp.dot(x, wk_ref[...], preferred_element_type=jnp.float32)
    v = jnp.dot(x, wv_ref[...], preferred_element_type=jnp.float32)

    col = jax.lax.broadcasted_iota(jnp.int32, (1, F), 1)

    ft2 = jnp.zeros_like(x)
    for h in range(H):                    # static; every op is full-lane-width
        hm = ((col >= h * D) & (col < (h + 1) * D)).astype(jnp.float32)   # (1, F)
        # (q*hm) @ k^T == q_h @ k_h^T because head columns are disjoint.
        s = jax.lax.dot_general(q * hm, k,
                                dimension_numbers=(((1,), (1,)), ((), ())),
                                preferred_element_type=jnp.float32)        # (R, R)
        s = s + bias                      # edges: +0, non-edges/cross-graph: -1e30
        m = jnp.max(s, axis=-1, keepdims=True)
        p = jnp.exp(s - m)
        denom = jnp.sum(p, axis=-1, keepdims=True)
        # a_h @ (v*hm) puts head h's output into its own D columns; sum == concat.
        unnorm = jnp.dot(p, v * hm, preferred_element_type=jnp.float32)
        ft2 = ft2 + unnorm * pl.reciprocal(denom, approx=True)

    # Nodes with no in-edges: DGL's sum over an empty message set is 0.
    has_edge = (jnp.max(bias, axis=-1, keepdims=True) > -1.0).astype(jnp.float32)
    ft2 = ft2 * has_edge

    # residual + LN1
    rst = _layernorm(ft2 + x, ln1g_ref[...], ln1b_ref[...])

    # FFN: Linear -> PReLU (per-channel) -> Linear -> Dropout (identity in eval)
    hid = jnp.dot(rst, w1_ref[...], preferred_element_type=jnp.float32) + b1_ref[...]
    hid = jnp.where(hid >= 0.0, hid, pa_ref[...] * hid)
    ffn = jnp.dot(hid, w2_ref[...], preferred_element_type=jnp.float32) + b2_ref[...]

    # residual + LN2
    out_ref[...] = _layernorm(rst + ffn, ln2g_ref[...], ln2b_ref[...])


def gat_forward(feat, adj, params):
    """feat: (B, N, F); adj: (B, N, N) with adj[g, dst, src] = 1.0 iff edge src->dst."""
    Bg = feat.shape[0]
    assert feat.shape == (Bg, N, F) and adj.shape == (Bg, N, N)
    assert Bg % B_TILE == 0
    num_blocks = Bg // B_TILE
    tot_rows = Bg * N

    # Node-major slab: rows ordered (graph, node); features on the 128-lane axis.
    x = feat.reshape(tot_rows, F).astype(jnp.float32)

    # Block-diagonal additive attention bias for each tile of B_TILE graphs:
    # 0 on real edges (within a graph), -1e30 on non-edges and across graphs.
    adj_t = adj.reshape(num_blocks, B_TILE, N, N).astype(jnp.float32)
    eye = jnp.eye(B_TILE, dtype=jnp.float32)
    blockdiag = eye[None, :, None, :, None] * adj_t[:, :, :, None, :]
    blockdiag = blockdiag.reshape(num_blocks, R, R)
    bias = jnp.where(blockdiag > 0.0, 0.0, -1e30).astype(jnp.float32)
    bias = bias.reshape(num_blocks * R, R)

    args = (x, bias,
            params["wq"], params["wk"], params["wv"],
            params["ln1_g"], params["ln1_b"], params["ln2_g"], params["ln2_b"],
            params["w1"], params["b1"], params["prelu_a"],
            params["w2"], params["b2"])

    def full_spec(a):   # whole weight resident in VMEM (constant block index)
        return pl.BlockSpec(a.shape, lambda b: (0,) * a.ndim)

    in_specs = [
        pl.BlockSpec((R, F), lambda b: (b, 0)),      # node features tile
        pl.BlockSpec((R, R), lambda b: (b, 0)),      # attention bias tile
    ] + [full_spec(a) for a in args[2:]]

    # Advisory cost estimate so XLA schedules this call sensibly in a model.
    flops = (6 * tot_rows * F * F                       # q/k/v projections
             + num_blocks * H * 4 * R * R * F           # scores + attn @ v
             + 4 * tot_rows * F * FFN_DIM)              # FFN matmuls
    transcendentals = num_blocks * H * R * R + 2 * tot_rows
    bytes_accessed = sum(int(a.size) * a.dtype.itemsize for a in args) + tot_rows * F * 4
    cost = pl.CostEstimate(flops=int(flops),
                           transcendentals=int(transcendentals),
                           bytes_accessed=int(bytes_accessed))

    out = pl.pallas_call(
        gat_kernel,
        out_shape=jax.ShapeDtypeStruct((tot_rows, F), jnp.float32),
        grid=(num_blocks,),
        in_specs=in_specs,
        out_specs=pl.BlockSpec((R, F), lambda b: (b, 0)),
        compiler_params=pltpu.CompilerParams(
            dimension_semantics=("parallel",)),   # batch tiles across v7x's 2 TCs
        cost_estimate=cost,
    )(*args)
    return out.reshape(Bg, N, F)


def gat_reference(feat, adj, params):
    """Pure-JAX reference (per-graph, per-head) for sanity checking."""
    Bg = feat.shape[0]
    q = feat @ params["wq"]
    k = feat @ params["wk"]
    v = feat @ params["wv"]
    q = q.reshape(Bg, N, H, D)
    k = k.reshape(Bg, N, H, D)
    v = v.reshape(Bg, N, H, D)
    s = jnp.einsum("bdhf,bshf->bdsh", q, k) / math.sqrt(D * H)
    s = jnp.where(adj[:, :, :, None] > 0, s, -1e30)
    a = jax.nn.softmax(s, axis=2)
    ft2 = jnp.einsum("bdsh,bshf->bdhf", a, v).reshape(Bg, N, F)
    deg = jnp.sum(adj, axis=2, keepdims=True)            # in-degree of each dst
    ft2 = jnp.where(deg > 0, ft2, 0.0)                   # isolated nodes -> 0
    rst = _layernorm(ft2 + feat, params["ln1_g"], params["ln1_b"])
    hid = rst @ params["w1"] + params["b1"]
    hid = jnp.where(hid >= 0, hid, params["prelu_a"] * hid)
    ffn = hid @ params["w2"] + params["b2"]
    return _layernorm(rst + ffn, params["ln2_g"], params["ln2_b"])


def init_params(key):
    ks = jax.random.split(key, 8)
    scale_f = 1.0 / math.sqrt(F)
    scale_4f = 1.0 / math.sqrt(FFN_DIM)
    return {
        # Linear weights stored pre-transposed as (in, out) so kernel does x @ W.
        "wq": jax.random.uniform(ks[0], (F, F), jnp.float32, -scale_f, scale_f),
        "wk": jax.random.uniform(ks[1], (F, F), jnp.float32, -scale_f, scale_f),
        "wv": jax.random.uniform(ks[2], (F, F), jnp.float32, -scale_f, scale_f),
        "ln1_g": jnp.ones((1, F), jnp.float32),
        "ln1_b": jnp.zeros((1, F), jnp.float32),
        "ln2_g": jnp.ones((1, F), jnp.float32),
        "ln2_b": jnp.zeros((1, F), jnp.float32),
        "w1": jax.random.uniform(ks[3], (F, FFN_DIM), jnp.float32, -scale_f, scale_f),
        "b1": jax.random.uniform(ks[4], (1, FFN_DIM), jnp.float32, -scale_f, scale_f),
        "prelu_a": jnp.full((1, FFN_DIM), 0.25, jnp.float32),   # PReLU default init
        "w2": jax.random.uniform(ks[5], (FFN_DIM, F), jnp.float32, -scale_4f, scale_4f),
        "b2": jax.random.uniform(ks[6], (1, F), jnp.float32, -scale_4f, scale_4f),
    }


if __name__ == "__main__":
    key = jax.random.PRNGKey(0)
    k_feat, k_adj, k_par = jax.random.split(key, 3)

    feat = jax.random.normal(k_feat, (B, N, F), jnp.float32)

    # Random sparse adjacency with self-loops (typical GAT setup); the kernel
    # also handles isolated nodes correctly via the has_edge guard.
    adj = (jax.random.uniform(k_adj, (B, N, N)) < 0.3).astype(jnp.float32)
    adj = jnp.maximum(adj, jnp.eye(N, dtype=jnp.float32)[None])   # adj[g, dst, src]

    params = init_params(k_par)

    out = jax.block_until_ready(gat_forward(feat, adj, params))
    ref = gat_reference(feat, adj, params)

    assert out.shape == (B, N, F)
    assert jnp.allclose(out, ref, atol=2e-2, rtol=2e-2), "kernel/reference mismatch"
    print("KERNEL_OK")
</pallas_src>

<mosaic_0001>
module attributes {stable_mosaic.version = 11 : i64} {
  func.func @gat_kernel(%arg0: i32, %arg1: memref<256x32xf32, #tpu.memory_space<vmem>>, %arg2: memref<256x256xf32, #tpu.memory_space<vmem>>, %arg3: memref<32x32xf32, #tpu.memory_space<vmem>>, %arg4: memref<32x32xf32, #tpu.memory_space<vmem>>, %arg5: memref<32x32xf32, #tpu.memory_space<vmem>>, %arg6: memref<1x32xf32, #tpu.memory_space<vmem>>, %arg7: memref<1x32xf32, #tpu.memory_space<vmem>>, %arg8: memref<1x32xf32, #tpu.memory_space<vmem>>, %arg9: memref<1x32xf32, #tpu.memory_space<vmem>>, %arg10: memref<32x128xf32, #tpu.memory_space<vmem>>, %arg11: memref<1x128xf32, #tpu.memory_space<vmem>>, %arg12: memref<1x128xf32, #tpu.memory_space<vmem>>, %arg13: memref<128x32xf32, #tpu.memory_space<vmem>>, %arg14: memref<1x32xf32, #tpu.memory_space<vmem>>, %arg15: memref<256x32xf32, #tpu.memory_space<vmem>>) attributes {dimension_semantics = [#tpu.dimension_semantics<parallel>], iteration_bounds = array<i64: 2>, scalar_prefetch = 0 : i64, scratch_operands = 0 : i64, tpu.core_type = #tpu.core_type<tc>, window_params = [{transform_indices = @transform_0, window_bounds = array<i64: 256, 32>}, {transform_indices = @transform_1, window_bounds = array<i64: 256, 256>}, {pipeline_mode = #tpu.pipeline_mode<synchronous>, transform_indices = @transform_2, window_bounds = array<i64: 32, 32>}, {pipeline_mode = #tpu.pipeline_mode<synchronous>, transform_indices = @transform_3, window_bounds = array<i64: 32, 32>}, {pipeline_mode = #tpu.pipeline_mode<synchronous>, transform_indices = @transform_4, window_bounds = array<i64: 32, 32>}, {pipeline_mode = #tpu.pipeline_mode<synchronous>, transform_indices = @transform_5, window_bounds = array<i64: 1, 32>}, {pipeline_mode = #tpu.pipeline_mode<synchronous>, transform_indices = @transform_6, window_bounds = array<i64: 1, 32>}, {pipeline_mode = #tpu.pipeline_mode<synchronous>, transform_indices = @transform_7, window_bounds = array<i64: 1, 32>}, {pipeline_mode = #tpu.pipeline_mode<synchronous>, transform_indices = @transform_8, window_bounds = array<i64: 1, 32>}, {pipeline_mode = #tpu.pipeline_mode<synchronous>, transform_indices = @transform_9, window_bounds = array<i64: 32, 128>}, {pipeline_mode = #tpu.pipeline_mode<synchronous>, transform_indices = @transform_10, window_bounds = array<i64: 1, 128>}, {pipeline_mode = #tpu.pipeline_mode<synchronous>, transform_indices = @transform_11, window_bounds = array<i64: 1, 128>}, {pipeline_mode = #tpu.pipeline_mode<synchronous>, transform_indices = @transform_12, window_bounds = array<i64: 128, 32>}, {pipeline_mode = #tpu.pipeline_mode<synchronous>, transform_indices = @transform_13, window_bounds = array<i64: 1, 32>}, {transform_indices = @transform_14, window_bounds = array<i64: 256, 32>}]} {
    %c0 = arith.constant 0 : index
    %c0_0 = arith.constant 0 : index
    %0 = vector.load %arg1[%c0, %c0_0] : memref<256x32xf32, #tpu.memory_space<vmem>>, vector<256x32xf32>
    %c0_1 = arith.constant 0 : index
    %c0_2 = arith.constant 0 : index
    %1 = vector.load %arg2[%c0_1, %c0_2] : memref<256x256xf32, #tpu.memory_space<vmem>>, vector<256x256xf32>
    %c0_3 = arith.constant 0 : index
    %c0_4 = arith.constant 0 : index
    %2 = vector.load %arg3[%c0_3, %c0_4] : memref<32x32xf32, #tpu.memory_space<vmem>>, vector<32x32xf32>
    %cst = arith.constant dense<0.000000e+00> : vector<256x32xf32>
    %3 = tpu.matmul %0, %2, %cst {dimension_numbers = #tpu.dot_dimension_numbers<[1], [0], [0], [1], [0, 0, 1, 1], [], []>} : vector<256x32xf32>, vector<32x32xf32>, vector<256x32xf32> -> vector<256x32xf32>
    %cst_5 = arith.constant 0.176776692 : f32
    %4 = vector.broadcast %cst_5 : f32 to vector<256x32xf32>
    %5 = arith.mulf %3, %4 : vector<256x32xf32>
    %c0_6 = arith.constant 0 : index
    %c0_7 = arith.constant 0 : index
    %6 = vector.load %arg4[%c0_6, %c0_7] : memref<32x32xf32, #tpu.memory_space<vmem>>, vector<32x32xf32>
    %cst_8 = arith.constant dense<0.000000e+00> : vector<256x32xf32>
    %7 = tpu.matmul %0, %6, %cst_8 {dimension_numbers = #tpu.dot_dimension_numbers<[1], [0], [0], [1], [0, 0, 1, 1], [], []>} : vector<256x32xf32>, vector<32x32xf32>, vector<256x32xf32> -> vector<256x32xf32>
    %c0_9 = arith.constant 0 : index
    %c0_10 = arith.constant 0 : index
    %8 = vector.load %arg5[%c0_9, %c0_10] : memref<32x32xf32, #tpu.memory_space<vmem>>, vector<32x32xf32>
    %cst_11 = arith.constant dense<0.000000e+00> : vector<256x32xf32>
    %9 = tpu.matmul %0, %8, %cst_11 {dimension_numbers = #tpu.dot_dimension_numbers<[1], [0], [0], [1], [0, 0, 1, 1], [], []>} : vector<256x32xf32>, vector<32x32xf32>, vector<256x32xf32> -> vector<256x32xf32>
    %10 = tpu.iota {dimensions = array<i32: 1>} : vector<1x32xi32>
    %cst_12 = arith.constant 0.000000e+00 : f32
    %11 = vector.broadcast %cst_12 : f32 to vector<256x32xf32>
    %c0_i32 = arith.constant 0 : i32
    %12 = vector.broadcast %c0_i32 : i32 to vector<1x32xi32>
    %13 = arith.cmpi sge, %10, %12 : vector<1x32xi32>
    %c8_i32 = arith.constant 8 : i32
    %14 = vector.broadcast %c8_i32 : i32 to vector<1x32xi32>
    %15 = arith.cmpi slt, %10, %14 : vector<1x32xi32>
    %16 = arith.andi %13, %15 : vector<1x32xi1>
    %17 = arith.extui %16 : vector<1x32xi1> to vector<1x32xi32>
    %18 = arith.sitofp %17 : vector<1x32xi32> to vector<1x32xf32>
    %19 = vector.broadcast %18 : vector<1x32xf32> to vector<256x32xf32>
    %20 = arith.mulf %5, %19 : vector<256x32xf32>
    %cst_13 = arith.constant dense<0.000000e+00> : vector<256x256xf32>
    %21 = tpu.matmul %20, %7, %cst_13 {dimension_numbers = #tpu.dot_dimension_numbers<[1], [1], [0], [0], [0, 0, 1, 0], [], []>} : vector<256x32xf32>, vector<256x32xf32>, vector<256x256xf32> -> vector<256x256xf32>
    %22 = arith.addf %21, %1 : vector<256x256xf32>
    %cst_14 = arith.constant dense<0xFF800000> : vector<256xf32>
    %23 = vector.multi_reduction <maximumf>, %22, %cst_14 [1] : vector<256x256xf32> to vector<256xf32>
    %24 = vector.shape_cast %23 : vector<256xf32> to vector<256x1xf32>
    %25 = vector.broadcast %24 : vector<256x1xf32> to vector<256x256xf32>
    %26 = arith.subf %22, %25 : vector<256x256xf32>
    %27 = math.exp %26 : vector<256x256xf32>
    %cst_15 = arith.constant dense<0.000000e+00> : vector<256xf32>
    %28 = vector.multi_reduction <add>, %27, %cst_15 [1] : vector<256x256xf32> to vector<256xf32>
    %29 = vector.shape_cast %28 : vector<256xf32> to vector<256x1xf32>
    %30 = vector.broadcast %18 : vector<1x32xf32> to vector<256x32xf32>
    %31 = arith.mulf %9, %30 : vector<256x32xf32>
    %cst_16 = arith.constant dense<0.000000e+00> : vector<256x32xf32>
    %32 = tpu.matmul %27, %31, %cst_16 {dimension_numbers = #tpu.dot_dimension_numbers<[1], [0], [0], [1], [0, 0, 1, 1], [], []>} : vector<256x256xf32>, vector<256x32xf32>, vector<256x32xf32> -> vector<256x32xf32>
    %33 = tpu.reciprocal %29 {approx = true} : vector<256x1xf32> -> vector<256x1xf32>
    %34 = vector.broadcast %33 : vector<256x1xf32> to vector<256x32xf32>
    %35 = arith.mulf %32, %34 : vector<256x32xf32>
    %36 = arith.addf %11, %35 : vector<256x32xf32>
    %c8_i32_17 = arith.constant 8 : i32
    %37 = vector.broadcast %c8_i32_17 : i32 to vector<1x32xi32>
    %38 = arith.cmpi sge, %10, %37 : vector<1x32xi32>
    %c16_i32 = arith.constant 16 : i32
    %39 = vector.broadcast %c16_i32 : i32 to vector<1x32xi32>
    %40 = arith.cmpi slt, %10, %39 : vector<1x32xi32>
    %41 = arith.andi %38, %40 : vector<1x32xi1>
    %42 = arith.extui %41 : vector<1x32xi1> to vector<1x32xi32>
    %43 = arith.sitofp %42 : vector<1x32xi32> to vector<1x32xf32>
    %44 = vector.broadcast %43 : vector<1x32xf32> to vector<256x32xf32>
    %45 = arith.mulf %5, %44 : vector<256x32xf32>
    %cst_18 = arith.constant dense<0.000000e+00> : vector<256x256xf32>
    %46 = tpu.matmul %45, %7, %cst_18 {dimension_numbers = #tpu.dot_dimension_numbers<[1], [1], [0], [0], [0, 0, 1, 0], [], []>} : vector<256x32xf32>, vector<256x32xf32>, vector<256x256xf32> -> vector<256x256xf32>
    %47 = arith.addf %46, %1 : vector<256x256xf32>
    %cst_19 = arith.constant dense<0xFF800000> : vector<256xf32>
    %48 = vector.multi_reduction <maximumf>, %47, %cst_19 [1] : vector<256x256xf32> to vector<256xf32>
    %49 = vector.shape_cast %48 : vector<256xf32> to vector<256x1xf32>
    %50 = vector.broadcast %49 : vector<256x1xf32> to vector<256x256xf32>
    %51 = arith.subf %47, %50 : vector<256x256xf32>
    %52 = math.exp %51 : vector<256x256xf32>
    %cst_20 = arith.constant dense<0.000000e+00> : vector<256xf32>
    %53 = vector.multi_reduction <add>, %52, %cst_20 [1] : vector<256x256xf32> to vector<256xf32>
    %54 = vector.shape_cast %53 : vector<256xf32> to vector<256x1xf32>
    %55 = vector.broadcast %43 : vector<1x32xf32> to vector<256x32xf32>
    %56 = arith.mulf %9, %55 : vector<256x32xf32>
    %cst_21 = arith.constant dense<0.000000e+00> : vector<256x32xf32>
    %57 = tpu.matmul %52, %56, %cst_21 {dimension_numbers = #tpu.dot_dimension_numbers<[1], [0], [0], [1], [0, 0, 1, 1], [], []>} : vector<256x256xf32>, vector<256x32xf32>, vector<256x32xf32> -> vector<256x32xf32>
    %58 = tpu.reciprocal %54 {approx = true} : vector<256x1xf32> -> vector<256x1xf32>
    %59 = vector.broadcast %58 : vector<256x1xf32> to vector<256x32xf32>
    %60 = arith.mulf %57, %59 : vector<256x32xf32>
    %61 = arith.addf %36, %60 : vector<256x32xf32>
    %c16_i32_22 = arith.constant 16 : i32
    %62 = vector.broadcast %c16_i32_22 : i32 to vector<1x32xi32>
    %63 = arith.cmpi sge, %10, %62 : vector<1x32xi32>
    %c24_i32 = arith.constant 24 : i32
    %64 = vector.broadcast %c24_i32 : i32 to vector<1x32xi32>
    %65 = arith.cmpi slt, %10, %64 : vector<1x32xi32>
    %66 = arith.andi %63, %65 : vector<1x32xi1>
    %67 = arith.extui %66 : vector<1x32xi1> to vector<1x32xi32>
    %68 = arith.sitofp %67 : vector<1x32xi32> to vector<1x32xf32>
    %69 = vector.broadcast %68 : vector<1x32xf32> to vector<256x32xf32>
    %70 = arith.mulf %5, %69 : vector<256x32xf32>
    %cst_23 = arith.constant dense<0.000000e+00> : vector<256x256xf32>
    %71 = tpu.matmul %70, %7, %cst_23 {dimension_numbers = #tpu.dot_dimension_numbers<[1], [1], [0], [0], [0, 0, 1, 0], [], []>} : vector<256x32xf32>, vector<256x32xf32>, vector<256x256xf32> -> vector<256x256xf32>
    %72 = arith.addf %71, %1 : vector<256x256xf32>
    %cst_24 = arith.constant dense<0xFF800000> : vector<256xf32>
    %73 = vector.multi_reduction <maximumf>, %72, %cst_24 [1] : vector<256x256xf32> to vector<256xf32>
    %74 = vector.shape_cast %73 : vector<256xf32> to vector<256x1xf32>
    %75 = vector.broadcast %74 : vector<256x1xf32> to vector<256x256xf32>
    %76 = arith.subf %72, %75 : vector<256x256xf32>
    %77 = math.exp %76 : vector<256x256xf32>
    %cst_25 = arith.constant dense<0.000000e+00> : vector<256xf32>
    %78 = vector.multi_reduction <add>, %77, %cst_25 [1] : vector<256x256xf32> to vector<256xf32>
    %79 = vector.shape_cast %78 : vector<256xf32> to vector<256x1xf32>
    %80 = vector.broadcast %68 : vector<1x32xf32> to vector<256x32xf32>
    %81 = arith.mulf %9, %80 : vector<256x32xf32>
    %cst_26 = arith.constant dense<0.000000e+00> : vector<256x32xf32>
    %82 = tpu.matmul %77, %81, %cst_26 {dimension_numbers = #tpu.dot_dimension_numbers<[1], [0], [0], [1], [0, 0, 1, 1], [], []>} : vector<256x256xf32>, vector<256x32xf32>, vector<256x32xf32> -> vector<256x32xf32>
    %83 = tpu.reciprocal %79 {approx = true} : vector<256x1xf32> -> vector<256x1xf32>
    %84 = vector.broadcast %83 : vector<256x1xf32> to vector<256x32xf32>
    %85 = arith.mulf %82, %84 : vector<256x32xf32>
    %86 = arith.addf %61, %85 : vector<256x32xf32>
    %c24_i32_27 = arith.constant 24 : i32
    %87 = vector.broadcast %c24_i32_27 : i32 to vector<1x32xi32>
    %88 = arith.cmpi sge, %10, %87 : vector<1x32xi32>
    %c32_i32 = arith.constant 32 : i32
    %89 = vector.broadcast %c32_i32 : i32 to vector<1x32xi32>
    %90 = arith.cmpi slt, %10, %89 : vector<1x32xi32>
    %91 = arith.andi %88, %90 : vector<1x32xi1>
    %92 = arith.extui %91 : vector<1x32xi1> to vector<1x32xi32>
    %93 = arith.sitofp %92 : vector<1x32xi32> to vector<1x32xf32>
    %94 = vector.broadcast %93 : vector<1x32xf32> to vector<256x32xf32>
    %95 = arith.mulf %5, %94 : vector<256x32xf32>
    %cst_28 = arith.constant dense<0.000000e+00> : vector<256x256xf32>
    %96 = tpu.matmul %95, %7, %cst_28 {dimension_numbers = #tpu.dot_dimension_numbers<[1], [1], [0], [0], [0, 0, 1, 0], [], []>} : vector<256x32xf32>, vector<256x32xf32>, vector<256x256xf32> -> vector<256x256xf32>
    %97 = arith.addf %96, %1 : vector<256x256xf32>
    %cst_29 = arith.constant dense<0xFF800000> : vector<256xf32>
    %98 = vector.multi_reduction <maximumf>, %97, %cst_29 [1] : vector<256x256xf32> to vector<256xf32>
    %99 = vector.shape_cast %98 : vector<256xf32> to vector<256x1xf32>
    %100 = vector.broadcast %99 : vector<256x1xf32> to vector<256x256xf32>
    %101 = arith.subf %97, %100 : vector<256x256xf32>
    %102 = math.exp %101 : vector<256x256xf32>
    %cst_30 = arith.constant dense<0.000000e+00> : vector<256xf32>
    %103 = vector.multi_reduction <add>, %102, %cst_30 [1] : vector<256x256xf32> to vector<256xf32>
    %104 = vector.shape_cast %103 : vector<256xf32> to vector<256x1xf32>
    %105 = vector.broadcast %93 : vector<1x32xf32> to vector<256x32xf32>
    %106 = arith.mulf %9, %105 : vector<256x32xf32>
    %cst_31 = arith.constant dense<0.000000e+00> : vector<256x32xf32>
    %107 = tpu.matmul %102, %106, %cst_31 {dimension_numbers = #tpu.dot_dimension_numbers<[1], [0], [0], [1], [0, 0, 1, 1], [], []>} : vector<256x256xf32>, vector<256x32xf32>, vector<256x32xf32> -> vector<256x32xf32>
    %108 = tpu.reciprocal %104 {approx = true} : vector<256x1xf32> -> vector<256x1xf32>
    %109 = vector.broadcast %108 : vector<256x1xf32> to vector<256x32xf32>
    %110 = arith.mulf %107, %109 : vector<256x32xf32>
    %111 = arith.addf %86, %110 : vector<256x32xf32>
    %cst_32 = arith.constant dense<0xFF800000> : vector<256xf32>
    %112 = vector.multi_reduction <maximumf>, %1, %cst_32 [1] : vector<256x256xf32> to vector<256xf32>
    %113 = vector.shape_cast %112 : vector<256xf32> to vector<256x1xf32>
    %cst_33 = arith.constant -1.000000e+00 : f32
    %114 = vector.broadcast %cst_33 : f32 to vector<256x1xf32>
    %115 = arith.cmpf ogt, %113, %114 : vector<256x1xf32>
    %116 = arith.extui %115 : vector<256x1xi1> to vector<256x1xi32>
    %117 = arith.sitofp %116 : vector<256x1xi32> to vector<256x1xf32>
    %118 = vector.broadcast %117 : vector<256x1xf32> to vector<256x32xf32>
    %119 = arith.mulf %111, %118 : vector<256x32xf32>
    %120 = arith.addf %119, %0 : vector<256x32xf32>
    %c0_34 = arith.constant 0 : index
    %c0_35 = arith.constant 0 : index
    %121 = vector.load %arg6[%c0_34, %c0_35] : memref<1x32xf32, #tpu.memory_space<vmem>>, vector<1x32xf32>
    %c0_36 = arith.constant 0 : index
    %c0_37 = arith.constant 0 : index
    %122 = vector.load %arg7[%c0_36, %c0_37] : memref<1x32xf32, #tpu.memory_space<vmem>>, vector<1x32xf32>
    %cst_38 = arith.constant dense<0.000000e+00> : vector<256xf32>
    %123 = vector.multi_reduction <add>, %120, %cst_38 [1] : vector<256x32xf32> to vector<256xf32>
    %124 = vector.shape_cast %123 : vector<256xf32> to vector<256x1xf32>
    %cst_39 = arith.constant 3.200000e+01 : f32
    %125 = vector.broadcast %cst_39 : f32 to vector<256x1xf32>
    %126 = arith.divf %124, %125 : vector<256x1xf32>
    %127 = vector.broadcast %126 : vector<256x1xf32> to vector<256x32xf32>
    %128 = arith.subf %120, %127 : vector<256x32xf32>
    %129 = arith.mulf %128, %128 : vector<256x32xf32>
    %cst_40 = arith.constant dense<0.000000e+00> : vector<256xf32>
    %130 = vector.multi_reduction <add>, %129, %cst_40 [1] : vector<256x32xf32> to vector<256xf32>
    %131 = vector.shape_cast %130 : vector<256xf32> to vector<256x1xf32>
    %cst_41 = arith.constant 3.200000e+01 : f32
    %132 = vector.broadcast %cst_41 : f32 to vector<256x1xf32>
    %133 = arith.divf %131, %132 : vector<256x1xf32>
    %cst_42 = arith.constant 9.99999974E-6 : f32
    %134 = vector.broadcast %cst_42 : f32 to vector<256x1xf32>
    %135 = arith.addf %133, %134 : vector<256x1xf32>
    %136 = math.rsqrt %135 : vector<256x1xf32>
    %137 = vector.broadcast %136 : vector<256x1xf32> to vector<256x32xf32>
    %138 = arith.mulf %128, %137 : vector<256x32xf32>
    %139 = vector.broadcast %121 : vector<1x32xf32> to vector<256x32xf32>
    %140 = arith.mulf %138, %139 : vector<256x32xf32>
    %141 = vector.broadcast %122 : vector<1x32xf32> to vector<256x32xf32>
    %142 = arith.addf %140, %141 : vector<256x32xf32>
    %c0_43 = arith.constant 0 : index
    %c0_44 = arith.constant 0 : index
    %143 = vector.load %arg10[%c0_43, %c0_44] : memref<32x128xf32, #tpu.memory_space<vmem>>, vector<32x128xf32>
    %cst_45 = arith.constant dense<0.000000e+00> : vector<256x128xf32>
    %144 = tpu.matmul %142, %143, %cst_45 {dimension_numbers = #tpu.dot_dimension_numbers<[1], [0], [0], [1], [0, 0, 1, 1], [], []>} : vector<256x32xf32>, vector<32x128xf32>, vector<256x128xf32> -> vector<256x128xf32>
    %c0_46 = arith.constant 0 : index
    %c0_47 = arith.constant 0 : index
    %145 = vector.load %arg11[%c0_46, %c0_47] : memref<1x128xf32, #tpu.memory_space<vmem>>, vector<1x128xf32>
    %146 = vector.broadcast %145 : vector<1x128xf32> to vector<256x128xf32>
    %147 = arith.addf %144, %146 : vector<256x128xf32>
    %cst_48 = arith.constant 0.000000e+00 : f32
    %148 = vector.broadcast %cst_48 : f32 to vector<256x128xf32>
    %149 = arith.cmpf oge, %147, %148 : vector<256x128xf32>
    %c0_49 = arith.constant 0 : index
    %c0_50 = arith.constant 0 : index
    %150 = vector.load %arg12[%c0_49, %c0_50] : memref<1x128xf32, #tpu.memory_space<vmem>>, vector<1x128xf32>
    %151 = vector.broadcast %150 : vector<1x128xf32> to vector<256x128xf32>
    %152 = arith.mulf %151, %147 : vector<256x128xf32>
    %153 = arith.select %149, %147, %152 : vector<256x128xi1>, vector<256x128xf32>
    %c0_51 = arith.constant 0 : index
    %c0_52 = arith.constant 0 : index
    %154 = vector.load %arg13[%c0_51, %c0_52] : memref<128x32xf32, #tpu.memory_space<vmem>>, vector<128x32xf32>
    %cst_53 = arith.constant dense<0.000000e+00> : vector<256x32xf32>
    %155 = tpu.matmul %153, %154, %cst_53 {dimension_numbers = #tpu.dot_dimension_numbers<[1], [0], [0], [1], [0, 0, 1, 1], [], []>} : vector<256x128xf32>, vector<128x32xf32>, vector<256x32xf32> -> vector<256x32xf32>
    %c0_54 = arith.constant 0 : index
    %c0_55 = arith.constant 0 : index
    %156 = vector.load %arg14[%c0_54, %c0_55] : memref<1x32xf32, #tpu.memory_space<vmem>>, vector<1x32xf32>
    %157 = vector.broadcast %156 : vector<1x32xf32> to vector<256x32xf32>
    %158 = arith.addf %155, %157 : vector<256x32xf32>
    %159 = arith.addf %142, %158 : vector<256x32xf32>
    %c0_56 = arith.constant 0 : index
    %c0_57 = arith.constant 0 : index
    %160 = vector.load %arg8[%c0_56, %c0_57] : memref<1x32xf32, #tpu.memory_space<vmem>>, vector<1x32xf32>
    %c0_58 = arith.constant 0 : index
    %c0_59 = arith.constant 0 : index
    %161 = vector.load %arg9[%c0_58, %c0_59] : memref<1x32xf32, #tpu.memory_space<vmem>>, vector<1x32xf32>
    %cst_60 = arith.constant dense<0.000000e+00> : vector<256xf32>
    %162 = vector.multi_reduction <add>, %159, %cst_60 [1] : vector<256x32xf32> to vector<256xf32>
    %163 = vector.shape_cast %162 : vector<256xf32> to vector<256x1xf32>
    %cst_61 = arith.constant 3.200000e+01 : f32
    %164 = vector.broadcast %cst_61 : f32 to vector<256x1xf32>
    %165 = arith.divf %163, %164 : vector<256x1xf32>
    %166 = vector.broadcast %165 : vector<256x1xf32> to vector<256x32xf32>
    %167 = arith.subf %159, %166 : vector<256x32xf32>
    %168 = arith.mulf %167, %167 : vector<256x32xf32>
    %cst_62 = arith.constant dense<0.000000e+00> : vector<256xf32>
    %169 = vector.multi_reduction <add>, %168, %cst_62 [1] : vector<256x32xf32> to vector<256xf32>
    %170 = vector.shape_cast %169 : vector<256xf32> to vector<256x1xf32>
    %cst_63 = arith.constant 3.200000e+01 : f32
    %171 = vector.broadcast %cst_63 : f32 to vector<256x1xf32>
    %172 = arith.divf %170, %171 : vector<256x1xf32>
    %cst_64 = arith.constant 9.99999974E-6 : f32
    %173 = vector.broadcast %cst_64 : f32 to vector<256x1xf32>
    %174 = arith.addf %172, %173 : vector<256x1xf32>
    %175 = math.rsqrt %174 : vector<256x1xf32>
    %176 = vector.broadcast %175 : vector<256x1xf32> to vector<256x32xf32>
    %177 = arith.mulf %167, %176 : vector<256x32xf32>
    %178 = vector.broadcast %160 : vector<1x32xf32> to vector<256x32xf32>
    %179 = arith.mulf %177, %178 : vector<256x32xf32>
    %180 = vector.broadcast %161 : vector<1x32xf32> to vector<256x32xf32>
    %181 = arith.addf %179, %180 : vector<256x32xf32>
    %c0_65 = arith.constant 0 : index
    %c0_66 = arith.constant 0 : index
    %182 = vector.load %arg15[%c0_65, %c0_66] : memref<256x32xf32, #tpu.memory_space<vmem>>, vector<256x32xf32>
    tpu.vector_store %arg15[%c0_65, %c0_66], %181 {strides = array<i32>} : memref<256x32xf32, #tpu.memory_space<vmem>>, vector<256x32xf32>,
    return
  }
  func.func @transform_0(%arg0: i32) -> (i32, i32) {
    %c0_i32 = arith.constant 0 : i32
    %c0_i32_0 = arith.constant 0 : i32
    return %arg0, %c0_i32 : i32, i32
  }
  func.func @transform_1(%arg0: i32) -> (i32, i32) {
    %c0_i32 = arith.constant 0 : i32
    %c0_i32_0 = arith.constant 0 : i32
    return %arg0, %c0_i32 : i32, i32
  }
  func.func @transform_2(%arg0: i32) -> (i32, i32) {
    %c0_i32 = arith.constant 0 : i32
    %c0_i32_0 = arith.constant 0 : i32
    %c0_i32_1 = arith.constant 0 : i32
    return %c0_i32, %c0_i32_0 : i32, i32
  }
  func.func @transform_3(%arg0: i32) -> (i32, i32) {
    %c0_i32 = arith.constant 0 : i32
    %c0_i32_0 = arith.constant 0 : i32
    %c0_i32_1 = arith.constant 0 : i32
    return %c0_i32, %c0_i32_0 : i32, i32
  }
  func.func @transform_4(%arg0: i32) -> (i32, i32) {
    %c0_i32 = arith.constant 0 : i32
    %c0_i32_0 = arith.constant 0 : i32
    %c0_i32_1 = arith.constant 0 : i32
    return %c0_i32, %c0_i32_0 : i32, i32
  }
  func.func @transform_5(%arg0: i32) -> (i32, i32) {
    %c0_i32 = arith.constant 0 : i32
    %c0_i32_0 = arith.constant 0 : i32
    %c0_i32_1 = arith.constant 0 : i32
    return %c0_i32, %c0_i32_0 : i32, i32
  }
  func.func @transform_6(%arg0: i32) -> (i32, i32) {
    %c0_i32 = arith.constant 0 : i32
    %c0_i32_0 = arith.constant 0 : i32
    %c0_i32_1 = arith.constant 0 : i32
    return %c0_i32, %c0_i32_0 : i32, i32
  }
  func.func @transform_7(%arg0: i32) -> (i32, i32) {
    %c0_i32 = arith.constant 0 : i32
    %c0_i32_0 = arith.constant 0 : i32
    %c0_i32_1 = arith.constant 0 : i32
    return %c0_i32, %c0_i32_0 : i32, i32
  }
  func.func @transform_8(%arg0: i32) -> (i32, i32) {
    %c0_i32 = arith.constant 0 : i32
    %c0_i32_0 = arith.constant 0 : i32
    %c0_i32_1 = arith.constant 0 : i32
    return %c0_i32, %c0_i32_0 : i32, i32
  }
  func.func @transform_9(%arg0: i32) -> (i32, i32) {
    %c0_i32 = arith.constant 0 : i32
    %c0_i32_0 = arith.constant 0 : i32
    %c0_i32_1 = arith.constant 0 : i32
    return %c0_i32, %c0_i32_0 : i32, i32
  }
  func.func @transform_10(%arg0: i32) -> (i32, i32) {
    %c0_i32 = arith.constant 0 : i32
    %c0_i32_0 = arith.constant 0 : i32
    %c0_i32_1 = arith.constant 0 : i32
    return %c0_i32, %c0_i32_0 : i32, i32
  }
  func.func @transform_11(%arg0: i32) -> (i32, i32) {
    %c0_i32 = arith.constant 0 : i32
    %c0_i32_0 = arith.constant 0 : i32
    %c0_i32_1 = arith.constant 0 : i32
    return %c0_i32, %c0_i32_0 : i32, i32
  }
  func.func @transform_12(%arg0: i32) -> (i32, i32) {
    %c0_i32 = arith.constant 0 : i32
    %c0_i32_0 = arith.constant 0 : i32
    %c0_i32_1 = arith.constant 0 : i32
    return %c0_i32, %c0_i32_0 : i32, i32
  }
  func.func @transform_13(%arg0: i32) -> (i32, i32) {
    %c0_i32 = arith.constant 0 : i32
    %c0_i32_0 = arith.constant 0 : i32
    %c0_i32_1 = arith.constant 0 : i32
    return %c0_i32, %c0_i32_0 : i32, i32
  }
  func.func @transform_14(%arg0: i32) -> (i32, i32) {
    %c0_i32 = arith.constant 0 : i32
    %c0_i32_0 = arith.constant 0 : i32
    return %arg0, %c0_i32 : i32, i32
  }
}

</mosaic_0001>

<bundles_post_ra>
// kernel: tpu_custom_call.1
= control target key start
LH: loop header
LB: loop body
LE: loop exit
PB: predicated region body
PF: predicated region fallthrough
CT: control target
= control target key end

     0   :  { %s17180_s0 = inlined_call_operand.vmem [shape: f32[512,32], index: 0, kind: input, shape index: {}]   ;;  %s17181_s1 = inlined_call_operand.hbm [shape: f32[512,256], index: 1, kind: input, shape index: {}]   ;;  %s17182_s2 = inlined_call_operand.vmem [shape: f32[32,32], index: 2, kind: input, shape index: {}]   ;;  %s17183_s3 = inlined_call_operand.vmem [shape: f32[32,32], index: 3, kind: input, shape index: {}]   ;;  %s17184_s4 = inlined_call_operand.vmem [shape: f32[32,32], index: 4, kind: input, shape index: {}]   ;;  %s17185_s5 = inlined_call_operand.vmem [shape: f32[1,32], index: 5, kind: input, shape index: {}]   ;;  %s17186_s6 = inlined_call_operand.vmem [shape: f32[1,32], index: 6, kind: input, shape index: {}]   ;;  %s17187_s7 = inlined_call_operand.vmem [shape: f32[1,32], index: 7, kind: input, shape index: {}]   ;;  %s17188_s8 = inlined_call_operand.vmem [shape: f32[1,32], index: 8, kind: input, shape index: {}]   ;;  %s17189_s9 = inlined_call_operand.vmem [shape: f32[32,128], index: 9, kind: input, shape index: {}]   ;;  %s17190_s10 = inlined_call_operand.vmem [shape: f32[1,128], index: 10, kind: input, shape index: {}]   ;;  %s17191_s11 = inlined_call_operand.vmem [shape: f32[1,128], index: 11, kind: input, shape index: {}]   ;;  %s17192_s12 = inlined_call_operand.vmem [shape: f32[128,32], index: 12, kind: input, shape index: {}]   ;;  %s17193_s13 = inlined_call_operand.vmem [shape: f32[1,32], index: 13, kind: input, shape index: {}]   ;;  %s17194_s14 = inlined_call_operand.vmem [shape: f32[512,32], index: 14, kind: output, shape index: {}]  }
   0x1   :  { %17537 = sst [smem:[#allocation196_spill]] %s17181_s1 }
   0x2   :  { %19 = vsyncpa [#allocation3], 0 }
   0x3   :  { %21 = vsyncpa [#allocation3 + $0x1], 0  ;;  %s11211_s29 = smov 0   ;;  %s11213_s30 = smov 0  }
   0x4   :  { %s11215_s15 = smov 0   ;;  %s11217_s16 = smov 0  }
   0x5 LB: > { %s17195_s17 = sadd.s32 4294967295, %s11129_s16   ;;  %s11231_s18 = sadd.s32 1, %s11129_s16   ;;  %s11129_s16 = sphi %s11217_s16, %s18546_s16   ;;  %s11125_s15 = sphi %s11215_s15, %s18545_s15   ;;  %s11121_s30 = sphi %s11213_s30, %s18544_s30   ;;  %s11117_s29 = sphi %s11211_s29, %s18543_s29  }
   0x6   : > { %s57_s19 = ssub.s32 %s11129_s16, %s11231_s18  ;;  %s60_s20 = sadd.s32 1, %s11125_s15 }
   0x7   : > { %p58_p0 = scmp.eq.s32.totalorder %s57_s19, 0  ;;  %p67_p1 = scmp.ne.s32.totalorder %s11125_s15, %s11121_s30 }
   0x8   : > { %p68_p2 = scmp.eq.s32.totalorder %s11129_s16, 0  ;;  %p73_p3 = scmp.ne.s32.totalorder %s11121_s30, %s11117_s29 }
   0x9   : > { %s11241_s21 = scalar_select %p58_p0, %s11125_s15, %s60_s20  }
   0xa   : > { %p69_p4 = por %p68_p2, %p67_p1  ;;  %p74_p5 = scmp.eq.s32.totalorder %s17195_s17, 0 }
   0xb   : > { %17538 = sst [smem:[#allocation5_spill]] %s11241_s21  ;;  %p9885_p6 = scmp.lt.s32.totalorder %s11129_s16, 2 }
   0xc   : > { %p11246_p7 = por %p74_p5, %p73_p3  ;;  %s420_s23 = sand.u32 1, %s11125_s15  }
   0xd   : > { %s8106_s24 = sshll.u32 %s420_s23, 9  ;;  %s8546_s25 = sshll.u32 %s11129_s16, 13 }
   0xe   : > { %s17540_s1 = sld [smem:[#allocation196_spill]]  ;;  %s424_s29 = scalar_lea.vmem [#allocation2], %s8106_s24 }
   0xf   : > { %s432_s19 = sshll.u32 %s424_s29, 4  ;;  %p11259_p8 = pnand %p9885_p6, %p69_p4  ;;  %s11257_s19 = int_to_ptr.vmem [resolvable:$true] %s432_s19 }
  0x10   : > { %s11264_s17 = scalar_lea.sflag [#allocation3], %s420_s23 }
  0x11   : > { %p11067_p11 = pneg %p11259_p8 }
  0x14   : > { %s11255_s28 = scalar_lea.hbm %s17540_s1, %s8546_s25  ;;  %s11070_s27 = scalar_lea.hbm %s17540_s1, 16384 }
  0x15   : > { %s11065_s26 = scalar_lea.hbm %s11255_s28, 8192  ;;  %p11071_p0 = scmp.lt.u32.totalorder %s11255_s28, %s17540_s1 }
  0x16   : > { %p11066_p10 = scmp.ne.s32.totalorder %s11255_s28, %s11065_s26  ;;  %p11072_p1 = scmp.lt.u32.totalorder %s11070_s27, %s11065_s26 }
  0x17   : > { %p11074_p3 = scmp.lt.u32.totalorder %s11065_s26, %s11255_s28 }
  0x18   : > { %p11068_p12 = pnand %p11067_p11, %p11066_p10  ;;  %p11073_p2 = por %p11072_p1, %p11071_p0 }
  0x1a   : > { %p11069_p13 = pneg %p11068_p12  ;;  %p11075_p4 = por %p11074_p3, %p11073_p2 }
  0x1c   : > { %p11076_p5 = pnand %p11075_p4, %p11069_p13 }
  0x1e   : > { %11079 = shalt.err (!%p11076_p5)
}
  0x1f   : > { %s11080_s23 = scalar_lea.vmem %s11257_s19, 8192  ;;  %s11131_s24 = smov [#allocation2]  }
  0x20   : > { %p11081_p6 = scmp.ne.s32.totalorder %s11257_s19, %s11080_s23  ;;  %s11085_s25 = sshll.u32 %s11131_s24, 4  ;;  %s11086_s25 = int_to_ptr.vmem [resolvable:$false] %s11085_s25 }
  0x21   : > { %s11087_s21 = scalar_lea.vmem %s11086_s25, 16384  ;;  %p11088_p9 = scmp.lt.s32.totalorder %s11257_s19, %s11086_s25 }
  0x22   : > { %p11083_p10 = pnand %p11081_p6, %p11067_p11  ;;  %p11089_p0 = scmp.lt.s32.totalorder %s11087_s21, %s11080_s23 }
  0x24   : > { %p11084_p12 = pneg %p11083_p10  ;;  %p11090_p1 = por %p11089_p0, %p11088_p9 }
  0x26   : > { %p11091_p2 = pnand %p11090_p1, %p11084_p12 }
  0x28   : > { %11094 = shalt.err (!%p11091_p2)
}
  0x29   : > { %s11132_s26 = smov 256   ;;  %s11133_s27 = smov 16  }
  0x2a   : > { %9884 = dma.hbm_to_vmem [thread:$0]  (!%p11259_p8), %s11255_s28, 8192, %s11257_s19, %s11264_s17, %s11132_s26, %s11132_s26, %s11133_s27  }
  0x2b   : > { %p440_p11 = scmp.lt.s32.totalorder %s11129_s16, 3  ;;  %p17542_p13 = scmp.ge.s32.totalorder %s11129_s16, 1 }
  0x2d   : > { %p441_p3 = pnand %p17542_p13, %p440_p11 }
  0x2f   : > { %444 = sbr.rel (%p441_p3) target bundleno = 2591 (0xa1f), region = 76 }
  0x36   : > { %s446_s29 = sand.u32 1, %s11121_s30  }
  0x37   : > { %s8111_s23 = sshll.u32 %s446_s29, 9  ;;  %s447_s24 = scalar_lea.sflag [#allocation3], %s446_s29 }
  0x38   : > { %s11296_s25 = scalar_lea.vmem [#allocation2], %s8111_s23 }
  0x39   : > { %11112 = dma.done.wait (%p11246_p7), %s447_s24, 8192  }
  0x3a   : > { %11114 = vsyncadd (%p11246_p7), %s447_s24, 4294959104  ;;  %s17543_s21 = sadd.s32 4294967295, %s11129_s16   ;;  %vm613_vm0 = vcmask 261120   ;;  %v609_v0 = vld [vmem:[%s17182_s2] sm:$0xff]  ;;  %v610_v1 = vld [vmem:[%s17182_s2 + $0x8] sm:$0xff]  ;;  %v1425_v44 = vlaneseq  ;;  %v17196_v51 = vmov 0.0  }
  0x3b   : > { %s8112_s20 = sshll.u32 %s17543_s21, 5  ;;  %v611_v2 = vld [vmem:[%s17182_s2 + $0x10] sm:$0xff]  ;;  %v9427_v3 = vpack.c.bf16 %v610_v1, %v609_v0  ;;  %v612_v4 = vld [vmem:[%s17182_s2 + $0x18] sm:$0xff]  ;;  %v967_v7 = vld [vmem:[%s17183_s3] sm:$0xff] }
  0x3c   : > { %p501_p8 = scmp.lt.s32.totalorder %s8112_s20, 63  ;;  %v9431_v6 = vpack.c.bf16 %v612_v4, %v611_v2  ;;  %v968_v8 = vld [vmem:[%s17183_s3 + $0x8] sm:$0xff]  ;;  %v969_v10 = vld [vmem:[%s17183_s3 + $0x10] sm:$0xff]  ;;  %v970_v11 = vld [vmem:[%s17183_s3 + $0x18] sm:$0xff]  ;;  %v11564_v45 = vand.u32 127, %v1425_v44 }
  0x3d   : > { %9875 = vmatprep.subr.bf16.mxu1 %v9427_v3  ;;  %9428 = vmatprep.subr.bf16.mxu0 %v9427_v3  ;;  %v9435_v9 = vpack.c.bf16 %v968_v8, %v967_v7  ;;  %v9439_v15 = vpack.c.bf16 %v970_v11, %v969_v10  ;;  %vm11658_vm2 = vmpackc.low %vm613_vm0, %vm613_vm0 }
  0x3e   : > { %s18548_s20 = smov (!%p501_p8, %s8112_s20), 63  ;;  %9877 = vmatpush3.bf16.msra.mxu1 %v9427_v3  ;;  %9430 = vmatpush3.bf16.msra.mxu0 %v9427_v3  ;;  %17545 = vst [vmem:[#allocation7_spill] sm:$0xff] %v11564_v45  ;;  %vm1428_vm1 = vcmp.lt.s32.totalorder %v11564_v45, 8 }
  0x3f   : > { %s8113_s17 = sshll.u32 %s18548_s20, 3  ;;  %9876 = vmatprep.subr.bf16.mxu1 %v9431_v6  ;;  %9432 = vmatprep.subr.bf16.mxu0 %v9431_v6  ;;  %v11576_v52 = vsel %vm1428_vm1, 1.0, %v17196_v51 }
  0x40   : > { %s11312_s26 = scalar_lea.vmem %s17180_s0, %s8113_s17  ;;  %s17008_s27 = scalar_lea.vmem %s17194_s14, %s8113_s17 }
  0x41   : > { %v11327_v5 = vld [vmem:[%s11312_s26 + $0x80] sm:$0xff]  ;;  %v11344_v12 = vld [vmem:[%s11312_s26 + $0x88] sm:$0xff]  ;;  %v11350_v14 = vld [vmem:[%s11312_s26 + $0x90] sm:$0xff] }
  0x42   : > { %9155 = vmatprep.mubr.msk.f32.mxu1 %vm613_vm0, %v11327_v5  ;;  %9878 = vmatpush3.bf16.msra.mxu1 %v9431_v6  ;;  %v11347_v13 = vld [vmem:[%s11312_s26] sm:$0xff]  ;;  %v11355_v16 = vld [vmem:[%s11312_s26 + $0x8] sm:$0xff]  ;;  %v11364_v17 = vld [vmem:[%s11312_s26 + $0x98] sm:$0xff] }
  0x43   : > { %9434 = vmatpush3.bf16.msra.mxu0 %v9431_v6  ;;  %9436 = vmatprep.subr.bf16.mxu1 %v9435_v9  ;;  %v11367_v18 = vld [vmem:[%s11312_s26 + $0x10] sm:$0xff]  ;;  %v11370_v19 = vld [vmem:[%s11312_s26 + $0xa0] sm:$0xff]  ;;  %v11375_v20 = vld [vmem:[%s11312_s26 + $0x18] sm:$0xff] }
  0x44   : > { %9131 = vmatprep.mubr.msk.f32.mxu0 %vm613_vm0, %v11347_v13  ;;  %v11384_v21 = vld [vmem:[%s11312_s26 + $0xa8] sm:$0xff]  ;;  %v11387_v22 = vld [vmem:[%s11312_s26 + $0x20] sm:$0xff]  ;;  %v11390_v23 = vld [vmem:[%s11312_s26 + $0xb0] sm:$0xff] }
  0x45   : > { %9156 = vmatmul.mubr.msk.f32.vlgmr.msra.gmra.mrb[0].mxu1 %vm613_vm0, %v11344_v12  ;;  %v11395_v24 = vld [vmem:[%s11312_s26 + $0x28] sm:$0xff]  ;;  %v11400_v25 = vld [vmem:[%s11312_s26 + $0x30] sm:$0xff]  ;;  %v11407_v26 = vld [vmem:[%s11312_s26 + $0xb8] sm:$0xff] }
  0x46   : > { %9132 = vmatmul.mubr.msk.f32.vlgmr.msra.gmra.mrb[0].mxu0 %vm613_vm0, %v11355_v16  ;;  %9438 = vmatpush3.bf16.msra.mxu1 %v9435_v9  ;;  %v11412_v27 = vld [vmem:[%s11312_s26 + $0xc0] sm:$0xff]  ;;  %v11415_v28 = vld [vmem:[%s11312_s26 + $0x38] sm:$0xff]  ;;  %v11427_v30 = vld [vmem:[%s11312_s26 + $0xc8] sm:$0xff] }
  0x47   : > { %9158 = vmatprep.mubr.msk.f32.mxu1 %vm613_vm0, %v11350_v14  ;;  %9440 = vmatprep.subr.bf16.mxu1 %v9439_v15  ;;  %v11420_v29 = vld [vmem:[%s11312_s26 + $0x40] sm:$0xff]  ;;  %v11432_v31 = vld [vmem:[%s11312_s26 + $0xd0] sm:$0xff]  ;;  %v11435_v32 = vld [vmem:[%s11312_s26 + $0x48] sm:$0xff] }
  0x48   : > { %9134 = vmatprep.mubr.msk.f32.mxu0 %vm613_vm0, %v11367_v18  ;;  %v11440_v33 = vld [vmem:[%s11312_s26 + $0x50] sm:$0xff]  ;;  %v11447_v34 = vld [vmem:[%s11312_s26 + $0xd8] sm:$0xff]  ;;  %v11452_v35 = vld [vmem:[%s11312_s26 + $0xe0] sm:$0xff] }
  0x49   : > { %9159 = vmatmul.mubr.msk.f32.gmra.mrb[2].mxu1 %vm613_vm0, %v11364_v17  ;;  %v11455_v36 = vld [vmem:[%s11312_s26 + $0x58] sm:$0xff]  ;;  %v11460_v37 = vld [vmem:[%s11312_s26 + $0x60] sm:$0xff]  ;;  %v11467_v38 = vld [vmem:[%s11312_s26 + $0xe8] sm:$0xff] }
  0x4a   : > { %9135 = vmatmul.mubr.msk.f32.gmra.mrb[2].mxu0 %vm613_vm0, %v11375_v20  ;;  %9161 = vmatprep.mubr.msk.f32.mxu1 %vm613_vm0, %v11370_v19  ;;  %v11472_v39 = vld [vmem:[%s11312_s26 + $0xf0] sm:$0xff]  ;;  %v11475_v40 = vld [vmem:[%s11312_s26 + $0x68] sm:$0xff]  ;;  %v11487_v42 = vld [vmem:[%s11312_s26 + $0xf8] sm:$0xff] }
  0x4b   : > { %9442 = vmatpush3.bf16.msra.mxu1 %v9439_v15  ;;  %9137 = vmatprep.mubr.msk.f32.mxu0 %vm613_vm0, %v11387_v22  ;;  %v11480_v41 = vld [vmem:[%s11312_s26 + $0x70] sm:$0xff]  ;;  %17544 = vst [vmem:[#allocation6_spill] sm:$0xff] %v11487_v42  ;;  %v11492_v43 = vld [vmem:[%s11312_s26 + $0x78] sm:$0xff] }
  0x4d   : > { %9162 = vmatmul.mubr.msk.f32.gmra.mrb[4].mxu1 %vm613_vm0, %v11384_v21 }
  0x4e   : > { %9138 = vmatmul.mubr.msk.f32.gmra.mrb[4].mxu0 %vm613_vm0, %v11395_v24  ;;  %9164 = vmatprep.mubr.msk.f32.mxu1 %vm613_vm0, %v11390_v23 }
  0x4f   : > { %9140 = vmatprep.mubr.msk.f32.mxu0 %vm613_vm0, %v11400_v25 }
  0x51   : > { %9165 = vmatmul.mubr.msk.f32.gmra.mrb[6].mxu1 %vm613_vm0, %v11407_v26 }
  0x52   : > { %9141 = vmatmul.mubr.msk.f32.gmra.mrb[6].mxu0 %vm613_vm0, %v11415_v28  ;;  %9167 = vmatprep.mubr.msk.f32.mxu1 %vm613_vm0, %v11412_v27 }
  0x53   : > { %9143 = vmatprep.mubr.msk.f32.mxu0 %vm613_vm0, %v11420_v29 }
  0x55   : > { %9168 = vmatmul.mubr.msk.f32.gmra.mrb[8].mxu1 %vm613_vm0, %v11427_v30 }
  0x56   : > { %9144 = vmatmul.mubr.msk.f32.gmra.mrb[8].mxu0 %vm613_vm0, %v11435_v32  ;;  %9170 = vmatprep.mubr.msk.f32.mxu1 %vm613_vm0, %v11432_v31 }
  0x57   : > { %9146 = vmatprep.mubr.msk.f32.mxu0 %vm613_vm0, %v11440_v33 }
  0x59   : > { %9171 = vmatmul.mubr.msk.f32.gmra.mrb[10].mxu1 %vm613_vm0, %v11447_v34 }
  0x5a   : > { %9147 = vmatmul.mubr.msk.f32.gmra.mrb[10].mxu0 %vm613_vm0, %v11455_v36  ;;  %9173 = vmatprep.mubr.msk.f32.mxu1 %vm613_vm0, %v11452_v35 }
  0x5b   : > { %9149 = vmatprep.mubr.msk.f32.mxu0 %vm613_vm0, %v11460_v37 }
  0x5d   : > { %9174 = vmatmul.mubr.msk.f32.gmra.mrb[12].mxu1 %vm613_vm0, %v11467_v38 }
  0x5e   : > { %9150 = vmatmul.mubr.msk.f32.gmra.mrb[12].mxu0 %vm613_vm0, %v11475_v40  ;;  %9176 = vmatprep.mubr.msk.f32.mxu1 %vm613_vm0, %v11472_v39 }
  0x5f   : > { %9152 = vmatprep.mubr.msk.f32.mxu0 %vm613_vm0, %v11480_v41 }
  0x61   : > { %9177 = vmatmul.mubr.msk.f32.gmra.mrb[14].mxu1 %vm613_vm0, %v11487_v42 }
  0x62   : > { %9153 = vmatmul.mubr.msk.f32.gmra.mrb[14].mxu0 %vm613_vm0, %v11492_v43  ;;  %9187 = vmatprep.mubr.msk.f32.mxu1 %vm613_vm0, %v11347_v13 }
  0x63   : > { %9243 = vmatprep.mubr.msk.f32.mxu0 %vm613_vm0, %v11347_v13 }
  0x65   : > { %9188 = vmatmul.mubr.msk.f32.vlgmr.msra.gmra.mrb[16].mxu1 %vm613_vm0, %v11355_v16 }
  0x66   : > { %9190 = vmatprep.mubr.msk.f32.mxu1 %vm613_vm0, %v11367_v18 }
  0x69   : > { %9191 = vmatmul.mubr.msk.f32.gmra.mrb[18].mxu1 %vm613_vm0, %v11375_v20 }
  0x6a   : > { %9193 = vmatprep.mubr.msk.f32.mxu1 %vm613_vm0, %v11387_v22 }
  0x6d   : > { %9194 = vmatmul.mubr.msk.f32.gmra.mrb[20].mxu1 %vm613_vm0, %v11395_v24 }
  0x6e   : > { %9196 = vmatprep.mubr.msk.f32.mxu1 %vm613_vm0, %v11400_v25 }
  0x71   : > { %9197 = vmatmul.mubr.msk.f32.gmra.mrb[22].mxu1 %vm613_vm0, %v11415_v28 }
  0x72   : > { %9199 = vmatprep.mubr.msk.f32.mxu1 %vm613_vm0, %v11420_v29 }
  0x75   : > { %9200 = vmatmul.mubr.msk.f32.gmra.mrb[24].mxu1 %vm613_vm0, %v11435_v32 }
  0x76   : > { %9202 = vmatprep.mubr.msk.f32.mxu1 %vm613_vm0, %v11440_v33 }
  0x79   : > { %9203 = vmatmul.mubr.msk.f32.gmra.mrb[26].mxu1 %vm613_vm0, %v11455_v36 }
  0x7a   : > { %9205 = vmatprep.mubr.msk.f32.mxu1 %vm613_vm0, %v11460_v37 }
  0x7d   : > { %9206 = vmatmul.mubr.msk.f32.gmra.mrb[28].mxu1 %vm613_vm0, %v11475_v40 }
  0x7e   : > { %9208 = vmatprep.mubr.msk.f32.mxu1 %vm613_vm0, %v11480_v41 }
  0x81   : > { %9209 = vmatmul.mubr.msk.f32.gmra.mrb[30].mxu1 %vm613_vm0, %v11492_v43 }
  0x82   : > { %9211 = vmatprep.mubr.msk.f32.mxu1 %vm613_vm0, %v11327_v5 }
  0x85   : > { %9212 = vmatmul.mubr.msk.f32.gmra.mrb[32].mxu1 %vm613_vm0, %v11344_v12 }
  0x86   : > { %9214 = vmatprep.mubr.msk.f32.mxu1 %vm613_vm0, %v11350_v14 }
  0x89   : > { %9215 = vmatmul.mubr.msk.f32.gmra.mrb[34].mxu1 %vm613_vm0, %v11364_v17 }
  0x8a   : > { %9217 = vmatprep.mubr.msk.f32.mxu1 %vm613_vm0, %v11370_v19 }
  0x8d   : > { %9218 = vmatmul.mubr.msk.f32.gmra.mrb[36].mxu1 %vm613_vm0, %v11384_v21 }
  0x8e   : > { %9220 = vmatprep.mubr.msk.f32.mxu1 %vm613_vm0, %v11390_v23 }
  0x91   : > { %9221 = vmatmul.mubr.msk.f32.gmra.mrb[38].mxu1 %vm613_vm0, %v11407_v26 }
  0x92   : > { %9223 = vmatprep.mubr.msk.f32.mxu1 %vm613_vm0, %v11412_v27 }
  0x95   : > { %9224 = vmatmul.mubr.msk.f32.gmra.mrb[40].mxu1 %vm613_vm0, %v11427_v30 }
  0x96   : > { %9226 = vmatprep.mubr.msk.f32.mxu1 %vm613_vm0, %v11432_v31 }
  0x99   : > { %9227 = vmatmul.mubr.msk.f32.gmra.mrb[42].mxu1 %vm613_vm0, %v11447_v34 }
  0x9a   : > { %9229 = vmatprep.mubr.msk.f32.mxu1 %vm613_vm0, %v11452_v35 }
  0x9d   : > { %9230 = vmatmul.mubr.msk.f32.gmra.mrb[44].mxu1 %vm613_vm0, %v11467_v38 }
  0x9e   : > { %9232 = vmatprep.mubr.msk.f32.mxu1 %vm613_vm0, %v11472_v39 }
  0xa1   : > { %9233 = vmatmul.mubr.msk.f32.gmra.mrb[46].mxu1 %vm613_vm0, %v11487_v42 }
 0x118   : > { %v11566_v46 = vpop.f32.mrb[0].mxu1 }
 0x119   : > { %17546 = vst [vmem:[#allocation8_spill] sm:$0xff] %v11566_v46  ;;  %v11568_v47 = vpop.f32.mrb[0].mxu0  ;;  %v11571_v48 = vpop.f32.mrb[1].mxu1 }
 0x11a   : > { %17547 = vst [vmem:[#allocation9_spill] sm:$0xff] %v11571_v48  ;;  %v776_v49 = vpop.f32.mrb[1].mxu0 }
 0x11b   : > { %v11573_v50 = vmul.f32 0.17677669, %v776_v49 }
 0x11c   : > { %v11578_v53 = vpop.f32.mrb[2].mxu1 }
 0x11d   : > { %17548 = vst [vmem:[#allocation10_spill] sm:$0xff] %v11573_v50  ;;  %17549 = vst [vmem:[#allocation11_spill] sm:$0xff] %v11578_v53  ;;  %v11582_v54 = vmul.f32 %v11576_v52, %v11573_v50  ;;  %v11584_v55 = vpop.f32.mrb[2].mxu0  ;;  %v11586_v56 = vpop.f32.mrb[3].mxu1 }
 0x11e   : > { %17550 = vst [vmem:[#allocation12_spill] sm:$0xff] %v11586_v56  ;;  %v11588_v57 = vpop.f32.mrb[3].mxu0 }
 0x11f   : > { %8687 = vmatprep.mubr.msk.f32.mxu1 %vm613_vm0, %v11582_v54 }
 0x120   : > { %v11592_v58 = vpop.f32.mrb[4].mxu1 }
 0x121   : > { %17551 = vst [vmem:[#allocation13_spill] sm:$0xff] %v11592_v58  ;;  %v11594_v59 = vpop.f32.mrb[5].mxu1  ;;  %v11598_v61 = vpop.f32.mrb[4].mxu0 }
 0x122   : > { %17552 = vst [vmem:[#allocation14_spill] sm:$0xff] %v11594_v59  ;;  %v11602_v63 = vpop.f32.mrb[5].mxu0 }
 0x124   : > { %v11596_v60 = vpop.f32.mrb[6].mxu1 }
 0x125   : > { %17553 = vst [vmem:[#allocation15_spill] sm:$0xff] %v11596_v60  ;;  %v11600_v62 = vpop.f32.mrb[7].mxu1  ;;  %v11610_v3 = vpop.f32.mrb[6].mxu0 }
 0x126   : > { %17554 = vst [vmem:[#allocation16_spill] sm:$0xff] %v11600_v62  ;;  %v11614_v6 = vpop.f32.mrb[7].mxu0 }
 0x128   : > { %v11604_v0 = vpop.f32.mrb[8].mxu1 }
 0x129   : > { %17555 = vst [vmem:[#allocation17_spill] sm:$0xff] %v11604_v0  ;;  %v11606_v1 = vpop.f32.mrb[9].mxu1  ;;  %v11622_v10 = vpop.f32.mrb[8].mxu0 }
 0x12a   : > { %17556 = vst [vmem:[#allocation18_spill] sm:$0xff] %v11606_v1  ;;  %17562 = vst [vmem:[#allocation24_spill] sm:$0xff] %v11622_v10  ;;  %v11626_v13 = vpop.f32.mrb[9].mxu0 }
 0x12c   : > { %v11608_v2 = vpop.f32.mrb[10].mxu1 }
 0x12d   : > { %17557 = vst [vmem:[#allocation19_spill] sm:$0xff] %v11608_v2  ;;  %v11612_v4 = vpop.f32.mrb[11].mxu1  ;;  %v11630_v50 = vpop.f32.mrb[10].mxu0 }
 0x12e   : > { %17558 = vst [vmem:[#allocation20_spill] sm:$0xff] %v11612_v4  ;;  %17564 = vst [vmem:[#allocation26_spill] sm:$0xff] %v11630_v50  ;;  %v11632_v2 = vpop.f32.mrb[11].mxu0 }
 0x12f   : > { %17565 = vst [vmem:[#allocation27_spill] sm:$0xff] %v11632_v2 }
 0x130   : > { %v11616_v7 = vpop.f32.mrb[12].mxu1 }
 0x131   : > { %17559 = vst [vmem:[#allocation21_spill] sm:$0xff] %v11616_v7  ;;  %v11618_v8 = vpop.f32.mrb[13].mxu1 }
 0x132   : > { %17560 = vst [vmem:[#allocation22_spill] sm:$0xff] %v11618_v8 }
 0x134   : > { %v11620_v9 = vpop.f32.mrb[14].mxu1 }
 0x135   : > { %17561 = vst [vmem:[#allocation23_spill] sm:$0xff] %v11620_v9  ;;  %v11624_v11 = vpop.f32.mrb[15].mxu1 }
 0x136   : > { %17563 = vst [vmem:[#allocation25_spill] sm:$0xff] %v11624_v11  ;;  %v11638_v11 = vpop.f32.mrb[12].mxu0 }
 0x137   : > { %17566 = vst [vmem:[#allocation28_spill] sm:$0xff] %v11638_v11  ;;  %v11640_v60 = vpop.f32.mrb[13].mxu0 }
 0x138   : > { %v9189_v15 = vpop.f32.mrb[16].mxu1  ;;  %17567 = vst [vmem:[#allocation29_spill] sm:$0xff] %v11640_v60  ;;  %v11646_v53 = vpop.f32.mrb[14].mxu0 }
 0x139   : > { %v1037_v44 = vpop.f32.mrb[17].mxu1  ;;  %17568 = vst [vmem:[#allocation30_spill] sm:$0xff] %v11646_v53 }
 0x13a   : > { %v11628_v49 = vpack.c.bf16 %v9189_v15, %v1037_v44 }
 0x13c   : > { %v9192_v51 = vpop.f32.mrb[18].mxu1 }
 0x13d   : > { %v1047_v45 = vpop.f32.mrb[19].mxu1 }
 0x13e   : > { %v11634_v7 = vpack.c.bf16 %v9192_v51, %v1047_v45  ;;  %v11648_v51 = vpop.f32.mrb[15].mxu0 }
 0x13f   : > { %17569 = vst [vmem:[#allocation31_spill] sm:$0xff] %v11648_v51 }
 0x140   : > { %v9195_v8 = vpop.f32.mrb[20].mxu1 }
 0x141   : > { %v1057_v9 = vpop.f32.mrb[21].mxu1 }
 0x142   : > { %v11636_v4 = vpack.c.bf16 %v9195_v8, %v1057_v9 }
 0x144   : > { %v9198_v0 = vpop.f32.mrb[22].mxu1 }
 0x145   : > { %v1067_v1 = vpop.f32.mrb[23].mxu1 }
 0x146   : > { %v11642_v15 = vpack.c.bf16 %v9198_v0, %v1067_v1 }
 0x148   : > { %v9201_v44 = vpop.f32.mrb[24].mxu1 }
 0x149   : > { %v1077_v62 = vpop.f32.mrb[25].mxu1 }
 0x14a   : > { %v11644_v58 = vpack.c.bf16 %v9201_v44, %v1077_v62 }
 0x14c   : > { %v9204_v59 = vpop.f32.mrb[26].mxu1 }
 0x14d   : > { %v1087_v45 = vpop.f32.mrb[27].mxu1 }
 0x14e   : > { %v11650_v8 = vpack.c.bf16 %v9204_v59, %v1087_v45  ;;  %v1197_v45 = vld [vmem:[%s17184_s4 + $0x8] sm:$0xff] }
 0x150   : > { %17570 = vst [vmem:[#allocation32_spill] sm:$0xff] %v11650_v8  ;;  %v9207_v9 = vpop.f32.mrb[28].mxu1 }
 0x151   : > { %v1097_v56 = vpop.f32.mrb[29].mxu1 }
 0x152   : > { %v11652_v46 = vpack.c.bf16 %v9207_v9, %v1097_v56 }
 0x154   : > { %17571 = vst [vmem:[#allocation33_spill] sm:$0xff] %v11652_v46  ;;  %v9210_v48 = vpop.f32.mrb[30].mxu1 }
 0x155   : > { %v1107_v11 = vpop.f32.mrb[31].mxu1 }
 0x156   : > { %v11654_v0 = vpack.c.bf16 %v9210_v48, %v1107_v11 }
 0x158   : > { %17572 = vst [vmem:[#allocation34_spill] sm:$0xff] %v11654_v0  ;;  %v9213_v1 = vpop.f32.mrb[32].mxu1 }
 0x159   : > { %v1117_v60 = vpop.f32.mrb[33].mxu1 }
 0x15a   : > { %v11662_v44 = vpack.c.bf16 %v9213_v1, %v1117_v60  ;;  %v1196_v60 = vld [vmem:[%s17184_s4] sm:$0xff] }
 0x15b   : > { %v9443_v1 = vpack.c.bf16 %v1197_v45, %v1196_v60 }
 0x15c   : > { %9453 = vmatprep.subr.msk.bf16.mxu1 %vm11658_vm2, %v11662_v44  ;;  %v9216_v56 = vpop.f32.mrb[34].mxu1 }
 0x15d   : > { %9456 = vmatpush3.bf16.xpose.msk.msra.mxu1 %vm11658_vm2, %v11628_v49  ;;  %v1127_v48 = vpop.f32.mrb[35].mxu1  ;;  %9444 = vmatprep.subr.bf16.mxu0 %v9443_v1 }
 0x15e   : > { %v11670_v59 = vpack.c.bf16 %v9216_v56, %v1127_v48  ;;  %9446 = vmatpush3.bf16.msra.mxu0 %v9443_v1  ;;  %v1198_v1 = vld [vmem:[%s17184_s4 + $0x10] sm:$0xff] }
 0x160   : > { %9459 = vmatprep.subr.msk.bf16.mxu1 %vm11658_vm2, %v11670_v59  ;;  %v9219_v11 = vpop.f32.mrb[36].mxu1 }
 0x161   : > { %v1137_v9 = vpop.f32.mrb[37].mxu1 }
 0x162   : > { %v11681_v53 = vpack.c.bf16 %v9219_v11, %v1137_v9 }
 0x164   : > { %v9222_v56 = vpop.f32.mrb[38].mxu1 }
 0x165   : > { %9462 = vmatpush3.bf16.xpose.msk.msra.mxu1 %vm11658_vm2, %v11634_v7  ;;  %v1147_v48 = vpop.f32.mrb[39].mxu1 }
 0x166   : > { %9465 = vmatprep.subr.msk.bf16.mxu1 %vm11658_vm2, %v11681_v53  ;;  %v11689_v51 = vpack.c.bf16 %v9222_v56, %v1147_v48 }
 0x168   : > { %v9225_v50 = vpop.f32.mrb[40].mxu1 }
 0x169   : > { %v1157_v2 = vpop.f32.mrb[41].mxu1 }
 0x16a   : > { %v11691_v10 = vpack.c.bf16 %v9225_v50, %v1157_v2  ;;  %v1199_v50 = vld [vmem:[%s17184_s4 + $0x18] sm:$0xff] }
 0x16b   : > { %v9447_v56 = vpack.c.bf16 %v1199_v50, %v1198_v1 }
 0x16c   : > { %v9228_v11 = vpop.f32.mrb[42].mxu1 }
 0x16d   : > { %9468 = vmatpush3.bf16.xpose.msk.msra.mxu1 %vm11658_vm2, %v11636_v4  ;;  %v1167_v60 = vpop.f32.mrb[43].mxu1  ;;  %9448 = vmatprep.subr.bf16.mxu0 %v9447_v56 }
 0x16e   : > { %9471 = vmatprep.subr.msk.bf16.mxu1 %vm11658_vm2, %v11689_v51  ;;  %v11699_v45 = vpack.c.bf16 %v9228_v11, %v1167_v60  ;;  %9450 = vmatpush3.bf16.msra.mxu0 %v9447_v56 }
 0x170   : > { %v9231_v9 = vpop.f32.mrb[44].mxu1 }
 0x171   : > { %v1177_v2 = vpop.f32.mrb[45].mxu1  ;;  %9244 = vmatmul.mubr.msk.f32.vlgmr.msra.gmra.mrb[16].mxu0 %vm613_vm0, %v11355_v16  ;;  %v11774_v16 = vmul.f32 0.17677669, %v11568_v47  ;;  %v17590_v47 = vld [vmem:[#allocation31_spill] sm:$0xff] }
 0x172   : > { %v11707_v48 = vpack.c.bf16 %v9231_v9, %v1177_v2  ;;  %9246 = vmatprep.mubr.msk.f32.mxu0 %vm613_vm0, %v11367_v18  ;;  %v11781_v18 = vmul.f32 0.17677669, %v11588_v57  ;;  %v17596_v9 = vld [vmem:[#allocation8_spill] sm:$0xff] }
 0x173   : > { %v11961_v1 = vmul.f32 0.17677669, %v17596_v9  ;;  %v17598_v2 = vld [vmem:[#allocation12_spill] sm:$0xff]  ;;  %v17616_v9 = vld [vmem:[#allocation19_spill] sm:$0xff] }
 0x174   : > { %17575 = vst [vmem:[#allocation35_spill] sm:$0xff] %v11707_v48  ;;  %v9234_v42 = vpop.f32.mrb[46].mxu1  ;;  %v11968_v56 = vmul.f32 0.17677669, %v17598_v2 }
 0x175   : > { %9474 = vmatpush3.bf16.xpose.msk.msra.mxu1 %vm11658_vm2, %v11642_v15  ;;  %v1187_v11 = vpop.f32.mrb[47].mxu1  ;;  %9247 = vmatmul.mubr.msk.f32.gmra.mrb[18].mxu0 %vm613_vm0, %v11375_v20 }
 0x176   : > { %9477 = vmatprep.subr.msk.bf16.mxu1 %vm11658_vm2, %v11691_v10  ;;  %v11715_v60 = vpack.c.bf16 %v9234_v42, %v1187_v11  ;;  %9249 = vmatprep.mubr.msk.f32.mxu0 %vm613_vm0, %v11387_v22  ;;  %v11838_v22 = vmul.f32 0.17677669, %v11614_v6  ;;  %v17588_v42 = vld [vmem:[#allocation28_spill] sm:$0xff]  ;;  %17599 = vst [vmem:[#allocation8_spill] sm:$0xff] %v11968_v56  ;;  %v1449_v11 = vmul.f32 %v11576_v52, %v11961_v1 }
 0x178   : > { %17576 = vst [vmem:[#allocation36_spill] sm:$0xff] %v11715_v60  ;;  %17577 = vst [vmem:[#allocation37_spill] sm:$0xff] %v11838_v22 }
 0x179   : > { %9250 = vmatmul.mubr.msk.f32.gmra.mrb[20].mxu0 %vm613_vm0, %v11395_v24  ;;  %v1438_v24 = vmul.f32 %v11576_v52, %v11838_v22 }
 0x17a   : > { %9252 = vmatprep.mubr.msk.f32.mxu0 %vm613_vm0, %v11400_v25  ;;  %v11857_v25 = vmul.f32 0.17677669, %v11610_v3  ;;  %v17594_v3 = vld [vmem:[#allocation9_spill] sm:$0xff] }
 0x17b   : > { %v11948_v6 = vmul.f32 0.17677669, %v17594_v3  ;;  %17597 = vst [vmem:[#allocation9_spill] sm:$0xff] %v11961_v1 }
 0x17d   : > { %9480 = vmatpush3.bf16.xpose.msk.msra.mxu1 %vm11658_vm2, %v11644_v58  ;;  %9253 = vmatmul.mubr.msk.f32.gmra.mrb[22].mxu0 %vm613_vm0, %v11415_v28  ;;  %v17579_v28 = vld [vmem:[#allocation6_spill] sm:$0xff]  ;;  %v1448_v50 = vmul.f32 %v11576_v52, %v11948_v6 }
 0x17e   : > { %9483 = vmatprep.subr.msk.bf16.mxu1 %vm11658_vm2, %v11699_v45  ;;  %9255 = vmatprep.mubr.msk.f32.mxu0 %vm613_vm0, %v11420_v29 }
 0x181   : > { %9256 = vmatmul.mubr.msk.f32.gmra.mrb[24].mxu0 %vm613_vm0, %v11435_v32  ;;  %v17582_v32 = vld [vmem:[#allocation27_spill] sm:$0xff] }
 0x182   : > { %9258 = vmatprep.mubr.msk.f32.mxu0 %vm613_vm0, %v11440_v33  ;;  %v11888_v33 = vmul.f32 0.17677669, %v17582_v32 }
 0x185   : > { %9486 = vmatpush3.bf16.xpose.msk.msra.mxu1 %vm11658_vm2, %v11650_v8  ;;  %9259 = vmatmul.mubr.msk.f32.gmra.mrb[26].mxu0 %vm613_vm0, %v11455_v36  ;;  %v17584_v36 = vld [vmem:[#allocation26_spill] sm:$0xff] }
 0x186   : > { %9489 = vmatprep.subr.msk.bf16.mxu1 %vm11658_vm2, %v11707_v48  ;;  %9261 = vmatprep.mubr.msk.f32.mxu0 %vm613_vm0, %v11460_v37  ;;  %v11903_v37 = vmul.f32 0.17677669, %v17584_v36 }
 0x188   : > { %17585 = vst [vmem:[#allocation27_spill] sm:$0xff] %v11903_v37 }
 0x189   : > { %9262 = vmatmul.mubr.msk.f32.gmra.mrb[28].mxu0 %vm613_vm0, %v11475_v40  ;;  %v1443_v40 = vmul.f32 %v11576_v52, %v11903_v37 }
 0x18a   : > { %9264 = vmatprep.mubr.msk.f32.mxu0 %vm613_vm0, %v11480_v41 }
 0x18d   : > { %9492 = vmatpush3.bf16.xpose.msk.msra.mxu1 %vm11658_vm2, %v11652_v46  ;;  %9265 = vmatmul.mubr.msk.f32.gmra.mrb[30].mxu0 %vm613_vm0, %v11492_v43  ;;  %v11923_v43 = vmul.f32 0.17677669, %v17588_v42 }
 0x18e   : > { %9495 = vmatprep.subr.msk.bf16.mxu1 %vm11658_vm2, %v11715_v60  ;;  %9267 = vmatprep.mubr.msk.f32.mxu0 %vm613_vm0, %v11327_v5  ;;  %v1433_v5 = vmul.f32 %v11576_v52, %v11774_v16 }
 0x191   : > { %9268 = vmatmul.mubr.msk.f32.gmra.mrb[32].mxu0 %vm613_vm0, %v11344_v12  ;;  %v1434_v12 = vmul.f32 %v11576_v52, %v11781_v18 }
 0x192   : > { %9270 = vmatprep.mubr.msk.f32.mxu0 %vm613_vm0, %v11350_v14  ;;  %v11801_v14 = vmul.f32 0.17677669, %v11584_v55  ;;  %v1445_v55 = vmul.f32 %v11576_v52, %v11923_v43 }
 0x195   : > { %9498 = vmatpush3.bf16.xpose.msk.msra.mxu1 %vm11658_vm2, %v11654_v0  ;;  %9271 = vmatmul.mubr.msk.f32.gmra.mrb[34].mxu0 %vm613_vm0, %v11364_v17  ;;  %v11810_v17 = vmul.f32 0.17677669, %v11602_v63 }
 0x196   : > { %9549 = vmatprep.subr.msk.bf16.mxu1 %vm11658_vm2, %v11662_v44  ;;  %9273 = vmatprep.mubr.msk.f32.mxu0 %vm613_vm0, %v11370_v19  ;;  %v1435_v19 = vmul.f32 %v11576_v52, %v11801_v14 }
 0x197   : > { %v1436_v20 = vmul.f32 %v11576_v52, %v11810_v17 }
 0x199   : > { %9274 = vmatmul.mubr.msk.f32.gmra.mrb[36].mxu0 %vm613_vm0, %v11384_v21  ;;  %v11829_v21 = vmul.f32 0.17677669, %v11598_v61  ;;  %v17592_v61 = vld [vmem:[#allocation30_spill] sm:$0xff] }
 0x19a   : > { %9276 = vmatprep.mubr.msk.f32.mxu0 %vm613_vm0, %v11390_v23  ;;  %v11943_v63 = vmul.f32 0.17677669, %v17592_v61  ;;  %17595 = vst [vmem:[#allocation30_spill] sm:$0xff] %v11948_v6  ;;  %v17614_v61 = vld [vmem:[#allocation20_spill] sm:$0xff] }
 0x19b   : > { %v1437_v23 = vmul.f32 %v11576_v52, %v11829_v21  ;;  %v12024_v3 = vmul.f32 0.17677669, %v17614_v61 }
 0x19c   : > { %8688 = vmatmul.mubr.msk.f32.vlgmr.msra.gmra.mrb[48].mxu1 %vm613_vm0, %v11582_v54  ;;  %v11928_v54 = vmul.f32 0.17677669, %v17590_v47  ;;  %17593 = vst [vmem:[#allocation31_spill] sm:$0xff] %v11943_v63  ;;  %v17612_v47 = vld [vmem:[#allocation17_spill] sm:$0xff] }
 0x19d   : > { %8689 = vmatprep.mubr.msk.f32.mxu1 %vm613_vm0, %v1433_v5  ;;  %9552 = vmatpush3.bf16.xpose.msk.msra.mxu1 %vm11658_vm2, %v11628_v49  ;;  %17615 = vst [vmem:[#allocation17_spill] sm:$0xff] %v12024_v3  ;;  %v1458_v2 = vmul.f32 %v11576_v52, %v12024_v3 }
 0x19e   : > { %9555 = vmatprep.subr.msk.bf16.mxu1 %vm11658_vm2, %v11670_v59  ;;  %9277 = vmatmul.mubr.msk.f32.gmra.mrb[38].mxu0 %vm613_vm0, %v11407_v26  ;;  %v11866_v26 = vmul.f32 0.17677669, %v11626_v13  ;;  %17591 = vst [vmem:[#allocation28_spill] sm:$0xff] %v11928_v54  ;;  %v1446_v57 = vmul.f32 %v11576_v52, %v11928_v54  ;;  %v1447_v13 = vmul.f32 %v11576_v52, %v11943_v63 }
 0x19f   : > { %9279 = vmatprep.mubr.msk.f32.mxu0 %vm613_vm0, %v11412_v27  ;;  %v1439_v27 = vmul.f32 %v11576_v52, %v11857_v25 }
 0x1a0   : > { %8690 = vmatmul.mubr.msk.f32.gmra.mrb[50].mxu1 %vm613_vm0, %v1433_v5  ;;  %17578 = vst [vmem:[#allocation38_spill] sm:$0xff] %v11866_v26  ;;  %v1440_v29 = vmul.f32 %v11576_v52, %v11866_v26  ;;  %v17600_v5 = vld [vmem:[#allocation11_spill] sm:$0xff] }
 0x1a1   : > { %8691 = vmatprep.mubr.msk.f32.mxu1 %vm613_vm0, %v1434_v12 }
 0x1a2   : > { %9280 = vmatmul.mubr.msk.f32.gmra.mrb[40].mxu0 %vm613_vm0, %v11427_v30  ;;  %v17580_v30 = vld [vmem:[#allocation24_spill] sm:$0xff] }
 0x1a3   : > { %9282 = vmatprep.mubr.msk.f32.mxu0 %vm613_vm0, %v11432_v31  ;;  %v11883_v31 = vmul.f32 0.17677669, %v17580_v30  ;;  %17583 = vst [vmem:[#allocation24_spill] sm:$0xff] %v11888_v33  ;;  %v17606_v30 = vld [vmem:[#allocation16_spill] sm:$0xff] }
 0x1a4   : > { %8692 = vmatmul.mubr.msk.f32.gmra.mrb[52].mxu1 %vm613_vm0, %v1434_v12  ;;  %v11975_v12 = vmul.f32 0.17677669, %v17600_v5  ;;  %v11996_v32 = vmul.f32 0.17677669, %v17606_v30 }
 0x1a5   : > { %8693 = vmatprep.mubr.msk.f32.mxu1 %vm613_vm0, %v1435_v19  ;;  %9558 = vmatpush3.bf16.xpose.msk.msra.mxu1 %vm11658_vm2, %v11634_v7  ;;  %17581 = vst [vmem:[#allocation6_spill] sm:$0xff] %v11883_v31 }
 0x1a6   : > { %9561 = vmatprep.subr.msk.bf16.mxu1 %vm11658_vm2, %v11681_v53  ;;  %9283 = vmatmul.mubr.msk.f32.gmra.mrb[42].mxu0 %vm613_vm0, %v11447_v34  ;;  %v1441_v34 = vmul.f32 %v11576_v52, %v11883_v31  ;;  %17601 = vst [vmem:[#allocation12_spill] sm:$0xff] %v11975_v12 }
 0x1a7   : > { %9285 = vmatprep.mubr.msk.f32.mxu0 %vm613_vm0, %v11452_v35  ;;  %v1442_v35 = vmul.f32 %v11576_v52, %v11888_v33 }
 0x1a8   : > { %8694 = vmatmul.mubr.msk.f32.gmra.mrb[54].mxu1 %vm613_vm0, %v1435_v19  ;;  %v1450_v19 = vmul.f32 %v11576_v52, %v11968_v56 }
 0x1a9   : > { %8695 = vmatprep.mubr.msk.f32.mxu1 %vm613_vm0, %v1436_v20 }
 0x1aa   : > { %9286 = vmatmul.mubr.msk.f32.gmra.mrb[44].mxu0 %vm613_vm0, %v11467_v38  ;;  %v17586_v38 = vld [vmem:[#allocation29_spill] sm:$0xff] }
 0x1ab   : > { %9288 = vmatprep.mubr.msk.f32.mxu0 %vm613_vm0, %v11472_v39  ;;  %v11908_v39 = vmul.f32 0.17677669, %v17586_v38  ;;  %17589 = vst [vmem:[#allocation29_spill] sm:$0xff] %v11923_v43  ;;  %v1454_v38 = vmul.f32 %v11576_v52, %v11996_v32 }
 0x1ac   : > { %8696 = vmatmul.mubr.msk.f32.gmra.mrb[56].mxu1 %vm613_vm0, %v1436_v20  ;;  %v17602_v20 = vld [vmem:[#allocation14_spill] sm:$0xff] }
 0x1ad   : > { %8697 = vmatprep.mubr.msk.f32.mxu1 %vm613_vm0, %v1437_v23  ;;  %9564 = vmatpush3.bf16.xpose.msk.msra.mxu1 %vm11658_vm2, %v11636_v4  ;;  %17587 = vst [vmem:[#allocation26_spill] sm:$0xff] %v11908_v39  ;;  %v1444_v41 = vmul.f32 %v11576_v52, %v11908_v39 }
 0x1ae   : > { %9567 = vmatprep.subr.msk.bf16.mxu1 %vm11658_vm2, %v11689_v51  ;;  %9289 = vmatmul.mubr.msk.f32.gmra.mrb[46].mxu0 %vm613_vm0, %v17579_v28 }
 0x1b0   : > { %8698 = vmatmul.mubr.msk.f32.gmra.mrb[58].mxu1 %vm613_vm0, %v1437_v23  ;;  %v11982_v23 = vmul.f32 0.17677669, %v17602_v20  ;;  %v17620_v20 = vld [vmem:[#allocation21_spill] sm:$0xff] }
 0x1b1   : > { %8699 = vmatprep.mubr.msk.f32.mxu1 %vm613_vm0, %v1438_v24 }
 0x1b2   : > { %17603 = vst [vmem:[#allocation11_spill] sm:$0xff] %v11982_v23 }
 0x1b4   : > { %8700 = vmatmul.mubr.msk.f32.gmra.mrb[60].mxu1 %vm613_vm0, %v1438_v24  ;;  %v1451_v24 = vmul.f32 %v11576_v52, %v11975_v12 }
 0x1b5   : > { %8701 = vmatprep.mubr.msk.f32.mxu1 %vm613_vm0, %v1439_v27  ;;  %9570 = vmatpush3.bf16.xpose.msk.msra.mxu1 %vm11658_vm2, %v11642_v15 }
 0x1b6   : > { %9573 = vmatprep.subr.msk.bf16.mxu1 %vm11658_vm2, %v11691_v10 }
 0x1b8   : > { %8702 = vmatmul.mubr.msk.f32.gmra.mrb[62].mxu1 %vm613_vm0, %v1439_v27  ;;  %v17604_v27 = vld [vmem:[#allocation13_spill] sm:$0xff] }
 0x1b9   : > { %8703 = vmatprep.mubr.msk.f32.mxu1 %vm613_vm0, %v1440_v29  ;;  %v11989_v28 = vmul.f32 0.17677669, %v17604_v27  ;;  %17607 = vst [vmem:[#allocation13_spill] sm:$0xff] %v11996_v32 }
 0x1bb   : > { %17605 = vst [vmem:[#allocation14_spill] sm:$0xff] %v11989_v28 }
 0x1bc   : > { %8704 = vmatmul.mubr.msk.f32.gmra.mrb[64].mxu1 %vm613_vm0, %v1440_v29  ;;  %v1452_v29 = vmul.f32 %v11576_v52, %v11982_v23 }
 0x1bd   : > { %8705 = vmatprep.mubr.msk.f32.mxu1 %vm613_vm0, %v1441_v34  ;;  %9576 = vmatpush3.bf16.xpose.msk.msra.mxu1 %vm11658_vm2, %v11644_v58 }
 0x1be   : > { %9579 = vmatprep.subr.msk.bf16.mxu1 %vm11658_vm2, %v11699_v45 }
 0x1c0   : > { %8706 = vmatmul.mubr.msk.f32.gmra.mrb[66].mxu1 %vm613_vm0, %v1441_v34  ;;  %v1453_v34 = vmul.f32 %v11576_v52, %v11989_v28 }
 0x1c1   : > { %8707 = vmatprep.mubr.msk.f32.mxu1 %vm613_vm0, %v1442_v35 }
 0x1c4   : > { %8708 = vmatmul.mubr.msk.f32.gmra.mrb[68].mxu1 %vm613_vm0, %v1442_v35  ;;  %v17608_v35 = vld [vmem:[#allocation15_spill] sm:$0xff] }
 0x1c5   : > { %8709 = vmatprep.mubr.msk.f32.mxu1 %vm613_vm0, %v1443_v40  ;;  %9582 = vmatpush3.bf16.xpose.msk.msra.mxu1 %vm11658_vm2, %v11650_v8  ;;  %v12003_v36 = vmul.f32 0.17677669, %v17608_v35  ;;  %v17624_v35 = vld [vmem:[#allocation23_spill] sm:$0xff] }
 0x1c6   : > { %9585 = vmatprep.subr.msk.bf16.mxu1 %vm11658_vm2, %v11707_v48 }
 0x1c7   : > { %17609 = vst [vmem:[#allocation16_spill] sm:$0xff] %v12003_v36  ;;  %v1455_v42 = vmul.f32 %v11576_v52, %v12003_v36 }
 0x1c8   : > { %8710 = vmatmul.mubr.msk.f32.gmra.mrb[70].mxu1 %vm613_vm0, %v1443_v40  ;;  %v17610_v40 = vld [vmem:[#allocation18_spill] sm:$0xff] }
 0x1c9   : > { %8711 = vmatprep.mubr.msk.f32.mxu1 %vm613_vm0, %v1444_v41 }
 0x1cc   : > { %8712 = vmatmul.mubr.msk.f32.gmra.mrb[72].mxu1 %vm613_vm0, %v1444_v41  ;;  %v12010_v41 = vmul.f32 0.17677669, %v17610_v40 }
 0x1cd   : > { %8713 = vmatprep.mubr.msk.f32.mxu1 %vm613_vm0, %v1445_v55  ;;  %9588 = vmatpush3.bf16.xpose.msk.msra.mxu1 %vm11658_vm2, %v11652_v46 }
 0x1ce   : > { %9591 = vmatprep.subr.msk.bf16.mxu1 %vm11658_vm2, %v11715_v60  ;;  %17611 = vst [vmem:[#allocation15_spill] sm:$0xff] %v12010_v41 }
 0x1d0   : > { %8714 = vmatmul.mubr.msk.f32.gmra.mrb[74].mxu1 %vm613_vm0, %v1445_v55  ;;  %v12017_v55 = vmul.f32 0.17677669, %v17612_v47 }
 0x1d1   : > { %8715 = vmatprep.mubr.msk.f32.mxu1 %vm613_vm0, %v1446_v57 }
 0x1d2   : > { %17613 = vst [vmem:[#allocation18_spill] sm:$0xff] %v12017_v55 }
 0x1d4   : > { %8716 = vmatmul.mubr.msk.f32.gmra.mrb[76].mxu1 %vm613_vm0, %v1446_v57  ;;  %v1456_v57 = vmul.f32 %v11576_v52, %v12010_v41 }
 0x1d5   : > { %8717 = vmatprep.mubr.msk.f32.mxu1 %vm613_vm0, %v1447_v13  ;;  %9594 = vmatpush3.bf16.xpose.msk.msra.mxu1 %vm11658_vm2, %v11654_v0 }
 0x1d6   : > { %9645 = vmatprep.subr.msk.bf16.mxu1 %vm11658_vm2, %v11662_v44 }
 0x1d8   : > { %8718 = vmatmul.mubr.msk.f32.gmra.mrb[78].mxu1 %vm613_vm0, %v1447_v13  ;;  %v1457_v13 = vmul.f32 %v11576_v52, %v12017_v55 }
 0x1d9   : > { %8719 = vmatprep.mubr.msk.f32.mxu1 %vm613_vm0, %v1448_v50 }
 0x1dc   : > { %8720 = vmatmul.mubr.msk.f32.gmra.mrb[80].mxu1 %vm613_vm0, %v1448_v50  ;;  %v12031_v50 = vmul.f32 0.17677669, %v17616_v9 }
 0x1dd   : > { %8721 = vmatprep.mubr.msk.f32.mxu1 %vm613_vm0, %v1449_v11 }
 0x1de   : > { %17617 = vst [vmem:[#allocation20_spill] sm:$0xff] %v12031_v50 }
 0x1e0   : > { %8722 = vmatmul.mubr.msk.f32.gmra.mrb[82].mxu1 %vm613_vm0, %v1449_v11  ;;  %v17618_v11 = vld [vmem:[#allocation22_spill] sm:$0xff] }
 0x1e1   : > { %8723 = vmatprep.mubr.msk.f32.mxu1 %vm613_vm0, %v1450_v19  ;;  %v12038_v5 = vmul.f32 0.17677669, %v17618_v11 }
 0x1e3   : > { %17619 = vst [vmem:[#allocation19_spill] sm:$0xff] %v12038_v5  ;;  %v1460_v27 = vmul.f32 %v11576_v52, %v12038_v5 }
 0x1e4   : > { %8724 = vmatmul.mubr.msk.f32.gmra.mrb[84].mxu1 %vm613_vm0, %v1450_v19  ;;  %v1459_v19 = vmul.f32 %v11576_v52, %v12031_v50 }
 0x1e5   : > { %8725 = vmatprep.mubr.msk.f32.mxu1 %vm613_vm0, %v1451_v24 }
 0x1e8   : > { %8726 = vmatmul.mubr.msk.f32.gmra.mrb[86].mxu1 %vm613_vm0, %v1451_v24  ;;  %v12045_v24 = vmul.f32 0.17677669, %v17620_v20 }
 0x1e9   : > { %8727 = vmatprep.mubr.msk.f32.mxu1 %vm613_vm0, %v1452_v29 }
 0x1ea   : > { %17621 = vst [vmem:[#allocation22_spill] sm:$0xff] %v12045_v24 }
 0x1ec   : > { %8728 = vmatmul.mubr.msk.f32.gmra.mrb[88].mxu1 %vm613_vm0, %v1452_v29  ;;  %v17622_v29 = vld [vmem:[#allocation25_spill] sm:$0xff] }
 0x1ed   : > { %8729 = vmatprep.mubr.msk.f32.mxu1 %vm613_vm0, %v1453_v34  ;;  %v12052_v30 = vmul.f32 0.17677669, %v17622_v29 }
 0x1ef   : > { %17623 = vst [vmem:[#allocation21_spill] sm:$0xff] %v12052_v30  ;;  %v1462_v40 = vmul.f32 %v11576_v52, %v12052_v30 }
 0x1f0   : > { %8730 = vmatmul.mubr.msk.f32.gmra.mrb[90].mxu1 %vm613_vm0, %v1453_v34  ;;  %v1461_v34 = vmul.f32 %v11576_v52, %v12045_v24 }
 0x1f1   : > { %8731 = vmatprep.mubr.msk.f32.mxu1 %vm613_vm0, %v1454_v38 }
 0x1f4   : > { %8732 = vmatmul.mubr.msk.f32.gmra.mrb[92].mxu1 %vm613_vm0, %v1454_v38  ;;  %v12059_v38 = vmul.f32 0.17677669, %v17624_v35 }
 0x1f5   : > { %8733 = vmatprep.mubr.msk.f32.mxu1 %vm613_vm0, %v1455_v42 }
 0x1f6   : > { %v1463_v47 = vmul.f32 %v11576_v52, %v12059_v38 }
 0x1f8   : > { %8734 = vmatmul.mubr.msk.f32.gmra.mrb[94].mxu1 %vm613_vm0, %v1455_v42  ;;  %v17625_v42 = vld [vmem:[#allocation7_spill] sm:$0xff] }
 0x1f9   : > { %8735 = vmatprep.mubr.msk.f32.mxu1 %vm613_vm0, %v1456_v57  ;;  %vm2650_vm3 = vcmp.ge.s32.totalorder %v17625_v42, 8  ;;  %vm2651_vm4 = vcmp.lt.s32.totalorder %v17625_v42, 16  ;;  %vm3777_vm6 = vcmp.ge.s32.totalorder %v17625_v42, 16  ;;  %vm3778_vm7 = vcmp.lt.s32.totalorder %v17625_v42, 24 }
 0x1fa   : > { %vm2652_vm5 = vmand %vm2650_vm3, %vm2651_vm4  ;;  %vm4904_vm8 = vcmp.ge.s32.totalorder %v17625_v42, 24  ;;  %vm4905_vm9 = vcmp.lt.s32.totalorder %v17625_v42, 32 }
 0x1fb   : > { %vm3779_vm10 = vmand %vm3777_vm6, %vm3778_vm7 }
 0x1fc   : > { %8736 = vmatmul.mubr.msk.f32.gmra.mrb[96].mxu1 %vm613_vm0, %v1456_v57  ;;  %v17626_v57 = vmov 0.0   ;;  %vm4906_vm11 = vmand %vm4904_vm8, %vm4905_vm9 }
 0x1fd   : > { %8737 = vmatprep.mubr.msk.f32.mxu1 %vm613_vm0, %v1457_v13  ;;  %v12072_v61 = vsel %vm2652_vm5, 1.0, %v17626_v57 }
 0x1fe   : > { %v2657_v11 = vmul.f32 %v12072_v61, %v11781_v18  ;;  %v2659_v20 = vmul.f32 %v12072_v61, %v11810_v17  ;;  %v2661_v29 = vmul.f32 %v12072_v61, %v11838_v22  ;;  %v2663_v35 = vmul.f32 %v12072_v61, %v11866_v26 }
 0x200   : > { %8738 = vmatmul.mubr.msk.f32.gmra.mrb[98].mxu1 %vm613_vm0, %v1457_v13  ;;  %v17627_v13 = vld [vmem:[#allocation10_spill] sm:$0xff] }
 0x201   : > { %8739 = vmatprep.mubr.msk.f32.mxu1 %vm613_vm0, %v1458_v2  ;;  %v2655_v9 = vmul.f32 %v12072_v61, %v17627_v13 }
 0x204   : > { %8740 = vmatmul.mubr.msk.f32.gmra.mrb[100].mxu1 %vm613_vm0, %v1458_v2  ;;  %v2656_v2 = vmul.f32 %v12072_v61, %v11774_v16 }
 0x205   : > { %8741 = vmatprep.mubr.msk.f32.mxu1 %vm613_vm0, %v1459_v19 }
 0x208   : > { %8742 = vmatmul.mubr.msk.f32.gmra.mrb[102].mxu1 %vm613_vm0, %v1459_v19  ;;  %v2658_v19 = vmul.f32 %v12072_v61, %v11801_v14 }
 0x209   : > { %8743 = vmatprep.mubr.msk.f32.mxu1 %vm613_vm0, %v1460_v27 }
 0x20c   : > { %8744 = vmatmul.mubr.msk.f32.gmra.mrb[104].mxu1 %vm613_vm0, %v1460_v27  ;;  %v2660_v27 = vmul.f32 %v12072_v61, %v11829_v21 }
 0x20d   : > { %8745 = vmatprep.mubr.msk.f32.mxu1 %vm613_vm0, %v1461_v34 }
 0x210   : > { %8746 = vmatmul.mubr.msk.f32.gmra.mrb[106].mxu1 %vm613_vm0, %v1461_v34  ;;  %v2662_v34 = vmul.f32 %v12072_v61, %v11857_v25 }
 0x211   : > { %8747 = vmatprep.mubr.msk.f32.mxu1 %vm613_vm0, %v1462_v40 }
 0x214   : > { %8748 = vmatmul.mubr.msk.f32.gmra.mrb[108].mxu1 %vm613_vm0, %v1462_v40  ;;  %v2664_v40 = vmul.f32 %v12072_v61, %v11883_v31 }
 0x215   : > { %8749 = vmatprep.mubr.msk.f32.mxu1 %vm613_vm0, %v1463_v47 }
 0x218   : > { %8750 = vmatmul.mubr.msk.f32.gmra.mrb[110].mxu1 %vm613_vm0, %v1463_v47  ;;  %v2665_v47 = vmul.f32 %v12072_v61, %v11888_v33 }
 0x219   : > { %8783 = vmatprep.mubr.msk.f32.mxu1 %vm613_vm0, %v2655_v9 }
 0x21c   : > { %8784 = vmatmul.mubr.msk.f32.vlgmr.msra.gmra.mrb[112].mxu1 %vm613_vm0, %v2655_v9  ;;  %v2666_v9 = vmul.f32 %v12072_v61, %v11903_v37 }
 0x21d   : > { %9648 = vmatpush3.bf16.xpose.msk.msra.mxu1 %vm11658_vm2, %v11628_v49  ;;  %8785 = vmatprep.mubr.msk.f32.mxu1 %vm613_vm0, %v2656_v2 }
 0x21e   : > { %9651 = vmatprep.subr.msk.bf16.mxu1 %vm11658_vm2, %v11670_v59 }
 0x220   : > { %8786 = vmatmul.mubr.msk.f32.gmra.mrb[114].mxu1 %vm613_vm0, %v2656_v2  ;;  %v2667_v2 = vmul.f32 %v12072_v61, %v11908_v39 }
 0x221   : > { %8787 = vmatprep.mubr.msk.f32.mxu1 %vm613_vm0, %v2657_v11 }
 0x224   : > { %8788 = vmatmul.mubr.msk.f32.gmra.mrb[116].mxu1 %vm613_vm0, %v2657_v11  ;;  %v2668_v11 = vmul.f32 %v12072_v61, %v11923_v43  ;;  %v12240_v43 = vsel %vm3779_vm10, 1.0, %v17626_v57 }
 0x225   : > { %9654 = vmatpush3.bf16.xpose.msk.msra.mxu1 %vm11658_vm2, %v11634_v7  ;;  %8789 = vmatprep.mubr.msk.f32.mxu1 %vm613_vm0, %v2658_v19 }
 0x226   : > { %9657 = vmatprep.subr.msk.bf16.mxu1 %vm11658_vm2, %v11681_v53 }
 0x228   : > { %8790 = vmatmul.mubr.msk.f32.gmra.mrb[118].mxu1 %vm613_vm0, %v2658_v19 }
 0x229   : > { %8791 = vmatprep.mubr.msk.f32.mxu1 %vm613_vm0, %v2659_v20 }
 0x22c   : > { %8792 = vmatmul.mubr.msk.f32.gmra.mrb[120].mxu1 %vm613_vm0, %v2659_v20 }
 0x22d   : > { %9660 = vmatpush3.bf16.xpose.msk.msra.mxu1 %vm11658_vm2, %v11636_v4  ;;  %8793 = vmatprep.mubr.msk.f32.mxu1 %vm613_vm0, %v2660_v27 }
 0x22e   : > { %9663 = vmatprep.subr.msk.bf16.mxu1 %vm11658_vm2, %v11689_v51 }
 0x230   : > { %8794 = vmatmul.mubr.msk.f32.gmra.mrb[122].mxu1 %vm613_vm0, %v2660_v27  ;;  %v2669_v27 = vmul.f32 %v12072_v61, %v11928_v54 }
 0x231   : > { %8795 = vmatprep.mubr.msk.f32.mxu1 %vm613_vm0, %v2661_v29 }
 0x234   : > { %8796 = vmatmul.mubr.msk.f32.gmra.mrb[124].mxu1 %vm613_vm0, %v2661_v29 }
 0x235   : > { %9666 = vmatpush3.bf16.xpose.msk.msra.mxu1 %vm11658_vm2, %v11642_v15  ;;  %8797 = vmatprep.mubr.msk.f32.mxu1 %vm613_vm0, %v2662_v34 }
 0x236   : > { %9669 = vmatprep.subr.msk.bf16.mxu1 %vm11658_vm2, %v11691_v10 }
 0x238   : > { %8798 = vmatmul.mubr.msk.f32.gmra.mrb[126].mxu1 %vm613_vm0, %v2662_v34 }
 0x239   : > { %8799 = vmatprep.mubr.msk.f32.mxu1 %vm613_vm0, %v2663_v35 }
 0x23c   : > { %8800 = vmatmul.mubr.msk.f32.gmra.mrb[128].mxu1 %vm613_vm0, %v2663_v35 }
 0x23d   : > { %9672 = vmatpush3.bf16.xpose.msk.msra.mxu1 %vm11658_vm2, %v11644_v58  ;;  %8801 = vmatprep.mubr.msk.f32.mxu1 %vm613_vm0, %v2664_v40 }
 0x23e   : > { %9675 = vmatprep.subr.msk.bf16.mxu1 %vm11658_vm2, %v11699_v45 }
 0x240   : > { %8802 = vmatmul.mubr.msk.f32.gmra.mrb[130].mxu1 %vm613_vm0, %v2664_v40 }
 0x241   : > { %8803 = vmatprep.mubr.msk.f32.mxu1 %vm613_vm0, %v2665_v47 }
 0x244   : > { %8804 = vmatmul.mubr.msk.f32.gmra.mrb[132].mxu1 %vm613_vm0, %v2665_v47  ;;  %v9245_v19 = vpop.f32.mrb[16].mxu0  ;;  %v17205_v47 = vmov 0.0|0.0  }
 0x245   : > { %9678 = vmatpush3.bf16.xpose.msk.msra.mxu1 %vm11658_vm2, %v11650_v8  ;;  %8805 = vmatprep.mubr.msk.f32.mxu1 %vm613_vm0, %v2666_v9  ;;  %v1266_v20 = vpop.f32.mrb[17].mxu0  ;;  %v2298_v34 = vmul.f32 %v9245_v19, %v11576_v52 }
 0x246   : > { %9681 = vmatprep.subr.msk.bf16.mxu1 %vm11658_vm2, %v11707_v48  ;;  %v2297_v29 = vmul.f32 %v11576_v52, %v1266_v20  ;;  %9499 = vmatprep.subr.bf16.mxu0 %v17205_v47 }
 0x248   : > { %8806 = vmatmul.mubr.msk.f32.gmra.mrb[134].mxu1 %vm613_vm0, %v2666_v9  ;;  %v12178_v35 = vpop.f32.mrb[18].mxu0  ;;  %v9500_v9 = vpack.c.bf16 %v2298_v34, %v2297_v29  ;;  %v17628_v29 = vmov 0.0|0.0  }
 0x249   : > { %8807 = vmatprep.mubr.msk.f32.mxu1 %vm613_vm0, %v2667_v2  ;;  %v12180_v40 = vpop.f32.mrb[19].mxu0  ;;  %v2300_v54 = vmul.f32 %v12178_v35, %v11576_v52 }
 0x24a   : > { %9501 = vmatpush1.bf16.msra.mxu0 %v9500_v9  ;;  %v2671_v9 = vmul.f32 %v12072_v61, %v11948_v6  ;;  %v2672_v6 = vmul.f32 %v12072_v61, %v11961_v1  ;;  %v12259_v1 = vmul.f32 %v12240_v43, %v1266_v20 }
 0x24b   : > { %9502 = vmatprep.subr.bf16.mxu0 %v17628_v29 }
 0x24c   : > { %8808 = vmatmul.mubr.msk.f32.gmra.mrb[136].mxu1 %vm613_vm0, %v2667_v2  ;;  %v2670_v2 = vmul.f32 %v12072_v61, %v11943_v63  ;;  %v12194_v47 = vpop.f32.mrb[20].mxu0  ;;  %17633 = vst [vmem:[#allocation39_spill] sm:$0xff] %v12259_v1 }
 0x24d   : > { %9684 = vmatpush3.bf16.xpose.msk.msra.mxu1 %vm11658_vm2, %v11652_v46  ;;  %8809 = vmatprep.mubr.msk.f32.mxu1 %vm613_vm0, %v2668_v11  ;;  %v2302_v42 = vmul.f32 %v12194_v47, %v11576_v52  ;;  %v12236_v46 = vmul.f32 %v12178_v35, %v12072_v61 }
 0x24e   : > { %9687 = vmatprep.subr.msk.bf16.mxu1 %vm11658_vm2, %v11715_v60  ;;  %v12232_v60 = vmul.f32 %v12072_v61, %v12180_v40 }
 0x24f   : > { %17632 = vst [vmem:[#allocation10_spill] sm:$0xff] %v12236_v46 }
 0x250   : > { %8810 = vmatmul.mubr.msk.f32.gmra.mrb[138].mxu1 %vm613_vm0, %v2668_v11  ;;  %v2299_v11 = vmul.f32 %v11576_v52, %v12180_v40  ;;  %17631 = vst [vmem:[#allocation7_spill] sm:$0xff] %v12232_v60 }
 0x251   : > { %8811 = vmatprep.mubr.msk.f32.mxu1 %vm613_vm0, %v2669_v27 }
 0x252   : > { %v9503_v34 = vpack.c.bf16 %v2300_v54, %v2299_v11 }
 0x254   : > { %8812 = vmatmul.mubr.msk.f32.gmra.mrb[140].mxu1 %vm613_vm0, %v2669_v27  ;;  %v12201_v27 = vpop.f32.mrb[21].mxu0  ;;  %9504 = vmatpush1.bf16.msra.mxu0 %v9503_v34 }
 0x255   : > { %9690 = vmatpush3.bf16.xpose.msk.msra.mxu1 %vm11658_vm2, %v11654_v0  ;;  %8813 = vmatprep.mubr.msk.f32.mxu1 %vm613_vm0, %v2670_v2  ;;  %v12213_v0 = vmul.f32 %v9245_v19, %v12072_v61  ;;  %v12216_v54 = vpop.f32.mrb[22].mxu0  ;;  %v2301_v11 = vmul.f32 %v11576_v52, %v12201_v27  ;;  %v12273_v8 = vmul.f32 %v12072_v61, %v12201_v27 }
 0x256   : > { %9741 = vmatprep.subr.msk.bf16.mxu1 %vm11658_vm2, %v11662_v44  ;;  %v12210_v44 = vmul.f32 %v12072_v61, %v1266_v20  ;;  %9505 = vmatprep.subr.bf16.mxu0 %v17628_v29  ;;  %v12320_v1 = vmul.f32 %v12216_v54, %v12072_v61 }
 0x257   : > { %17630 = vst [vmem:[#allocation23_spill] sm:$0xff] %v12213_v0  ;;  %v9506_v63 = vpack.c.bf16 %v2302_v42, %v2301_v11  ;;  %v12245_v11 = vsel %vm4906_vm11, 1.0, %v17626_v57  ;;  %v2304_v0 = vmul.f32 %v12216_v54, %v11576_v52  ;;  %v12262_v57 = vmul.f32 %v9245_v19, %v12240_v43  ;;  %17637 = vst [vmem:[#allocation43_spill] sm:$0xff] %v12273_v8 }
 0x258   : > { %8814 = vmatmul.mubr.msk.f32.gmra.mrb[142].mxu1 %vm613_vm0, %v2670_v2  ;;  %17629 = vst [vmem:[#allocation25_spill] sm:$0xff] %v12210_v44  ;;  %v12223_v2 = vpop.f32.mrb[23].mxu0  ;;  %v12268_v39 = vmul.f32 %v9245_v19, %v12245_v11  ;;  %v12299_v19 = vmul.f32 %v12240_v43, %v12180_v40  ;;  %17644 = vst [vmem:[#allocation50_spill] sm:$0xff] %v12320_v1 }
 0x259   : > { %8815 = vmatprep.mubr.msk.f32.mxu1 %vm613_vm0, %v2671_v9  ;;  %9507 = vmatpush1.bf16.msra.mxu0 %v9506_v63  ;;  %v12242_v34 = vpop.f32.mrb[24].mxu0  ;;  %v2303_v44 = vmul.f32 %v11576_v52, %v12223_v2  ;;  %17634 = vst [vmem:[#allocation40_spill] sm:$0xff] %v12262_v57  ;;  %v12277_v63 = vmul.f32 %v12194_v47, %v12072_v61 }
 0x25a   : > { %v12249_v42 = vpop.f32.mrb[25].mxu0  ;;  %9508 = vmatprep.subr.bf16.mxu0 %v17628_v29  ;;  %17636 = vst [vmem:[#allocation42_spill] sm:$0xff] %v12268_v39  ;;  %v2306_v46 = vmul.f32 %v12242_v34, %v11576_v52  ;;  %17639 = vst [vmem:[#allocation45_spill] sm:$0xff] %v12299_v19  ;;  %v12316_v39 = vmul.f32 %v12072_v61, %v12223_v2  ;;  %v12363_v19 = vmul.f32 %v12242_v34, %v12072_v61 }
 0x25b   : > { %v9509_v48 = vpack.c.bf16 %v2304_v0, %v2303_v44  ;;  %17638 = vst [vmem:[#allocation44_spill] sm:$0xff] %v12277_v63  ;;  %v12280_v60 = vpop.f32.mrb[26].mxu0  ;;  %v2674_v0 = vmul.f32 %v12072_v61, %v11975_v12  ;;  %v2305_v44 = vmul.f32 %v11576_v52, %v12249_v42 }
 0x25c   : > { %8816 = vmatmul.mubr.msk.f32.gmra.mrb[144].mxu1 %vm613_vm0, %v2671_v9  ;;  %v2673_v9 = vmul.f32 %v12072_v61, %v11968_v56  ;;  %v12265_v56 = vmul.f32 %v12245_v11, %v1266_v20  ;;  %v12307_v20 = vmul.f32 %v12245_v11, %v12180_v40  ;;  %17643 = vst [vmem:[#allocation49_spill] sm:$0xff] %v12316_v39  ;;  %17650 = vst [vmem:[#allocation56_spill] sm:$0xff] %v12363_v19 }
 0x25d   : > { %8817 = vmatprep.mubr.msk.f32.mxu1 %vm613_vm0, %v2672_v6  ;;  %9510 = vmatpush1.bf16.msra.mxu0 %v9509_v48  ;;  %v12303_v48 = vmul.f32 %v12178_v35, %v12240_v43  ;;  %v9512_v37 = vpack.c.bf16 %v2306_v46, %v2305_v44  ;;  %v2675_v46 = vmul.f32 %v12072_v61, %v11982_v23 }
 0x25e   : > { %17635 = vst [vmem:[#allocation41_spill] sm:$0xff] %v12265_v56  ;;  %9511 = vmatprep.subr.bf16.mxu0 %v17628_v29  ;;  %17641 = vst [vmem:[#allocation47_spill] sm:$0xff] %v12307_v20  ;;  %v12311_v56 = vmul.f32 %v12178_v35, %v12245_v11  ;;  %v2308_v8 = vmul.f32 %v12280_v60, %v11576_v52  ;;  %v12342_v35 = vmul.f32 %v12240_v43, %v12201_v27 }
 0x25f   : > { %17640 = vst [vmem:[#allocation46_spill] sm:$0xff] %v12303_v48  ;;  %v12350_v40 = vmul.f32 %v12245_v11, %v12201_v27  ;;  %v12354_v20 = vmul.f32 %v12194_v47, %v12245_v11  ;;  %v2676_v27 = vmul.f32 %v12072_v61, %v11989_v28  ;;  %v12439_v28 = vmul.f32 %v12072_v61, %v12024_v3  ;;  %v548_v3 = vld [vmem:[%s11296_s25 + $0x18] sm:$0xff] }
 0x260   : > { %8818 = vmatmul.mubr.msk.f32.gmra.mrb[146].mxu1 %vm613_vm0, %v2672_v6  ;;  %v12288_v6 = vpop.f32.mrb[27].mxu0  ;;  %17642 = vst [vmem:[#allocation48_spill] sm:$0xff] %v12311_v56  ;;  %17645 = vst [vmem:[#allocation51_spill] sm:$0xff] %v12342_v35  ;;  %v12359_v56 = vmul.f32 %v12072_v61, %v12249_v42  ;;  %v12443_v23 = vmul.f32 %v12072_v61, %v12031_v50 }
 0x261   : > { %8819 = vmatprep.mubr.msk.f32.mxu1 %vm613_vm0, %v2673_v9  ;;  %v12323_v57 = vpop.f32.mrb[28].mxu0  ;;  %9513 = vmatpush1.bf16.msra.mxu0 %v9512_v37  ;;  %v2307_v44 = vmul.f32 %v11576_v52, %v12288_v6  ;;  %v12346_v37 = vmul.f32 %v12194_v47, %v12240_v43  ;;  %17647 = vst [vmem:[#allocation53_spill] sm:$0xff] %v12350_v40  ;;  %17648 = vst [vmem:[#allocation54_spill] sm:$0xff] %v12354_v20 }
 0x262   : > { %9514 = vmatprep.subr.bf16.mxu0 %v17628_v29  ;;  %17649 = vst [vmem:[#allocation55_spill] sm:$0xff] %v12359_v56  ;;  %v12370_v47 = vmul.f32 %v12072_v61, %v12003_v36  ;;  %v2310_v36 = vmul.f32 %v12323_v57, %v11576_v52  ;;  %v12401_v40 = vmul.f32 %v12245_v11, %v12223_v2 }
 0x263   : > { %17646 = vst [vmem:[#allocation52_spill] sm:$0xff] %v12346_v37  ;;  %v9515_v63 = vpack.c.bf16 %v2308_v8, %v2307_v44  ;;  %v12380_v44 = vmul.f32 %v12072_v61, %v11996_v32  ;;  %v12405_v20 = vmul.f32 %v12216_v54, %v12245_v11  ;;  %v12410_v8 = vmul.f32 %v12072_v61, %v12017_v55  ;;  %v546_v55 = vld [vmem:[%s11296_s25 + $0x8] sm:$0xff] }
 0x264   : > { %8820 = vmatmul.mubr.msk.f32.gmra.mrb[148].mxu1 %vm613_vm0, %v2673_v9  ;;  %v12331_v9 = vpop.f32.mrb[29].mxu0  ;;  %17653 = vst [vmem:[#allocation59_spill] sm:$0xff] %v12401_v40  ;;  %v12414_v37 = vmul.f32 %v12072_v61, %v12288_v6  ;;  %v12418_v56 = vmul.f32 %v12280_v60, %v12072_v61  ;;  %v12435_v32 = vmul.f32 %v12072_v61, %v12010_v41 }
 0x265   : > { %8821 = vmatprep.mubr.msk.f32.mxu1 %vm613_vm0, %v2674_v0  ;;  %v12372_v48 = vpop.f32.mrb[30].mxu0  ;;  %9516 = vmatpush1.bf16.msra.mxu0 %v9515_v63  ;;  %v2309_v1 = vmul.f32 %v11576_v52, %v12331_v9  ;;  %v12397_v63 = vmul.f32 %v12216_v54, %v12240_v43  ;;  %17654 = vst [vmem:[#allocation60_spill] sm:$0xff] %v12405_v20 }
 0x266   : > { %v12382_v39 = vpop.f32.mrb[31].mxu0  ;;  %9517 = vmatprep.subr.bf16.mxu0 %v17628_v29  ;;  %17655 = vst [vmem:[#allocation61_spill] sm:$0xff] %v12414_v37  ;;  %17656 = vst [vmem:[#allocation62_spill] sm:$0xff] %v12418_v56  ;;  %v2312_v19 = vmul.f32 %v12372_v48, %v11576_v52  ;;  %v12452_v20 = vmul.f32 %v12240_v43, %v12249_v42  ;;  %v12475_v37 = vmul.f32 %v12242_v34, %v12245_v11 }
 0x267   : > { %17652 = vst [vmem:[#allocation58_spill] sm:$0xff] %v12397_v63  ;;  %v9518_v35 = vpack.c.bf16 %v2310_v36, %v2309_v1  ;;  %v12422_v54 = vpop.f32.mrb[32].mxu0 }
 0x268   : > { %8822 = vmatmul.mubr.msk.f32.gmra.mrb[150].mxu1 %vm613_vm0, %v2674_v0  ;;  %v12393_v0 = vmul.f32 %v12240_v43, %v12223_v2  ;;  %v545_v2 = vld [vmem:[%s11296_s25] sm:$0xff]  ;;  %v12445_v12 = vpop.f32.mrb[33].mxu0  ;;  %17657 = vst [vmem:[#allocation63_spill] sm:$0xff] %v12452_v20  ;;  %17663 = vst [vmem:[#allocation69_spill] sm:$0xff] %v12475_v37  ;;  %v2314_v56 = vmul.f32 %v12422_v54, %v11576_v52 }
 0x269   : > { %8823 = vmatprep.mubr.msk.f32.mxu1 %vm613_vm0, %v2675_v46  ;;  %9519 = vmatpush1.bf16.msra.mxu0 %v9518_v35  ;;  %v12460_v35 = vmul.f32 %v12245_v11, %v12249_v42 }
 0x26a   : > { %17651 = vst [vmem:[#allocation57_spill] sm:$0xff] %v12393_v0  ;;  %9520 = vmatprep.subr.bf16.mxu0 %v17628_v29  ;;  %v12456_v0 = vmul.f32 %v12242_v34, %v12240_v43  ;;  %v12493_v34 = vmul.f32 %v12072_v61, %v12038_v5  ;;  %v12560_v5 = vmul.f32 %v12280_v60, %v12245_v11 }
 0x26b   : > { %17659 = vst [vmem:[#allocation65_spill] sm:$0xff] %v12460_v35  ;;  %v12522_v35 = vmul.f32 %v12072_v61, %v12382_v39 }
 0x26c   : > { %8824 = vmatmul.mubr.msk.f32.gmra.mrb[152].mxu1 %vm613_vm0, %v2675_v46  ;;  %v2311_v46 = vmul.f32 %v11576_v52, %v12382_v39  ;;  %17658 = vst [vmem:[#allocation64_spill] sm:$0xff] %v12456_v0  ;;  %17673 = vst [vmem:[#allocation79_spill] sm:$0xff] %v12560_v5  ;;  %v12617_v5 = vmul.f32 %v12323_v57, %v12245_v11 }
 0x26d   : > { %8825 = vmatprep.mubr.msk.f32.mxu1 %vm613_vm0, %v2676_v27  ;;  %17668 = vst [vmem:[#allocation74_spill] sm:$0xff] %v12522_v35 }
 0x26e   : > { %v9521_v40 = vpack.c.bf16 %v2312_v19, %v2311_v46  ;;  %v12467_v19 = vmul.f32 %v12072_v61, %v12331_v9  ;;  %v12471_v46 = vmul.f32 %v12323_v57, %v12072_v61  ;;  %17682 = vst [vmem:[#allocation88_spill] sm:$0xff] %v12617_v5  ;;  %v12674_v5 = vmul.f32 %v12372_v48, %v12245_v11 }
 0x26f   : > { %v1722_v1 = vpop.f32.mrb[48].mxu1 }
 0x270   : > { %v1724_v63 = vpop.f32.mrb[49].mxu1  ;;  %8826 = vmatmul.mubr.msk.f32.gmra.mrb[154].mxu1 %vm613_vm0, %v2676_v27  ;;  %v12463_v36 = vadd.f32 %v1722_v1, %v545_v2  ;;  %17661 = vst [vmem:[#allocation67_spill] sm:$0xff] %v12467_v19  ;;  %17662 = vst [vmem:[#allocation68_spill] sm:$0xff] %v12471_v46  ;;  %v547_v27 = vld [vmem:[%s11296_s25 + $0x10] sm:$0xff]  ;;  %v12482_v2 = vpop.f32.mrb[34].mxu0  ;;  %v2313_v1 = vmul.f32 %v11576_v52, %v12445_v12  ;;  %9522 = vmatpush1.bf16.msra.mxu0 %v9521_v40  ;;  %v12546_v46 = vld [vmem:[%s11296_s25 + $0x28] sm:$0xff] }
 0x271   : > { %8827 = vmatprep.mubr.msk.f32.mxu1 %vm613_vm0, %v12380_v44  ;;  %v12479_v42 = vadd.f32 %v1724_v63, %v546_v55  ;;  %v12497_v55 = vmul.f32 %v12072_v61, %v12045_v24  ;;  %v12499_v63 = vpop.f32.mrb[35].mxu0  ;;  %9523 = vmatprep.subr.bf16.mxu0 %v17628_v29  ;;  %v12510_v40 = vmul.f32 %v12240_v43, %v12288_v6 }
 0x272   : > { %17660 = vst [vmem:[#allocation66_spill] sm:$0xff] %v12463_v36  ;;  %v9524_v0 = vpack.c.bf16 %v2314_v56, %v2313_v1  ;;  %v12514_v24 = vmul.f32 %v12280_v60, %v12240_v43  ;;  %v12526_v56 = vmul.f32 %v12372_v48, %v12072_v61  ;;  %v12530_v1 = vmul.f32 %v12245_v11, %v12288_v6 }
 0x273   : > { %17664 = vst [vmem:[#allocation70_spill] sm:$0xff] %v12479_v42  ;;  %v1728_v50 = vpop.f32.mrb[50].mxu1  ;;  %v1913_v20 = vmax.f32 %v12463_v36, %v12479_v42  ;;  %17665 = vst [vmem:[#allocation71_spill] sm:$0xff] %v12510_v40  ;;  %v2316_v19 = vmul.f32 %v12482_v2, %v11576_v52  ;;  %v12580_v40 = vmul.f32 %v12072_v61, %v12445_v12 }
 0x274   : > { %17666 = vst [vmem:[#allocation72_spill] sm:$0xff] %v12514_v24  ;;  %v1730_v41 = vpop.f32.mrb[51].mxu1  ;;  %8828 = vmatmul.mubr.msk.f32.gmra.mrb[156].mxu1 %vm613_vm0, %v12380_v44  ;;  %v12518_v33 = vadd.f32 %v1728_v50, %v547_v27  ;;  %17669 = vst [vmem:[#allocation75_spill] sm:$0xff] %v12526_v56  ;;  %v12537_v50 = vld [vmem:[%s11296_s25 + $0x20] sm:$0xff]  ;;  %v12539_v44 = vpop.f32.mrb[36].mxu0  ;;  %v2315_v27 = vmul.f32 %v11576_v52, %v12499_v63  ;;  %9525 = vmatpush1.bf16.msra.mxu0 %v9524_v0 }
 0x275   : > { %17670 = vst [vmem:[#allocation76_spill] sm:$0xff] %v12530_v1  ;;  %1914 = vmax.xlane.f32.xlu0 %v1913_v20  ;;  %8829 = vmatprep.mubr.msk.f32.mxu1 %vm613_vm0, %v12370_v47  ;;  %v12534_v37 = vadd.f32 %v1730_v41, %v548_v3  ;;  %17672 = vst [vmem:[#allocation78_spill] sm:$0xff] %v12546_v46  ;;  %v12550_v20 = vmul.f32 %v12072_v61, %v12052_v30  ;;  %v12552_v6 = vpop.f32.mrb[37].mxu0 }
 0x276   : > { %17667 = vst [vmem:[#allocation73_spill] sm:$0xff] %v12518_v33  ;;  %9526 = vmatprep.subr.bf16.mxu0 %v17628_v29  ;;  %v9527_v0 = vpack.c.bf16 %v2316_v19, %v2315_v27  ;;  %v12567_v30 = vmul.f32 %v12240_v43, %v12331_v9  ;;  %v12571_v3 = vmul.f32 %v12323_v57, %v12240_v43  ;;  %17677 = vst [vmem:[#allocation83_spill] sm:$0xff] %v12580_v40  ;;  %v12596_v24 = vpop.f32.mrb[38].mxu0 }
 0x277   : > { %17671 = vst [vmem:[#allocation77_spill] sm:$0xff] %v12534_v37  ;;  %v1734_v42 = vpop.f32.mrb[52].mxu1  ;;  %v1916_v36 = vmax.f32 %v12518_v33, %v12534_v37  ;;  %v12584_v19 = vmul.f32 %v12422_v54, %v12072_v61  ;;  %v2317_v35 = vmul.f32 %v11576_v52, %v12552_v6  ;;  %v2318_v56 = vmul.f32 %v12539_v44, %v11576_v52  ;;  %v12603_v37 = vld [vmem:[%s11296_s25 + $0x38] sm:$0xff] }
 0x278   : > { %17674 = vst [vmem:[#allocation80_spill] sm:$0xff] %v12567_v30  ;;  %17675 = vst [vmem:[#allocation81_spill] sm:$0xff] %v12571_v3  ;;  %v1736_v41 = vpop.f32.mrb[53].mxu1  ;;  %8830 = vmatmul.mubr.msk.f32.gmra.mrb[158].mxu1 %vm613_vm0, %v12370_v47  ;;  %v12576_v60 = vadd.f32 %v1734_v42, %v12537_v50  ;;  %v12594_v42 = vld [vmem:[%s11296_s25 + $0x30] sm:$0xff]  ;;  %9528 = vmatpush1.bf16.msra.mxu0 %v9527_v0  ;;  %v12613_v1 = vmul.f32 %v12245_v11, %v12331_v9 }
 0x279   : > { %17678 = vst [vmem:[#allocation84_spill] sm:$0xff] %v12584_v19  ;;  %1917 = vmax.xlane.f32.xlu0 %v1916_v36  ;;  %8831 = vmatprep.mubr.msk.f32.mxu1 %vm613_vm0, %v12435_v32  ;;  %v12591_v47 = vadd.f32 %v1736_v41, %v12546_v46  ;;  %17680 = vst [vmem:[#allocation86_spill] sm:$0xff] %v12603_v37  ;;  %v12605_v36 = vpop.f32.mrb[39].mxu0  ;;  %v9530_v46 = vpack.c.bf16 %v2318_v56, %v2317_v35 }
 0x27a   : > { %17676 = vst [vmem:[#allocation82_spill] sm:$0xff] %v12576_v60  ;;  %17681 = vst [vmem:[#allocation87_spill] sm:$0xff] %v12613_v1  ;;  %9529 = vmatprep.subr.bf16.mxu0 %v17628_v29  ;;  %v12624_v41 = vmul.f32 %v12240_v43, %v12382_v39  ;;  %v12628_v9 = vmul.f32 %v12372_v48, %v12240_v43  ;;  %v12637_v30 = vmul.f32 %v12072_v61, %v12499_v63  ;;  %v12653_v3 = vpop.f32.mrb[40].mxu0 }
 0x27b   : > { %17679 = vst [vmem:[#allocation85_spill] sm:$0xff] %v12591_v47  ;;  %v1740_v33 = vpop.f32.mrb[54].mxu1  ;;  %v1919_v0 = vmax.f32 %v12576_v60, %v12591_v47  ;;  %v12641_v35 = vmul.f32 %v12482_v2, %v12072_v61  ;;  %v2319_v40 = vmul.f32 %v11576_v52, %v12605_v36  ;;  %v2320_v19 = vmul.f32 %v12596_v24, %v11576_v52  ;;  %v12660_v47 = vld [vmem:[%s11296_s25 + $0x48] sm:$0xff] }
 0x27c   : > { %17683 = vst [vmem:[#allocation89_spill] sm:$0xff] %v12624_v41  ;;  %17684 = vst [vmem:[#allocation90_spill] sm:$0xff] %v12628_v9  ;;  %v1742_v27 = vpop.f32.mrb[55].mxu1  ;;  %8832 = vmatmul.mubr.msk.f32.gmra.mrb[160].mxu1 %vm613_vm0, %v12435_v32  ;;  %v12633_v57 = vadd.f32 %v1740_v33, %v12594_v42  ;;  %v12651_v33 = vld [vmem:[%s11296_s25 + $0x40] sm:$0xff]  ;;  %9531 = vmatpush1.bf16.msra.mxu0 %v9530_v46  ;;  %v12670_v1 = vmul.f32 %v12245_v11, %v12382_v39 }
 0x27d   : > { %17686 = vst [vmem:[#allocation92_spill] sm:$0xff] %v12637_v30  ;;  %17687 = vst [vmem:[#allocation93_spill] sm:$0xff] %v12641_v35  ;;  %1920 = vmax.xlane.f32.xlu1 %v1919_v0  ;;  %8833 = vmatprep.mubr.msk.f32.mxu1 %vm613_vm0, %v12410_v8  ;;  %v12648_v32 = vadd.f32 %v1742_v27, %v12603_v37  ;;  %v12662_v0 = vpop.f32.mrb[41].mxu0  ;;  %v9533_v37 = vpack.c.bf16 %v2320_v19, %v2319_v40 }
 0x27e   : > { %17685 = vst [vmem:[#allocation91_spill] sm:$0xff] %v12633_v57  ;;  %17689 = vst [vmem:[#allocation95_spill] sm:$0xff] %v12670_v1  ;;  %9532 = vmatprep.subr.bf16.mxu0 %v17628_v29  ;;  %v12681_v27 = vmul.f32 %v12240_v43, %v12445_v12  ;;  %v12685_v39 = vmul.f32 %v12422_v54, %v12240_v43  ;;  %v12694_v41 = vmul.f32 %v12072_v61, %v12552_v6  ;;  %v12710_v9 = vpop.f32.mrb[42].mxu0 }
 0x27f   : > { %17688 = vst [vmem:[#allocation94_spill] sm:$0xff] %v12648_v32  ;;  %17690 = vst [vmem:[#allocation96_spill] sm:$0xff] %v12674_v5  ;;  %v1746_v60 = vpop.f32.mrb[56].mxu1  ;;  %v1922_v46 = vmax.f32 %v12633_v57, %v12648_v32  ;;  %v12698_v40 = vmul.f32 %v12539_v44, %v12072_v61  ;;  %v12716_v35 = vmul.f32 %v12245_v11, %v12445_v12  ;;  %v12719_v32 = vld [vmem:[%s11296_s25 + $0x58] sm:$0xff] }
 0x280   : > { %17691 = vst [vmem:[#allocation97_spill] sm:$0xff] %v12681_v27  ;;  %17692 = vst [vmem:[#allocation98_spill] sm:$0xff] %v12685_v39  ;;  %v1748_v56 = vpop.f32.mrb[57].mxu1  ;;  %8834 = vmatmul.mubr.msk.f32.gmra.mrb[162].mxu1 %vm613_vm0, %v12410_v8  ;;  %v12690_v48 = vadd.f32 %v1746_v60, %v12651_v33  ;;  %v12708_v60 = vld [vmem:[%s11296_s25 + $0x50] sm:$0xff]  ;;  %9534 = vmatpush1.bf16.msra.mxu0 %v9533_v37  ;;  %v12729_v1 = vmul.f32 %v12422_v54, %v12245_v11 }
 0x281   : > { %17694 = vst [vmem:[#allocation100_spill] sm:$0xff] %v12694_v41  ;;  %17695 = vst [vmem:[#allocation101_spill] sm:$0xff] %v12698_v40  ;;  %1923 = vmax.xlane.f32.xlu1 %v1922_v46  ;;  %8835 = vmatprep.mubr.msk.f32.mxu1 %vm613_vm0, %v12439_v28  ;;  %v12705_v8 = vadd.f32 %v1748_v56, %v12660_v47  ;;  %v2321_v46 = vmul.f32 %v11576_v52, %v12662_v0 }
 0x282   : > { %17693 = vst [vmem:[#allocation99_spill] sm:$0xff] %v12690_v48  ;;  %17697 = vst [vmem:[#allocation103_spill] sm:$0xff] %v12716_v35  ;;  %v2322_v56 = vmul.f32 %v12653_v3, %v11576_v52  ;;  %9535 = vmatprep.subr.bf16.mxu0 %v17628_v29  ;;  %v12736_v37 = vmul.f32 %v12240_v43, %v12499_v63  ;;  %v12740_v5 = vmul.f32 %v12482_v2, %v12240_v43 }
 0x283   : > { %17696 = vst [vmem:[#allocation102_spill] sm:$0xff] %v12705_v8  ;;  %17698 = vst [vmem:[#allocation104_spill] sm:$0xff] %v12729_v1  ;;  %v1752_v30 = vpop.f32.mrb[58].mxu1  ;;  %v1925_v12 = vmax.f32 %v12690_v48, %v12705_v8  ;;  %v12744_v54 = vmul.f32 %v12245_v11, %v12499_v63  ;;  %v12753_v41 = vmul.f32 %v12072_v61, %v12605_v36  ;;  %v12774_v8 = vld [vmem:[%s11296_s25 + $0x68] sm:$0xff] }
 0x284   : > { %17699 = vst [vmem:[#allocation105_spill] sm:$0xff] %v12736_v37  ;;  %17700 = vst [vmem:[#allocation106_spill] sm:$0xff] %v12740_v5  ;;  %v1754_v19 = vpop.f32.mrb[59].mxu1  ;;  %8836 = vmatmul.mubr.msk.f32.gmra.mrb[164].mxu1 %vm613_vm0, %v12439_v28  ;;  %v12749_v27 = vadd.f32 %v1752_v30, %v12708_v60  ;;  %v9536_v39 = vpack.c.bf16 %v2322_v56, %v2321_v46  ;;  %v12757_v40 = vmul.f32 %v12596_v24, %v12072_v61  ;;  %v12765_v28 = vld [vmem:[%s11296_s25 + $0x60] sm:$0xff]  ;;  %v12767_v30 = vpop.f32.mrb[43].mxu0 }
 0x285   : > { %17701 = vst [vmem:[#allocation107_spill] sm:$0xff] %v12744_v54  ;;  %17703 = vst [vmem:[#allocation109_spill] sm:$0xff] %v12753_v41  ;;  %1926 = vmax.xlane.f32.xlu0 %v1925_v12  ;;  %8837 = vmatprep.mubr.msk.f32.mxu1 %vm613_vm0, %v12443_v23  ;;  %v12762_v63 = vadd.f32 %v1754_v19, %v12719_v32  ;;  %v2323_v12 = vmul.f32 %v11576_v52, %v12767_v30  ;;  %v12806_v37 = vpop.f32.mrb[44].mxu0 }
 0x286   : > { %17702 = vst [vmem:[#allocation108_spill] sm:$0xff] %v12749_v27  ;;  %17704 = vst [vmem:[#allocation110_spill] sm:$0xff] %v12757_v40  ;;  %9537 = vmatpush1.bf16.msra.mxu0 %v9536_v39  ;;  %v2324_v19 = vmul.f32 %v12710_v9, %v11576_v52  ;;  %v12784_v57 = vmul.f32 %v12482_v2, %v12245_v11  ;;  %v12791_v39 = vmul.f32 %v12240_v43, %v12552_v6 }
 0x287   : > { %17705 = vst [vmem:[#allocation111_spill] sm:$0xff] %v12762_v63  ;;  %17706 = vst [vmem:[#allocation112_spill] sm:$0xff] %v12774_v8  ;;  %v1758_v46 = vpop.f32.mrb[60].mxu1  ;;  %v1928_v56 = vmax.f32 %v12749_v27, %v12762_v63  ;;  %9538 = vmatprep.subr.bf16.mxu0 %v17628_v29  ;;  %v12795_v35 = vmul.f32 %v12539_v44, %v12240_v43  ;;  %v12799_v2 = vmul.f32 %v12245_v11, %v12552_v6  ;;  %v12822_v6 = vld [vmem:[%s11296_s25 + $0x70] sm:$0xff]  ;;  %v12831_v63 = vld [vmem:[%s11296_s25 + $0x78] sm:$0xff] }
 0x288   : > { %17707 = vst [vmem:[#allocation113_spill] sm:$0xff] %v12784_v57  ;;  %17708 = vst [vmem:[#allocation114_spill] sm:$0xff] %v12791_v39  ;;  %v1760_v48 = vpop.f32.mrb[61].mxu1  ;;  %8838 = vmatmul.mubr.msk.f32.gmra.mrb[166].mxu1 %vm613_vm0, %v12443_v23  ;;  %v12804_v1 = vadd.f32 %v1758_v46, %v12765_v28  ;;  %v9539_v5 = vpack.c.bf16 %v2324_v19, %v2323_v12  ;;  %v12810_v41 = vmul.f32 %v12072_v61, %v12662_v0  ;;  %v12824_v46 = vpop.f32.mrb[45].mxu0 }
 0x289   : > { %17709 = vst [vmem:[#allocation115_spill] sm:$0xff] %v12795_v35  ;;  %17710 = vst [vmem:[#allocation116_spill] sm:$0xff] %v12799_v2  ;;  %v12814_v40 = vmul.f32 %v12653_v3, %v12072_v61  ;;  %1929 = vmax.xlane.f32.xlu1 %v1928_v56  ;;  %8839 = vmatprep.mubr.msk.f32.mxu1 %vm613_vm0, %v12493_v34  ;;  %v12819_v23 = vadd.f32 %v1760_v48, %v12774_v8  ;;  %v12863_v39 = vpop.f32.mrb[46].mxu0 }
 0x28a   : > { %17711 = vst [vmem:[#allocation117_spill] sm:$0xff] %v12804_v1  ;;  %17712 = vst [vmem:[#allocation118_spill] sm:$0xff] %v12810_v41  ;;  %9540 = vmatpush1.bf16.msra.mxu0 %v9539_v5  ;;  %v2325_v56 = vmul.f32 %v11576_v52, %v12824_v46  ;;  %v2326_v48 = vmul.f32 %v12806_v37, %v11576_v52  ;;  %v12841_v8 = vmul.f32 %v12539_v44, %v12245_v11 }
 0x28b   : > { %17713 = vst [vmem:[#allocation119_spill] sm:$0xff] %v12814_v40  ;;  %17714 = vst [vmem:[#allocation120_spill] sm:$0xff] %v12819_v23  ;;  %v1764_v12 = vpop.f32.mrb[62].mxu1  ;;  %v1931_v19 = vmax.f32 %v12804_v1, %v12819_v23  ;;  %9541 = vmatprep.subr.bf16.mxu0 %v17628_v29  ;;  %v12848_v5 = vmul.f32 %v12240_v43, %v12605_v36  ;;  %v12852_v54 = vmul.f32 %v12596_v24, %v12240_v43  ;;  %v12888_v23 = vld [vmem:[%s11296_s25 + $0x88] sm:$0xff] }
 0x28c   : > { %17715 = vst [vmem:[#allocation121_spill] sm:$0xff] %v12831_v63  ;;  %17716 = vst [vmem:[#allocation122_spill] sm:$0xff] %v12841_v8  ;;  %v12856_v44 = vmul.f32 %v12245_v11, %v12605_v36  ;;  %v1766_v27 = vpop.f32.mrb[63].mxu1  ;;  %8840 = vmatmul.mubr.msk.f32.gmra.mrb[168].mxu1 %vm613_vm0, %v12493_v34  ;;  %v12861_v57 = vadd.f32 %v1764_v12, %v12822_v6  ;;  %v9542_v35 = vpack.c.bf16 %v2326_v48, %v2325_v56  ;;  %v12879_v36 = vld [vmem:[%s11296_s25 + $0x80] sm:$0xff]  ;;  %v12881_v12 = vpop.f32.mrb[47].mxu0 }
 0x28d   : > { %17717 = vst [vmem:[#allocation123_spill] sm:$0xff] %v12848_v5  ;;  %17718 = vst [vmem:[#allocation124_spill] sm:$0xff] %v12852_v54  ;;  %v12867_v41 = vmul.f32 %v12072_v61, %v12767_v30  ;;  %v12871_v40 = vmul.f32 %v12710_v9, %v12072_v61  ;;  %1932 = vmax.xlane.f32.xlu0 %v1931_v19  ;;  %8841 = vmatprep.mubr.msk.f32.mxu1 %vm613_vm0, %v12497_v55 }
 0x28e   : > { %17719 = vst [vmem:[#allocation125_spill] sm:$0xff] %v12856_v44  ;;  %v12876_v34 = vadd.f32 %v1766_v27, %v12831_v63  ;;  %9543 = vmatpush1.bf16.msra.mxu0 %v9542_v35  ;;  %v2327_v19 = vmul.f32 %v11576_v52, %v12881_v12  ;;  %v2328_v27 = vmul.f32 %v12863_v39, %v11576_v52 }
 0x28f   : > { %17720 = vst [vmem:[#allocation126_spill] sm:$0xff] %v12867_v41  ;;  %17721 = vst [vmem:[#allocation127_spill] sm:$0xff] %v12871_v40  ;;  %v12898_v63 = vmul.f32 %v12596_v24, %v12245_v11  ;;  %v1770_v56 = vpop.f32.mrb[64].mxu1  ;;  %9544 = vmatprep.subr.bf16.mxu0 %v17628_v29  ;;  %v12905_v35 = vmul.f32 %v12240_v43, %v12662_v0  ;;  %v12909_v52 = vmul.f32 %v12653_v3, %v12240_v43  ;;  %v12943_v41 = vld [vmem:[%s11296_s25 + $0x98] sm:$0xff] }
 0x290   : > { %v1934_v48 = vmax.f32 %v12861_v57, %v12876_v34  ;;  %v12913_v24 = vmul.f32 %v12245_v11, %v12662_v0  ;;  %v1772_v1 = vpop.f32.mrb[65].mxu1  ;;  %8842 = vmatmul.mubr.msk.f32.gmra.mrb[170].mxu1 %vm613_vm0, %v12497_v55  ;;  %v12918_v2 = vadd.f32 %v1770_v56, %v12879_v36  ;;  %v9545_v8 = vpack.c.bf16 %v2328_v27, %v2327_v19  ;;  %v12934_v55 = vld [vmem:[%s11296_s25 + $0x90] sm:$0xff] }
 0x291   : > { %17722 = vst [vmem:[#allocation128_spill] sm:$0xff] %v12898_v63  ;;  %17723 = vst [vmem:[#allocation129_spill] sm:$0xff] %v12905_v35  ;;  %v12922_v5 = vmul.f32 %v12072_v61, %v12824_v46  ;;  %v12926_v54 = vmul.f32 %v12806_v37, %v12072_v61  ;;  %8843 = vmatprep.mubr.msk.f32.mxu1 %vm613_vm0, %v12550_v20  ;;  %v12931_v0 = vadd.f32 %v1772_v1, %v12888_v23 }
 0x292   : > { %17724 = vst [vmem:[#allocation130_spill] sm:$0xff] %v12909_v52  ;;  %17725 = vst [vmem:[#allocation131_spill] sm:$0xff] %v12913_v24  ;;  %1935 = vmax.xlane.f32.xlu1 %v1934_v48  ;;  %v2686_v27 = vmul.f32 %v12072_v61, %v12059_v38  ;;  %9546 = vmatpush1.bf16.msra.mxu0 %v9545_v8  ;;  %v12949_v1 = vmul.f32 %v12653_v3, %v12245_v11  ;;  %v12997_v52 = vld [vmem:[%s11296_s25 + $0xa8] sm:$0xff] }
 0x293   : > { %17726 = vst [vmem:[#allocation132_spill] sm:$0xff] %v12922_v5  ;;  %17727 = vst [vmem:[#allocation133_spill] sm:$0xff] %v12926_v54  ;;  %v1776_v40 = vpop.f32.mrb[66].mxu1  ;;  %v1937_v56 = vmax.f32 %v12918_v2, %v12931_v0  ;;  %9595 = vmatprep.subr.bf16.mxu0 %v17628_v29  ;;  %v12956_v19 = vmul.f32 %v12240_v43, %v12767_v30  ;;  %v12960_v8 = vmul.f32 %v12710_v9, %v12240_v43 }
 0x294   : > { %17728 = vst [vmem:[#allocation134_spill] sm:$0xff] %v12949_v1  ;;  %v12964_v3 = vmul.f32 %v12245_v11, %v12767_v30  ;;  %v1778_v48 = vpop.f32.mrb[67].mxu1  ;;  %8844 = vmatmul.mubr.msk.f32.gmra.mrb[172].mxu1 %vm613_vm0, %v12550_v20  ;;  %v12969_v44 = vadd.f32 %v1776_v40, %v12934_v55  ;;  %v12973_v63 = vmul.f32 %v12072_v61, %v12881_v12  ;;  %v12986_v20 = vld [vmem:[%s11296_s25 + $0xa0] sm:$0xff]  ;;  %v13030_v1 = vld [vmem:[%s11296_s25 + $0xb0] sm:$0xff] }
 0x295   : > { %17729 = vst [vmem:[#allocation135_spill] sm:$0xff] %v12956_v19  ;;  %17730 = vst [vmem:[#allocation136_spill] sm:$0xff] %v12960_v8  ;;  %v12977_v35 = vmul.f32 %v12863_v39, %v12072_v61  ;;  %1938 = vmax.xlane.f32.xlu0 %v1937_v56  ;;  %8845 = vmatprep.mubr.msk.f32.mxu1 %vm613_vm0, %v2686_v27  ;;  %v12983_v30 = vadd.f32 %v1778_v48, %v12943_v41 }
 0x296   : > { %17731 = vst [vmem:[#allocation137_spill] sm:$0xff] %v12964_v3  ;;  %17732 = vst [vmem:[#allocation138_spill] sm:$0xff] %v12973_v63  ;;  %v12992_v5 = vmul.f32 %v12710_v9, %v12245_v11  ;;  %v3782_v61 = vmul.f32 %v12240_v43, %v17627_v13  ;;  %v13005_v40 = vmul.f32 %v12240_v43, %v12824_v46 }
 0x297   : > { %17733 = vst [vmem:[#allocation139_spill] sm:$0xff] %v12977_v35  ;;  %v1782_v48 = vpop.f32.mrb[68].mxu1  ;;  %v1940_v24 = vmax.f32 %v12969_v44, %v12983_v30  ;;  %v13009_v9 = vmul.f32 %v12806_v37, %v12240_v43  ;;  %v13019_v8 = vmul.f32 %v12245_v11, %v12824_v46  ;;  %v13023_v63 = vmul.f32 %v12806_v37, %v12245_v11 }
 0x298   : > { %17734 = vst [vmem:[#allocation140_spill] sm:$0xff] %v12992_v5  ;;  %17735 = vst [vmem:[#allocation141_spill] sm:$0xff] %v13005_v40  ;;  %v1784_v19 = vpop.f32.mrb[69].mxu1  ;;  %8846 = vmatmul.mubr.msk.f32.gmra.mrb[174].mxu1 %vm613_vm0, %v2686_v27  ;;  %v13015_v56 = vadd.f32 %v1782_v48, %v12986_v20  ;;  %v13035_v48 = vld [vmem:[%s11296_s25 + $0xb8] sm:$0xff]  ;;  %v13051_v27 = vmul.f32 %v12245_v11, %v12881_v12  ;;  %v3783_v46 = vmul.f32 %v12240_v43, %v11774_v16 }
 0x299   : > { %17736 = vst [vmem:[#allocation142_spill] sm:$0xff] %v13009_v9  ;;  %17737 = vst [vmem:[#allocation143_spill] sm:$0xff] %v13019_v8  ;;  %1941 = vmax.xlane.f32.xlu1 %v1940_v24  ;;  %8879 = vmatprep.mubr.msk.f32.mxu1 %vm613_vm0, %v3782_v61  ;;  %v13027_v35 = vadd.f32 %v1784_v19, %v12997_v52  ;;  %v13043_v24 = vmul.f32 %v12240_v43, %v12881_v12 }
 0x29a   : > { %17738 = vst [vmem:[#allocation144_spill] sm:$0xff] %v13023_v63  ;;  %v13047_v19 = vmul.f32 %v12863_v39, %v12240_v43  ;;  %17741 = vst [vmem:[#allocation147_spill] sm:$0xff] %v13051_v27  ;;  %v13061_v63 = vmul.f32 %v12863_v39, %v12245_v11  ;;  %v13079_v39 = vld [vmem:[%s11296_s25 + $0xc8] sm:$0xff]  ;;  %v3784_v40 = vmul.f32 %v12240_v43, %v11781_v18  ;;  %v13099_v27 = vld [vmem:[%s11296_s25 + $0xd8] sm:$0xff] }
 0x29b   : > { %v1788_v3 = vpop.f32.mrb[70].mxu1  ;;  %v1943_v37 = vmax.f32 %v13015_v56, %v13027_v35  ;;  %17739 = vst [vmem:[#allocation145_spill] sm:$0xff] %v13043_v24 }
 0x29c   : > { %17740 = vst [vmem:[#allocation146_spill] sm:$0xff] %v13047_v19  ;;  %v1790_v5 = vpop.f32.mrb[71].mxu1  ;;  %8880 = vmatmul.mubr.msk.f32.vlgmr.msra.gmra.mrb[176].mxu1 %vm613_vm0, %v3782_v61  ;;  %v13057_v8 = vadd.f32 %v1788_v3, %v13030_v1  ;;  %17743 = vst [vmem:[#allocation149_spill] sm:$0xff] %v13061_v63  ;;  %v13070_v61 = vld [vmem:[%s11296_s25 + $0xc0] sm:$0xff] }
 0x29d   : > { %9744 = vmatpush3.bf16.xpose.msk.msra.mxu1 %vm11658_vm2, %v11628_v49  ;;  %1944 = vmax.xlane.f32.xlu0 %v1943_v37  ;;  %v13067_v12 = vadd.f32 %v1790_v5, %v13035_v48  ;;  %v13096_v49 = vld [vmem:[%s11296_s25 + $0xd0] sm:$0xff]  ;;  %v13116_v19 = vld [vmem:[%s11296_s25 + $0xe0] sm:$0xff] }
 0x29e   : > { %17742 = vst [vmem:[#allocation148_spill] sm:$0xff] %v13057_v8  ;;  %8881 = vmatprep.mubr.msk.f32.mxu1 %vm613_vm0, %v3783_v46  ;;  %9747 = vmatprep.subr.msk.bf16.mxu1 %vm11658_vm2, %v11670_v59 }
 0x29f   : > { %17744 = vst [vmem:[#allocation150_spill] sm:$0xff] %v13067_v12  ;;  %v1794_v5 = vpop.f32.mrb[72].mxu1  ;;  %v1946_v37 = vmax.f32 %v13057_v8, %v13067_v12 }
 0x2a0   : > { %v1796_v9 = vpop.f32.mrb[73].mxu1  ;;  %8882 = vmatmul.mubr.msk.f32.gmra.mrb[178].mxu1 %vm613_vm0, %v3783_v46  ;;  %v13089_v3 = vadd.f32 %v1794_v5, %v13070_v61  ;;  %v3785_v5 = vmul.f32 %v12240_v43, %v11801_v14 }
 0x2a1   : > { %1947 = vmax.xlane.f32.xlu1 %v1946_v37  ;;  %8883 = vmatprep.mubr.msk.f32.mxu1 %vm613_vm0, %v3784_v40  ;;  %v13093_v59 = vadd.f32 %v1796_v9, %v13079_v39 }
 0x2a2   : > { %17745 = vst [vmem:[#allocation151_spill] sm:$0xff] %v13089_v3 }
 0x2a3   : > { %17746 = vst [vmem:[#allocation152_spill] sm:$0xff] %v13093_v59  ;;  %v1800_v63 = vpop.f32.mrb[74].mxu1  ;;  %v1949_v24 = vmax.f32 %v13089_v3, %v13093_v59  ;;  %v13138_v59 = vld [vmem:[%s11296_s25 + $0xf0] sm:$0xff]  ;;  %v3787_v3 = vmul.f32 %v12240_v43, %v11829_v21 }
 0x2a4   : > { %v1802_v46 = vpop.f32.mrb[75].mxu1  ;;  %8884 = vmatmul.mubr.msk.f32.gmra.mrb[180].mxu1 %vm613_vm0, %v3784_v40  ;;  %v13107_v37 = vadd.f32 %v1800_v63, %v13096_v49  ;;  %v13123_v63 = vld [vmem:[%s11296_s25 + $0xe8] sm:$0xff] }
 0x2a5   : > { %9750 = vmatpush3.bf16.xpose.msk.msra.mxu1 %vm11658_vm2, %v11634_v7  ;;  %1950 = vmax.xlane.f32.xlu0 %v1949_v24  ;;  %v13113_v9 = vadd.f32 %v1802_v46, %v13099_v27  ;;  %v3786_v24 = vmul.f32 %v12240_v43, %v11810_v17 }
 0x2a6   : > { %17747 = vst [vmem:[#allocation153_spill] sm:$0xff] %v13107_v37  ;;  %8885 = vmatprep.mubr.msk.f32.mxu1 %vm613_vm0, %v3785_v5  ;;  %9753 = vmatprep.subr.msk.bf16.mxu1 %vm11658_vm2, %v11681_v53 }
 0x2a7   : > { %17748 = vst [vmem:[#allocation154_spill] sm:$0xff] %v13113_v9  ;;  %v1806_v40 = vpop.f32.mrb[76].mxu1  ;;  %v1952_v7 = vmax.f32 %v13107_v37, %v13113_v9  ;;  %v13141_v9 = vld [vmem:[%s11296_s25 + $0xf8] sm:$0xff] }
 0x2a8   : > { %v1808_v54 = vpop.f32.mrb[77].mxu1  ;;  %8886 = vmatmul.mubr.msk.f32.gmra.mrb[182].mxu1 %vm613_vm0, %v3785_v5  ;;  %v13131_v46 = vadd.f32 %v1806_v40, %v13116_v19 }
 0x2a9   : > { %1953 = vmax.xlane.f32.xlu1 %v1952_v7  ;;  %8887 = vmatprep.mubr.msk.f32.mxu1 %vm613_vm0, %v3786_v24  ;;  %v13135_v53 = vadd.f32 %v1808_v54, %v13123_v63  ;;  %v13156_v54 = vld [vmem:[%s11296_s25 + $0x100] sm:$0xff] }
 0x2aa   : > { %17749 = vst [vmem:[#allocation155_spill] sm:$0xff] %v13131_v46 }
 0x2ab   : > { %17750 = vst [vmem:[#allocation156_spill] sm:$0xff] %v13135_v53  ;;  %v1812_v37 = vpop.f32.mrb[78].mxu1  ;;  %v1955_v5 = vmax.f32 %v13131_v46, %v13135_v53 }
 0x2ac   : > { %v1814_v40 = vpop.f32.mrb[79].mxu1  ;;  %8888 = vmatmul.mubr.msk.f32.gmra.mrb[184].mxu1 %vm613_vm0, %v3786_v24  ;;  %v13149_v7 = vadd.f32 %v1812_v37, %v13138_v59  ;;  %v13165_v37 = vld [vmem:[%s11296_s25 + $0x108] sm:$0xff] }
 0x2ad   : > { %9756 = vmatpush3.bf16.xpose.msk.msra.mxu1 %vm11658_vm2, %v11636_v4  ;;  %8889 = vmatprep.mubr.msk.f32.mxu1 %vm613_vm0, %v3787_v3  ;;  %v13159_v12 = vadd.f32 %v1814_v40, %v13141_v9  ;;  %v3788_v4 = vmul.f32 %v12240_v43, %v11838_v22 }
 0x2ae   : > { %17751 = vst [vmem:[#allocation157_spill] sm:$0xff] %v13149_v7  ;;  %9759 = vmatprep.subr.msk.bf16.mxu1 %vm11658_vm2, %v11689_v51  ;;  %1956 = vmax.xlane.f32.xlu0 %v1955_v5  ;;  %v13180_v51 = vld [vmem:[%s11296_s25 + $0x110] sm:$0xff]  ;;  %v13183_v5 = vld [vmem:[%s11296_s25 + $0x118] sm:$0xff] }
 0x2af   : > { %17752 = vst [vmem:[#allocation158_spill] sm:$0xff] %v13159_v12  ;;  %v1818_v24 = vpop.f32.mrb[80].mxu1  ;;  %v1958_v53 = vmax.f32 %v13149_v7, %v13159_v12  ;;  %17755 = vst [vmem:[#allocation161_spill] sm:$0xff] %v13183_v5 }
 0x2b0   : > { %v13172_v46 = vadd.f32 %v1818_v24, %v13156_v54  ;;  %v1820_v8 = vpop.f32.mrb[81].mxu1  ;;  %8890 = vmatmul.mubr.msk.f32.gmra.mrb[186].mxu1 %vm613_vm0, %v3787_v3  ;;  %v3789_v24 = vmul.f32 %v12240_v43, %v11857_v25 }
 0x2b1   : > { %v13176_v40 = vadd.f32 %v1820_v8, %v13165_v37  ;;  %8891 = vmatprep.mubr.msk.f32.mxu1 %vm613_vm0, %v3788_v4  ;;  %1959 = vmax.xlane.f32.xlu1 %v1958_v53  ;;  %v13201_v53 = vld [vmem:[%s11296_s25 + $0x120] sm:$0xff] }
 0x2b2   : > { %17753 = vst [vmem:[#allocation159_spill] sm:$0xff] %v13172_v46 }
 0x2b3   : > { %17754 = vst [vmem:[#allocation160_spill] sm:$0xff] %v13176_v40  ;;  %v1824_v22 = vpop.f32.mrb[82].mxu1  ;;  %v1961_v12 = vmax.f32 %v13172_v46, %v13176_v40 }
 0x2b4   : > { %v13190_v3 = vadd.f32 %v1824_v22, %v13180_v51  ;;  %v1826_v8 = vpop.f32.mrb[83].mxu1  ;;  %8892 = vmatmul.mubr.msk.f32.gmra.mrb[188].mxu1 %vm613_vm0, %v3788_v4  ;;  %v13207_v22 = vld [vmem:[%s11296_s25 + $0x128] sm:$0xff] }
 0x2b5   : > { %v13194_v7 = vadd.f32 %v1826_v8, %v13183_v5  ;;  %9762 = vmatpush3.bf16.xpose.msk.msra.mxu1 %vm11658_vm2, %v11642_v15  ;;  %8893 = vmatprep.mubr.msk.f32.mxu1 %vm613_vm0, %v3789_v24  ;;  %17758 = vst [vmem:[#allocation164_spill] sm:$0xff] %v13207_v22  ;;  %v3790_v8 = vmul.f32 %v12240_v43, %v11866_v26 }
 0x2b6   : > { %17756 = vst [vmem:[#allocation162_spill] sm:$0xff] %v13190_v3  ;;  %9765 = vmatprep.subr.msk.bf16.mxu1 %vm11658_vm2, %v11691_v10  ;;  %1962 = vmax.xlane.f32.xlu0 %v1961_v12  ;;  %v13222_v10 = vld [vmem:[%s11296_s25 + $0x130] sm:$0xff]  ;;  %v13225_v12 = vld [vmem:[%s11296_s25 + $0x138] sm:$0xff] }
 0x2b7   : > { %17757 = vst [vmem:[#allocation163_spill] sm:$0xff] %v13194_v7  ;;  %v1830_v4 = vpop.f32.mrb[84].mxu1  ;;  %v1964_v40 = vmax.f32 %v13190_v3, %v13194_v7  ;;  %17761 = vst [vmem:[#allocation167_spill] sm:$0xff] %v13222_v10 }
 0x2b8   : > { %v13214_v15 = vadd.f32 %v1830_v4, %v13201_v53  ;;  %v1832_v46 = vpop.f32.mrb[85].mxu1  ;;  %8894 = vmatmul.mubr.msk.f32.gmra.mrb[190].mxu1 %vm613_vm0, %v3789_v24  ;;  %17762 = vst [vmem:[#allocation168_spill] sm:$0xff] %v13225_v12  ;;  %v3791_v4 = vmul.f32 %v12240_v43, %v11883_v31 }
 0x2b9   : > { %v13218_v5 = vadd.f32 %v1832_v46, %v13207_v22  ;;  %8895 = vmatprep.mubr.msk.f32.mxu1 %vm613_vm0, %v3790_v8  ;;  %1965 = vmax.xlane.f32.xlu1 %v1964_v40  ;;  %v13243_v40 = vld [vmem:[%s11296_s25 + $0x140] sm:$0xff] }
 0x2ba   : > { %17759 = vst [vmem:[#allocation165_spill] sm:$0xff] %v13214_v15  ;;  %17765 = vst [vmem:[#allocation171_spill] sm:$0xff] %v13243_v40 }
 0x2bb   : > { %17760 = vst [vmem:[#allocation166_spill] sm:$0xff] %v13218_v5  ;;  %v1836_v26 = vpop.f32.mrb[86].mxu1  ;;  %v1967_v7 = vmax.f32 %v13214_v15, %v13218_v5  ;;  %v17766_v5 = vld [vmem:[#allocation24_spill] sm:$0xff] }
 0x2bc   : > { %v13232_v24 = vadd.f32 %v1836_v26, %v13222_v10  ;;  %v1838_v46 = vpop.f32.mrb[87].mxu1  ;;  %8896 = vmatmul.mubr.msk.f32.gmra.mrb[192].mxu1 %vm613_vm0, %v3790_v8  ;;  %v586_v26 = vld [vmem:[%s11296_s25 + $0x148] sm:$0xff] }
 0x2bd   : > { %v13236_v3 = vadd.f32 %v1838_v46, %v13225_v12  ;;  %9768 = vmatpush3.bf16.xpose.msk.msra.mxu1 %vm11658_vm2, %v11644_v58  ;;  %8897 = vmatprep.mubr.msk.f32.mxu1 %vm613_vm0, %v3791_v4  ;;  %v3792_v46 = vmul.f32 %v12240_v43, %v17766_v5  ;;  %v17769_v5 = vld [vmem:[#allocation27_spill] sm:$0xff] }
 0x2be   : > { %17763 = vst [vmem:[#allocation169_spill] sm:$0xff] %v13232_v24  ;;  %9771 = vmatprep.subr.msk.bf16.mxu1 %vm11658_vm2, %v11699_v45  ;;  %1968 = vmax.xlane.f32.xlu0 %v1967_v7  ;;  %v587_v45 = vld [vmem:[%s11296_s25 + $0x150] sm:$0xff]  ;;  %v588_v7 = vld [vmem:[%s11296_s25 + $0x158] sm:$0xff]  ;;  %v3793_v22 = vmul.f32 %v12240_v43, %v17769_v5 }
 0x2bf   : > { %17764 = vst [vmem:[#allocation170_spill] sm:$0xff] %v13236_v3  ;;  %v1842_v8 = vpop.f32.mrb[88].mxu1  ;;  %v1970_v15 = vmax.f32 %v13232_v24, %v13236_v3 }
 0x2c0   : > { %v13254_v58 = vadd.f32 %v1842_v8, %v13243_v40  ;;  %v1844_v12 = vpop.f32.mrb[89].mxu1  ;;  %8898 = vmatmul.mubr.msk.f32.gmra.mrb[194].mxu1 %vm613_vm0, %v3791_v4  ;;  %v17772_v4 = vld [vmem:[#allocation32_spill] sm:$0xff]  ;;  %v17777_v40 = vld [vmem:[#allocation29_spill] sm:$0xff] }
 0x2c1   : > { %v13257_v10 = vadd.f32 %v1844_v12, %v586_v26  ;;  %8899 = vmatprep.mubr.msk.f32.mxu1 %vm613_vm0, %v3792_v46  ;;  %1971 = vmax.xlane.f32.xlu1 %v1970_v15  ;;  %v589_v15 = vld [vmem:[%s11296_s25 + $0x160] sm:$0xff]  ;;  %v17773_v26 = vld [vmem:[#allocation35_spill] sm:$0xff] }
 0x2c2   : > { %17767 = vst [vmem:[#allocation172_spill] sm:$0xff] %v13254_v58 }
 0x2c3   : > { %17768 = vst [vmem:[#allocation173_spill] sm:$0xff] %v13257_v10  ;;  %v1848_v31 = vpop.f32.mrb[90].mxu1  ;;  %v1973_v8 = vmax.f32 %v13254_v58, %v13257_v10  ;;  %v17774_v10 = vld [vmem:[#allocation26_spill] sm:$0xff] }
 0x2c4   : > { %v13266_v3 = vadd.f32 %v1848_v31, %v587_v45  ;;  %v1850_v24 = vpop.f32.mrb[91].mxu1  ;;  %8900 = vmatmul.mubr.msk.f32.gmra.mrb[196].mxu1 %vm613_vm0, %v3792_v46  ;;  %v590_v31 = vld [vmem:[%s11296_s25 + $0x168] sm:$0xff] }
 0x2c5   : > { %v13269_v12 = vadd.f32 %v1850_v24, %v588_v7  ;;  %9774 = vmatpush3.bf16.xpose.msk.msra.mxu1 %vm11658_vm2, %v17772_v4  ;;  %8901 = vmatprep.mubr.msk.f32.mxu1 %vm613_vm0, %v3793_v22  ;;  %v3794_v24 = vmul.f32 %v12240_v43, %v17774_v10  ;;  %v3795_v10 = vmul.f32 %v12240_v43, %v17777_v40  ;;  %v17785_v40 = vld [vmem:[#allocation31_spill] sm:$0xff] }
 0x2c6   : > { %17770 = vst [vmem:[#allocation174_spill] sm:$0xff] %v13266_v3  ;;  %9777 = vmatprep.subr.msk.bf16.mxu1 %vm11658_vm2, %v17773_v26  ;;  %1974 = vmax.xlane.f32.xlu0 %v1973_v8  ;;  %v591_v8 = vld [vmem:[%s11296_s25 + $0x170] sm:$0xff]  ;;  %v592_v26 = vld [vmem:[%s11296_s25 + $0x178] sm:$0xff] }
 0x2c7   : > { %17771 = vst [vmem:[#allocation175_spill] sm:$0xff] %v13269_v12  ;;  %v1854_v45 = vpop.f32.mrb[92].mxu1  ;;  %v1976_v46 = vmax.f32 %v13266_v3, %v13269_v12 }
 0x2c8   : > { %v13284_v7 = vadd.f32 %v1854_v45, %v589_v15  ;;  %v1856_v4 = vpop.f32.mrb[93].mxu1  ;;  %8902 = vmatmul.mubr.msk.f32.gmra.mrb[198].mxu1 %vm613_vm0, %v3793_v22 }
 0x2c9   : > { %v13287_v58 = vadd.f32 %v1856_v4, %v590_v31  ;;  %8903 = vmatprep.mubr.msk.f32.mxu1 %vm613_vm0, %v3794_v24  ;;  %1977 = vmax.xlane.f32.xlu1 %v1976_v46  ;;  %v17780_v31 = vld [vmem:[#allocation33_spill] sm:$0xff]  ;;  %v593_v46 = vld [vmem:[%s11296_s25 + $0x180] sm:$0xff]  ;;  %v17781_v4 = vld [vmem:[#allocation36_spill] sm:$0xff] }
 0x2ca   : > { %17775 = vst [vmem:[#allocation32_spill] sm:$0xff] %v13284_v7 }
 0x2cb   : > { %17776 = vst [vmem:[#allocation35_spill] sm:$0xff] %v13287_v58  ;;  %v1860_v5 = vpop.f32.mrb[94].mxu1  ;;  %v1979_v15 = vmax.f32 %v13284_v7, %v13287_v58  ;;  %v17782_v58 = vld [vmem:[#allocation28_spill] sm:$0xff] }
 0x2cc   : > { %v13296_v45 = vadd.f32 %v1860_v5, %v591_v8  ;;  %v1862_v12 = vpop.f32.mrb[95].mxu1  ;;  %8904 = vmatmul.mubr.msk.f32.gmra.mrb[200].mxu1 %vm613_vm0, %v3794_v24  ;;  %v594_v5 = vld [vmem:[%s11296_s25 + $0x188] sm:$0xff] }
 0x2cd   : > { %v13299_v22 = vadd.f32 %v1862_v12, %v592_v26  ;;  %9780 = vmatpush3.bf16.xpose.msk.msra.mxu1 %vm11658_vm2, %v17780_v31  ;;  %8905 = vmatprep.mubr.msk.f32.mxu1 %vm613_vm0, %v3795_v10  ;;  %v3796_v12 = vmul.f32 %v12240_v43, %v17782_v58  ;;  %v3797_v58 = vmul.f32 %v12240_v43, %v17785_v40 }
 0x2ce   : > { %17778 = vst [vmem:[#allocation176_spill] sm:$0xff] %v13296_v45  ;;  %9783 = vmatprep.subr.msk.bf16.mxu1 %vm11658_vm2, %v17781_v4  ;;  %1980 = vmax.xlane.f32.xlu0 %v1979_v15  ;;  %v595_v15 = vld [vmem:[%s11296_s25 + $0x190] sm:$0xff]  ;;  %v596_v4 = vld [vmem:[%s11296_s25 + $0x198] sm:$0xff] }
 0x2cf   : > { %17779 = vst [vmem:[#allocation177_spill] sm:$0xff] %v13299_v22  ;;  %v1866_v8 = vpop.f32.mrb[96].mxu1  ;;  %v1982_v24 = vmax.f32 %v13296_v45, %v13299_v22 }
 0x2d0   : > { %v13314_v26 = vadd.f32 %v1866_v8, %v593_v46  ;;  %v1868_v31 = vpop.f32.mrb[97].mxu1  ;;  %8906 = vmatmul.mubr.msk.f32.gmra.mrb[202].mxu1 %vm613_vm0, %v3795_v10 }
 0x2d1   : > { %v13317_v7 = vadd.f32 %v1868_v31, %v594_v5  ;;  %8907 = vmatprep.mubr.msk.f32.mxu1 %vm613_vm0, %v3796_v12  ;;  %1983 = vmax.xlane.f32.xlu1 %v1982_v24  ;;  %v17788_v5 = vld [vmem:[#allocation34_spill] sm:$0xff]  ;;  %v598_v31 = vld [vmem:[%s11296_s25 + $0x1a8] sm:$0xff] }
 0x2d2   : > { %17783 = vst [vmem:[#allocation33_spill] sm:$0xff] %v13314_v26  ;;  %v597_v24 = vld [vmem:[%s11296_s25 + $0x1a0] sm:$0xff] }
 0x2d3   : > { %17784 = vst [vmem:[#allocation36_spill] sm:$0xff] %v13317_v7  ;;  %v1872_v3 = vpop.f32.mrb[98].mxu1  ;;  %v1985_v46 = vmax.f32 %v13314_v26, %v13317_v7  ;;  %v17789_v7 = vld [vmem:[#allocation30_spill] sm:$0xff]  ;;  %v17792_v26 = vld [vmem:[#allocation9_spill] sm:$0xff] }
 0x2d4   : > { %v13326_v8 = vadd.f32 %v1872_v3, %v595_v15  ;;  %v1874_v22 = vpop.f32.mrb[99].mxu1  ;;  %8908 = vmatmul.mubr.msk.f32.gmra.mrb[204].mxu1 %vm613_vm0, %v3796_v12  ;;  %v3798_v3 = vmul.f32 %v12240_v43, %v17789_v7  ;;  %v3799_v7 = vmul.f32 %v12240_v43, %v17792_v26 }
 0x2d5   : > { %v13329_v10 = vadd.f32 %v1874_v22, %v596_v4  ;;  %9786 = vmatpush3.bf16.xpose.msk.msra.mxu1 %vm11658_vm2, %v17788_v5  ;;  %8909 = vmatprep.mubr.msk.f32.mxu1 %vm613_vm0, %v3797_v58  ;;  %v599_v4 = vld [vmem:[%s11296_s25 + $0x1b0] sm:$0xff] }
 0x2d6   : > { %17786 = vst [vmem:[#allocation31_spill] sm:$0xff] %v13326_v8  ;;  %1986 = vmax.xlane.f32.xlu0 %v1985_v46  ;;  %v600_v46 = vld [vmem:[%s11296_s25 + $0x1b8] sm:$0xff] }
 0x2d7   : > { %17787 = vst [vmem:[#allocation178_spill] sm:$0xff] %v13329_v10  ;;  %v1878_v45 = vpop.f32.mrb[100].mxu1  ;;  %v1988_v12 = vmax.f32 %v13326_v8, %v13329_v10  ;;  %v17795_v8 = vld [vmem:[#allocation8_spill] sm:$0xff] }
 0x2d8   : > { %v13341_v15 = vadd.f32 %v1878_v45, %v597_v24  ;;  %v1880_v22 = vpop.f32.mrb[101].mxu1  ;;  %8910 = vmatmul.mubr.msk.f32.gmra.mrb[206].mxu1 %vm613_vm0, %v3797_v58  ;;  %v3800_v26 = vmul.f32 %v12240_v43, %v17795_v8 }
 0x2d9   : > { %v13344_v62 = vadd.f32 %v1880_v22, %v598_v31  ;;  %8911 = vmatprep.mubr.msk.f32.mxu1 %vm613_vm0, %v3798_v3  ;;  %1989 = vmax.xlane.f32.xlu1 %v1988_v12  ;;  %v601_v31 = vld [vmem:[%s11296_s25 + $0x1c0] sm:$0xff]  ;;  %v602_v12 = vld [vmem:[%s11296_s25 + $0x1c8] sm:$0xff] }
 0x2da   : > { %17790 = vst [vmem:[#allocation34_spill] sm:$0xff] %v13341_v15 }
 0x2db   : > { %17791 = vst [vmem:[#allocation179_spill] sm:$0xff] %v13344_v62  ;;  %v1884_v5 = vpop.f32.mrb[102].mxu1  ;;  %v1991_v45 = vmax.f32 %v13341_v15, %v13344_v62  ;;  %v17798_v15 = vld [vmem:[#allocation12_spill] sm:$0xff] }
 0x2dc   : > { %v13353_v24 = vadd.f32 %v1884_v5, %v599_v4  ;;  %v1886_v10 = vpop.f32.mrb[103].mxu1  ;;  %8912 = vmatmul.mubr.msk.f32.gmra.mrb[208].mxu1 %vm613_vm0, %v3798_v3  ;;  %v603_v3 = vld [vmem:[%s11296_s25 + $0x1d0] sm:$0xff]  ;;  %v3801_v8 = vmul.f32 %v12240_v43, %v17798_v15 }
 0x2dd   : > { %v13356_v58 = vadd.f32 %v1886_v10, %v600_v46  ;;  %8913 = vmatprep.mubr.msk.f32.mxu1 %vm613_vm0, %v3799_v7  ;;  %1992 = vmax.xlane.f32.xlu0 %v1991_v45  ;;  %v604_v46 = vld [vmem:[%s11296_s25 + $0x1d8] sm:$0xff] }
 0x2de   : > { %17793 = vst [vmem:[#allocation180_spill] sm:$0xff] %v13353_v24 }
 0x2df   : > { %17794 = vst [vmem:[#allocation181_spill] sm:$0xff] %v13356_v58  ;;  %v1890_v22 = vpop.f32.mrb[104].mxu1  ;;  %v1994_v4 = vmax.f32 %v13353_v24, %v13356_v58  ;;  %v17801_v24 = vld [vmem:[#allocation11_spill] sm:$0xff] }
 0x2e0   : > { %v13365_v5 = vadd.f32 %v1890_v22, %v601_v31  ;;  %v1892_v62 = vpop.f32.mrb[105].mxu1  ;;  %8914 = vmatmul.mubr.msk.f32.gmra.mrb[210].mxu1 %vm613_vm0, %v3799_v7  ;;  %v3802_v15 = vmul.f32 %v12240_v43, %v17801_v24 }
 0x2e1   : > { %v13368_v10 = vadd.f32 %v1892_v62, %v602_v12  ;;  %8915 = vmatprep.mubr.msk.f32.mxu1 %vm613_vm0, %v3800_v26  ;;  %1995 = vmax.xlane.f32.xlu1 %v1994_v4  ;;  %v605_v62 = vld [vmem:[%s11296_s25 + $0x1e0] sm:$0xff]  ;;  %v606_v12 = vld [vmem:[%s11296_s25 + $0x1e8] sm:$0xff] }
 0x2e2   : > { %17796 = vst [vmem:[#allocation182_spill] sm:$0xff] %v13365_v5 }
 0x2e3   : > { %17797 = vst [vmem:[#allocation183_spill] sm:$0xff] %v13368_v10  ;;  %v1896_v45 = vpop.f32.mrb[106].mxu1  ;;  %v1997_v31 = vmax.f32 %v13365_v5, %v13368_v10  ;;  %v17804_v5 = vld [vmem:[#allocation14_spill] sm:$0xff] }
 0x2e4   : > { %v13377_v22 = vadd.f32 %v1896_v45, %v603_v3  ;;  %v1898_v58 = vpop.f32.mrb[107].mxu1  ;;  %8916 = vmatmul.mubr.msk.f32.gmra.mrb[212].mxu1 %vm613_vm0, %v3800_v26  ;;  %v3803_v24 = vmul.f32 %v12240_v43, %v17804_v5 }
 0x2e5   : > { %v13380_v7 = vadd.f32 %v1898_v58, %v604_v46  ;;  %8917 = vmatprep.mubr.msk.f32.mxu1 %vm613_vm0, %v3801_v8  ;;  %1998 = vmax.xlane.f32.xlu0 %v1997_v31  ;;  %v607_v58 = vld [vmem:[%s11296_s25 + $0x1f0] sm:$0xff]  ;;  %v608_v46 = vld [vmem:[%s11296_s25 + $0x1f8] sm:$0xff] }
 0x2e6   : > { %17799 = vst [vmem:[#allocation184_spill] sm:$0xff] %v13377_v22 }
 0x2e7   : > { %17800 = vst [vmem:[#allocation185_spill] sm:$0xff] %v13380_v7  ;;  %v1902_v4 = vpop.f32.mrb[108].mxu1  ;;  %v2000_v3 = vmax.f32 %v13377_v22, %v13380_v7 }
 0x2e8   : > { %v13389_v45 = vadd.f32 %v1902_v4, %v605_v62  ;;  %v1904_v10 = vpop.f32.mrb[109].mxu1  ;;  %8918 = vmatmul.mubr.msk.f32.gmra.mrb[214].mxu1 %vm613_vm0, %v3801_v8 }
 0x2e9   : > { %v13392_v26 = vadd.f32 %v1904_v10, %v606_v12  ;;  %8919 = vmatprep.mubr.msk.f32.mxu1 %vm613_vm0, %v3802_v15  ;;  %2001 = vmax.xlane.f32.xlu1 %v2000_v3  ;;  %v17807_v12 = vld [vmem:[#allocation13_spill] sm:$0xff] }
 0x2ea   : > { %17802 = vst [vmem:[#allocation186_spill] sm:$0xff] %v13389_v45  ;;  %v3804_v3 = vmul.f32 %v12240_v43, %v17807_v12 }
 0x2eb   : > { %17803 = vst [vmem:[#allocation187_spill] sm:$0xff] %v13392_v26  ;;  %v1908_v31 = vpop.f32.mrb[110].mxu1  ;;  %v2003_v62 = vmax.f32 %v13389_v45, %v13392_v26  ;;  %v10818_v26 = vld [vmem:[%s11296_s25] sm:$0xff] }
 0x2ec   : > { %v13401_v4 = vadd.f32 %v1908_v31, %v607_v58  ;;  %v1910_v7 = vpop.f32.mrb[111].mxu1  ;;  %8920 = vmatmul.mubr.msk.f32.gmra.mrb[216].mxu1 %vm613_vm0, %v3802_v15  ;;  %v10819_v15 = vld [vmem:[%s11296_s25 + $0x8] sm:$0xff] }
 0x2ed   : > { %v13404_v8 = vadd.f32 %v1910_v7, %v608_v46  ;;  %8921 = vmatprep.mubr.msk.f32.mxu1 %vm613_vm0, %v3803_v24  ;;  %2004 = vmax.xlane.f32.xlu0 %v2003_v62  ;;  %v17810_v62 = vld [vmem:[#allocation16_spill] sm:$0xff] }
 0x2ee   : > { %17805 = vst [vmem:[#allocation14_spill] sm:$0xff] %v13401_v4  ;;  %v3805_v45 = vmul.f32 %v12240_v43, %v17810_v62 }
 0x2ef   : > { %17806 = vst [vmem:[#allocation188_spill] sm:$0xff] %v13404_v8  ;;  %v2849_v10 = vpop.f32.mrb[112].mxu1  ;;  %v2006_v22 = vmax.f32 %v13401_v4, %v13404_v8  ;;  %v10820_v4 = vld [vmem:[%s11296_s25 + $0x10] sm:$0xff] }
 0x2f0   : > { %v13412_v58 = vadd.f32 %v10818_v26, %v2849_v10  ;;  %v2851_v31 = vpop.f32.mrb[113].mxu1  ;;  %8922 = vmatmul.mubr.msk.f32.gmra.mrb[218].mxu1 %vm613_vm0, %v3803_v24  ;;  %v10821_v24 = vld [vmem:[%s11296_s25 + $0x18] sm:$0xff] }
 0x2f1   : > { %v13416_v7 = vadd.f32 %v10819_v15, %v2851_v31  ;;  %8923 = vmatprep.mubr.msk.f32.mxu1 %vm613_vm0, %v3804_v3  ;;  %2007 = vmax.xlane.f32.xlu1 %v2006_v22  ;;  %v17813_v31 = vld [vmem:[#allocation15_spill] sm:$0xff] }
 0x2f2   : > { %17808 = vst [vmem:[#allocation189_spill] sm:$0xff] %v13412_v58  ;;  %v3806_v15 = vmul.f32 %v12240_v43, %v17813_v31 }
 0x2f3   : > { %17809 = vst [vmem:[#allocation190_spill] sm:$0xff] %v13416_v7  ;;  %v2855_v46 = vpop.f32.mrb[114].mxu1  ;;  %v3040_v8 = vmax.f32 %v13412_v58, %v13416_v7 }
 0x2f4   : > { %v13424_v12 = vadd.f32 %v10820_v4, %v2855_v46  ;;  %v2857_v26 = vpop.f32.mrb[115].mxu1  ;;  %8924 = vmatmul.mubr.msk.f32.gmra.mrb[220].mxu1 %vm613_vm0, %v3804_v3  ;;  %v17815_v3 = vld [vmem:[#allocation78_spill] sm:$0xff] }
 0x2f5   : > { %v13428_v10 = vadd.f32 %v10821_v24, %v2857_v26  ;;  %8925 = vmatprep.mubr.msk.f32.mxu1 %vm613_vm0, %v3805_v45  ;;  %3041 = vmax.xlane.f32.xlu0 %v3040_v8  ;;  %v17817_v26 = vld [vmem:[#allocation18_spill] sm:$0xff] }
 0x2f6   : > { %17811 = vst [vmem:[#allocation191_spill] sm:$0xff] %v13424_v12  ;;  %v3807_v24 = vmul.f32 %v12240_v43, %v17817_v26  ;;  %v17826_v26 = vld [vmem:[#allocation20_spill] sm:$0xff] }
 0x2f7   : > { %17812 = vst [vmem:[#allocation192_spill] sm:$0xff] %v13428_v10  ;;  %v2861_v22 = vpop.f32.mrb[116].mxu1  ;;  %v3043_v62 = vmax.f32 %v13424_v12, %v13428_v10 }
 0x2f8   : > { %v13436_v7 = vadd.f32 %v2861_v22, %v12537_v50  ;;  %v2863_v4 = vpop.f32.mrb[117].mxu1  ;;  %8926 = vmatmul.mubr.msk.f32.gmra.mrb[222].mxu1 %vm613_vm0, %v3805_v45  ;;  %v17819_v45 = vld [vmem:[#allocation86_spill] sm:$0xff] }
 0x2f9   : > { %v13440_v46 = vadd.f32 %v2863_v4, %v17815_v3  ;;  %8927 = vmatprep.mubr.msk.f32.mxu1 %vm613_vm0, %v3806_v15  ;;  %3044 = vmax.xlane.f32.xlu1 %v3043_v62  ;;  %v17821_v4 = vld [vmem:[#allocation17_spill] sm:$0xff] }
 0x2fa   : > { %17814 = vst [vmem:[#allocation15_spill] sm:$0xff] %v13436_v7  ;;  %v3808_v3 = vmul.f32 %v12240_v43, %v17821_v4 }
 0x2fb   : > { %17816 = vst [vmem:[#allocation78_spill] sm:$0xff] %v13440_v46  ;;  %v2867_v8 = vpop.f32.mrb[118].mxu1  ;;  %v3046_v58 = vmax.f32 %v13436_v7, %v13440_v46 }
 0x2fc   : > { %v13448_v10 = vadd.f32 %v2867_v8, %v12594_v42  ;;  %v2869_v50 = vpop.f32.mrb[119].mxu1  ;;  %8928 = vmatmul.mubr.msk.f32.gmra.mrb[224].mxu1 %vm613_vm0, %v3806_v15  ;;  %v17824_v8 = vld [vmem:[#allocation66_spill] sm:$0xff] }
 0x2fd   : > { %v13452_v22 = vadd.f32 %v2869_v50, %v17819_v45  ;;  %8929 = vmatprep.mubr.msk.f32.mxu1 %vm613_vm0, %v3807_v24  ;;  %3047 = vmax.xlane.f32.xlu0 %v3046_v58  ;;  %v17825_v45 = vld [vmem:[#allocation70_spill] sm:$0xff] }
 0x2fe   : > { %17818 = vst [vmem:[#allocation193_spill] sm:$0xff] %v13448_v10 }
 0x2ff   : > { %17820 = vst [vmem:[#allocation86_spill] sm:$0xff] %v13452_v22  ;;  %v2873_v62 = vpop.f32.mrb[120].mxu1  ;;  %v3049_v12 = vmax.f32 %v13448_v10, %v13452_v22  ;;  %v3809_v22 = vmul.f32 %v12240_v43, %v17826_v26 }
 0x300   : > { %v13460_v46 = vadd.f32 %v2873_v62, %v12651_v33  ;;  %v2875_v42 = vpop.f32.mrb[121].mxu1  ;;  %8930 = vmatmul.mubr.msk.f32.gmra.mrb[226].mxu1 %vm613_vm0, %v3807_v24 }
 0x301   : > { %v13464_v15 = vadd.f32 %v2875_v42, %v12660_v47  ;;  %8931 = vmatprep.mubr.msk.f32.mxu1 %vm613_vm0, %v3808_v3  ;;  %3050 = vmax.xlane.f32.xlu1 %v3049_v12 }
 0x302   : > { %17822 = vst [vmem:[#allocation194_spill] sm:$0xff] %v13460_v46  ;;  %v1915_v58 = vpop.xlane.xlu0 %1914 }
 0x303   : > { %17823 = vst [vmem:[#allocation195_spill] sm:$0xff] %v13464_v15  ;;  %v2009_v50 = vsub.f32 %v17824_v8, %v1915_v58  ;;  %v2010_v7 = vsub.f32 %v17825_v45, %v1915_v58  ;;  %v2879_v4 = vpop.f32.mrb[122].mxu1  ;;  %v3052_v33 = vmax.f32 %v13460_v46, %v13464_v15  ;;  %v17829_v8 = vld [vmem:[#allocation19_spill] sm:$0xff]  ;;  %v17830_v15 = vld [vmem:[#allocation73_spill] sm:$0xff] }
 0x304   : > { %v13474_v24 = vadd.f32 %v2879_v4, %v12708_v60  ;;  %v2881_v47 = vpop.f32.mrb[123].mxu1  ;;  %8932 = vmatmul.mubr.msk.f32.gmra.mrb[228].mxu1 %vm613_vm0, %v3808_v3  ;;  %v3810_v45 = vmul.f32 %v12240_v43, %v17829_v8  ;;  %v17831_v60 = vld [vmem:[#allocation77_spill] sm:$0xff] }
 0x305   : > { %v2073_v62 = vmul.f32 1.442695, %v2009_v50  ;;  %v2075_v12 = vmul.f32 1.442695, %v2010_v7  ;;  %v13478_v42 = vadd.f32 %v2881_v47, %v12719_v32  ;;  %8933 = vmatprep.mubr.msk.f32.mxu1 %vm613_vm0, %v3809_v22  ;;  %3053 = vmax.xlane.f32.xlu0 %v3052_v33  ;;  %v17832_v47 = vld [vmem:[#allocation112_spill] sm:$0xff] }
 0x306   : > { %17827 = vst [vmem:[#allocation66_spill] sm:$0xff] %v13474_v24  ;;  %v1918_v58 = vpop.xlane.xlu0 %1917 }
 0x307   : > { %17828 = vst [vmem:[#allocation70_spill] sm:$0xff] %v13478_v42  ;;  %9922 = vpow2.f32 %v2073_v62  ;;  %v2011_v46 = vsub.f32 %v17830_v15, %v1918_v58  ;;  %v2012_v4 = vsub.f32 %v17831_v60, %v1918_v58  ;;  %v2885_v10 = vpop.f32.mrb[124].mxu1  ;;  %v3055_v3 = vmax.f32 %v13474_v24, %v13478_v42  ;;  %v17834_v62 = vld [vmem:[#allocation22_spill] sm:$0xff] }
 0x308   : > { %9924 = vpow2.f32 %v2075_v12  ;;  %v13488_v32 = vadd.f32 %v2885_v10, %v12765_v28  ;;  %v2887_v7 = vpop.f32.mrb[125].mxu1  ;;  %8934 = vmatmul.mubr.msk.f32.gmra.mrb[230].mxu1 %vm613_vm0, %v3809_v22  ;;  %v3811_v58 = vmul.f32 %v12240_v43, %v17834_v62  ;;  %v17835_v12 = vld [vmem:[#allocation82_spill] sm:$0xff]  ;;  %v17836_v28 = vld [vmem:[#allocation85_spill] sm:$0xff] }
 0x309   : > { %v2077_v50 = vmul.f32 1.442695, %v2011_v46  ;;  %v2079_v33 = vmul.f32 1.442695, %v2012_v4  ;;  %v13492_v8 = vadd.f32 %v2887_v7, %v17832_v47  ;;  %8935 = vmatprep.mubr.msk.f32.mxu1 %vm613_vm0, %v3810_v45  ;;  %3056 = vmax.xlane.f32.xlu1 %v3055_v3  ;;  %v17838_v47 = vld [vmem:[#allocation121_spill] sm:$0xff] }
 0x30a   : > { %v1921_v15 = vpop.xlane.xlu1 %1920 }
 0x30b   : > { %17833 = vst [vmem:[#allocation20_spill] sm:$0xff] %v13492_v8  ;;  %9926 = vpow2.f32 %v2077_v50  ;;  %v2013_v60 = vsub.f32 %v17835_v12, %v1921_v15  ;;  %v2014_v10 = vsub.f32 %v17836_v28, %v1921_v15  ;;  %v2891_v42 = vpop.f32.mrb[126].mxu1  ;;  %v3058_v46 = vmax.f32 %v13488_v32, %v13492_v8  ;;  %v17840_v15 = vld [vmem:[#allocation21_spill] sm:$0xff] }
 0x30c   : > { %9928 = vpow2.f32 %v2079_v33  ;;  %v13502_v22 = vadd.f32 %v2891_v42, %v12822_v6  ;;  %v2893_v4 = vpop.f32.mrb[127].mxu1  ;;  %8936 = vmatmul.mubr.msk.f32.gmra.mrb[232].mxu1 %vm613_vm0, %v3810_v45  ;;  %v3812_v12 = vmul.f32 %v12240_v43, %v17840_v15  ;;  %v17841_v33 = vld [vmem:[#allocation91_spill] sm:$0xff]  ;;  %v17842_v6 = vld [vmem:[#allocation94_spill] sm:$0xff] }
 0x30d   : > { %v2081_v3 = vmul.f32 1.442695, %v2013_v60  ;;  %v2083_v7 = vmul.f32 1.442695, %v2014_v10  ;;  %v13506_v24 = vadd.f32 %v2893_v4, %v17838_v47  ;;  %8937 = vmatprep.mubr.msk.f32.mxu1 %vm613_vm0, %v3811_v58  ;;  %3059 = vmax.xlane.f32.xlu0 %v3058_v46 }
 0x30e   : > { %17837 = vst [vmem:[#allocation73_spill] sm:$0xff] %v13502_v22  ;;  %v1924_v50 = vpop.xlane.xlu1 %1923 }
 0x30f   : > { %17839 = vst [vmem:[#allocation77_spill] sm:$0xff] %v13506_v24  ;;  %9930 = vpow2.f32 %v2081_v3  ;;  %v2015_v28 = vsub.f32 %v17841_v33, %v1924_v50  ;;  %v2016_v42 = vsub.f32 %v17842_v6, %v1924_v50  ;;  %v2897_v8 = vpop.f32.mrb[128].mxu1  ;;  %v3061_v45 = vmax.f32 %v13502_v22, %v13506_v24  ;;  %v17844_v6 = vld [vmem:[#allocation102_spill] sm:$0xff]  ;;  %v17846_v22 = vld [vmem:[#allocation25_spill] sm:$0xff] }
 0x310   : > { %9932 = vpow2.f32 %v2083_v7  ;;  %v13516_v60 = vadd.f32 %v2897_v8, %v12879_v36  ;;  %v2899_v10 = vpop.f32.mrb[129].mxu1  ;;  %8938 = vmatmul.mubr.msk.f32.gmra.mrb[234].mxu1 %vm613_vm0, %v3811_v58  ;;  %v3813_v7 = vmul.f32 %v12240_v43, %v12059_v38  ;;  %v17843_v36 = vld [vmem:[#allocation99_spill] sm:$0xff] }
 0x311   : > { %v9923_v46 = vpop.eup %9922  ;;  %v2085_v4 = vmul.f32 1.442695, %v2015_v28  ;;  %v2087_v47 = vmul.f32 1.442695, %v2016_v42  ;;  %v13520_v3 = vadd.f32 %v2899_v10, %v12888_v23  ;;  %8939 = vmatprep.mubr.msk.f32.mxu1 %vm613_vm0, %v3812_v12  ;;  %3062 = vmax.xlane.f32.xlu1 %v3061_v45 }
 0x312   : > { %v9925_v50 = vpop.eup %9924  ;;  %v1927_v33 = vpop.xlane.xlu0 %1926 }
 0x313   : > { %9934 = vpow2.f32 %v2085_v4  ;;  %2393 = vmatprep.mubr.f32.mxu0 %v9925_v50  ;;  %v2017_v8 = vsub.f32 %v17843_v36, %v1927_v33  ;;  %v2018_v58 = vsub.f32 %v17844_v6, %v1927_v33  ;;  %v2903_v24 = vpop.f32.mrb[130].mxu1  ;;  %v3064_v28 = vmax.f32 %v13516_v60, %v13520_v3  ;;  %v17845_v36 = vld [vmem:[#allocation23_spill] sm:$0xff] }
 0x314   : > { %9936 = vpow2.f32 %v2087_v47  ;;  %2394 = vmatmul.mubr.f32.vlgmr.msra.gmra.mrb[48].mxu0 %v9923_v46  ;;  %v13530_v23 = vadd.f32 %v2903_v24, %v12934_v55  ;;  %v2905_v42 = vpop.f32.mrb[131].mxu1  ;;  %8940 = vmatmul.mubr.msk.f32.gmra.mrb[236].mxu1 %vm613_vm0, %v3812_v12  ;;  %v13533_v45 = vadd.f32 %v9925_v50, %v9923_v46  ;;  %v17847_v33 = vpack.c.bf16 %v17845_v36, %v17846_v22  ;;  %v17848_v12 = vld [vmem:[#allocation108_spill] sm:$0xff]  ;;  %v17849_v50 = vld [vmem:[#allocation111_spill] sm:$0xff] }
 0x315   : > { %v9927_v43 = vpop.eup %9926  ;;  %v2089_v10 = vmul.f32 1.442695, %v2017_v8  ;;  %v2091_v4 = vmul.f32 1.442695, %v2018_v58  ;;  %v13539_v6 = vadd.f32 %v2905_v42, %v12943_v41  ;;  %8941 = vmatprep.mubr.msk.f32.mxu1 %vm613_vm0, %v3813_v7  ;;  %3065 = vmax.xlane.f32.xlu0 %v3064_v28  ;;  %v4909_v24 = vmul.f32 %v12245_v11, %v17627_v13 }
 0x316   : > { %9597 = vmatpush1.bf16.msra.mxu0 %v17847_v33  ;;  %v9929_v47 = vpop.eup %9928  ;;  %v1930_v55 = vpop.xlane.xlu1 %1929  ;;  %v17850_v33 = vld [vmem:[#allocation10_spill] sm:$0xff] }
 0x317   : > { %9598 = vmatprep.subr.bf16.mxu0 %v17628_v29  ;;  %9938 = vpow2.f32 %v2089_v10  ;;  %v2019_v46 = vsub.f32 %v17848_v12, %v1930_v55  ;;  %v2020_v8 = vsub.f32 %v17849_v50, %v1930_v55  ;;  %2398 = vmatprep.mubr.f32.mxu0 %v9929_v47  ;;  %v2909_v22 = vpop.f32.mrb[132].mxu1  ;;  %v3067_v41 = vmax.f32 %v13530_v23, %v13539_v6  ;;  %v17851_v55 = vld [vmem:[#allocation7_spill] sm:$0xff] }
 0x318   : > { %9940 = vpow2.f32 %v2091_v4  ;;  %2399 = vmatmul.mubr.f32.gmra.mrb[50].mxu0 %v9927_v43  ;;  %v13550_v58 = vadd.f32 %v2909_v22, %v12986_v20  ;;  %v2911_v28 = vpop.f32.mrb[133].mxu1  ;;  %8942 = vmatmul.mubr.msk.f32.gmra.mrb[238].mxu1 %vm613_vm0, %v3813_v7  ;;  %v13553_v42 = vadd.f32 %v9929_v47, %v9927_v43  ;;  %v17852_v12 = vpack.c.bf16 %v17850_v33, %v17851_v55  ;;  %v17853_v43 = vld [vmem:[#allocation117_spill] sm:$0xff] }
 0x319   : > { %v9931_v13 = vpop.eup %9930  ;;  %v2093_v10 = vmul.f32 1.442695, %v2019_v46  ;;  %v2095_v36 = vmul.f32 1.442695, %v2020_v8  ;;  %v13559_v50 = vadd.f32 %v2911_v28, %v12997_v52  ;;  %8975 = vmatprep.mubr.msk.f32.mxu1 %vm613_vm0, %v4909_v24  ;;  %3068 = vmax.xlane.f32.xlu1 %v3067_v41  ;;  %v4910_v7 = vmul.f32 %v12245_v11, %v11774_v16  ;;  %v17854_v46 = vld [vmem:[#allocation120_spill] sm:$0xff] }
 0x31a   : > { %9600 = vmatpush1.bf16.msra.mxu0 %v17852_v12  ;;  %v9933_v4 = vpop.eup %9932  ;;  %v1933_v20 = vpop.xlane.xlu0 %1932  ;;  %v17855_v12 = vld [vmem:[#allocation44_spill] sm:$0xff] }
 0x31b   : > { %9601 = vmatprep.subr.bf16.mxu0 %v17628_v29  ;;  %9942 = vpow2.f32 %v2093_v10  ;;  %v2021_v47 = vsub.f32 %v17853_v43, %v1933_v20  ;;  %v2022_v8 = vsub.f32 %v17854_v46, %v1933_v20  ;;  %2403 = vmatprep.mubr.f32.mxu0 %v9933_v4  ;;  %v2915_v22 = vpop.f32.mrb[134].mxu1  ;;  %v3070_v52 = vmax.f32 %v13550_v58, %v13559_v50  ;;  %v17856_v20 = vld [vmem:[#allocation43_spill] sm:$0xff] }
 0x31c   : > { %9944 = vpow2.f32 %v2095_v36  ;;  %2404 = vmatmul.mubr.f32.gmra.mrb[52].mxu0 %v9931_v13  ;;  %v13570_v41 = vadd.f32 %v2915_v22, %v13030_v1  ;;  %v2917_v28 = vpop.f32.mrb[135].mxu1  ;;  %8976 = vmatmul.mubr.msk.f32.vlgmr.msra.gmra.mrb[240].mxu1 %vm613_vm0, %v4909_v24  ;;  %v13573_v33 = vadd.f32 %v9933_v4, %v9931_v13  ;;  %v17857_v43 = vpack.c.bf16 %v17855_v12, %v17856_v20 }
 0x31d   : > { %v9935_v16 = vpop.eup %9934  ;;  %v2097_v10 = vmul.f32 1.442695, %v2021_v47  ;;  %v2099_v55 = vmul.f32 1.442695, %v2022_v8  ;;  %v13579_v46 = vadd.f32 %v2917_v28, %v13035_v48  ;;  %8977 = vmatprep.mubr.msk.f32.mxu1 %vm613_vm0, %v4910_v7  ;;  %3071 = vmax.xlane.f32.xlu0 %v3070_v52  ;;  %v4911_v24 = vmul.f32 %v12245_v11, %v11781_v18 }
 0x31e   : > { %9603 = vmatpush1.bf16.msra.mxu0 %v17857_v43  ;;  %v9937_v36 = vpop.eup %9936 }
 0x31f   : > { %v1936_v1 = vpop.xlane.xlu1 %1935  ;;  %9604 = vmatprep.subr.bf16.mxu0 %v17628_v29  ;;  %9946 = vpow2.f32 %v2097_v10  ;;  %2408 = vmatprep.mubr.f32.mxu0 %v9937_v36  ;;  %v2921_v47 = vpop.f32.mrb[136].mxu1  ;;  %v3073_v48 = vmax.f32 %v13570_v41, %v13579_v46  ;;  %v13593_v52 = vadd.f32 %v9937_v36, %v9935_v16  ;;  %v17859_v10 = vld [vmem:[#allocation50_spill] sm:$0xff] }
 0x320   : > { %v2023_v13 = vsub.f32 %v12861_v57, %v1936_v1  ;;  %v2024_v4 = vsub.f32 %v12876_v34, %v1936_v1  ;;  %9948 = vpow2.f32 %v2099_v55  ;;  %2409 = vmatmul.mubr.f32.gmra.mrb[54].mxu0 %v9935_v16  ;;  %v13590_v8 = vadd.f32 %v2921_v47, %v13070_v61  ;;  %v2923_v22 = vpop.f32.mrb[137].mxu1  ;;  %8978 = vmatmul.mubr.msk.f32.gmra.mrb[242].mxu1 %vm613_vm0, %v4910_v7  ;;  %v17860_v34 = vld [vmem:[#allocation49_spill] sm:$0xff] }
 0x321   : > { %17858 = vst [vmem:[#allocation112_spill] sm:$0xff] %v13593_v52  ;;  %v9939_v18 = vpop.eup %9938  ;;  %v17861_v12 = vpack.c.bf16 %v17859_v10, %v17860_v34  ;;  %v13599_v20 = vadd.f32 %v2923_v22, %v13079_v39  ;;  %8979 = vmatprep.mubr.msk.f32.mxu1 %vm613_vm0, %v4911_v24  ;;  %3074 = vmax.xlane.f32.xlu1 %v3073_v48  ;;  %v17863_v48 = vld [vmem:[#allocation56_spill] sm:$0xff] }
 0x322   : > { %v2101_v28 = vmul.f32 1.442695, %v2023_v13  ;;  %v2103_v57 = vmul.f32 1.442695, %v2024_v4  ;;  %v9941_v55 = vpop.eup %9940  ;;  %v1939_v61 = vpop.xlane.xlu0 %1938  ;;  %v4912_v7 = vmul.f32 %v12245_v11, %v11801_v14 }
 0x323   : > { %9606 = vmatpush1.bf16.msra.mxu0 %v17861_v12  ;;  %v2025_v16 = vsub.f32 %v12918_v2, %v1939_v61  ;;  %v2026_v43 = vsub.f32 %v12931_v0, %v1939_v61  ;;  %2413 = vmatprep.mubr.f32.mxu0 %v9941_v55  ;;  %v2927_v36 = vpop.f32.mrb[138].mxu1  ;;  %v3076_v39 = vmax.f32 %v13590_v8, %v13599_v20  ;;  %v17864_v0 = vld [vmem:[#allocation55_spill] sm:$0xff] }
 0x324   : > { %9607 = vmatprep.subr.bf16.mxu0 %v17628_v29  ;;  %9950 = vpow2.f32 %v2101_v28  ;;  %2414 = vmatmul.mubr.f32.gmra.mrb[56].mxu0 %v9939_v18  ;;  %v13610_v1 = vadd.f32 %v2927_v36, %v13096_v49  ;;  %v2929_v13 = vpop.f32.mrb[139].mxu1  ;;  %v13613_v4 = vadd.f32 %v9941_v55, %v9939_v18  ;;  %v17865_v22 = vpack.c.bf16 %v17863_v48, %v17864_v0 }
 0x325   : > { %9952 = vpow2.f32 %v2103_v57  ;;  %8980 = vmatmul.mubr.msk.f32.gmra.mrb[244].mxu1 %vm613_vm0, %v4911_v24  ;;  %v9943_v14 = vpop.eup %9942  ;;  %v2105_v47 = vmul.f32 1.442695, %v2025_v16  ;;  %v2107_v2 = vmul.f32 1.442695, %v2026_v43  ;;  %v13619_v28 = vadd.f32 %v2929_v13, %v13099_v27  ;;  %3077 = vmax.xlane.f32.xlu0 %v3076_v39  ;;  %v17867_v43 = vld [vmem:[#allocation62_spill] sm:$0xff] }
 0x326   : > { %17862 = vst [vmem:[#allocation22_spill] sm:$0xff] %v13613_v4  ;;  %8981 = vmatprep.mubr.msk.f32.mxu1 %vm613_vm0, %v4912_v7  ;;  %v9945_v57 = vpop.eup %9944  ;;  %v1942_v49 = vpop.xlane.xlu1 %1941  ;;  %v4913_v24 = vmul.f32 %v12245_v11, %v11810_v17 }
 0x327   : > { %9609 = vmatpush1.bf16.msra.mxu0 %v17865_v22  ;;  %9954 = vpow2.f32 %v2105_v47  ;;  %v2027_v18 = vsub.f32 %v12969_v44, %v1942_v49  ;;  %v2028_v10 = vsub.f32 %v12983_v30, %v1942_v49  ;;  %2418 = vmatprep.mubr.f32.mxu0 %v9945_v57  ;;  %v2933_v34 = vpop.f32.mrb[140].mxu1  ;;  %v3079_v27 = vmax.f32 %v13610_v1, %v13619_v28  ;;  %v17868_v30 = vld [vmem:[#allocation61_spill] sm:$0xff]  ;;  %v17871_v49 = vld [vmem:[#allocation68_spill] sm:$0xff] }
 0x328   : > { %9610 = vmatprep.subr.bf16.mxu0 %v17628_v29  ;;  %9956 = vpow2.f32 %v2107_v2  ;;  %2419 = vmatmul.mubr.f32.gmra.mrb[58].mxu0 %v9943_v14  ;;  %v13630_v12 = vadd.f32 %v2933_v34, %v13116_v19  ;;  %v2935_v55 = vpop.f32.mrb[141].mxu1  ;;  %v13633_v61 = vadd.f32 %v9945_v57, %v9943_v14  ;;  %v17869_v36 = vpack.c.bf16 %v17867_v43, %v17868_v30 }
 0x329   : > { %8982 = vmatmul.mubr.msk.f32.gmra.mrb[246].mxu1 %vm613_vm0, %v4912_v7  ;;  %v9947_v17 = vpop.eup %9946  ;;  %v2109_v16 = vmul.f32 1.442695, %v2027_v18  ;;  %v2111_v44 = vmul.f32 1.442695, %v2028_v10  ;;  %v13639_v39 = vadd.f32 %v2935_v55, %v13123_v63  ;;  %3080 = vmax.xlane.f32.xlu1 %v3079_v27  ;;  %v4914_v7 = vmul.f32 %v12245_v11, %v11829_v21  ;;  %v17875_v55 = vld [vmem:[#allocation148_spill] sm:$0xff] }
 0x32a   : > { %17866 = vst [vmem:[#allocation82_spill] sm:$0xff] %v13633_v61  ;;  %8983 = vmatprep.mubr.msk.f32.mxu1 %vm613_vm0, %v4913_v24  ;;  %v9949_v13 = vpop.eup %9948  ;;  %v1945_v19 = vpop.xlane.xlu0 %1944 }
 0x32b   : > { %9612 = vmatpush1.bf16.msra.mxu0 %v17869_v36  ;;  %9958 = vpow2.f32 %v2109_v16  ;;  %v2029_v14 = vsub.f32 %v13015_v56, %v1945_v19  ;;  %v2030_v47 = vsub.f32 %v13027_v35, %v1945_v19  ;;  %2423 = vmatprep.mubr.f32.mxu0 %v9949_v13  ;;  %v2939_v2 = vpop.f32.mrb[142].mxu1  ;;  %v3082_v63 = vmax.f32 %v13630_v12, %v13639_v39  ;;  %v17872_v35 = vld [vmem:[#allocation67_spill] sm:$0xff]  ;;  %v17876_v16 = vld [vmem:[#allocation150_spill] sm:$0xff] }
 0x32c   : > { %9613 = vmatprep.subr.bf16.mxu0 %v17628_v29  ;;  %9960 = vpow2.f32 %v2111_v44  ;;  %2424 = vmatmul.mubr.f32.gmra.mrb[60].mxu0 %v9947_v17  ;;  %v13650_v48 = vadd.f32 %v2939_v2, %v13138_v59  ;;  %v2941_v0 = vpop.f32.mrb[143].mxu1  ;;  %v13653_v22 = vadd.f32 %v9949_v13, %v9947_v17  ;;  %v17873_v18 = vpack.c.bf16 %v17871_v49, %v17872_v35  ;;  %v17878_v2 = vld [vmem:[#allocation75_spill] sm:$0xff]  ;;  %v17882_v35 = vld [vmem:[#allocation152_spill] sm:$0xff] }
 0x32d   : > { %8984 = vmatmul.mubr.msk.f32.gmra.mrb[248].mxu1 %vm613_vm0, %v4913_v24  ;;  %v2113_v57 = vmul.f32 1.442695, %v2029_v14  ;;  %v2115_v56 = vmul.f32 1.442695, %v2030_v47  ;;  %v13659_v10 = vadd.f32 %v2941_v0, %v13141_v9  ;;  %3083 = vmax.xlane.f32.xlu0 %v3082_v63  ;;  %v17874_v24 = vld [vmem:[#allocation37_spill] sm:$0xff]  ;;  %v17879_v63 = vld [vmem:[#allocation74_spill] sm:$0xff] }
 0x32e   : > { %17870 = vst [vmem:[#allocation85_spill] sm:$0xff] %v13653_v22  ;;  %v9951_v21 = vpop.eup %9950  ;;  %8985 = vmatprep.mubr.msk.f32.mxu1 %vm613_vm0, %v4914_v7  ;;  %v1948_v59 = vpop.xlane.xlu1 %1947  ;;  %v4915_v27 = vmul.f32 %v12245_v11, %v17874_v24  ;;  %v17880_v0 = vpack.c.bf16 %v17878_v2, %v17879_v63  ;;  %v17889_v2 = vld [vmem:[#allocation153_spill] sm:$0xff]  ;;  %v17925_v22 = vld [vmem:[#allocation126_spill] sm:$0xff] }
 0x32f   : > { %9615 = vmatpush1.bf16.msra.mxu0 %v17873_v18  ;;  %v9953_v34 = vpop.eup %9952  ;;  %9962 = vpow2.f32 %v2113_v57  ;;  %v2031_v17 = vsub.f32 %v17875_v55, %v1948_v59  ;;  %v2032_v44 = vsub.f32 %v17876_v16, %v1948_v59  ;;  %v2945_v43 = vpop.f32.mrb[144].mxu1  ;;  %v3085_v9 = vmax.f32 %v13650_v48, %v13659_v10 }
 0x330   : > { %9616 = vmatprep.subr.bf16.mxu0 %v17628_v29  ;;  %2428 = vmatprep.mubr.f32.mxu0 %v9953_v34  ;;  %9964 = vpow2.f32 %v2115_v56  ;;  %v13670_v30 = vadd.f32 %v2945_v43, %v13156_v54  ;;  %v2947_v36 = vpop.f32.mrb[145].mxu1  ;;  %v13673_v13 = vadd.f32 %v9953_v34, %v9951_v21  ;;  %v17885_v43 = vld [vmem:[#allocation83_spill] sm:$0xff] }
 0x331   : > { %2429 = vmatmul.mubr.f32.gmra.mrb[62].mxu0 %v9951_v21  ;;  %8986 = vmatmul.mubr.msk.f32.gmra.mrb[250].mxu1 %vm613_vm0, %v4914_v7  ;;  %v9955_v19 = vpop.eup %9954  ;;  %v2117_v14 = vmul.f32 1.442695, %v2031_v17  ;;  %v2119_v47 = vmul.f32 1.442695, %v2032_v44  ;;  %v13679_v57 = vadd.f32 %v2947_v36, %v13165_v37  ;;  %v4916_v7 = vmul.f32 %v12245_v11, %v11857_v25  ;;  %v17881_v21 = vld [vmem:[#allocation151_spill] sm:$0xff]  ;;  %v17884_v44 = vld [vmem:[#allocation84_spill] sm:$0xff] }
 0x332   : > { %17877 = vst [vmem:[#allocation121_spill] sm:$0xff] %v13673_v13  ;;  %8987 = vmatprep.mubr.msk.f32.mxu1 %vm613_vm0, %v4915_v27  ;;  %v9957_v56 = vpop.eup %9956  ;;  %3086 = vmax.xlane.f32.xlu1 %v3085_v9  ;;  %v1951_v54 = vpop.xlane.xlu0 %1950  ;;  %v17886_v9 = vpack.c.bf16 %v17884_v44, %v17885_v43  ;;  %v17887_v36 = vld [vmem:[#allocation161_spill] sm:$0xff]  ;;  %v17893_v44 = vld [vmem:[#allocation92_spill] sm:$0xff] }
 0x333   : > { %9618 = vmatpush1.bf16.msra.mxu0 %v17880_v0  ;;  %9966 = vpow2.f32 %v2117_v14  ;;  %v2033_v49 = vsub.f32 %v17881_v21, %v1951_v54  ;;  %v2034_v18 = vsub.f32 %v17882_v35, %v1951_v54  ;;  %2433 = vmatprep.mubr.f32.mxu0 %v9957_v56  ;;  %v2951_v34 = vpop.f32.mrb[146].mxu1  ;;  %v3088_v37 = vmax.f32 %v13670_v30, %v13679_v57  ;;  %v17890_v0 = vld [vmem:[#allocation154_spill] sm:$0xff]  ;;  %v10824_v13 = vld [vmem:[%s11296_s25 + $0x158] sm:$0xff] }
 0x334   : > { %9619 = vmatprep.subr.bf16.mxu0 %v17628_v29  ;;  %9968 = vpow2.f32 %v2119_v47  ;;  %v13690_v59 = vadd.f32 %v2951_v34, %v13180_v51  ;;  %v2953_v24 = vpop.f32.mrb[147].mxu1  ;;  %v13693_v55 = vadd.f32 %v9957_v56, %v9955_v19 }
 0x335   : > { %2434 = vmatmul.mubr.f32.gmra.mrb[64].mxu0 %v9955_v19  ;;  %8988 = vmatmul.mubr.msk.f32.gmra.mrb[252].mxu1 %vm613_vm0, %v4915_v27  ;;  %v9959_v25 = vpop.eup %9958  ;;  %v2121_v17 = vmul.f32 1.442695, %v2033_v49  ;;  %v2123_v16 = vmul.f32 1.442695, %v2034_v18  ;;  %v13699_v14 = vadd.f32 %v2953_v24, %v17887_v36  ;;  %v17888_v27 = vld [vmem:[#allocation38_spill] sm:$0xff] }
 0x336   : > { %17883 = vst [vmem:[#allocation21_spill] sm:$0xff] %v13693_v55  ;;  %8989 = vmatprep.mubr.msk.f32.mxu1 %vm613_vm0, %v4916_v7  ;;  %v9961_v47 = vpop.eup %9960  ;;  %3089 = vmax.xlane.f32.xlu0 %v3088_v37  ;;  %v1954_v51 = vpop.xlane.xlu1 %1953  ;;  %v4917_v19 = vmul.f32 %v12245_v11, %v17888_v27 }
 0x337   : > { %9621 = vmatpush1.bf16.msra.mxu0 %v17886_v9  ;;  %9970 = vpow2.f32 %v2121_v17  ;;  %v2035_v63 = vsub.f32 %v17889_v2, %v1954_v51  ;;  %v2036_v56 = vsub.f32 %v17890_v0, %v1954_v51  ;;  %2438 = vmatprep.mubr.f32.mxu0 %v9961_v47  ;;  %v2957_v54 = vpop.f32.mrb[148].mxu1  ;;  %v3091_v21 = vmax.f32 %v13690_v59, %v13699_v14  ;;  %v17892_v17 = vld [vmem:[#allocation93_spill] sm:$0xff]  ;;  %v17895_v9 = vld [vmem:[#allocation164_spill] sm:$0xff]  ;;  %v17898_v2 = vld [vmem:[#allocation155_spill] sm:$0xff] }
 0x338   : > { %9622 = vmatprep.subr.bf16.mxu0 %v17628_v29  ;;  %9972 = vpow2.f32 %v2123_v16  ;;  %v13710_v49 = vadd.f32 %v2957_v54, %v13201_v53  ;;  %v2959_v35 = vpop.f32.mrb[149].mxu1  ;;  %v13713_v18 = vadd.f32 %v9961_v47, %v9959_v25  ;;  %v17894_v43 = vpack.c.bf16 %v17892_v17, %v17893_v44  ;;  %v17899_v0 = vld [vmem:[#allocation156_spill] sm:$0xff]  ;;  %v17900_v54 = vld [vmem:[#allocation167_spill] sm:$0xff]  ;;  %v17901_v17 = vld [vmem:[#allocation101_spill] sm:$0xff] }
 0x339   : > { %2439 = vmatmul.mubr.f32.gmra.mrb[66].mxu0 %v9959_v25  ;;  %8990 = vmatmul.mubr.msk.f32.gmra.mrb[254].mxu1 %vm613_vm0, %v4916_v7  ;;  %v9963_v34 = vpop.eup %9962  ;;  %v2125_v37 = vmul.f32 1.442695, %v2035_v63  ;;  %v2127_v24 = vmul.f32 1.442695, %v2036_v56  ;;  %v13719_v36 = vadd.f32 %v2959_v35, %v17895_v9  ;;  %v17896_v25 = vld [vmem:[#allocation6_spill] sm:$0xff]  ;;  %v17902_v44 = vld [vmem:[#allocation100_spill] sm:$0xff] }
 0x33a   : > { %17891 = vst [vmem:[#allocation91_spill] sm:$0xff] %v13713_v18  ;;  %8991 = vmatprep.mubr.msk.f32.mxu1 %vm613_vm0, %v4917_v19  ;;  %v9965_v16 = vpop.eup %9964  ;;  %3092 = vmax.xlane.f32.xlu1 %v3091_v21  ;;  %v4918_v47 = vmul.f32 %v12245_v11, %v17896_v25  ;;  %v17904_v9 = vld [vmem:[#allocation168_spill] sm:$0xff]  ;;  %v10822_v18 = vld [vmem:[%s11296_s25 + $0x148] sm:$0xff] }
 0x33b   : > { %9624 = vmatpush1.bf16.msra.mxu0 %v17894_v43  ;;  %9974 = vpow2.f32 %v2125_v37  ;;  %2443 = vmatprep.mubr.f32.mxu0 %v9965_v16  ;;  %v1957_v53 = vpop.xlane.xlu0 %1956  ;;  %v2963_v7 = vpop.f32.mrb[150].mxu1  ;;  %v3094_v51 = vmax.f32 %v13710_v49, %v13719_v36  ;;  %v13727_v27 = vadd.f32 %v9965_v16, %v9963_v34  ;;  %v17903_v43 = vpack.c.bf16 %v17901_v17, %v17902_v44 }
 0x33c   : > { %9625 = vmatprep.subr.bf16.mxu0 %v17628_v29  ;;  %9976 = vpow2.f32 %v2127_v24  ;;  %v2037_v63 = vsub.f32 %v17898_v2, %v1957_v53  ;;  %v2038_v56 = vsub.f32 %v17899_v0, %v1957_v53  ;;  %v13732_v21 = vadd.f32 %v2963_v7, %v17900_v54  ;;  %v2965_v35 = vpop.f32.mrb[151].mxu1  ;;  %v17905_v7 = vld [vmem:[#allocation24_spill] sm:$0xff]  ;;  %v17906_v2 = vld [vmem:[#allocation157_spill] sm:$0xff]  ;;  %v17907_v54 = vld [vmem:[#allocation158_spill] sm:$0xff] }
 0x33d   : > { %17897 = vst [vmem:[#allocation94_spill] sm:$0xff] %v13727_v27  ;;  %2444 = vmatmul.mubr.f32.gmra.mrb[68].mxu0 %v9963_v34  ;;  %8992 = vmatmul.mubr.msk.f32.gmra.mrb[0].mxu1 %vm613_vm0, %v4917_v19  ;;  %v9967_v37 = vpop.eup %9966  ;;  %v13739_v16 = vadd.f32 %v2965_v35, %v17904_v9  ;;  %v4919_v19 = vmul.f32 %v12245_v11, %v17905_v7  ;;  %v17910_v27 = vld [vmem:[#allocation110_spill] sm:$0xff] }
 0x33e   : > { %8993 = vmatprep.mubr.msk.f32.mxu1 %vm613_vm0, %v4918_v47  ;;  %v9969_v24 = vpop.eup %9968  ;;  %v2129_v25 = vmul.f32 1.442695, %v2037_v63  ;;  %v2131_v53 = vmul.f32 1.442695, %v2038_v56  ;;  %3095 = vmax.xlane.f32.xlu0 %v3094_v51  ;;  %v1960_v34 = vpop.xlane.xlu1 %1959  ;;  %v17909_v51 = vld [vmem:[#allocation171_spill] sm:$0xff] }
 0x33f   : > { %9627 = vmatpush1.bf16.msra.mxu0 %v17903_v43  ;;  %2448 = vmatprep.mubr.f32.mxu0 %v9969_v24  ;;  %v2039_v0 = vsub.f32 %v17906_v2, %v1960_v34  ;;  %v2040_v17 = vsub.f32 %v17907_v54, %v1960_v34  ;;  %v2969_v35 = vpop.f32.mrb[152].mxu1  ;;  %v3097_v44 = vmax.f32 %v13732_v21, %v13739_v16  ;;  %v17911_v34 = vld [vmem:[#allocation109_spill] sm:$0xff] }
 0x340   : > { %9628 = vmatprep.subr.bf16.mxu0 %v17628_v29  ;;  %v13749_v43 = vadd.f32 %v9969_v24, %v9967_v37  ;;  %9978 = vpow2.f32 %v2129_v25  ;;  %v13752_v63 = vadd.f32 %v2969_v35, %v17909_v51  ;;  %v2971_v56 = vpop.f32.mrb[153].mxu1  ;;  %v17912_v54 = vpack.c.bf16 %v17910_v27, %v17911_v34  ;;  %v17913_v25 = vld [vmem:[#allocation27_spill] sm:$0xff]  ;;  %v17916_v35 = vld [vmem:[#allocation160_spill] sm:$0xff] }
 0x341   : > { %2449 = vmatmul.mubr.f32.gmra.mrb[70].mxu0 %v9967_v37  ;;  %8994 = vmatmul.mubr.msk.f32.gmra.mrb[2].mxu1 %vm613_vm0, %v4918_v47  ;;  %v9971_v9 = vpop.eup %9970  ;;  %9980 = vpow2.f32 %v2131_v53  ;;  %v2133_v7 = vmul.f32 1.442695, %v2039_v0  ;;  %v2135_v2 = vmul.f32 1.442695, %v2040_v17  ;;  %v13759_v55 = vadd.f32 %v10822_v18, %v2971_v56  ;;  %v17915_v0 = vld [vmem:[#allocation159_spill] sm:$0xff]  ;;  %v10823_v51 = vld [vmem:[%s11296_s25 + $0x150] sm:$0xff] }
 0x342   : > { %17908 = vst [vmem:[#allocation99_spill] sm:$0xff] %v13749_v43  ;;  %8995 = vmatprep.mubr.msk.f32.mxu1 %vm613_vm0, %v4919_v19  ;;  %v9973_v37 = vpop.eup %9972  ;;  %3098 = vmax.xlane.f32.xlu1 %v3097_v44  ;;  %v4920_v53 = vmul.f32 %v12245_v11, %v17913_v25  ;;  %v17918_v25 = vld [vmem:[#allocation118_spill] sm:$0xff] }
 0x343   : > { %9630 = vmatpush1.bf16.msra.mxu0 %v17912_v54  ;;  %9982 = vpow2.f32 %v2133_v7  ;;  %2453 = vmatprep.mubr.f32.mxu0 %v9973_v37  ;;  %v1963_v47 = vpop.xlane.xlu0 %1962  ;;  %v2975_v24 = vpop.f32.mrb[154].mxu1  ;;  %v3100_v27 = vmax.f32 %v13752_v63, %v13759_v55  ;;  %v13767_v18 = vadd.f32 %v9973_v37, %v9971_v9  ;;  %v17917_v54 = vld [vmem:[#allocation119_spill] sm:$0xff] }
 0x344   : > { %9631 = vmatprep.subr.bf16.mxu0 %v17628_v29  ;;  %9984 = vpow2.f32 %v2135_v2  ;;  %v2041_v17 = vsub.f32 %v17915_v0, %v1963_v47  ;;  %v2042_v44 = vsub.f32 %v17916_v35, %v1963_v47  ;;  %v13772_v56 = vadd.f32 %v10823_v51, %v2975_v24  ;;  %v2977_v7 = vpop.f32.mrb[155].mxu1  ;;  %v17920_v0 = vld [vmem:[#allocation26_spill] sm:$0xff]  ;;  %v17922_v51 = vld [vmem:[#allocation163_spill] sm:$0xff] }
 0x345   : > { %17914 = vst [vmem:[#allocation102_spill] sm:$0xff] %v13767_v18  ;;  %2454 = vmatmul.mubr.f32.gmra.mrb[72].mxu0 %v9971_v9  ;;  %8996 = vmatmul.mubr.msk.f32.gmra.mrb[4].mxu1 %vm613_vm0, %v4919_v19  ;;  %v9975_v34 = vpop.eup %9974  ;;  %v17919_v43 = vpack.c.bf16 %v17917_v54, %v17918_v25  ;;  %v13779_v37 = vadd.f32 %v10824_v13, %v2977_v7  ;;  %v17921_v35 = vld [vmem:[#allocation162_spill] sm:$0xff] }
 0x346   : > { %8997 = vmatprep.mubr.msk.f32.mxu1 %vm613_vm0, %v4920_v53  ;;  %v9977_v2 = vpop.eup %9976  ;;  %v2137_v47 = vmul.f32 1.442695, %v2041_v17  ;;  %v2139_v9 = vmul.f32 1.442695, %v2042_v44  ;;  %3101 = vmax.xlane.f32.xlu0 %v3100_v27  ;;  %v1966_v24 = vpop.xlane.xlu1 %1965  ;;  %v4921_v19 = vmul.f32 %v12245_v11, %v17920_v0  ;;  %v10825_v27 = vld [vmem:[%s11296_s25 + $0x160] sm:$0xff] }
 0x347   : > { %9633 = vmatpush1.bf16.msra.mxu0 %v17919_v43  ;;  %2458 = vmatprep.mubr.f32.mxu0 %v9977_v2  ;;  %v2043_v43 = vsub.f32 %v17921_v35, %v1966_v24  ;;  %v2044_v13 = vsub.f32 %v17922_v51, %v1966_v24  ;;  %v2981_v7 = vpop.f32.mrb[156].mxu1  ;;  %v3103_v54 = vmax.f32 %v13772_v56, %v13779_v37  ;;  %v17924_v35 = vld [vmem:[#allocation127_spill] sm:$0xff] }
 0x348   : > { %9634 = vmatprep.subr.bf16.mxu0 %v17628_v29  ;;  %v13789_v25 = vadd.f32 %v9977_v2, %v9975_v34  ;;  %9986 = vpow2.f32 %v2137_v47  ;;  %v13792_v17 = vadd.f32 %v10825_v27, %v2981_v7  ;;  %v2983_v44 = vpop.f32.mrb[157].mxu1  ;;  %v17926_v24 = vpack.c.bf16 %v17924_v35, %v17925_v22  ;;  %v10826_v51 = vld [vmem:[%s11296_s25 + $0x168] sm:$0xff]  ;;  %v17930_v27 = vld [vmem:[#allocation166_spill] sm:$0xff] }
 0x349   : > { %2459 = vmatmul.mubr.f32.gmra.mrb[74].mxu0 %v9975_v34  ;;  %8998 = vmatmul.mubr.msk.f32.gmra.mrb[6].mxu1 %vm613_vm0, %v4920_v53  ;;  %9988 = vpow2.f32 %v2139_v9  ;;  %v2141_v0 = vmul.f32 1.442695, %v2043_v43  ;;  %v2143_v18 = vmul.f32 1.442695, %v2044_v13  ;;  %v13799_v61 = vadd.f32 %v10826_v51, %v2983_v44  ;;  %v17928_v9 = vld [vmem:[#allocation29_spill] sm:$0xff] }
 0x34a   : > { %17923 = vst [vmem:[#allocation23_spill] sm:$0xff] %v13789_v25  ;;  %8999 = vmatprep.mubr.msk.f32.mxu1 %vm613_vm0, %v4921_v19  ;;  %v9979_v34 = vpop.eup %9978  ;;  %3104 = vmax.xlane.f32.xlu1 %v3103_v54  ;;  %v4922_v43 = vmul.f32 %v12245_v11, %v17928_v9  ;;  %v17929_v13 = vld [vmem:[#allocation165_spill] sm:$0xff]  ;;  %v10827_v54 = vld [vmem:[%s11296_s25 + $0x170] sm:$0xff] }
 0x34b   : > { %9636 = vmatpush1.bf16.msra.mxu0 %v17926_v24  ;;  %17927 = vst [vmem:[#allocation25_spill] sm:$0xff] %v13799_v61  ;;  %v9981_v2 = vpop.eup %9980  ;;  %9990 = vpow2.f32 %v2141_v0  ;;  %v1969_v53 = vpop.xlane.xlu0 %1968  ;;  %v3106_v22 = vmax.f32 %v13792_v17, %v13799_v61  ;;  %v10828_v51 = vld [vmem:[%s11296_s25 + $0x178] sm:$0xff]  ;;  %v17938_v61 = vld [vmem:[#allocation170_spill] sm:$0xff] }
 0x34c   : > { %9637 = vmatprep.subr.bf16.mxu0 %v17628_v29  ;;  %v2987_v47 = vpop.f32.mrb[158].mxu1  ;;  %9992 = vpow2.f32 %v2143_v18  ;;  %2463 = vmatprep.mubr.f32.mxu0 %v9981_v2  ;;  %v2045_v7 = vsub.f32 %v17929_v13, %v1969_v53  ;;  %v2046_v44 = vsub.f32 %v17930_v27, %v1969_v53  ;;  %v13817_v18 = vadd.f32 %v9981_v2, %v9979_v34  ;;  %v17933_v53 = vld [vmem:[#allocation133_spill] sm:$0xff]  ;;  %v17934_v27 = vld [vmem:[#allocation132_spill] sm:$0xff] }
 0x34d   : > { %v13810_v35 = vadd.f32 %v10827_v54, %v2987_v47  ;;  %v2989_v24 = vpop.f32.mrb[159].mxu1  ;;  %9000 = vmatmul.mubr.msk.f32.gmra.mrb[8].mxu1 %vm613_vm0, %v4921_v19  ;;  %v9983_v0 = vpop.eup %9982  ;;  %2464 = vmatmul.mubr.f32.gmra.mrb[76].mxu0 %v9979_v34  ;;  %v17935_v47 = vpack.c.bf16 %v17933_v53, %v17934_v27  ;;  %v17936_v19 = vld [vmem:[#allocation28_spill] sm:$0xff] }
 0x34e   : > { %v13814_v25 = vadd.f32 %v10828_v51, %v2989_v24  ;;  %9001 = vmatprep.mubr.msk.f32.mxu1 %vm613_vm0, %v4922_v43  ;;  %17932 = vst [vmem:[#allocation111_spill] sm:$0xff] %v13817_v18  ;;  %v9985_v9 = vpop.eup %9984  ;;  %v2145_v13 = vmul.f32 1.442695, %v2045_v7  ;;  %v2147_v4 = vmul.f32 1.442695, %v2046_v44  ;;  %3107 = vmax.xlane.f32.xlu0 %v3106_v22  ;;  %v1972_v54 = vpop.xlane.xlu1 %1971  ;;  %v4923_v52 = vmul.f32 %v12245_v11, %v17936_v19  ;;  %v17937_v24 = vld [vmem:[#allocation169_spill] sm:$0xff] }
 0x34f   : > { %9639 = vmatpush1.bf16.msra.mxu0 %v17935_v47  ;;  %v2047_v51 = vsub.f32 %v17937_v24, %v1972_v54  ;;  %v2048_v34 = vsub.f32 %v17938_v61, %v1972_v54  ;;  %2468 = vmatprep.mubr.f32.mxu0 %v9985_v9  ;;  %v2993_v2 = vpop.f32.mrb[160].mxu1  ;;  %v10829_v44 = vld [vmem:[%s11296_s25 + $0x180] sm:$0xff]  ;;  %v13833_v27 = vadd.f32 %v9985_v9, %v9983_v0  ;;  %v10830_v24 = vld [vmem:[%s11296_s25 + $0x188] sm:$0xff] }
 0x350   : > { %17931 = vst [vmem:[#allocation108_spill] sm:$0xff] %v13814_v25  ;;  %9640 = vmatprep.subr.bf16.mxu0 %v17628_v29  ;;  %v3109_v7 = vmax.f32 %v13810_v35, %v13814_v25  ;;  %9994 = vpow2.f32 %v2145_v13  ;;  %v13830_v53 = vadd.f32 %v10829_v44, %v2993_v2  ;;  %v2995_v22 = vpop.f32.mrb[161].mxu1  ;;  %v17942_v13 = vld [vmem:[#allocation139_spill] sm:$0xff]  ;;  %v17943_v18 = vld [vmem:[#allocation138_spill] sm:$0xff] }
 0x351   : > { %9002 = vmatmul.mubr.msk.f32.gmra.mrb[10].mxu1 %vm613_vm0, %v4922_v43  ;;  %17940 = vst [vmem:[#allocation7_spill] sm:$0xff] %v13833_v27  ;;  %9996 = vpow2.f32 %v2147_v4  ;;  %v2149_v47 = vmul.f32 1.442695, %v2047_v51  ;;  %v2151_v19 = vmul.f32 1.442695, %v2048_v34  ;;  %2469 = vmatmul.mubr.f32.gmra.mrb[78].mxu0 %v9983_v0  ;;  %v13836_v61 = vadd.f32 %v10830_v24, %v2995_v22  ;;  %v17945_v51 = vld [vmem:[#allocation172_spill] sm:$0xff] }
 0x352   : > { %17939 = vst [vmem:[#allocation10_spill] sm:$0xff] %v13830_v53  ;;  %9003 = vmatprep.mubr.msk.f32.mxu1 %vm613_vm0, %v4923_v52  ;;  %v9987_v54 = vpop.eup %9986  ;;  %v17944_v2 = vpack.c.bf16 %v17942_v13, %v17943_v18  ;;  %3110 = vmax.xlane.f32.xlu1 %v3109_v7  ;;  %v4924_v0 = vmul.f32 %v12245_v11, %v17785_v40  ;;  %v17946_v18 = vld [vmem:[#allocation173_spill] sm:$0xff]  ;;  %v10831_v7 = vld [vmem:[%s11296_s25 + $0x190] sm:$0xff] }
 0x353   : > { %17941 = vst [vmem:[#allocation117_spill] sm:$0xff] %v13836_v61  ;;  %v9989_v44 = vpop.eup %9988  ;;  %9998 = vpow2.f32 %v2149_v47  ;;  %v1975_v43 = vpop.xlane.xlu0 %1974  ;;  %v3112_v9 = vmax.f32 %v13830_v53, %v13836_v61  ;;  %v10832_v40 = vld [vmem:[%s11296_s25 + $0x198] sm:$0xff]  ;;  %v17952_v53 = vld [vmem:[#allocation175_spill] sm:$0xff] }
 0x354   : > { %9642 = vmatpush1.bf16.msra.mxu0 %v17944_v2  ;;  %v2999_v4 = vpop.f32.mrb[162].mxu1  ;;  %10000 = vpow2.f32 %v2151_v19  ;;  %2473 = vmatprep.mubr.f32.mxu0 %v9989_v44  ;;  %v2049_v34 = vsub.f32 %v17945_v51, %v1975_v43  ;;  %v2050_v22 = vsub.f32 %v17946_v18, %v1975_v43  ;;  %v13857_v19 = vadd.f32 %v9989_v44, %v9987_v54  ;;  %v10833_v44 = vld [vmem:[%s11296_s25 + $0x1a0] sm:$0xff] }
 0x355   : > { %9691 = vmatprep.subr.bf16.mxu0 %v17628_v29  ;;  %v13850_v24 = vadd.f32 %v10831_v7, %v2999_v4  ;;  %v3001_v47 = vpop.f32.mrb[163].mxu1  ;;  %9004 = vmatmul.mubr.msk.f32.gmra.mrb[12].mxu1 %vm613_vm0, %v4923_v52  ;;  %v9991_v13 = vpop.eup %9990  ;;  %v17950_v4 = vld [vmem:[#allocation30_spill] sm:$0xff] }
 0x356   : > { %2474 = vmatmul.mubr.f32.gmra.mrb[80].mxu0 %v9987_v54  ;;  %v13854_v2 = vadd.f32 %v10832_v40, %v3001_v47  ;;  %9005 = vmatprep.mubr.msk.f32.mxu1 %vm613_vm0, %v4924_v0  ;;  %17949 = vst [vmem:[#allocation43_spill] sm:$0xff] %v13857_v19  ;;  %v9993_v27 = vpop.eup %9992  ;;  %v2153_v51 = vmul.f32 1.442695, %v2049_v34  ;;  %v2155_v61 = vmul.f32 1.442695, %v2050_v22  ;;  %v1978_v43 = vpop.xlane.xlu1 %1977  ;;  %v4925_v18 = vmul.f32 %v12245_v11, %v17950_v4  ;;  %v17951_v7 = vld [vmem:[#allocation174_spill] sm:$0xff] }
 0x357   : > { %17947 = vst [vmem:[#allocation120_spill] sm:$0xff] %v13850_v24  ;;  %3113 = vmax.xlane.f32.xlu0 %v3112_v9  ;;  %v2051_v52 = vsub.f32 %v17951_v7, %v1978_v43  ;;  %v2052_v25 = vsub.f32 %v17952_v53, %v1978_v43  ;;  %2478 = vmatprep.mubr.f32.mxu0 %v9993_v27  ;;  %v3005_v47 = vpop.f32.mrb[164].mxu1  ;;  %v10834_v53 = vld [vmem:[%s11296_s25 + $0x1a8] sm:$0xff]  ;;  %v10836_v19 = vld [vmem:[%s11296_s25 + $0x1b8] sm:$0xff] }
 0x358   : > { %17948 = vst [vmem:[#allocation44_spill] sm:$0xff] %v13854_v2  ;;  %v3115_v40 = vmax.f32 %v13850_v24, %v13854_v2  ;;  %v13865_v54 = vadd.f32 %v9993_v27, %v9991_v13  ;;  %10002 = vpow2.f32 %v2153_v51  ;;  %v13868_v34 = vadd.f32 %v10833_v44, %v3005_v47  ;;  %v3007_v9 = vpop.f32.mrb[165].mxu1  ;;  %v17956_v44 = vld [vmem:[#allocation9_spill] sm:$0xff] }
 0x359   : > { %9006 = vmatmul.mubr.msk.f32.gmra.mrb[14].mxu1 %vm613_vm0, %v4924_v0  ;;  %10004 = vpow2.f32 %v2155_v61  ;;  %v2157_v22 = vmul.f32 1.442695, %v2051_v52  ;;  %v2159_v4 = vmul.f32 1.442695, %v2052_v25  ;;  %v13872_v43 = vadd.f32 %v10834_v53, %v3007_v9  ;;  %v17957_v61 = vld [vmem:[#allocation32_spill] sm:$0xff]  ;;  %v17958_v52 = vld [vmem:[#allocation35_spill] sm:$0xff] }
 0x35a   : > { %17953 = vst [vmem:[#allocation50_spill] sm:$0xff] %v13865_v54  ;;  %17954 = vst [vmem:[#allocation49_spill] sm:$0xff] %v13868_v34  ;;  %2479 = vmatmul.mubr.f32.gmra.mrb[82].mxu0 %v9991_v13  ;;  %9007 = vmatprep.mubr.msk.f32.mxu1 %vm613_vm0, %v4925_v18  ;;  %v9995_v7 = vpop.eup %9994  ;;  %v4926_v0 = vmul.f32 %v12245_v11, %v17956_v44  ;;  %v10835_v53 = vld [vmem:[%s11296_s25 + $0x1b0] sm:$0xff] }
 0x35b   : > { %17955 = vst [vmem:[#allocation56_spill] sm:$0xff] %v13872_v43  ;;  %3116 = vmax.xlane.f32.xlu1 %v3115_v40  ;;  %v9997_v27 = vpop.eup %9996  ;;  %10006 = vpow2.f32 %v2157_v22  ;;  %v1981_v51 = vpop.xlane.xlu0 %1980  ;;  %v3118_v25 = vmax.f32 %v13868_v34, %v13872_v43  ;;  %v17964_v34 = vld [vmem:[#allocation177_spill] sm:$0xff] }
 0x35c   : > { %v3011_v47 = vpop.f32.mrb[166].mxu1  ;;  %10008 = vpow2.f32 %v2159_v4  ;;  %2483 = vmatprep.mubr.f32.mxu0 %v9997_v27  ;;  %v2053_v13 = vsub.f32 %v17957_v61, %v1981_v51  ;;  %v2054_v9 = vsub.f32 %v17958_v52, %v1981_v51  ;;  %v13889_v4 = vadd.f32 %v9997_v27, %v9995_v7  ;;  %v10837_v27 = vld [vmem:[%s11296_s25 + $0x1c0] sm:$0xff] }
 0x35d   : > { %v13882_v54 = vadd.f32 %v10835_v53, %v3011_v47  ;;  %v3013_v40 = vpop.f32.mrb[167].mxu1  ;;  %9008 = vmatmul.mubr.msk.f32.gmra.mrb[16].mxu1 %vm613_vm0, %v4925_v18  ;;  %v9999_v22 = vpop.eup %9998  ;;  %3119 = vmax.xlane.f32.xlu0 %v3118_v25  ;;  %v17962_v47 = vld [vmem:[#allocation8_spill] sm:$0xff] }
 0x35e   : > { %2484 = vmatmul.mubr.f32.gmra.mrb[84].mxu0 %v9995_v7  ;;  %v13886_v2 = vadd.f32 %v10836_v19, %v3013_v40  ;;  %9009 = vmatprep.mubr.msk.f32.mxu1 %vm613_vm0, %v4926_v0  ;;  %17961 = vst [vmem:[#allocation61_spill] sm:$0xff] %v13889_v4  ;;  %v10001_v44 = vpop.eup %10000  ;;  %v2161_v61 = vmul.f32 1.442695, %v2053_v13  ;;  %v2163_v43 = vmul.f32 1.442695, %v2054_v9  ;;  %v1984_v51 = vpop.xlane.xlu1 %1983  ;;  %v4927_v52 = vmul.f32 %v12245_v11, %v17962_v47  ;;  %v17963_v53 = vld [vmem:[#allocation176_spill] sm:$0xff] }
 0x35f   : > { %17959 = vst [vmem:[#allocation55_spill] sm:$0xff] %v13882_v54  ;;  %v2055_v18 = vsub.f32 %v17963_v53, %v1984_v51  ;;  %v2056_v24 = vsub.f32 %v17964_v34, %v1984_v51  ;;  %2488 = vmatprep.mubr.f32.mxu0 %v10001_v44  ;;  %v3017_v19 = vpop.f32.mrb[168].mxu1  ;;  %v13897_v7 = vadd.f32 %v10001_v44, %v9999_v22  ;;  %v10838_v34 = vld [vmem:[%s11296_s25 + $0x1c8] sm:$0xff]  ;;  %v10840_v4 = vld [vmem:[%s11296_s25 + $0x1d8] sm:$0xff] }
 0x360   : > { %17960 = vst [vmem:[#allocation62_spill] sm:$0xff] %v13886_v2  ;;  %v3121_v40 = vmax.f32 %v13882_v54, %v13886_v2  ;;  %10010 = vpow2.f32 %v2161_v61  ;;  %v13900_v13 = vadd.f32 %v10837_v27, %v3017_v19  ;;  %v3019_v25 = vpop.f32.mrb[169].mxu1  ;;  %v17968_v27 = vld [vmem:[#allocation12_spill] sm:$0xff] }
 0x361   : > { %17965 = vst [vmem:[#allocation68_spill] sm:$0xff] %v13897_v7  ;;  %9010 = vmatmul.mubr.msk.f32.gmra.mrb[18].mxu1 %vm613_vm0, %v4926_v0  ;;  %10012 = vpow2.f32 %v2163_v43  ;;  %v2165_v9 = vmul.f32 1.442695, %v2055_v18  ;;  %v2167_v47 = vmul.f32 1.442695, %v2056_v24  ;;  %v13904_v51 = vadd.f32 %v10838_v34, %v3019_v25  ;;  %v17969_v43 = vld [vmem:[#allocation33_spill] sm:$0xff] }
 0x362   : > { %17966 = vst [vmem:[#allocation67_spill] sm:$0xff] %v13900_v13  ;;  %2489 = vmatmul.mubr.f32.gmra.mrb[86].mxu0 %v9999_v22  ;;  %9011 = vmatprep.mubr.msk.f32.mxu1 %vm613_vm0, %v4927_v52  ;;  %v10003_v53 = vpop.eup %10002  ;;  %v4928_v0 = vmul.f32 %v12245_v11, %v17968_v27  ;;  %v17970_v18 = vld [vmem:[#allocation36_spill] sm:$0xff] }
 0x363   : > { %17967 = vst [vmem:[#allocation37_spill] sm:$0xff] %v13904_v51  ;;  %3122 = vmax.xlane.f32.xlu1 %v3121_v40  ;;  %v10005_v44 = vpop.eup %10004  ;;  %10014 = vpow2.f32 %v2165_v9  ;;  %v1987_v61 = vpop.xlane.xlu0 %1986  ;;  %v3124_v24 = vmax.f32 %v13900_v13, %v13904_v51  ;;  %v10839_v34 = vld [vmem:[%s11296_s25 + $0x1d0] sm:$0xff]  ;;  %v17974_v13 = vld [vmem:[#allocation178_spill] sm:$0xff] }
 0x364   : > { %v3023_v19 = vpop.f32.mrb[170].mxu1  ;;  %10016 = vpow2.f32 %v2167_v47  ;;  %2493 = vmatprep.mubr.f32.mxu0 %v10005_v44  ;;  %v2057_v22 = vsub.f32 %v17969_v43, %v1987_v61  ;;  %v2058_v25 = vsub.f32 %v17970_v18, %v1987_v61  ;;  %v13921_v47 = vadd.f32 %v10005_v44, %v10003_v53  ;;  %v10841_v44 = vld [vmem:[%s11296_s25 + $0x1e0] sm:$0xff] }
 0x365   : > { %v13914_v7 = vadd.f32 %v10839_v34, %v3023_v19  ;;  %v3025_v40 = vpop.f32.mrb[171].mxu1  ;;  %9012 = vmatmul.mubr.msk.f32.gmra.mrb[20].mxu1 %vm613_vm0, %v4927_v52  ;;  %v10007_v9 = vpop.eup %10006  ;;  %3125 = vmax.xlane.f32.xlu0 %v3124_v24  ;;  %v17972_v19 = vld [vmem:[#allocation11_spill] sm:$0xff] }
 0x366   : > { %2494 = vmatmul.mubr.f32.gmra.mrb[88].mxu0 %v10003_v53  ;;  %v13918_v2 = vadd.f32 %v10840_v4, %v3025_v40  ;;  %9013 = vmatprep.mubr.msk.f32.mxu1 %vm613_vm0, %v4928_v0  ;;  %17971 = vst [vmem:[#allocation148_spill] sm:$0xff] %v13921_v47  ;;  %v10009_v27 = vpop.eup %10008  ;;  %v2169_v43 = vmul.f32 1.442695, %v2057_v22  ;;  %v2171_v51 = vmul.f32 1.442695, %v2058_v25  ;;  %v1990_v61 = vpop.xlane.xlu1 %1989  ;;  %v4929_v18 = vmul.f32 %v12245_v11, %v17972_v19  ;;  %v17973_v34 = vld [vmem:[#allocation31_spill] sm:$0xff] }
 0x367   : > { %v2059_v52 = vsub.f32 %v17973_v34, %v1990_v61  ;;  %v2060_v54 = vsub.f32 %v17974_v13, %v1990_v61  ;;  %2498 = vmatprep.mubr.f32.mxu0 %v10009_v27  ;;  %v3029_v4 = vpop.f32.mrb[172].mxu1  ;;  %v13929_v53 = vadd.f32 %v10009_v27, %v10007_v9  ;;  %v10842_v13 = vld [vmem:[%s11296_s25 + $0x1e8] sm:$0xff] }
 0x368   : > { %v3127_v40 = vmax.f32 %v13914_v7, %v13918_v2  ;;  %10018 = vpow2.f32 %v2169_v43  ;;  %v13932_v22 = vadd.f32 %v10841_v44, %v3029_v4  ;;  %v3031_v24 = vpop.f32.mrb[173].mxu1  ;;  %v4930_v43 = vmul.f32 %v12245_v11, %v17804_v5  ;;  %v17978_v44 = vld [vmem:[#allocation34_spill] sm:$0xff] }
 0x369   : > { %17975 = vst [vmem:[#allocation150_spill] sm:$0xff] %v13929_v53  ;;  %9014 = vmatmul.mubr.msk.f32.gmra.mrb[22].mxu1 %vm613_vm0, %v4928_v0  ;;  %10020 = vpow2.f32 %v2171_v51  ;;  %v2173_v25 = vmul.f32 1.442695, %v2059_v52  ;;  %v2175_v19 = vmul.f32 1.442695, %v2060_v54  ;;  %v13936_v61 = vadd.f32 %v10842_v13, %v3031_v24  ;;  %v17979_v0 = vld [vmem:[#allocation179_spill] sm:$0xff] }
 0x36a   : > { %17976 = vst [vmem:[#allocation75_spill] sm:$0xff] %v13932_v22  ;;  %2499 = vmatmul.mubr.f32.gmra.mrb[90].mxu0 %v10007_v9  ;;  %9015 = vmatprep.mubr.msk.f32.mxu1 %vm613_vm0, %v4929_v18  ;;  %v10011_v34 = vpop.eup %10010  ;;  %v1993_v27 = vpop.xlane.xlu0 %1992  ;;  %v10843_v24 = vld [vmem:[%s11296_s25 + $0x1f0] sm:$0xff] }
 0x36b   : > { %17977 = vst [vmem:[#allocation74_spill] sm:$0xff] %v13936_v61  ;;  %3128 = vmax.xlane.f32.xlu1 %v3127_v40  ;;  %v10013_v4 = vpop.eup %10012  ;;  %10022 = vpow2.f32 %v2173_v25  ;;  %v2061_v51 = vsub.f32 %v17978_v44, %v1993_v27  ;;  %v2062_v54 = vsub.f32 %v17979_v0, %v1993_v27  ;;  %v3035_v9 = vpop.f32.mrb[174].mxu1  ;;  %v3130_v52 = vmax.f32 %v13932_v22, %v13936_v61  ;;  %v10844_v27 = vld [vmem:[%s11296_s25 + $0x1f8] sm:$0xff] }
 0x36c   : > { %10024 = vpow2.f32 %v2175_v19  ;;  %2503 = vmatprep.mubr.f32.mxu0 %v10013_v4  ;;  %v13946_v13 = vadd.f32 %v10843_v24, %v3035_v9  ;;  %v3037_v40 = vpop.f32.mrb[175].mxu1  ;;  %v13949_v5 = vadd.f32 %v10013_v4, %v10011_v34  ;;  %v17983_v9 = vld [vmem:[#allocation13_spill] sm:$0xff] }
 0x36d   : > { %9016 = vmatmul.mubr.msk.f32.gmra.mrb[24].mxu1 %vm613_vm0, %v4929_v18  ;;  %v10015_v25 = vpop.eup %10014  ;;  %v2177_v53 = vmul.f32 1.442695, %v2061_v51  ;;  %v2179_v47 = vmul.f32 1.442695, %v2062_v54  ;;  %v13952_v44 = vadd.f32 %v10844_v27, %v3037_v40  ;;  %3131 = vmax.xlane.f32.xlu0 %v3130_v52  ;;  %v4931_v24 = vmul.f32 %v12245_v11, %v17983_v9  ;;  %v17984_v18 = vld [vmem:[#allocation180_spill] sm:$0xff]  ;;  %v10845_v40 = vld [vmem:[%s11296_s25] sm:$0xff] }
 0x36e   : > { %17980 = vst [vmem:[#allocation151_spill] sm:$0xff] %v13946_v13  ;;  %17981 = vst [vmem:[#allocation152_spill] sm:$0xff] %v13949_v5  ;;  %2504 = vmatmul.mubr.f32.gmra.mrb[92].mxu0 %v10011_v34  ;;  %9017 = vmatprep.mubr.msk.f32.mxu1 %vm613_vm0, %v4930_v43  ;;  %v10017_v19 = vpop.eup %10016  ;;  %v1996_v0 = vpop.xlane.xlu1 %1995  ;;  %v17985_v5 = vld [vmem:[#allocation181_spill] sm:$0xff] }
 0x36f   : > { %17982 = vst [vmem:[#allocation84_spill] sm:$0xff] %v13952_v44  ;;  %10026 = vpow2.f32 %v2177_v53  ;;  %v2063_v4 = vsub.f32 %v17984_v18, %v1996_v0  ;;  %v2064_v51 = vsub.f32 %v17985_v5, %v1996_v0  ;;  %2508 = vmatprep.mubr.f32.mxu0 %v10017_v19  ;;  %v3976_v54 = vpop.f32.mrb[176].mxu1  ;;  %v3133_v34 = vmax.f32 %v13946_v13, %v13952_v44  ;;  %v10846_v18 = vld [vmem:[%s11296_s25 + $0x8] sm:$0xff]  ;;  %v17988_v44 = vld [vmem:[#allocation16_spill] sm:$0xff] }
 0x370   : > { %10028 = vpow2.f32 %v2179_v47  ;;  %v13962_v27 = vadd.f32 %v10845_v40, %v3976_v54  ;;  %v3978_v52 = vpop.f32.mrb[177].mxu1  ;;  %v13965_v61 = vadd.f32 %v10017_v19, %v10015_v25  ;;  %v4932_v54 = vmul.f32 %v12245_v11, %v17988_v44 }
 0x371   : > { %9018 = vmatmul.mubr.msk.f32.gmra.mrb[26].mxu1 %vm613_vm0, %v4930_v43  ;;  %v2181_v9 = vmul.f32 1.442695, %v2063_v4  ;;  %v2183_v53 = vmul.f32 1.442695, %v2064_v51  ;;  %v13968_v5 = vadd.f32 %v10846_v18, %v3978_v52  ;;  %3134 = vmax.xlane.f32.xlu1 %v3133_v34  ;;  %v17989_v43 = vld [vmem:[#allocation182_spill] sm:$0xff]  ;;  %v17990_v4 = vld [vmem:[#allocation183_spill] sm:$0xff] }
 0x372   : > { %17986 = vst [vmem:[#allocation83_spill] sm:$0xff] %v13965_v61  ;;  %2509 = vmatmul.mubr.f32.gmra.mrb[94].mxu0 %v10015_v25  ;;  %9019 = vmatprep.mubr.msk.f32.mxu1 %vm613_vm0, %v4931_v24  ;;  %v10019_v0 = vpop.eup %10018  ;;  %v1999_v47 = vpop.xlane.xlu0 %1998  ;;  %v10847_v18 = vld [vmem:[%s11296_s25 + $0x10] sm:$0xff] }
 0x373   : > { %17987 = vst [vmem:[#allocation161_spill] sm:$0xff] %v13968_v5  ;;  %v10021_v40 = vpop.eup %10020  ;;  %10030 = vpow2.f32 %v2181_v9  ;;  %v2065_v19 = vsub.f32 %v17989_v43, %v1999_v47  ;;  %v2066_v51 = vsub.f32 %v17990_v4, %v1999_v47  ;;  %v3982_v25 = vpop.f32.mrb[178].mxu1  ;;  %v4167_v52 = vmax.f32 %v13962_v27, %v13968_v5  ;;  %v10848_v47 = vld [vmem:[%s11296_s25 + $0x18] sm:$0xff] }
 0x374   : > { %10032 = vpow2.f32 %v2183_v53  ;;  %2513 = vmatprep.mubr.f32.mxu0 %v10021_v40  ;;  %v13978_v61 = vadd.f32 %v10847_v18, %v3982_v25  ;;  %v3984_v34 = vpop.f32.mrb[179].mxu1  ;;  %v13981_v44 = vadd.f32 %v10021_v40, %v10019_v0  ;;  %v4933_v25 = vmul.f32 %v12245_v11, %v17813_v31  ;;  %v17995_v18 = vld [vmem:[#allocation185_spill] sm:$0xff] }
 0x375   : > { %9020 = vmatmul.mubr.msk.f32.gmra.mrb[28].mxu1 %vm613_vm0, %v4931_v24  ;;  %v10023_v9 = vpop.eup %10022  ;;  %v2185_v13 = vmul.f32 1.442695, %v2065_v19  ;;  %v2187_v22 = vmul.f32 1.442695, %v2066_v51  ;;  %v13984_v43 = vadd.f32 %v10848_v47, %v3984_v34  ;;  %4168 = vmax.xlane.f32.xlu0 %v4167_v52  ;;  %v17994_v24 = vld [vmem:[#allocation184_spill] sm:$0xff]  ;;  %v10849_v34 = vld [vmem:[%s11296_s25 + $0x20] sm:$0xff] }
 0x376   : > { %17991 = vst [vmem:[#allocation38_spill] sm:$0xff] %v13978_v61  ;;  %17992 = vst [vmem:[#allocation153_spill] sm:$0xff] %v13981_v44  ;;  %2514 = vmatmul.mubr.f32.gmra.mrb[96].mxu0 %v10019_v0  ;;  %9021 = vmatprep.mubr.msk.f32.mxu1 %vm613_vm0, %v4932_v54  ;;  %v10025_v53 = vpop.eup %10024  ;;  %v2002_v4 = vpop.xlane.xlu1 %2001 }
 0x377   : > { %17993 = vst [vmem:[#allocation154_spill] sm:$0xff] %v13984_v43  ;;  %10034 = vpow2.f32 %v2185_v13  ;;  %v2067_v40 = vsub.f32 %v17994_v24, %v2002_v4  ;;  %v2068_v19 = vsub.f32 %v17995_v18, %v2002_v4  ;;  %2518 = vmatprep.mubr.f32.mxu0 %v10025_v53  ;;  %v3988_v51 = vpop.f32.mrb[180].mxu1  ;;  %v4170_v0 = vmax.f32 %v13978_v61, %v13984_v43  ;;  %v10850_v4 = vld [vmem:[%s11296_s25 + $0x28] sm:$0xff] }
 0x378   : > { %10036 = vpow2.f32 %v2187_v22  ;;  %v13994_v47 = vadd.f32 %v10849_v34, %v3988_v51  ;;  %v3990_v52 = vpop.f32.mrb[181].mxu1  ;;  %v13997_v44 = vadd.f32 %v10025_v53, %v10023_v9  ;;  %v17999_v51 = vld [vmem:[#allocation18_spill] sm:$0xff] }
 0x379   : > { %9022 = vmatmul.mubr.msk.f32.gmra.mrb[30].mxu1 %vm613_vm0, %v4932_v54  ;;  %v10027_v31 = vpop.eup %10026  ;;  %v2189_v13 = vmul.f32 1.442695, %v2067_v40  ;;  %v2191_v5 = vmul.f32 1.442695, %v2068_v19  ;;  %v14000_v24 = vadd.f32 %v10850_v4, %v3990_v52  ;;  %4171 = vmax.xlane.f32.xlu1 %v4170_v0  ;;  %v4934_v34 = vmul.f32 %v12245_v11, %v17999_v51  ;;  %v18000_v54 = vld [vmem:[#allocation186_spill] sm:$0xff]  ;;  %v18001_v40 = vld [vmem:[#allocation187_spill] sm:$0xff] }
 0x37a   : > { %17996 = vst [vmem:[#allocation93_spill] sm:$0xff] %v13994_v47  ;;  %17997 = vst [vmem:[#allocation92_spill] sm:$0xff] %v13997_v44  ;;  %2519 = vmatmul.mubr.f32.gmra.mrb[98].mxu0 %v10023_v9  ;;  %9023 = vmatprep.mubr.msk.f32.mxu1 %vm613_vm0, %v4933_v25  ;;  %v10029_v18 = vpop.eup %10028  ;;  %v2005_v22 = vpop.xlane.xlu0 %2004  ;;  %v10851_v52 = vld [vmem:[%s11296_s25 + $0x30] sm:$0xff] }
 0x37b   : > { %17998 = vst [vmem:[#allocation164_spill] sm:$0xff] %v14000_v24  ;;  %10038 = vpow2.f32 %v2189_v13  ;;  %2523 = vmatprep.mubr.f32.mxu0 %v10029_v18  ;;  %v2069_v53 = vsub.f32 %v18000_v54, %v2005_v22  ;;  %v2070_v19 = vsub.f32 %v18001_v40, %v2005_v22  ;;  %v3994_v44 = vpop.f32.mrb[182].mxu1  ;;  %v4173_v9 = vmax.f32 %v13994_v47, %v14000_v24  ;;  %v10852_v54 = vld [vmem:[%s11296_s25 + $0x38] sm:$0xff] }
 0x37c   : > { %10040 = vpow2.f32 %v2191_v5  ;;  %v14010_v4 = vadd.f32 %v10851_v52, %v3994_v44  ;;  %v3996_v0 = vpop.f32.mrb[183].mxu1  ;;  %v14013_v43 = vadd.f32 %v10029_v18, %v10027_v31  ;;  %v18004_v44 = vld [vmem:[#allocation17_spill] sm:$0xff] }
 0x37d   : > { %9024 = vmatmul.mubr.msk.f32.gmra.mrb[32].mxu1 %vm613_vm0, %v4933_v25  ;;  %v10031_v13 = vpop.eup %10030  ;;  %v2193_v51 = vmul.f32 1.442695, %v2069_v53  ;;  %v2195_v61 = vmul.f32 1.442695, %v2070_v19  ;;  %v14016_v22 = vadd.f32 %v10852_v54, %v3996_v0  ;;  %4174 = vmax.xlane.f32.xlu0 %v4173_v9  ;;  %v4935_v52 = vmul.f32 %v12245_v11, %v18004_v44  ;;  %v18005_v25 = vld [vmem:[#allocation14_spill] sm:$0xff] }
 0x37e   : > { %18002 = vst [vmem:[#allocation6_spill] sm:$0xff] %v14013_v43  ;;  %2524 = vmatmul.mubr.f32.gmra.mrb[100].mxu0 %v10027_v31  ;;  %9025 = vmatprep.mubr.msk.f32.mxu1 %vm613_vm0, %v4934_v34  ;;  %v10033_v40 = vpop.eup %10032  ;;  %v2008_v5 = vpop.xlane.xlu1 %2007  ;;  %v18006_v43 = vld [vmem:[#allocation188_spill] sm:$0xff]  ;;  %v10853_v0 = vld [vmem:[%s11296_s25 + $0x40] sm:$0xff] }
 0x37f   : > { %18003 = vst [vmem:[#allocation155_spill] sm:$0xff] %v14016_v22  ;;  %10042 = vpow2.f32 %v2193_v51  ;;  %v2071_v18 = vsub.f32 %v18005_v25, %v2008_v5  ;;  %v2072_v53 = vsub.f32 %v18006_v43, %v2008_v5  ;;  %2528 = vmatprep.mubr.f32.mxu0 %v10033_v40  ;;  %v4000_v19 = vpop.f32.mrb[184].mxu1  ;;  %v4176_v31 = vmax.f32 %v14010_v4, %v14016_v22  ;;  %v10854_v43 = vld [vmem:[%s11296_s25 + $0x48] sm:$0xff] }
 0x380   : > { %10044 = vpow2.f32 %v2195_v61  ;;  %v14026_v54 = vadd.f32 %v10853_v0, %v4000_v19  ;;  %v4002_v9 = vpop.f32.mrb[185].mxu1  ;;  %v14029_v24 = vadd.f32 %v10033_v40, %v10031_v13  ;;  %v4936_v19 = vmul.f32 %v12245_v11, %v17826_v26 }
 0x381   : > { %9026 = vmatmul.mubr.msk.f32.gmra.mrb[34].mxu1 %vm613_vm0, %v4934_v34  ;;  %v10035_v51 = vpop.eup %10034  ;;  %v2197_v44 = vmul.f32 1.442695, %v2071_v18  ;;  %v2199_v47 = vmul.f32 1.442695, %v2072_v53  ;;  %v14032_v5 = vadd.f32 %v10854_v43, %v4002_v9  ;;  %4177 = vmax.xlane.f32.xlu1 %v4176_v31  ;;  %v18010_v34 = vld [vmem:[#allocation189_spill] sm:$0xff]  ;;  %v18011_v18 = vld [vmem:[#allocation190_spill] sm:$0xff] }
 0x382   : > { %18007 = vst [vmem:[#allocation156_spill] sm:$0xff] %v14026_v54  ;;  %18008 = vst [vmem:[#allocation167_spill] sm:$0xff] %v14029_v24  ;;  %2529 = vmatmul.mubr.f32.gmra.mrb[102].mxu0 %v10031_v13  ;;  %9027 = vmatprep.mubr.msk.f32.mxu1 %vm613_vm0, %v4935_v52  ;;  %v10037_v25 = vpop.eup %10036  ;;  %v3042_v61 = vpop.xlane.xlu0 %3041  ;;  %v10855_v9 = vld [vmem:[%s11296_s25 + $0x50] sm:$0xff] }
 0x383   : > { %18009 = vst [vmem:[#allocation101_spill] sm:$0xff] %v14032_v5  ;;  %10046 = vpow2.f32 %v2197_v44  ;;  %2533 = vmatprep.mubr.f32.mxu0 %v10037_v25  ;;  %v3136_v40 = vsub.f32 %v18010_v34, %v3042_v61  ;;  %v3137_v53 = vsub.f32 %v18011_v18, %v3042_v61  ;;  %v4006_v0 = vpop.f32.mrb[186].mxu1  ;;  %v4179_v13 = vmax.f32 %v14026_v54, %v14032_v5  ;;  %v10856_v34 = vld [vmem:[%s11296_s25 + $0x58] sm:$0xff] }
 0x384   : > { %10048 = vpow2.f32 %v2199_v47  ;;  %v14042_v43 = vadd.f32 %v10855_v9, %v4006_v0  ;;  %v4008_v31 = vpop.f32.mrb[187].mxu1  ;;  %v14045_v24 = vadd.f32 %v10037_v25, %v10035_v51  ;;  %v18015_v0 = vld [vmem:[#allocation19_spill] sm:$0xff] }
 0x385   : > { %9028 = vmatmul.mubr.msk.f32.gmra.mrb[36].mxu1 %vm613_vm0, %v4935_v52  ;;  %v10039_v26 = vpop.eup %10038  ;;  %v3200_v44 = vmul.f32 1.442695, %v3136_v40  ;;  %v3202_v22 = vmul.f32 1.442695, %v3137_v53  ;;  %v14048_v61 = vadd.f32 %v10856_v34, %v4008_v31  ;;  %4180 = vmax.xlane.f32.xlu0 %v4179_v13  ;;  %v4937_v9 = vmul.f32 %v12245_v11, %v18015_v0  ;;  %v18016_v52 = vld [vmem:[#allocation191_spill] sm:$0xff]  ;;  %v10857_v31 = vld [vmem:[%s11296_s25 + $0x60] sm:$0xff] }
 0x386   : > { %18012 = vst [vmem:[#allocation100_spill] sm:$0xff] %v14042_v43  ;;  %18013 = vst [vmem:[#allocation168_spill] sm:$0xff] %v14045_v24  ;;  %2534 = vmatmul.mubr.f32.gmra.mrb[104].mxu0 %v10035_v51  ;;  %9029 = vmatprep.mubr.msk.f32.mxu1 %vm613_vm0, %v4936_v19  ;;  %v10041_v18 = vpop.eup %10040  ;;  %v3045_v47 = vpop.xlane.xlu1 %3044  ;;  %v18017_v24 = vld [vmem:[#allocation192_spill] sm:$0xff] }
 0x387   : > { %18014 = vst [vmem:[#allocation24_spill] sm:$0xff] %v14048_v61  ;;  %10050 = vpow2.f32 %v3200_v44  ;;  %v3138_v25 = vsub.f32 %v18016_v52, %v3045_v47  ;;  %v3139_v40 = vsub.f32 %v18017_v24, %v3045_v47  ;;  %2538 = vmatprep.mubr.f32.mxu0 %v10041_v18  ;;  %v4012_v53 = vpop.f32.mrb[188].mxu1  ;;  %v4182_v51 = vmax.f32 %v14042_v43, %v14048_v61  ;;  %v10858_v24 = vld [vmem:[%s11296_s25 + $0x68] sm:$0xff]  ;;  %v18055_v43 = vld [vmem:[#allocation57_spill] sm:$0xff] }
 0x388   : > { %10052 = vpow2.f32 %v3202_v22  ;;  %v14058_v34 = vadd.f32 %v10857_v31, %v4012_v53  ;;  %v4014_v13 = vpop.f32.mrb[189].mxu1  ;;  %v14061_v5 = vadd.f32 %v10041_v18, %v10039_v26  ;;  %v4938_v53 = vmul.f32 %v12245_v11, %v17834_v62 }
 0x389   : > { %9030 = vmatmul.mubr.msk.f32.gmra.mrb[38].mxu1 %vm613_vm0, %v4936_v19  ;;  %v10043_v44 = vpop.eup %10042  ;;  %v3204_v0 = vmul.f32 1.442695, %v3138_v25  ;;  %v3206_v54 = vmul.f32 1.442695, %v3139_v40  ;;  %v14064_v47 = vadd.f32 %v10858_v24, %v4014_v13  ;;  %4183 = vmax.xlane.f32.xlu1 %v4182_v51  ;;  %v18021_v19 = vld [vmem:[#allocation15_spill] sm:$0xff]  ;;  %v18022_v25 = vld [vmem:[#allocation78_spill] sm:$0xff] }
 0x38a   : > { %18018 = vst [vmem:[#allocation157_spill] sm:$0xff] %v14058_v34  ;;  %18019 = vst [vmem:[#allocation158_spill] sm:$0xff] %v14061_v5  ;;  %2539 = vmatmul.mubr.f32.gmra.mrb[106].mxu0 %v10039_v26  ;;  %9031 = vmatprep.mubr.msk.f32.mxu1 %vm613_vm0, %v4937_v9  ;;  %v10045_v52 = vpop.eup %10044  ;;  %v3048_v22 = vpop.xlane.xlu0 %3047  ;;  %v10859_v13 = vld [vmem:[%s11296_s25 + $0x70] sm:$0xff] }
 0x38b   : > { %18020 = vst [vmem:[#allocation171_spill] sm:$0xff] %v14064_v47  ;;  %10054 = vpow2.f32 %v3204_v0  ;;  %2543 = vmatprep.mubr.f32.mxu0 %v10045_v52  ;;  %v3140_v18 = vsub.f32 %v18021_v19, %v3048_v22  ;;  %v3141_v40 = vsub.f32 %v18022_v25, %v3048_v22  ;;  %v4018_v31 = vpop.f32.mrb[190].mxu1  ;;  %v4185_v26 = vmax.f32 %v14058_v34, %v14064_v47  ;;  %v10860_v19 = vld [vmem:[%s11296_s25 + $0x78] sm:$0xff]  ;;  %v18048_v34 = vld [vmem:[#allocation51_spill] sm:$0xff] }
 0x38c   : > { %10056 = vpow2.f32 %v3206_v54  ;;  %v14074_v24 = vadd.f32 %v10859_v13, %v4018_v31  ;;  %v4020_v51 = vpop.f32.mrb[191].mxu1  ;;  %v14077_v5 = vadd.f32 %v10045_v52, %v10043_v44  ;;  %v4939_v31 = vmul.f32 %v12245_v11, %v17840_v15  ;;  %v18027_v13 = vld [vmem:[#allocation86_spill] sm:$0xff]  ;;  %v10868_v47 = vld [vmem:[%s11296_s25 + $0xb8] sm:$0xff] }
 0x38d   : > { %9032 = vmatmul.mubr.msk.f32.gmra.mrb[40].mxu1 %vm613_vm0, %v4937_v9  ;;  %v10047_v62 = vpop.eup %10046  ;;  %v3208_v0 = vmul.f32 1.442695, %v3140_v18  ;;  %v3210_v61 = vmul.f32 1.442695, %v3141_v40  ;;  %v14080_v22 = vadd.f32 %v10860_v19, %v4020_v51  ;;  %4186 = vmax.xlane.f32.xlu0 %v4185_v26  ;;  %v18026_v9 = vld [vmem:[#allocation193_spill] sm:$0xff]  ;;  %v10861_v51 = vld [vmem:[%s11296_s25 + $0x80] sm:$0xff] }
 0x38e   : > { %18023 = vst [vmem:[#allocation110_spill] sm:$0xff] %v14074_v24  ;;  %18024 = vst [vmem:[#allocation109_spill] sm:$0xff] %v14077_v5  ;;  %2544 = vmatmul.mubr.f32.gmra.mrb[108].mxu0 %v10043_v44  ;;  %9033 = vmatprep.mubr.msk.f32.mxu1 %vm613_vm0, %v4938_v53  ;;  %v10049_v25 = vpop.eup %10048  ;;  %v3051_v54 = vpop.xlane.xlu1 %3050 }
 0x38f   : > { %18025 = vst [vmem:[#allocation27_spill] sm:$0xff] %v14080_v22  ;;  %10058 = vpow2.f32 %v3208_v0  ;;  %v3142_v52 = vsub.f32 %v18026_v9, %v3051_v54  ;;  %v3143_v18 = vsub.f32 %v18027_v13, %v3051_v54  ;;  %2548 = vmatprep.mubr.f32.mxu0 %v10049_v25  ;;  %v4024_v40 = vpop.f32.mrb[192].mxu1  ;;  %v4188_v44 = vmax.f32 %v14074_v24, %v14080_v22  ;;  %v10862_v54 = vld [vmem:[%s11296_s25 + $0x88] sm:$0xff]  ;;  %v10865_v22 = vld [vmem:[%s11296_s25 + $0xa0] sm:$0xff] }
 0x390   : > { %10060 = vpow2.f32 %v3210_v61  ;;  %v14090_v19 = vadd.f32 %v10861_v51, %v4024_v40  ;;  %v4026_v26 = vpop.f32.mrb[193].mxu1  ;;  %v14093_v5 = vadd.f32 %v10049_v25, %v10047_v62  ;;  %v18031_v25 = vld [vmem:[#allocation194_spill] sm:$0xff] }
 0x391   : > { %9034 = vmatmul.mubr.msk.f32.gmra.mrb[42].mxu1 %vm613_vm0, %v4938_v53  ;;  %v14095_v15 = vpop.eup %10050  ;;  %v3212_v0 = vmul.f32 1.442695, %v3142_v52  ;;  %v3214_v9 = vmul.f32 1.442695, %v3143_v18  ;;  %v14098_v13 = vadd.f32 %v10862_v54, %v4026_v26  ;;  %4189 = vmax.xlane.f32.xlu1 %v4188_v44  ;;  %v4940_v53 = vmul.f32 %v12245_v11, %v12059_v38  ;;  %v18032_v18 = vld [vmem:[#allocation195_spill] sm:$0xff]  ;;  %v10863_v54 = vld [vmem:[%s11296_s25 + $0x90] sm:$0xff] }
 0x392   : > { %18028 = vst [vmem:[#allocation159_spill] sm:$0xff] %v14090_v19  ;;  %18029 = vst [vmem:[#allocation160_spill] sm:$0xff] %v14093_v5  ;;  %2549 = vmatmul.mubr.f32.gmra.mrb[110].mxu0 %v10047_v62  ;;  %9035 = vmatprep.mubr.msk.f32.mxu1 %vm613_vm0, %v4939_v31  ;;  %v14101_v61 = vpop.eup %10052  ;;  %v3054_v40 = vpop.xlane.xlu0 %3053  ;;  %v18042_v24 = vld [vmem:[#allocation46_spill] sm:$0xff] }
 0x393   : > { %18030 = vst [vmem:[#allocation119_spill] sm:$0xff] %v14098_v13  ;;  %10062 = vpow2.f32 %v3212_v0  ;;  %3520 = vmatprep.mubr.f32.mxu0 %v14101_v61  ;;  %v3144_v52 = vsub.f32 %v18031_v25, %v3054_v40  ;;  %v3145_v62 = vsub.f32 %v18032_v18, %v3054_v40  ;;  %v4030_v51 = vpop.f32.mrb[194].mxu1  ;;  %v4191_v26 = vmax.f32 %v14090_v19, %v14098_v13  ;;  %v10864_v25 = vld [vmem:[%s11296_s25 + $0x98] sm:$0xff]  ;;  %v18038_v13 = vld [vmem:[#allocation66_spill] sm:$0xff] }
 0x394   : > { %10064 = vpow2.f32 %v3214_v9  ;;  %v14111_v5 = vadd.f32 %v10863_v54, %v4030_v51  ;;  %v4032_v44 = vpop.f32.mrb[195].mxu1  ;;  %v18035_v9 = vld [vmem:[#allocation40_spill] sm:$0xff]  ;;  %v18036_v51 = vld [vmem:[#allocation39_spill] sm:$0xff] }
 0x395   : > { %9036 = vmatmul.mubr.msk.f32.gmra.mrb[44].mxu1 %vm613_vm0, %v4939_v31  ;;  %v14114_v38 = vpop.eup %10054  ;;  %v3216_v11 = vmul.f32 1.442695, %v3144_v52  ;;  %v3218_v0 = vmul.f32 1.442695, %v3145_v62  ;;  %v14118_v40 = vadd.f32 %v10864_v25, %v4032_v44  ;;  %v18037_v54 = vpack.c.bf16 %v18035_v9, %v18036_v51  ;;  %4192 = vmax.xlane.f32.xlu0 %v4191_v26  ;;  %v18039_v62 = vld [vmem:[#allocation70_spill] sm:$0xff] }
 0x396   : > { %18033 = vst [vmem:[#allocation118_spill] sm:$0xff] %v14111_v5  ;;  %3521 = vmatmul.mubr.f32.vlgmr.msra.gmra.mrb[112].mxu0 %v14095_v15  ;;  %9037 = vmatprep.mubr.msk.f32.mxu1 %vm613_vm0, %v4940_v53  ;;  %v14121_v18 = vpop.eup %10056  ;;  %v3057_v31 = vpop.xlane.xlu1 %3056 }
 0x397   : > { %18034 = vst [vmem:[#allocation26_spill] sm:$0xff] %v14118_v40  ;;  %9693 = vmatpush1.bf16.msra.mxu0 %v18037_v54  ;;  %10066 = vpow2.f32 %v3216_v11  ;;  %v3146_v52 = vsub.f32 %v18038_v13, %v3057_v31  ;;  %v3147_v19 = vsub.f32 %v18039_v62, %v3057_v31  ;;  %3525 = vmatprep.mubr.f32.mxu0 %v14121_v18  ;;  %v4036_v44 = vpop.f32.mrb[196].mxu1  ;;  %v10866_v54 = vld [vmem:[%s11296_s25 + $0xa8] sm:$0xff] }
 0x398   : > { %9694 = vmatprep.subr.bf16.mxu0 %v17628_v29  ;;  %v4194_v25 = vmax.f32 %v14111_v5, %v14118_v40  ;;  %10068 = vpow2.f32 %v3218_v0  ;;  %v14133_v9 = vadd.f32 %v10865_v22, %v4036_v44  ;;  %v4038_v26 = vpop.f32.mrb[197].mxu1  ;;  %v18043_v40 = vld [vmem:[#allocation45_spill] sm:$0xff] }
 0x399   : > { %9038 = vmatmul.mubr.msk.f32.gmra.mrb[46].mxu1 %vm613_vm0, %v4940_v53  ;;  %v10059_v11 = vpop.eup %10058  ;;  %v3220_v51 = vmul.f32 1.442695, %v3146_v52  ;;  %v3222_v13 = vmul.f32 1.442695, %v3147_v19  ;;  %v14138_v31 = vadd.f32 %v10866_v54, %v4038_v26  ;;  %v18044_v0 = vpack.c.bf16 %v18042_v24, %v18043_v40  ;;  %v18045_v53 = vld [vmem:[#allocation20_spill] sm:$0xff] }
 0x39a   : > { %18040 = vst [vmem:[#allocation162_spill] sm:$0xff] %v14133_v9  ;;  %3526 = vmatmul.mubr.f32.gmra.mrb[114].mxu0 %v14114_v38  ;;  %4195 = vmax.xlane.f32.xlu1 %v4194_v25  ;;  %v10061_v62 = vpop.eup %10060  ;;  %v3060_v22 = vpop.xlane.xlu0 %3059  ;;  %v10867_v25 = vld [vmem:[%s11296_s25 + $0xb0] sm:$0xff] }
 0x39b   : > { %18041 = vst [vmem:[#allocation163_spill] sm:$0xff] %v14138_v31  ;;  %9696 = vmatpush1.bf16.msra.mxu0 %v18044_v0  ;;  %10070 = vpow2.f32 %v3220_v51  ;;  %3530 = vmatprep.mubr.f32.mxu0 %v10061_v62  ;;  %v3148_v19 = vsub.f32 %v13488_v32, %v3060_v22  ;;  %v3149_v52 = vsub.f32 %v18045_v53, %v3060_v22  ;;  %v4042_v44 = vpop.f32.mrb[198].mxu1  ;;  %v18047_v53 = vld [vmem:[#allocation52_spill] sm:$0xff] }
 0x39c   : > { %9697 = vmatprep.subr.bf16.mxu0 %v17628_v29  ;;  %v4197_v26 = vmax.f32 %v14133_v9, %v14138_v31  ;;  %10072 = vpow2.f32 %v3222_v13  ;;  %v14149_v54 = vadd.f32 %v10867_v25, %v4042_v44  ;;  %v4044_v24 = vpop.f32.mrb[199].mxu1  ;;  %v14151_v40 = vadd.f32 %v10061_v62, %v10059_v11  ;;  %v18050_v44 = vld [vmem:[#allocation73_spill] sm:$0xff] }
 0x39d   : > { %v10063_v51 = vpop.eup %10062  ;;  %v3224_v0 = vmul.f32 1.442695, %v3148_v19  ;;  %v3226_v5 = vmul.f32 1.442695, %v3149_v52  ;;  %v14154_v32 = vadd.f32 %v10868_v47, %v4044_v24  ;;  %v18049_v31 = vpack.c.bf16 %v18047_v53, %v18048_v34  ;;  %v18051_v25 = vld [vmem:[#allocation77_spill] sm:$0xff]  ;;  %v10869_v19 = vld [vmem:[%s11296_s25 + $0xc0] sm:$0xff] }
 0x39e   : > { %3531 = vmatmul.mubr.f32.gmra.mrb[116].mxu0 %v10059_v11  ;;  %4198 = vmax.xlane.f32.xlu0 %v4197_v26  ;;  %v10065_v22 = vpop.eup %10064  ;;  %v3063_v13 = vpop.xlane.xlu1 %3062  ;;  %v10870_v53 = vld [vmem:[%s11296_s25 + $0xc8] sm:$0xff] }
 0x39f   : > { %18046 = vst [vmem:[#allocation127_spill] sm:$0xff] %v14154_v32  ;;  %9699 = vmatpush1.bf16.msra.mxu0 %v18049_v31  ;;  %10074 = vpow2.f32 %v3224_v0  ;;  %v3150_v62 = vsub.f32 %v18050_v44, %v3063_v13  ;;  %v3151_v9 = vsub.f32 %v18051_v25, %v3063_v13  ;;  %3535 = vmatprep.mubr.f32.mxu0 %v10065_v22  ;;  %v4048_v11 = vpop.f32.mrb[200].mxu1  ;;  %v18054_v25 = vld [vmem:[#allocation58_spill] sm:$0xff] }
 0x3a0   : > { %9700 = vmatprep.subr.bf16.mxu0 %v17628_v29  ;;  %v4200_v47 = vmax.f32 %v14149_v54, %v14154_v32  ;;  %10076 = vpow2.f32 %v3226_v5  ;;  %v14165_v52 = vadd.f32 %v10869_v19, %v4048_v11  ;;  %v4050_v34 = vpop.f32.mrb[201].mxu1  ;;  %v14167_v31 = vadd.f32 %v10065_v22, %v10063_v51 }
 0x3a1   : > { %v10067_v26 = vpop.eup %10066  ;;  %v3228_v24 = vmul.f32 1.442695, %v3150_v62  ;;  %v3230_v0 = vmul.f32 1.442695, %v3151_v9  ;;  %v14170_v13 = vadd.f32 %v10870_v53, %v4050_v34  ;;  %v18056_v32 = vpack.c.bf16 %v18054_v25, %v18055_v43  ;;  %v10872_v34 = vld [vmem:[%s11296_s25 + $0xd8] sm:$0xff] }
 0x3a2   : > { %18052 = vst [vmem:[#allocation126_spill] sm:$0xff] %v14165_v52  ;;  %3536 = vmatmul.mubr.f32.gmra.mrb[118].mxu0 %v10063_v51  ;;  %4201 = vmax.xlane.f32.xlu1 %v4200_v47  ;;  %v10069_v44 = vpop.eup %10068  ;;  %v3066_v5 = vpop.xlane.xlu0 %3065  ;;  %v10871_v47 = vld [vmem:[%s11296_s25 + $0xd0] sm:$0xff] }
 0x3a3   : > { %18053 = vst [vmem:[#allocation29_spill] sm:$0xff] %v14170_v13  ;;  %9702 = vmatpush1.bf16.msra.mxu0 %v18056_v32  ;;  %10078 = vpow2.f32 %v3228_v24  ;;  %3540 = vmatprep.mubr.f32.mxu0 %v10069_v44  ;;  %v4054_v22 = vpop.f32.mrb[202].mxu1  ;;  %v4203_v9 = vmax.f32 %v14165_v52, %v14170_v13  ;;  %v14178_v51 = vadd.f32 %v10069_v44, %v10067_v26  ;;  %v18058_v13 = vld [vmem:[#allocation64_spill] sm:$0xff] }
 0x3a4   : > { %9703 = vmatprep.subr.bf16.mxu0 %v17628_v29  ;;  %10080 = vpow2.f32 %v3230_v0  ;;  %v3152_v62 = vsub.f32 %v13516_v60, %v3066_v5  ;;  %v3153_v11 = vsub.f32 %v13520_v3, %v3066_v5  ;;  %v14183_v43 = vadd.f32 %v10871_v47, %v4054_v22  ;;  %v4056_v32 = vpop.f32.mrb[203].mxu1  ;;  %v18059_v0 = vld [vmem:[#allocation63_spill] sm:$0xff] }
 0x3a5   : > { %v10071_v19 = vpop.eup %10070  ;;  %v14186_v24 = vadd.f32 %v10872_v34, %v4056_v32  ;;  %4204 = vmax.xlane.f32.xlu0 %v4203_v9  ;;  %v18060_v52 = vpack.c.bf16 %v18058_v13, %v18059_v0  ;;  %v10874_v47 = vld [vmem:[%s11296_s25 + $0xe8] sm:$0xff] }
 0x3a6   : > { %3541 = vmatmul.mubr.f32.gmra.mrb[120].mxu0 %v10067_v26  ;;  %v10073_v53 = vpop.eup %10072  ;;  %v3232_v25 = vmul.f32 1.442695, %v3152_v62  ;;  %v3234_v44 = vmul.f32 1.442695, %v3153_v11  ;;  %v3069_v60 = vpop.xlane.xlu1 %3068  ;;  %v10873_v62 = vld [vmem:[%s11296_s25 + $0xe0] sm:$0xff] }
 0x3a7   : > { %18057 = vst [vmem:[#allocation165_spill] sm:$0xff] %v14186_v24  ;;  %9705 = vmatpush1.bf16.msra.mxu0 %v18060_v52  ;;  %3545 = vmatprep.mubr.f32.mxu0 %v10073_v53  ;;  %v4060_v3 = vpop.f32.mrb[204].mxu1  ;;  %v4206_v26 = vmax.f32 %v14183_v43, %v14186_v24  ;;  %v14194_v5 = vadd.f32 %v10073_v53, %v10071_v19  ;;  %v18063_v24 = vld [vmem:[#allocation71_spill] sm:$0xff] }
 0x3a8   : > { %9706 = vmatprep.subr.bf16.mxu0 %v17628_v29  ;;  %10082 = vpow2.f32 %v3232_v25  ;;  %v3154_v22 = vsub.f32 %v13530_v23, %v3069_v60  ;;  %v3155_v9 = vsub.f32 %v13539_v6, %v3069_v60  ;;  %v14199_v11 = vadd.f32 %v10873_v62, %v4060_v3  ;;  %v4062_v52 = vpop.f32.mrb[205].mxu1  ;;  %v18062_v25 = vld [vmem:[#allocation72_spill] sm:$0xff] }
 0x3a9   : > { %v10075_v13 = vpop.eup %10074  ;;  %10084 = vpow2.f32 %v3234_v44  ;;  %v14202_v32 = vadd.f32 %v10874_v47, %v4062_v52  ;;  %4207 = vmax.xlane.f32.xlu1 %v4206_v26  ;;  %v18064_v23 = vpack.c.bf16 %v18062_v25, %v18063_v24  ;;  %v10876_v52 = vld [vmem:[%s11296_s25 + $0xf8] sm:$0xff] }
 0x3aa   : > { %3546 = vmatmul.mubr.f32.gmra.mrb[122].mxu0 %v10071_v19  ;;  %v10077_v34 = vpop.eup %10076  ;;  %v3236_v53 = vmul.f32 1.442695, %v3154_v22  ;;  %v3238_v0 = vmul.f32 1.442695, %v3155_v9  ;;  %v3072_v6 = vpop.xlane.xlu0 %3071  ;;  %v10875_v22 = vld [vmem:[%s11296_s25 + $0xf0] sm:$0xff] }
 0x3ab   : > { %18061 = vst [vmem:[#allocation166_spill] sm:$0xff] %v14202_v32  ;;  %9708 = vmatpush1.bf16.msra.mxu0 %v18064_v23  ;;  %3550 = vmatprep.mubr.f32.mxu0 %v10077_v34  ;;  %v4066_v60 = vpop.f32.mrb[206].mxu1  ;;  %v4209_v19 = vmax.f32 %v14199_v11, %v14202_v32  ;;  %v14210_v44 = vadd.f32 %v10077_v34, %v10075_v13  ;;  %v18067_v32 = vld [vmem:[#allocation80_spill] sm:$0xff] }
 0x3ac   : > { %9709 = vmatprep.subr.bf16.mxu0 %v17628_v29  ;;  %10086 = vpow2.f32 %v3236_v53  ;;  %v3156_v3 = vsub.f32 %v13550_v58, %v3072_v6  ;;  %v3157_v26 = vsub.f32 %v13559_v50, %v3072_v6  ;;  %v14215_v9 = vadd.f32 %v10875_v22, %v4066_v60  ;;  %v4068_v24 = vpop.f32.mrb[207].mxu1  ;;  %v18066_v53 = vld [vmem:[#allocation81_spill] sm:$0xff]  ;;  %v10878_v22 = vld [vmem:[%s11296_s25 + $0x108] sm:$0xff] }
 0x3ad   : > { %v10079_v62 = vpop.eup %10078  ;;  %10088 = vpow2.f32 %v3238_v0  ;;  %v14218_v47 = vadd.f32 %v10876_v52, %v4068_v24  ;;  %4210 = vmax.xlane.f32.xlu0 %v4209_v19  ;;  %v18068_v58 = vpack.c.bf16 %v18066_v53, %v18067_v32 }
 0x3ae   : > { %3551 = vmatmul.mubr.f32.gmra.mrb[124].mxu0 %v10075_v13  ;;  %v10081_v25 = vpop.eup %10080  ;;  %v3240_v34 = vmul.f32 1.442695, %v3156_v3  ;;  %v3242_v23 = vmul.f32 1.442695, %v3157_v26  ;;  %v3075_v50 = vpop.xlane.xlu1 %3074  ;;  %v10877_v3 = vld [vmem:[%s11296_s25 + $0x100] sm:$0xff] }
 0x3af   : > { %18065 = vst [vmem:[#allocation133_spill] sm:$0xff] %v14218_v47  ;;  %9711 = vmatpush1.bf16.msra.mxu0 %v18068_v58  ;;  %3555 = vmatprep.mubr.f32.mxu0 %v10081_v25  ;;  %v4072_v6 = vpop.f32.mrb[208].mxu1  ;;  %v4212_v13 = vmax.f32 %v14215_v9, %v14218_v47  ;;  %v14226_v0 = vadd.f32 %v10081_v25, %v10079_v62  ;;  %v18070_v58 = vld [vmem:[#allocation90_spill] sm:$0xff] }
 0x3b0   : > { %9712 = vmatprep.subr.bf16.mxu0 %v17628_v29  ;;  %10090 = vpow2.f32 %v3240_v34  ;;  %v3158_v60 = vsub.f32 %v13570_v41, %v3075_v50  ;;  %v3159_v19 = vsub.f32 %v13579_v46, %v3075_v50  ;;  %v14231_v26 = vadd.f32 %v10877_v3, %v4072_v6  ;;  %v4074_v32 = vpop.f32.mrb[209].mxu1  ;;  %v18071_v34 = vld [vmem:[#allocation89_spill] sm:$0xff] }
 0x3b1   : > { %10092 = vpow2.f32 %v3242_v23  ;;  %v14234_v24 = vadd.f32 %v10878_v22, %v4074_v32  ;;  %4213 = vmax.xlane.f32.xlu1 %v4212_v13  ;;  %v18072_v47 = vpack.c.bf16 %v18070_v58, %v18071_v34  ;;  %v10879_v13 = vld [vmem:[%s11296_s25 + $0x110] sm:$0xff]  ;;  %v18073_v34 = vld [vmem:[#allocation98_spill] sm:$0xff] }
 0x3b2   : > { %3556 = vmatmul.mubr.f32.gmra.mrb[126].mxu0 %v10079_v62  ;;  %v10083_v52 = vpop.eup %10082  ;;  %v3244_v53 = vmul.f32 1.442695, %v3158_v60  ;;  %v3246_v25 = vmul.f32 1.442695, %v3159_v19  ;;  %v3078_v46 = vpop.xlane.xlu0 %3077 }
 0x3b3   : > { %18069 = vst [vmem:[#allocation132_spill] sm:$0xff] %v14234_v24  ;;  %9714 = vmatpush1.bf16.msra.mxu0 %v18072_v47  ;;  %v10085_v41 = vpop.eup %10084  ;;  %v4078_v50 = vpop.f32.mrb[210].mxu1  ;;  %v4215_v62 = vmax.f32 %v14231_v26, %v14234_v24  ;;  %v3160_v23 = vsub.f32 %v13590_v8, %v3078_v46  ;;  %v3161_v6 = vsub.f32 %v13599_v20, %v3078_v46  ;;  %v10880_v47 = vld [vmem:[%s11296_s25 + $0x118] sm:$0xff] }
 0x3b4   : > { %9715 = vmatprep.subr.bf16.mxu0 %v17628_v29  ;;  %10094 = vpow2.f32 %v3244_v53  ;;  %3560 = vmatprep.mubr.f32.mxu0 %v10085_v41  ;;  %v14245_v60 = vadd.f32 %v10879_v13, %v4078_v50  ;;  %v4080_v19 = vpop.f32.mrb[211].mxu1  ;;  %v14250_v32 = vadd.f32 %v10085_v41, %v10083_v52  ;;  %v18074_v8 = vld [vmem:[#allocation97_spill] sm:$0xff] }
 0x3b5   : > { %10096 = vpow2.f32 %v3246_v25  ;;  %v14248_v3 = vadd.f32 %v10880_v47, %v4080_v19  ;;  %4216 = vmax.xlane.f32.xlu0 %v4215_v62  ;;  %v3248_v53 = vmul.f32 1.442695, %v3160_v23  ;;  %v3250_v58 = vmul.f32 1.442695, %v3161_v6  ;;  %v10881_v62 = vld [vmem:[%s11296_s25 + $0x120] sm:$0xff] }
 0x3b6   : > { %3561 = vmatmul.mubr.f32.gmra.mrb[128].mxu0 %v10083_v52  ;;  %v10087_v22 = vpop.eup %10086  ;;  %v18075_v24 = vpack.c.bf16 %v18073_v34, %v18074_v8  ;;  %v3081_v46 = vpop.xlane.xlu1 %3080  ;;  %v18079_v8 = vld [vmem:[#allocation105_spill] sm:$0xff] }
 0x3b7   : > { %v10089_v20 = vpop.eup %10088  ;;  %v4084_v25 = vpop.f32.mrb[212].mxu1  ;;  %v4218_v50 = vmax.f32 %v14245_v60, %v14248_v3  ;;  %10098 = vpow2.f32 %v3248_v53  ;;  %v3162_v52 = vsub.f32 %v13610_v1, %v3081_v46  ;;  %v3163_v41 = vsub.f32 %v13619_v28, %v3081_v46  ;;  %v18078_v1 = vld [vmem:[#allocation106_spill] sm:$0xff] }
 0x3b8   : > { %9717 = vmatpush1.bf16.msra.mxu0 %v18075_v24  ;;  %3565 = vmatprep.mubr.f32.mxu0 %v10089_v20  ;;  %v14261_v23 = vadd.f32 %v10881_v62, %v4084_v25  ;;  %v4086_v6 = vpop.f32.mrb[213].mxu1  ;;  %10100 = vpow2.f32 %v3250_v58  ;;  %v10882_v24 = vld [vmem:[%s11296_s25 + $0x128] sm:$0xff]  ;;  %v14266_v19 = vadd.f32 %v10089_v20, %v10087_v22  ;;  %v18080_v28 = vpack.c.bf16 %v18078_v1, %v18079_v8 }
 0x3b9   : > { %9718 = vmatprep.subr.bf16.mxu0 %v17628_v29  ;;  %v14264_v13 = vadd.f32 %v10882_v24, %v4086_v6  ;;  %4219 = vmax.xlane.f32.xlu1 %v4218_v50  ;;  %v3252_v53 = vmul.f32 1.442695, %v3162_v52  ;;  %v3254_v34 = vmul.f32 1.442695, %v3163_v41  ;;  %v10883_v50 = vld [vmem:[%s11296_s25 + $0x130] sm:$0xff]  ;;  %v10884_v6 = vld [vmem:[%s11296_s25 + $0x138] sm:$0xff] }
 0x3ba   : > { %18076 = vst [vmem:[#allocation28_spill] sm:$0xff] %v14261_v23  ;;  %3566 = vmatmul.mubr.f32.gmra.mrb[130].mxu0 %v10087_v22  ;;  %v10091_v47 = vpop.eup %10090  ;;  %v3084_v58 = vpop.xlane.xlu0 %3083 }
 0x3bb   : > { %18077 = vst [vmem:[#allocation169_spill] sm:$0xff] %v14264_v13  ;;  %v10093_v46 = vpop.eup %10092  ;;  %v4090_v25 = vpop.f32.mrb[214].mxu1  ;;  %v4221_v62 = vmax.f32 %v14261_v23, %v14264_v13  ;;  %10102 = vpow2.f32 %v3252_v53  ;;  %v3164_v22 = vsub.f32 %v13630_v12, %v3084_v58  ;;  %v3165_v20 = vsub.f32 %v13639_v39, %v3084_v58  ;;  %v18081_v13 = vld [vmem:[#allocation115_spill] sm:$0xff]  ;;  %v18082_v12 = vld [vmem:[#allocation114_spill] sm:$0xff] }
 0x3bc   : > { %9720 = vmatpush1.bf16.msra.mxu0 %v18080_v28  ;;  %3570 = vmatprep.mubr.f32.mxu0 %v10093_v46  ;;  %v14277_v52 = vadd.f32 %v10883_v50, %v4090_v25  ;;  %v4092_v41 = vpop.f32.mrb[215].mxu1  ;;  %10104 = vpow2.f32 %v3254_v34  ;;  %v14282_v1 = vadd.f32 %v10093_v46, %v10091_v47  ;;  %v18083_v23 = vpack.c.bf16 %v18081_v13, %v18082_v12  ;;  %v18086_v12 = vld [vmem:[#allocation123_spill] sm:$0xff] }
 0x3bd   : > { %9721 = vmatprep.subr.bf16.mxu0 %v17628_v29  ;;  %v14280_v24 = vadd.f32 %v10884_v6, %v4092_v41  ;;  %4222 = vmax.xlane.f32.xlu0 %v4221_v62  ;;  %v3256_v53 = vmul.f32 1.442695, %v3164_v22  ;;  %v3258_v28 = vmul.f32 1.442695, %v3165_v20  ;;  %v10885_v62 = vld [vmem:[%s11296_s25 + $0x140] sm:$0xff] }
 0x3be   : > { %3571 = vmatmul.mubr.f32.gmra.mrb[132].mxu0 %v10091_v47  ;;  %v10095_v8 = vpop.eup %10094 }
 0x3bf   : > { %v10097_v39 = vpop.eup %10096  ;;  %v3087_v58 = vpop.xlane.xlu1 %3086  ;;  %v4224_v25 = vmax.f32 %v14277_v52, %v14280_v24  ;;  %10106 = vpow2.f32 %v3256_v53 }
 0x3c0   : > { %9723 = vmatpush1.bf16.msra.mxu0 %v18083_v23  ;;  %v4096_v34 = vpop.f32.mrb[216].mxu1  ;;  %v3166_v47 = vsub.f32 %v13650_v48, %v3087_v58  ;;  %v3167_v46 = vsub.f32 %v13659_v10, %v3087_v58  ;;  %3575 = vmatprep.mubr.f32.mxu0 %v10097_v39  ;;  %10108 = vpow2.f32 %v3258_v28  ;;  %v10886_v23 = vld [vmem:[%s11296_s25 + $0x148] sm:$0xff]  ;;  %v14298_v50 = vadd.f32 %v10097_v39, %v10095_v8  ;;  %v18085_v48 = vld [vmem:[#allocation124_spill] sm:$0xff] }
 0x3c1   : > { %9724 = vmatprep.subr.bf16.mxu0 %v17628_v29  ;;  %v14293_v22 = vadd.f32 %v10885_v62, %v4096_v34  ;;  %v4098_v13 = vpop.f32.mrb[217].mxu1  ;;  %4225 = vmax.xlane.f32.xlu1 %v4224_v25  ;;  %v10099_v41 = vpop.eup %10098  ;;  %v18087_v10 = vpack.c.bf16 %v18085_v48, %v18086_v12 }
 0x3c2   : > { %3576 = vmatmul.mubr.f32.gmra.mrb[134].mxu0 %v10095_v8  ;;  %v14296_v20 = vadd.f32 %v10886_v23, %v4098_v13  ;;  %18084 = vst [vmem:[#allocation170_spill] sm:$0xff] %v14298_v50  ;;  %v3260_v6 = vmul.f32 1.442695, %v3166_v47  ;;  %v3262_v53 = vmul.f32 1.442695, %v3167_v46  ;;  %v10101_v58 = vpop.eup %10100  ;;  %v3328_v8 = vadd.f32 %v14101_v61, %v14095_v15  ;;  %v10887_v47 = vld [vmem:[%s11296_s25 + $0x150] sm:$0xff] }
 0x3c3   : > { %v3090_v28 = vpop.xlane.xlu0 %3089  ;;  %v4102_v34 = vpop.f32.mrb[218].mxu1  ;;  %3580 = vmatprep.mubr.f32.mxu0 %v10101_v58  ;;  %v10888_v23 = vld [vmem:[%s11296_s25 + $0x158] sm:$0xff]  ;;  %v14316_v12 = vadd.f32 %v10101_v58, %v10099_v41 }
 0x3c4   : > { %9726 = vmatpush1.bf16.msra.mxu0 %v18087_v10  ;;  %v4227_v62 = vmax.f32 %v14293_v22, %v14296_v20  ;;  %10110 = vpow2.f32 %v3260_v6  ;;  %v3168_v39 = vsub.f32 %v13670_v30, %v3090_v28  ;;  %v3169_v25 = vsub.f32 %v13679_v57, %v3090_v28  ;;  %v4104_v13 = vpop.f32.mrb[219].mxu1  ;;  %v18088_v10 = vld [vmem:[#allocation130_spill] sm:$0xff]  ;;  %v18089_v30 = vld [vmem:[#allocation129_spill] sm:$0xff] }
 0x3c5   : > { %9727 = vmatprep.subr.bf16.mxu0 %v17628_v29  ;;  %v14311_v46 = vadd.f32 %v10887_v47, %v4102_v34  ;;  %10112 = vpow2.f32 %v3262_v53  ;;  %v14314_v48 = vadd.f32 %v10888_v23, %v4104_v13  ;;  %v10103_v15 = vpop.eup %10102  ;;  %v18090_v50 = vpack.c.bf16 %v18088_v10, %v18089_v30  ;;  %3329 = vadd.xlane.f32.xlu1 %v3328_v8  ;;  %v10890_v8 = vld [vmem:[%s11296_s25 + $0x168] sm:$0xff] }
 0x3c6   : > { %3581 = vmatmul.mubr.f32.gmra.mrb[136].mxu0 %v10099_v41  ;;  %4228 = vmax.xlane.f32.xlu0 %v4227_v62  ;;  %v3264_v61 = vmul.f32 1.442695, %v3168_v39  ;;  %v3266_v6 = vmul.f32 1.442695, %v3169_v25  ;;  %v10105_v57 = vpop.eup %10104  ;;  %v10889_v62 = vld [vmem:[%s11296_s25 + $0x160] sm:$0xff] }
 0x3c7   : > { %v3093_v28 = vpop.xlane.xlu1 %3092  ;;  %v4108_v53 = vpop.f32.mrb[220].mxu1  ;;  %v4230_v34 = vmax.f32 %v14311_v46, %v14314_v48  ;;  %3585 = vmatprep.mubr.f32.mxu0 %v10105_v57  ;;  %v14333_v47 = vadd.f32 %v10105_v57, %v10103_v15 }
 0x3c8   : > { %9729 = vmatpush1.bf16.msra.mxu0 %v18090_v50  ;;  %10114 = vpow2.f32 %v3264_v61  ;;  %v3170_v41 = vsub.f32 %v13690_v59, %v3093_v28  ;;  %v3171_v58 = vsub.f32 %v13699_v14, %v3093_v28  ;;  %v14327_v39 = vadd.f32 %v10889_v62, %v4108_v53  ;;  %v4110_v50 = vpop.f32.mrb[221].mxu1  ;;  %v18091_v61 = vld [vmem:[#allocation136_spill] sm:$0xff]  ;;  %v18092_v14 = vld [vmem:[#allocation135_spill] sm:$0xff]  ;;  %v10892_v62 = vld [vmem:[%s11296_s25 + $0x178] sm:$0xff] }
 0x3c9   : > { %9730 = vmatprep.subr.bf16.mxu0 %v17628_v29  ;;  %10116 = vpow2.f32 %v3266_v6  ;;  %v14330_v25 = vadd.f32 %v10890_v8, %v4110_v50  ;;  %v10107_v13 = vpop.eup %10106  ;;  %v18093_v10 = vpack.c.bf16 %v18091_v61, %v18092_v14  ;;  %4231 = vmax.xlane.f32.xlu1 %v4230_v34  ;;  %v18095_v61 = vld [vmem:[#allocation142_spill] sm:$0xff] }
 0x3ca   : > { %3586 = vmatmul.mubr.f32.gmra.mrb[138].mxu0 %v10103_v15  ;;  %2202 = vadd.xlane.f32.xlu0 %v13533_v45  ;;  %v3268_v23 = vmul.f32 1.442695, %v3170_v41  ;;  %v3270_v59 = vmul.f32 1.442695, %v3171_v58  ;;  %v10109_v30 = vpop.eup %10108  ;;  %v3331_v15 = vadd.f32 %v14121_v18, %v14114_v38  ;;  %v10891_v41 = vld [vmem:[%s11296_s25 + $0x170] sm:$0xff] }
 0x3cb   : > { %v3096_v6 = vpop.xlane.xlu0 %3095  ;;  %v4114_v28 = vpop.f32.mrb[222].mxu1  ;;  %v4233_v45 = vmax.f32 %v14327_v39, %v14330_v25  ;;  %3590 = vmatprep.mubr.f32.mxu0 %v10109_v30  ;;  %v14351_v8 = vadd.f32 %v10109_v30, %v10107_v13 }
 0x3cc   : > { %9732 = vmatpush1.bf16.msra.mxu0 %v18093_v10  ;;  %10118 = vpow2.f32 %v3268_v23  ;;  %v3172_v57 = vsub.f32 %v13710_v49, %v3096_v6  ;;  %v3173_v53 = vsub.f32 %v13719_v36, %v3096_v6  ;;  %v14346_v34 = vadd.f32 %v10891_v41, %v4114_v28  ;;  %v4116_v58 = vpop.f32.mrb[223].mxu1  ;;  %v18096_v49 = vld [vmem:[#allocation141_spill] sm:$0xff]  ;;  %v10893_v28 = vld [vmem:[%s11296_s25 + $0x180] sm:$0xff] }
 0x3cd   : > { %9733 = vmatprep.subr.bf16.mxu0 %v17628_v29  ;;  %10120 = vpow2.f32 %v3270_v59  ;;  %v14349_v50 = vadd.f32 %v10892_v62, %v4116_v58  ;;  %18094 = vst [vmem:[#allocation139_spill] sm:$0xff] %v14351_v8  ;;  %v18097_v14 = vpack.c.bf16 %v18095_v61, %v18096_v49  ;;  %3332 = vadd.xlane.f32.xlu1 %v3331_v15  ;;  %v10894_v15 = vld [vmem:[%s11296_s25 + $0x188] sm:$0xff] }
 0x3ce   : > { %3591 = vmatmul.mubr.f32.gmra.mrb[140].mxu0 %v10107_v13  ;;  %4234 = vmax.xlane.f32.xlu0 %v4233_v45  ;;  %v10111_v38 = vpop.eup %10110  ;;  %v3272_v18 = vmul.f32 1.442695, %v3172_v57  ;;  %v3274_v23 = vmul.f32 1.442695, %v3173_v53 }
 0x3cf   : > { %v10113_v36 = vpop.eup %10112  ;;  %v3099_v10 = vpop.xlane.xlu1 %3098  ;;  %v4236_v6 = vmax.f32 %v14346_v34, %v14349_v50 }
 0x3d0   : > { %9735 = vmatpush1.bf16.msra.mxu0 %v18097_v14  ;;  %v4120_v59 = vpop.f32.mrb[224].mxu1  ;;  %10122 = vpow2.f32 %v3272_v18  ;;  %v3174_v13 = vsub.f32 %v13732_v21, %v3099_v10  ;;  %v3175_v30 = vsub.f32 %v13739_v16, %v3099_v10  ;;  %3595 = vmatprep.mubr.f32.mxu0 %v10113_v36  ;;  %v14368_v41 = vadd.f32 %v10113_v36, %v10111_v38  ;;  %v18099_v18 = vld [vmem:[#allocation146_spill] sm:$0xff]  ;;  %v18100_v16 = vld [vmem:[#allocation145_spill] sm:$0xff]  ;;  %v10895_v36 = vld [vmem:[%s11296_s25 + $0x190] sm:$0xff] }
 0x3d1   : > { %9736 = vmatprep.subr.bf16.mxu0 %v17628_v29  ;;  %v14362_v45 = vadd.f32 %v10893_v28, %v4120_v59  ;;  %v4122_v57 = vpop.f32.mrb[225].mxu1  ;;  %10124 = vpow2.f32 %v3274_v23  ;;  %v18101_v61 = vpack.c.bf16 %v18099_v18, %v18100_v16  ;;  %4237 = vmax.xlane.f32.xlu1 %v4236_v6  ;;  %v10896_v6 = vld [vmem:[%s11296_s25 + $0x198] sm:$0xff] }
 0x3d2   : > { %3596 = vmatmul.mubr.f32.gmra.mrb[142].mxu0 %v10111_v38  ;;  %v14365_v53 = vadd.f32 %v10894_v15, %v4122_v57  ;;  %2205 = vadd.xlane.f32.xlu0 %v13553_v42  ;;  %18098 = vst [vmem:[#allocation138_spill] sm:$0xff] %v14368_v41  ;;  %v10115_v58 = vpop.eup %10114  ;;  %v3276_v62 = vmul.f32 1.442695, %v3174_v13  ;;  %v3278_v21 = vmul.f32 1.442695, %v3175_v30 }
 0x3d3   : > { %v10117_v49 = vpop.eup %10116  ;;  %v3102_v23 = vpop.xlane.xlu0 %3101 }
 0x3d4   : > { %9738 = vmatpush1.bf16.msra.mxu0 %v18101_v61  ;;  %v4126_v14 = vpop.f32.mrb[226].mxu1  ;;  %v4239_v10 = vmax.f32 %v14362_v45, %v14365_v53  ;;  %10126 = vpow2.f32 %v3276_v62  ;;  %3600 = vmatprep.mubr.f32.mxu0 %v10117_v49  ;;  %v3176_v42 = vsub.f32 %v13752_v63, %v3102_v23  ;;  %v3177_v38 = vsub.f32 %v13759_v55, %v3102_v23 }
 0x3d5   : > { %9787 = vmatprep.subr.bf16.mxu0 %v17628_v29  ;;  %v14379_v59 = vadd.f32 %v10895_v36, %v4126_v14  ;;  %v4128_v13 = vpop.f32.mrb[227].mxu1  ;;  %10128 = vpow2.f32 %v3278_v21  ;;  %v14384_v28 = vadd.f32 %v10117_v49, %v10115_v58  ;;  %3335 = vadd.xlane.f32.xlu1 %v14151_v40  ;;  %v10898_v14 = vld [vmem:[%s11296_s25 + $0x1a8] sm:$0xff] }
 0x3d6   : > { %3601 = vmatmul.mubr.f32.gmra.mrb[144].mxu0 %v10115_v58  ;;  %v14382_v30 = vadd.f32 %v10896_v6, %v4128_v13  ;;  %4240 = vmax.xlane.f32.xlu0 %v4239_v10  ;;  %v10119_v57 = vpop.eup %10118  ;;  %v3280_v15 = vmul.f32 1.442695, %v3176_v42  ;;  %v3282_v62 = vmul.f32 1.442695, %v3177_v38  ;;  %v10897_v58 = vld [vmem:[%s11296_s25 + $0x1a0] sm:$0xff] }
 0x3d7   : > { %18102 = vst [vmem:[#allocation172_spill] sm:$0xff] %v14384_v28  ;;  %v10121_v55 = vpop.eup %10120  ;;  %v3105_v63 = vpop.xlane.xlu1 %3104 }
 0x3d8   : > { %v4132_v18 = vpop.f32.mrb[228].mxu1  ;;  %v4242_v21 = vmax.f32 %v14379_v59, %v14382_v30  ;;  %10130 = vpow2.f32 %v3280_v15  ;;  %v3178_v16 = vsub.f32 %v13772_v56, %v3105_v63  ;;  %v3179_v61 = vsub.f32 %v13779_v37, %v3105_v63  ;;  %3605 = vmatprep.mubr.f32.mxu0 %v10121_v55 }
 0x3d9   : > { %v14392_v49 = vadd.f32 %v10897_v58, %v4132_v18  ;;  %v4134_v23 = vpop.f32.mrb[229].mxu1  ;;  %10132 = vpow2.f32 %v3282_v62  ;;  %v14398_v10 = vadd.f32 %v10121_v55, %v10119_v57  ;;  %v18104_v62 = vld [vmem:[#allocation25_spill] sm:$0xff] }
 0x3da   : > { %3606 = vmatmul.mubr.f32.gmra.mrb[146].mxu0 %v10119_v57  ;;  %v14395_v40 = vadd.f32 %v10898_v14, %v4134_v23  ;;  %2208 = vadd.xlane.f32.xlu0 %v13573_v33  ;;  %v10123_v42 = vpop.eup %10122  ;;  %v3284_v38 = vmul.f32 1.442695, %v3178_v16  ;;  %v3286_v56 = vmul.f32 1.442695, %v3179_v61  ;;  %v10899_v33 = vld [vmem:[%s11296_s25 + $0x1b0] sm:$0xff]  ;;  %v10900_v18 = vld [vmem:[%s11296_s25 + $0x1b8] sm:$0xff] }
 0x3db   : > { %18103 = vst [vmem:[#allocation173_spill] sm:$0xff] %v14398_v10  ;;  %4243 = vmax.xlane.f32.xlu1 %v4242_v21  ;;  %v10125_v37 = vpop.eup %10124  ;;  %v3108_v36 = vpop.xlane.xlu0 %3107 }
 0x3dc   : > { %v4138_v13 = vpop.f32.mrb[230].mxu1  ;;  %v4245_v6 = vmax.f32 %v14392_v49, %v14395_v40  ;;  %10134 = vpow2.f32 %v3284_v38  ;;  %3610 = vmatprep.mubr.f32.mxu0 %v10125_v37  ;;  %v3180_v15 = vsub.f32 %v13792_v17, %v3108_v36  ;;  %v3181_v63 = vsub.f32 %v18104_v62, %v3108_v36  ;;  %v18106_v17 = vld [vmem:[#allocation112_spill] sm:$0xff] }
 0x3dd   : > { %v14405_v57 = vadd.f32 %v10899_v33, %v4138_v13  ;;  %v4140_v55 = vpop.f32.mrb[231].mxu1  ;;  %10136 = vpow2.f32 %v3286_v56  ;;  %v14410_v16 = vadd.f32 %v10125_v37, %v10123_v42  ;;  %v18107_v62 = vld [vmem:[#allocation108_spill] sm:$0xff] }
 0x3de   : > { %3611 = vmatmul.mubr.f32.gmra.mrb[148].mxu0 %v10123_v42  ;;  %v14408_v21 = vadd.f32 %v10900_v18, %v4140_v55  ;;  %4246 = vmax.xlane.f32.xlu0 %v4245_v6  ;;  %v10127_v61 = vpop.eup %10126  ;;  %v3288_v58 = vmul.f32 1.442695, %v3180_v15  ;;  %v3290_v23 = vmul.f32 1.442695, %v3181_v63  ;;  %v10901_v42 = vld [vmem:[%s11296_s25 + $0x1c0] sm:$0xff]  ;;  %v10902_v15 = vld [vmem:[%s11296_s25 + $0x1c8] sm:$0xff] }
 0x3df   : > { %18105 = vst [vmem:[#allocation30_spill] sm:$0xff] %v14410_v16  ;;  %2211 = vadd.xlane.f32.xlu1 %v18106_v17  ;;  %v10129_v14 = vpop.eup %10128  ;;  %v3111_v36 = vpop.xlane.xlu1 %3110 }
 0x3e0   : > { %v4248_v38 = vmax.f32 %v14405_v57, %v14408_v21  ;;  %v4144_v56 = vpop.f32.mrb[232].mxu1  ;;  %10138 = vpow2.f32 %v3288_v58  ;;  %v3182_v13 = vsub.f32 %v13810_v35, %v3111_v36  ;;  %v3183_v33 = vsub.f32 %v18107_v62, %v3111_v36  ;;  %3615 = vmatprep.mubr.f32.mxu0 %v10129_v14  ;;  %v18109_v62 = vld [vmem:[#allocation10_spill] sm:$0xff] }
 0x3e1   : > { %v14418_v37 = vadd.f32 %v10901_v42, %v4144_v56  ;;  %v4146_v6 = vpop.f32.mrb[233].mxu1  ;;  %10140 = vpow2.f32 %v3290_v23  ;;  %v14424_v55 = vadd.f32 %v10129_v14, %v10127_v61 }
 0x3e2   : > { %3616 = vmatmul.mubr.f32.gmra.mrb[150].mxu0 %v10127_v61  ;;  %v14421_v63 = vadd.f32 %v10902_v15, %v4146_v6  ;;  %3338 = vadd.xlane.f32.xlu0 %v14167_v31  ;;  %v10131_v18 = vpop.eup %10130  ;;  %v3292_v58 = vmul.f32 1.442695, %v3182_v13  ;;  %v3294_v35 = vmul.f32 1.442695, %v3183_v33  ;;  %v18110_v6 = vld [vmem:[#allocation117_spill] sm:$0xff]  ;;  %v10903_v31 = vld [vmem:[%s11296_s25 + $0x1d0] sm:$0xff] }
 0x3e3   : > { %18108 = vst [vmem:[#allocation174_spill] sm:$0xff] %v14424_v55  ;;  %4249 = vmax.xlane.f32.xlu1 %v4248_v38  ;;  %v10133_v17 = vpop.eup %10132  ;;  %v4150_v23 = vpop.f32.mrb[234].mxu1  ;;  %v10904_v13 = vld [vmem:[%s11296_s25 + $0x1d8] sm:$0xff] }
 0x3e4   : > { %v4251_v36 = vmax.f32 %v14418_v37, %v14421_v63  ;;  %v3114_v56 = vpop.xlane.xlu0 %3113  ;;  %10142 = vpow2.f32 %v3292_v58  ;;  %3620 = vmatprep.mubr.f32.mxu0 %v10133_v17  ;;  %v14431_v61 = vadd.f32 %v10903_v31, %v4150_v23  ;;  %v4152_v14 = vpop.f32.mrb[235].mxu1  ;;  %v14436_v33 = vadd.f32 %v10133_v17, %v10131_v18 }
 0x3e5   : > { %v3184_v42 = vsub.f32 %v18109_v62, %v3114_v56  ;;  %v3185_v15 = vsub.f32 %v18110_v6, %v3114_v56  ;;  %10144 = vpow2.f32 %v3294_v35  ;;  %v14434_v38 = vadd.f32 %v10904_v13, %v4152_v14  ;;  %v18114_v6 = vld [vmem:[#allocation120_spill] sm:$0xff]  ;;  %v18117_v13 = vld [vmem:[#allocation22_spill] sm:$0xff] }
 0x3e6   : > { %18111 = vst [vmem:[#allocation175_spill] sm:$0xff] %v14431_v61  ;;  %3621 = vmatmul.mubr.f32.gmra.mrb[152].mxu0 %v10131_v18  ;;  %4252 = vmax.xlane.f32.xlu0 %v4251_v36  ;;  %18113 = vst [vmem:[#allocation32_spill] sm:$0xff] %v14436_v33  ;;  %v10135_v55 = vpop.eup %10134  ;;  %v18115_v36 = vld [vmem:[#allocation44_spill] sm:$0xff] }
 0x3e7   : > { %18112 = vst [vmem:[#allocation9_spill] sm:$0xff] %v14434_v38  ;;  %v3296_v58 = vmul.f32 1.442695, %v3184_v42  ;;  %v3298_v16 = vmul.f32 1.442695, %v3185_v15  ;;  %3341 = vadd.xlane.f32.xlu1 %v14178_v51  ;;  %v10137_v62 = vpop.eup %10136  ;;  %v4254_v56 = vmax.f32 %v14431_v61, %v14434_v38  ;;  %v14441_v23 = vpop.f32.mrb[48].mxu0 }
 0x3e8   : > { %v3117_v35 = vpop.xlane.xlu1 %3116  ;;  %3625 = vmatprep.mubr.f32.mxu0 %v10137_v62  ;;  %v2397_v17 = vpop.f32.mrb[49].mxu0  ;;  %v10905_v42 = vld [vmem:[%s11296_s25 + $0x1e0] sm:$0xff]  ;;  %v14449_v33 = vadd.f32 %v10137_v62, %v10135_v55  ;;  %v10908_v38 = vld [vmem:[%s11296_s25 + $0x1f8] sm:$0xff]  ;;  %v10914_v61 = vld [vmem:[%s11296_s25 + $0x28] sm:$0xff] }
 0x3e9   : > { %10146 = vpow2.f32 %v3296_v58  ;;  %v3186_v31 = vsub.f32 %v18114_v6, %v3117_v35  ;;  %v3187_v18 = vsub.f32 %v18115_v36, %v3117_v35  ;;  %v4156_v14 = vpop.f32.mrb[236].mxu1  ;;  %v10906_v6 = vld [vmem:[%s11296_s25 + $0x1e8] sm:$0xff] }
 0x3ea   : > { %10148 = vpow2.f32 %v3298_v16  ;;  %3626 = vmatmul.mubr.f32.gmra.mrb[154].mxu0 %v10135_v55  ;;  %v14446_v51 = vadd.f32 %v10905_v42, %v4156_v14  ;;  %v4158_v15 = vpop.f32.mrb[237].mxu1  ;;  %2214 = vadd.xlane.f32.xlu0 %v18117_v13  ;;  %18118 = vst [vmem:[#allocation8_spill] sm:$0xff] %v14449_v33  ;;  %v10139_v10 = vpop.eup %10138  ;;  %v18120_v55 = vld [vmem:[#allocation49_spill] sm:$0xff]  ;;  %v18121_v14 = vld [vmem:[#allocation56_spill] sm:$0xff] }
 0x3eb   : > { %v3300_v58 = vmul.f32 1.442695, %v3186_v31  ;;  %v3302_v28 = vmul.f32 1.442695, %v3187_v18  ;;  %v14452_v41 = vadd.f32 %v10906_v6, %v4158_v15  ;;  %4255 = vmax.xlane.f32.xlu1 %v4254_v56  ;;  %v10141_v35 = vpop.eup %10140  ;;  %v14454_v36 = vpop.f32.mrb[50].mxu0  ;;  %v10907_v15 = vld [vmem:[%s11296_s25 + $0x1f0] sm:$0xff] }
 0x3ec   : > { %18116 = vst [vmem:[#allocation35_spill] sm:$0xff] %v14446_v51  ;;  %v3120_v16 = vpop.xlane.xlu0 %3119  ;;  %3630 = vmatprep.mubr.f32.mxu0 %v10141_v35  ;;  %v2402_v18 = vpop.f32.mrb[51].mxu0  ;;  %v14463_v6 = vadd.f32 %v10141_v35, %v10139_v10  ;;  %v18126_v35 = vld [vmem:[#allocation55_spill] sm:$0xff] }
 0x3ed   : > { %18119 = vst [vmem:[#allocation176_spill] sm:$0xff] %v14452_v41  ;;  %10150 = vpow2.f32 %v3300_v58  ;;  %v4257_v17 = vmax.f32 %v14446_v51, %v14452_v41  ;;  %v3188_v62 = vsub.f32 %v18120_v55, %v3120_v16  ;;  %v3189_v31 = vsub.f32 %v18121_v14, %v3120_v16  ;;  %v4162_v42 = vpop.f32.mrb[238].mxu1  ;;  %v18125_v55 = vld [vmem:[#allocation82_spill] sm:$0xff] }
 0x3ee   : > { %10152 = vpow2.f32 %v3302_v28  ;;  %3631 = vmatmul.mubr.f32.gmra.mrb[156].mxu0 %v10139_v10  ;;  %v14461_v56 = vadd.f32 %v10907_v15, %v4162_v42  ;;  %v4164_v13 = vpop.f32.mrb[239].mxu1  ;;  %18123 = vst [vmem:[#allocation12_spill] sm:$0xff] %v14463_v6  ;;  %v10143_v58 = vpop.eup %10142 }
 0x3ef   : > { %v3304_v33 = vmul.f32 1.442695, %v3188_v62  ;;  %v3306_v8 = vmul.f32 1.442695, %v3189_v31  ;;  %v14466_v41 = vadd.f32 %v10908_v38, %v4164_v13  ;;  %4258 = vmax.xlane.f32.xlu0 %v4257_v17  ;;  %2217 = vadd.xlane.f32.xlu1 %v18125_v55  ;;  %v10145_v16 = vpop.eup %10144  ;;  %v14469_v14 = vpop.f32.mrb[52].mxu0  ;;  %v18127_v62 = vld [vmem:[#allocation62_spill] sm:$0xff] }
 0x3f0   : > { %18122 = vst [vmem:[#allocation177_spill] sm:$0xff] %v14461_v56  ;;  %v3123_v28 = vpop.xlane.xlu1 %3122  ;;  %3635 = vmatprep.mubr.f32.mxu0 %v10145_v16  ;;  %v2407_v42 = vpop.f32.mrb[53].mxu0  ;;  %v14476_v17 = vld [vmem:[%s11296_s25] sm:$0xff] }
 0x3f1   : > { %18124 = vst [vmem:[#allocation33_spill] sm:$0xff] %v14466_v41  ;;  %10154 = vpow2.f32 %v3304_v33  ;;  %v4260_v10 = vmax.f32 %v14461_v56, %v14466_v41  ;;  %v3190_v18 = vsub.f32 %v18126_v35, %v3123_v28  ;;  %v3191_v31 = vsub.f32 %v18127_v62, %v3123_v28  ;;  %v5103_v38 = vpop.f32.mrb[240].mxu1  ;;  %v14484_v56 = vld [vmem:[%s11296_s25 + $0x8] sm:$0xff] }
 0x3f2   : > { %10156 = vpow2.f32 %v3306_v8  ;;  %3636 = vmatmul.mubr.f32.gmra.mrb[158].mxu0 %v10143_v58  ;;  %v14479_v15 = vadd.f32 %v14476_v17, %v5103_v38  ;;  %v5105_v13 = vpop.f32.mrb[241].mxu1  ;;  %v14481_v33 = vadd.f32 %v10145_v16, %v10143_v58  ;;  %v3126_v62 = vpop.xlane.xlu0 %3125  ;;  %v18132_v16 = vld [vmem:[#allocation67_spill] sm:$0xff] }
 0x3f3   : > { %v10147_v55 = vpop.eup %10146  ;;  %v3308_v6 = vmul.f32 1.442695, %v3190_v18  ;;  %v3310_v41 = vmul.f32 1.442695, %v3191_v31  ;;  %v14487_v28 = vadd.f32 %v14484_v56, %v5105_v13  ;;  %3344 = vadd.xlane.f32.xlu0 %v14194_v5  ;;  %4261 = vmax.xlane.f32.xlu1 %v4260_v10  ;;  %v14490_v35 = vpop.f32.mrb[54].mxu0  ;;  %v3192_v18 = vsub.f32 %v18132_v16, %v3126_v62  ;;  %v18133_v31 = vld [vmem:[#allocation37_spill] sm:$0xff] }
 0x3f4   : > { %18128 = vst [vmem:[#allocation36_spill] sm:$0xff] %v14479_v15  ;;  %18129 = vst [vmem:[#allocation11_spill] sm:$0xff] %v14481_v33  ;;  %v10149_v8 = vpop.eup %10148  ;;  %v3193_v42 = vsub.f32 %v18133_v31, %v3126_v62  ;;  %v2412_v38 = vpop.f32.mrb[55].mxu0  ;;  %v14497_v5 = vld [vmem:[%s11296_s25 + $0x10] sm:$0xff] }
 0x3f5   : > { %18130 = vst [vmem:[#allocation31_spill] sm:$0xff] %v14487_v28  ;;  %18131 = vst [vmem:[#allocation178_spill] sm:$0xff] %v14490_v35  ;;  %10158 = vpow2.f32 %v3308_v6  ;;  %v5294_v58 = vmax.f32 %v14479_v15, %v14487_v28  ;;  %3640 = vmatprep.mubr.f32.mxu0 %v10149_v8  ;;  %v5109_v13 = vpop.f32.mrb[242].mxu1  ;;  %v14502_v6 = vadd.f32 %v10149_v8, %v10147_v55  ;;  %v3312_v35 = vmul.f32 1.442695, %v3192_v18  ;;  %v14505_v15 = vld [vmem:[%s11296_s25 + $0x18] sm:$0xff] }
 0x3f6   : > { %10160 = vpow2.f32 %v3310_v41  ;;  %3641 = vmatmul.mubr.f32.gmra.mrb[160].mxu0 %v10147_v55  ;;  %v14500_v10 = vadd.f32 %v14497_v5, %v5109_v13  ;;  %v5111_v33 = vpop.f32.mrb[243].mxu1  ;;  %v3314_v28 = vmul.f32 1.442695, %v3193_v42 }
 0x3f7   : > { %18135 = vst [vmem:[#allocation179_spill] sm:$0xff] %v14502_v6  ;;  %v10151_v51 = vpop.eup %10150  ;;  %v14508_v62 = vadd.f32 %v14505_v15, %v5111_v33  ;;  %5295 = vmax.xlane.f32.xlu0 %v5294_v58  ;;  %3347 = vadd.xlane.f32.xlu1 %v14210_v44  ;;  %v14511_v16 = vpop.f32.mrb[56].mxu0  ;;  %10162 = vpow2.f32 %v3312_v35  ;;  %v10913_v58 = vld [vmem:[%s11296_s25 + $0x20] sm:$0xff] }
 0x3f8   : > { %18134 = vst [vmem:[#allocation34_spill] sm:$0xff] %v14500_v10  ;;  %v10153_v41 = vpop.eup %10152  ;;  %18137 = vst [vmem:[#allocation180_spill] sm:$0xff] %v14511_v16  ;;  %v3129_v31 = vpop.xlane.xlu1 %3128  ;;  %10164 = vpow2.f32 %v3314_v28 }
 0x3f9   : > { %18136 = vst [vmem:[#allocation13_spill] sm:$0xff] %v14508_v62  ;;  %v5297_v55 = vmax.f32 %v14500_v10, %v14508_v62  ;;  %v3194_v8 = vsub.f32 %v13914_v7, %v3129_v31  ;;  %v3195_v18 = vsub.f32 %v13918_v2, %v3129_v31  ;;  %3645 = vmatprep.mubr.f32.mxu0 %v10153_v41  ;;  %v2417_v42 = vpop.f32.mrb[57].mxu0  ;;  %v5115_v33 = vpop.f32.mrb[244].mxu1  ;;  %v18141_v7 = vld [vmem:[#allocation85_spill] sm:$0xff] }
 0x3fa   : > { %3646 = vmatmul.mubr.f32.gmra.mrb[162].mxu0 %v10151_v51  ;;  %v14518_v44 = vadd.f32 %v10913_v58, %v5115_v33  ;;  %v5117_v38 = vpop.f32.mrb[245].mxu1  ;;  %v14520_v13 = vadd.f32 %v10153_v41, %v10151_v51  ;;  %v3132_v28 = vpop.xlane.xlu0 %3131  ;;  %v18143_v41 = vld [vmem:[#allocation75_spill] sm:$0xff]  ;;  %v10915_v58 = vld [vmem:[%s11296_s25 + $0x30] sm:$0xff]  ;;  %v10916_v10 = vld [vmem:[%s11296_s25 + $0x38] sm:$0xff] }
 0x3fb   : > { %v10155_v35 = vpop.eup %10154  ;;  %v3316_v6 = vmul.f32 1.442695, %v3194_v8  ;;  %v3318_v16 = vmul.f32 1.442695, %v3195_v18  ;;  %v14523_v62 = vadd.f32 %v10914_v61, %v5117_v38  ;;  %2220 = vadd.xlane.f32.xlu0 %v18141_v7  ;;  %5298 = vmax.xlane.f32.xlu1 %v5297_v55  ;;  %v14526_v31 = vpop.f32.mrb[58].mxu0  ;;  %v3196_v8 = vsub.f32 %v18143_v41, %v3132_v28  ;;  %v18144_v18 = vld [vmem:[#allocation74_spill] sm:$0xff] }
 0x3fc   : > { %18138 = vst [vmem:[#allocation181_spill] sm:$0xff] %v14518_v44  ;;  %18139 = vst [vmem:[#allocation16_spill] sm:$0xff] %v14520_v13  ;;  %v10157_v2 = vpop.eup %10156  ;;  %v3197_v42 = vsub.f32 %v18144_v18, %v3132_v28  ;;  %v2422_v33 = vpop.f32.mrb[59].mxu0  ;;  %v18148_v41 = vld [vmem:[#allocation121_spill] sm:$0xff] }
 0x3fd   : > { %18140 = vst [vmem:[#allocation182_spill] sm:$0xff] %v14523_v62  ;;  %18142 = vst [vmem:[#allocation183_spill] sm:$0xff] %v14526_v31  ;;  %10166 = vpow2.f32 %v3316_v6  ;;  %v5300_v51 = vmax.f32 %v14518_v44, %v14523_v62  ;;  %3650 = vmatprep.mubr.f32.mxu0 %v10157_v2  ;;  %v5121_v61 = vpop.f32.mrb[246].mxu1  ;;  %v14535_v7 = vadd.f32 %v10157_v2, %v10155_v35  ;;  %v3320_v13 = vmul.f32 1.442695, %v3196_v8  ;;  %v18150_v2 = vld [vmem:[#allocation151_spill] sm:$0xff] }
 0x3fe   : > { %10168 = vpow2.f32 %v3318_v16  ;;  %3651 = vmatmul.mubr.f32.gmra.mrb[164].mxu0 %v10155_v35  ;;  %v14533_v55 = vadd.f32 %v10915_v58, %v5121_v61  ;;  %v5123_v38 = vpop.f32.mrb[247].mxu1  ;;  %v3322_v31 = vmul.f32 1.442695, %v3197_v42  ;;  %v3135_v16 = vpop.xlane.xlu1 %3134  ;;  %v18151_v8 = vld [vmem:[#allocation84_spill] sm:$0xff] }
 0x3ff   : > { %18146 = vst [vmem:[#allocation185_spill] sm:$0xff] %v14535_v7  ;;  %v10159_v6 = vpop.eup %10158  ;;  %v14538_v62 = vadd.f32 %v10916_v10, %v5123_v38  ;;  %5301 = vmax.xlane.f32.xlu0 %v5300_v51  ;;  %2223 = vadd.xlane.f32.xlu1 %v18148_v41  ;;  %v14541_v18 = vpop.f32.mrb[60].mxu0  ;;  %10170 = vpow2.f32 %v3320_v13  ;;  %v3198_v33 = vsub.f32 %v18150_v2, %v3135_v16  ;;  %v10917_v51 = vld [vmem:[%s11296_s25 + $0x40] sm:$0xff]  ;;  %v10918_v13 = vld [vmem:[%s11296_s25 + $0x48] sm:$0xff] }
 0x400   : > { %18145 = vst [vmem:[#allocation184_spill] sm:$0xff] %v14533_v55  ;;  %v10161_v28 = vpop.eup %10160  ;;  %18149 = vst [vmem:[#allocation186_spill] sm:$0xff] %v14541_v18  ;;  %v3199_v42 = vsub.f32 %v18151_v8, %v3135_v16  ;;  %v2427_v61 = vpop.f32.mrb[61].mxu0  ;;  %10172 = vpow2.f32 %v3322_v31 }
 0x401   : > { %18147 = vst [vmem:[#allocation18_spill] sm:$0xff] %v14538_v62  ;;  %v5303_v35 = vmax.f32 %v14533_v55, %v14538_v62  ;;  %3655 = vmatprep.mubr.f32.mxu0 %v10161_v28  ;;  %v5127_v10 = vpop.f32.mrb[248].mxu1  ;;  %v10163_v41 = vpop.eup %10162  ;;  %v3324_v7 = vmul.f32 1.442695, %v3198_v33  ;;  %v14554_v16 = vadd.f32 %v10161_v28, %v10159_v6 }
 0x402   : > { %3656 = vmatmul.mubr.f32.gmra.mrb[166].mxu0 %v10159_v6  ;;  %v14548_v58 = vadd.f32 %v10917_v51, %v5127_v10  ;;  %v5129_v38 = vpop.f32.mrb[249].mxu1  ;;  %v3326_v18 = vmul.f32 1.442695, %v3199_v42  ;;  %v10165_v2 = vpop.eup %10164  ;;  %v18156_v42 = vld [vmem:[#allocation161_spill] sm:$0xff] }
 0x403   : > { %v14551_v44 = vadd.f32 %v10918_v13, %v5129_v38  ;;  %3350 = vadd.xlane.f32.xlu0 %v14226_v0  ;;  %5304 = vmax.xlane.f32.xlu1 %v5303_v35  ;;  %18154 = vst [vmem:[#allocation14_spill] sm:$0xff] %v14554_v16  ;;  %v4169_v31 = vpop.xlane.xlu0 %4168  ;;  %10174 = vpow2.f32 %v3324_v7  ;;  %v10919_v0 = vld [vmem:[%s11296_s25 + $0x50] sm:$0xff]  ;;  %v14565_v35 = vadd.f32 %v10165_v2, %v10163_v41 }
 0x404   : > { %18152 = vst [vmem:[#allocation187_spill] sm:$0xff] %v14548_v58  ;;  %v14556_v8 = vpop.f32.mrb[62].mxu0  ;;  %3660 = vmatprep.mubr.f32.mxu0 %v10165_v2  ;;  %v4263_v33 = vsub.f32 %v13962_v27, %v4169_v31  ;;  %v4264_v10 = vsub.f32 %v18156_v42, %v4169_v31  ;;  %v5133_v38 = vpop.f32.mrb[250].mxu1  ;;  %10176 = vpow2.f32 %v3326_v18  ;;  %v18161_v2 = vld [vmem:[#allocation38_spill] sm:$0xff] }
 0x405   : > { %18153 = vst [vmem:[#allocation17_spill] sm:$0xff] %v14551_v44  ;;  %18155 = vst [vmem:[#allocation188_spill] sm:$0xff] %v14556_v8  ;;  %v5306_v61 = vmax.f32 %v14548_v58, %v14551_v44  ;;  %v2432_v51 = vpop.f32.mrb[63].mxu0  ;;  %v14563_v6 = vadd.f32 %v10919_v0, %v5133_v38  ;;  %v5135_v28 = vpop.f32.mrb[251].mxu1  ;;  %v10920_v8 = vld [vmem:[%s11296_s25 + $0x58] sm:$0xff]  ;;  %v18190_v58 = vld [vmem:[#allocation48_spill] sm:$0xff] }
 0x406   : > { %3661 = vmatmul.mubr.f32.gmra.mrb[168].mxu0 %v10163_v41  ;;  %18158 = vst [vmem:[#allocation190_spill] sm:$0xff] %v14565_v35  ;;  %v4327_v13 = vmul.f32 1.442695, %v4263_v33  ;;  %v4329_v16 = vmul.f32 1.442695, %v4264_v10  ;;  %v14568_v44 = vadd.f32 %v10920_v8, %v5135_v28  ;;  %v4172_v18 = vpop.xlane.xlu1 %4171  ;;  %v18162_v33 = vld [vmem:[#allocation154_spill] sm:$0xff] }
 0x407   : > { %18157 = vst [vmem:[#allocation189_spill] sm:$0xff] %v14563_v6  ;;  %v10167_v7 = vpop.eup %10166  ;;  %5307 = vmax.xlane.f32.xlu0 %v5306_v61  ;;  %3353 = vadd.xlane.f32.xlu1 %v14250_v32  ;;  %v4265_v42 = vsub.f32 %v18161_v2, %v4172_v18  ;;  %v4266_v10 = vsub.f32 %v18162_v33, %v4172_v18  ;;  %v10921_v61 = vld [vmem:[%s11296_s25 + $0x60] sm:$0xff]  ;;  %v18166_v2 = vld [vmem:[#allocation21_spill] sm:$0xff] }
 0x408   : > { %18159 = vst [vmem:[#allocation19_spill] sm:$0xff] %v14568_v44  ;;  %v10169_v27 = vpop.eup %10168  ;;  %v14571_v31 = vpop.f32.mrb[64].mxu0  ;;  %10178 = vpow2.f32 %v4327_v13  ;;  %v5309_v41 = vmax.f32 %v14563_v6, %v14568_v44  ;;  %v10924_v6 = vld [vmem:[%s11296_s25 + $0x78] sm:$0xff] }
 0x409   : > { %18160 = vst [vmem:[#allocation191_spill] sm:$0xff] %v14571_v31  ;;  %3665 = vmatprep.mubr.f32.mxu0 %v10169_v27  ;;  %v2437_v51 = vpop.f32.mrb[65].mxu0  ;;  %v5139_v8 = vpop.f32.mrb[252].mxu1  ;;  %10180 = vpow2.f32 %v4329_v16  ;;  %v14580_v0 = vadd.f32 %v10169_v27, %v10167_v7  ;;  %v4331_v13 = vmul.f32 1.442695, %v4265_v42  ;;  %v10922_v31 = vld [vmem:[%s11296_s25 + $0x68] sm:$0xff] }
 0x40a   : > { %3666 = vmatmul.mubr.f32.gmra.mrb[170].mxu0 %v10167_v7  ;;  %v14578_v32 = vadd.f32 %v10921_v61, %v5139_v8  ;;  %v5141_v38 = vpop.f32.mrb[253].mxu1  ;;  %v10171_v28 = vpop.eup %10170  ;;  %v4333_v35 = vmul.f32 1.442695, %v4266_v10  ;;  %v18168_v27 = vld [vmem:[#allocation93_spill] sm:$0xff]  ;;  %v18169_v10 = vld [vmem:[#allocation164_spill] sm:$0xff] }
 0x40b   : > { %18164 = vst [vmem:[#allocation15_spill] sm:$0xff] %v14580_v0  ;;  %v14583_v44 = vadd.f32 %v10922_v31, %v5141_v38  ;;  %2226 = vadd.xlane.f32.xlu0 %v18166_v2  ;;  %5310 = vmax.xlane.f32.xlu1 %v5309_v41  ;;  %v10173_v18 = vpop.eup %10172  ;;  %v4175_v16 = vpop.xlane.xlu0 %4174  ;;  %10182 = vpow2.f32 %v4331_v13  ;;  %v10923_v61 = vld [vmem:[%s11296_s25 + $0x70] sm:$0xff] }
 0x40c   : > { %18163 = vst [vmem:[#allocation192_spill] sm:$0xff] %v14578_v32  ;;  %v14586_v33 = vpop.f32.mrb[66].mxu0  ;;  %3670 = vmatprep.mubr.f32.mxu0 %v10173_v18  ;;  %v4267_v42 = vsub.f32 %v18168_v27, %v4175_v16  ;;  %v4268_v51 = vsub.f32 %v18169_v10, %v4175_v16  ;;  %v5145_v31 = vpop.f32.mrb[254].mxu1  ;;  %10184 = vpow2.f32 %v4333_v35  ;;  %v14595_v2 = vadd.f32 %v10173_v18, %v10171_v28  ;;  %v18173_v27 = vld [vmem:[#allocation91_spill] sm:$0xff] }
 0x40d   : > { %18165 = vst [vmem:[#allocation78_spill] sm:$0xff] %v14583_v44  ;;  %18167 = vst [vmem:[#allocation193_spill] sm:$0xff] %v14586_v33  ;;  %v5312_v7 = vmax.f32 %v14578_v32, %v14583_v44  ;;  %v2442_v8 = vpop.f32.mrb[67].mxu0  ;;  %v14593_v41 = vadd.f32 %v10923_v61, %v5145_v31  ;;  %v5147_v38 = vpop.f32.mrb[255].mxu1  ;;  %v18175_v18 = vld [vmem:[#allocation155_spill] sm:$0xff]  ;;  %v18183_v32 = vld [vmem:[#allocation41_spill] sm:$0xff] }
 0x40e   : > { %3671 = vmatmul.mubr.f32.gmra.mrb[172].mxu0 %v10171_v28  ;;  %18171 = vst [vmem:[#allocation194_spill] sm:$0xff] %v14595_v2  ;;  %v10175_v13 = vpop.eup %10174  ;;  %v4335_v0 = vmul.f32 1.442695, %v4267_v42  ;;  %v4337_v33 = vmul.f32 1.442695, %v4268_v51  ;;  %v14598_v44 = vadd.f32 %v10924_v6, %v5147_v38  ;;  %v4178_v35 = vpop.xlane.xlu1 %4177 }
 0x40f   : > { %18170 = vst [vmem:[#allocation86_spill] sm:$0xff] %v14593_v41  ;;  %5313 = vmax.xlane.f32.xlu0 %v5312_v7  ;;  %2229 = vadd.xlane.f32.xlu1 %v18173_v27  ;;  %v10177_v16 = vpop.eup %10176  ;;  %v4269_v28 = vsub.f32 %v14010_v4, %v4178_v35  ;;  %v4270_v31 = vsub.f32 %v18175_v18, %v4178_v35  ;;  %v18178_v35 = vld [vmem:[#allocation156_spill] sm:$0xff] }
 0x410   : > { %18172 = vst [vmem:[#allocation195_spill] sm:$0xff] %v14598_v44  ;;  %v14601_v10 = vpop.f32.mrb[68].mxu0  ;;  %10186 = vpow2.f32 %v4335_v0  ;;  %v5315_v8 = vmax.f32 %v14593_v41, %v14598_v44  ;;  %3675 = vmatprep.mubr.f32.mxu0 %v10177_v16  ;;  %v5151_v51 = vpop.f32.mrb[0].mxu1  ;;  %v14607_v7 = vadd.f32 %v10177_v16, %v10175_v13 }
 0x411   : > { %18174 = vst [vmem:[#allocation40_spill] sm:$0xff] %v14601_v10  ;;  %v2447_v42 = vpop.f32.mrb[69].mxu0  ;;  %10188 = vpow2.f32 %v4337_v33  ;;  %v5153_v6 = vpop.f32.mrb[1].mxu1  ;;  %v4339_v38 = vmul.f32 1.442695, %v4269_v28  ;;  %v10926_v28 = vld [vmem:[%s11296_s25 + $0x88] sm:$0xff] }
 0x412   : > { %3676 = vmatmul.mubr.f32.gmra.mrb[174].mxu0 %v10175_v13  ;;  %18176 = vst [vmem:[#allocation39_spill] sm:$0xff] %v14607_v7  ;;  %v10179_v61 = vpop.eup %10178  ;;  %v4341_v0 = vmul.f32 1.442695, %v4270_v31  ;;  %v4181_v4 = vpop.xlane.xlu0 %4180  ;;  %v18179_v42 = vld [vmem:[#allocation101_spill] sm:$0xff]  ;;  %v10925_v13 = vld [vmem:[%s11296_s25 + $0x80] sm:$0xff]  ;;  %v14617_v31 = vadd.f32 %v10926_v28, %v5153_v6 }
 0x413   : > { %5316 = vmax.xlane.f32.xlu1 %v5315_v8  ;;  %v10181_v27 = vpop.eup %10180  ;;  %10190 = vpow2.f32 %v4339_v38  ;;  %v4271_v18 = vsub.f32 %v18178_v35, %v4181_v4  ;;  %v4272_v33 = vsub.f32 %v18179_v42, %v4181_v4  ;;  %v14614_v16 = vadd.f32 %v10925_v13, %v5151_v51  ;;  %v18182_v35 = vld [vmem:[#allocation42_spill] sm:$0xff]  ;;  %v10927_v42 = vld [vmem:[%s11296_s25 + $0x90] sm:$0xff]  ;;  %v10928_v13 = vld [vmem:[%s11296_s25 + $0x98] sm:$0xff] }
 0x414   : > { %v14609_v2 = vpop.f32.mrb[70].mxu0  ;;  %4647 = vmatprep.mubr.f32.mxu0 %v10181_v27  ;;  %v5157_v44 = vpop.f32.mrb[2].mxu1  ;;  %10192 = vpow2.f32 %v4341_v0  ;;  %18181 = vst [vmem:[#allocation46_spill] sm:$0xff] %v14617_v31  ;;  %v4455_v7 = vadd.f32 %v10181_v27, %v10179_v61  ;;  %v18184_v4 = vpack.c.bf16 %v18182_v35, %v18183_v32  ;;  %v18188_v27 = vld [vmem:[#allocation100_spill] sm:$0xff] }
 0x415   : > { %18177 = vst [vmem:[#allocation66_spill] sm:$0xff] %v14609_v2  ;;  %v2452_v10 = vpop.f32.mrb[71].mxu0  ;;  %18180 = vst [vmem:[#allocation70_spill] sm:$0xff] %v14614_v16  ;;  %v5159_v8 = vpop.f32.mrb[3].mxu1  ;;  %v4343_v2 = vmul.f32 1.442695, %v4271_v18  ;;  %v14623_v0 = vadd.f32 %v10927_v42, %v5157_v44  ;;  %v5318_v44 = vmax.f32 %v14614_v16, %v14617_v31 }
 0x416   : > { %4648 = vmatmul.mubr.f32.vlgmr.msra.gmra.mrb[176].mxu0 %v10179_v61  ;;  %v10183_v38 = vpop.eup %10182  ;;  %v4345_v41 = vmul.f32 1.442695, %v4272_v33  ;;  %4456 = vadd.xlane.f32.xlu0 %v4455_v7  ;;  %v4184_v6 = vpop.xlane.xlu1 %4183  ;;  %v14629_v61 = vadd.f32 %v10928_v13, %v5159_v8  ;;  %v18189_v33 = vld [vmem:[#allocation24_spill] sm:$0xff]  ;;  %v18191_v8 = vld [vmem:[#allocation47_spill] sm:$0xff]  ;;  %v18199_v16 = vld [vmem:[#allocation53_spill] sm:$0xff] }
 0x417   : > { %9789 = vmatpush1.bf16.msra.mxu0 %v18184_v4  ;;  %v10185_v10 = vpop.eup %10184  ;;  %18185 = vst [vmem:[#allocation45_spill] sm:$0xff] %v14623_v0  ;;  %10194 = vpow2.f32 %v4343_v2  ;;  %v4273_v18 = vsub.f32 %v18188_v27, %v4184_v6  ;;  %v4274_v28 = vsub.f32 %v18189_v33, %v4184_v6  ;;  %v18192_v13 = vpack.c.bf16 %v18190_v58, %v18191_v8  ;;  %v10930_v8 = vld [vmem:[%s11296_s25 + $0xa8] sm:$0xff] }
 0x418   : > { %v14625_v51 = vpop.f32.mrb[72].mxu0  ;;  %9790 = vmatprep.subr.bf16.mxu0 %v17628_v29  ;;  %18187 = vst [vmem:[#allocation52_spill] sm:$0xff] %v14629_v61  ;;  %4652 = vmatprep.mubr.f32.mxu0 %v10185_v10  ;;  %v5163_v35 = vpop.f32.mrb[4].mxu1  ;;  %10196 = vpow2.f32 %v4345_v41  ;;  %v4458_v4 = vadd.f32 %v10185_v10, %v10183_v38  ;;  %v5321_v41 = vmax.f32 %v14623_v0, %v14629_v61 }
 0x419   : > { %18186 = vst [vmem:[#allocation20_spill] sm:$0xff] %v14625_v51  ;;  %v2457_v32 = vpop.f32.mrb[73].mxu0  ;;  %v5165_v7 = vpop.f32.mrb[5].mxu1  ;;  %v4347_v51 = vmul.f32 1.442695, %v4273_v18  ;;  %v18195_v18 = vld [vmem:[#allocation171_spill] sm:$0xff] }
 0x41a   : > { %4653 = vmatmul.mubr.f32.gmra.mrb[178].mxu0 %v10183_v38  ;;  %v10187_v42 = vpop.eup %10186  ;;  %v4349_v2 = vmul.f32 1.442695, %v4274_v28  ;;  %4459 = vadd.xlane.f32.xlu1 %v4458_v4  ;;  %v4187_v33 = vpop.xlane.xlu0 %4186  ;;  %v18194_v38 = vld [vmem:[#allocation157_spill] sm:$0xff]  ;;  %v10929_v4 = vld [vmem:[%s11296_s25 + $0xa0] sm:$0xff] }
 0x41b   : > { %9792 = vmatpush1.bf16.msra.mxu0 %v18192_v13  ;;  %v10189_v27 = vpop.eup %10188  ;;  %5319 = vmax.xlane.f32.xlu0 %v5318_v44  ;;  %10198 = vpow2.f32 %v4347_v51  ;;  %v4275_v10 = vsub.f32 %v18194_v38, %v4187_v33  ;;  %v4276_v58 = vsub.f32 %v18195_v18, %v4187_v33  ;;  %v14646_v44 = vadd.f32 %v10929_v4, %v5163_v35  ;;  %v18198_v38 = vld [vmem:[#allocation54_spill] sm:$0xff]  ;;  %v10932_v4 = vld [vmem:[%s11296_s25 + $0xb8] sm:$0xff] }
 0x41c   : > { %v14638_v6 = vpop.f32.mrb[74].mxu0  ;;  %4657 = vmatprep.mubr.f32.mxu0 %v10189_v27  ;;  %9793 = vmatprep.subr.bf16.mxu0 %v17628_v29  ;;  %v5169_v32 = vpop.f32.mrb[6].mxu1  ;;  %10200 = vpow2.f32 %v4349_v2  ;;  %v14649_v13 = vadd.f32 %v10930_v8, %v5165_v7  ;;  %v18200_v33 = vpack.c.bf16 %v18198_v38, %v18199_v16 }
 0x41d   : > { %18193 = vst [vmem:[#allocation51_spill] sm:$0xff] %v14638_v6  ;;  %v2462_v28 = vpop.f32.mrb[75].mxu0  ;;  %18196 = vst [vmem:[#allocation73_spill] sm:$0xff] %v14646_v44  ;;  %v5171_v51 = vpop.f32.mrb[7].mxu1  ;;  %v4461_v6 = vadd.f32 %v10189_v27, %v10187_v42  ;;  %v4351_v0 = vmul.f32 1.442695, %v4275_v10 }
 0x41e   : > { %18197 = vst [vmem:[#allocation77_spill] sm:$0xff] %v14649_v13  ;;  %4658 = vmatmul.mubr.f32.gmra.mrb[180].mxu0 %v10187_v42  ;;  %v10191_v61 = vpop.eup %10190  ;;  %v4353_v31 = vmul.f32 1.442695, %v4276_v58  ;;  %v10931_v28 = vld [vmem:[%s11296_s25 + $0xb0] sm:$0xff]  ;;  %5322 = vmax.xlane.f32.xlu1 %v5321_v41  ;;  %v4190_v35 = vpop.xlane.xlu1 %4189  ;;  %v14658_v8 = vadd.f32 %v10932_v4, %v5171_v51  ;;  %v18203_v42 = vld [vmem:[#allocation110_spill] sm:$0xff]  ;;  %v18204_v10 = vld [vmem:[#allocation27_spill] sm:$0xff]  ;;  %v5324_v41 = vmax.f32 %v14646_v44, %v14649_v13 }
 0x41f   : > { %9795 = vmatpush1.bf16.msra.mxu0 %v18200_v33  ;;  %v10193_v18 = vpop.eup %10192  ;;  %v14655_v2 = vadd.f32 %v10931_v28, %v5169_v32  ;;  %4462 = vadd.xlane.f32.xlu0 %v4461_v6  ;;  %10202 = vpow2.f32 %v4351_v0  ;;  %v4277_v27 = vsub.f32 %v18203_v42, %v4190_v35  ;;  %v4278_v58 = vsub.f32 %v18204_v10, %v4190_v35  ;;  %v18206_v33 = vld [vmem:[#allocation60_spill] sm:$0xff]  ;;  %v18207_v28 = vld [vmem:[#allocation59_spill] sm:$0xff]  ;;  %v18212_v13 = vld [vmem:[#allocation69_spill] sm:$0xff] }
 0x420   : > { %v5175_v7 = vpop.f32.mrb[8].mxu1  ;;  %18202 = vst [vmem:[#allocation57_spill] sm:$0xff] %v14658_v8  ;;  %v14662_v62 = vpop.f32.mrb[76].mxu0  ;;  %4662 = vmatprep.mubr.f32.mxu0 %v10193_v18  ;;  %9796 = vmatprep.subr.bf16.mxu0 %v17628_v29  ;;  %10204 = vpow2.f32 %v4353_v31  ;;  %v4464_v0 = vadd.f32 %v10193_v18, %v10191_v61  ;;  %v18208_v4 = vpack.c.bf16 %v18206_v33, %v18207_v28  ;;  %v10933_v28 = vld [vmem:[%s11296_s25 + $0xc0] sm:$0xff] }
 0x421   : > { %18201 = vst [vmem:[#allocation58_spill] sm:$0xff] %v14655_v2  ;;  %18205 = vst [vmem:[#allocation64_spill] sm:$0xff] %v14662_v62  ;;  %v5177_v16 = vpop.f32.mrb[9].mxu1  ;;  %v2467_v6 = vpop.f32.mrb[77].mxu0  ;;  %v4355_v51 = vmul.f32 1.442695, %v4277_v27  ;;  %v5327_v31 = vmax.f32 %v14655_v2, %v14658_v8 }
 0x422   : > { %4663 = vmatmul.mubr.f32.gmra.mrb[182].mxu0 %v10191_v61  ;;  %v10195_v32 = vpop.eup %10194  ;;  %v4357_v38 = vmul.f32 1.442695, %v4278_v58  ;;  %4465 = vadd.xlane.f32.xlu1 %v4464_v0  ;;  %v4193_v42 = vpop.xlane.xlu0 %4192  ;;  %v18210_v61 = vld [vmem:[#allocation159_spill] sm:$0xff]  ;;  %v14678_v0 = vadd.f32 %v10933_v28, %v5175_v7  ;;  %v18215_v7 = vld [vmem:[#allocation118_spill] sm:$0xff] }
 0x423   : > { %9798 = vmatpush1.bf16.msra.mxu0 %v18208_v4  ;;  %v10197_v35 = vpop.eup %10196  ;;  %5325 = vmax.xlane.f32.xlu0 %v5324_v41  ;;  %10206 = vpow2.f32 %v4355_v51  ;;  %v4279_v18 = vsub.f32 %v18210_v61, %v4193_v42  ;;  %v18211_v27 = vld [vmem:[#allocation119_spill] sm:$0xff]  ;;  %v18213_v61 = vld [vmem:[#allocation65_spill] sm:$0xff] }
 0x424   : > { %v5181_v10 = vpop.f32.mrb[10].mxu1  ;;  %v14672_v6 = vpop.f32.mrb[78].mxu0  ;;  %4667 = vmatprep.mubr.f32.mxu0 %v10197_v35  ;;  %9799 = vmatprep.subr.bf16.mxu0 %v17628_v29  ;;  %v4280_v58 = vsub.f32 %v18211_v27, %v4193_v42  ;;  %10208 = vpow2.f32 %v4357_v38  ;;  %v10934_v41 = vld [vmem:[%s11296_s25 + $0xc8] sm:$0xff]  ;;  %v4467_v51 = vadd.f32 %v10197_v35, %v10195_v32  ;;  %v18214_v44 = vpack.c.bf16 %v18212_v13, %v18213_v61 }
 0x425   : > { %18209 = vst [vmem:[#allocation63_spill] sm:$0xff] %v14672_v6  ;;  %v5183_v33 = vpop.f32.mrb[11].mxu1  ;;  %v14681_v4 = vadd.f32 %v10934_v41, %v5177_v16  ;;  %v2472_v62 = vpop.f32.mrb[79].mxu0  ;;  %v4359_v8 = vmul.f32 1.442695, %v4279_v18  ;;  %v18216_v16 = vld [vmem:[#allocation26_spill] sm:$0xff] }
 0x426   : > { %4668 = vmatmul.mubr.f32.gmra.mrb[184].mxu0 %v10195_v32  ;;  %v10199_v6 = vpop.eup %10198  ;;  %v4361_v2 = vmul.f32 1.442695, %v4280_v58  ;;  %5328 = vmax.xlane.f32.xlu1 %v5327_v31  ;;  %v10935_v62 = vld [vmem:[%s11296_s25 + $0xd0] sm:$0xff]  ;;  %v10936_v32 = vld [vmem:[%s11296_s25 + $0xd8] sm:$0xff]  ;;  %v18220_v61 = vld [vmem:[#allocation79_spill] sm:$0xff] }
 0x427   : > { %9801 = vmatpush1.bf16.msra.mxu0 %v18214_v44  ;;  %v4196_v42 = vpop.xlane.xlu1 %4195  ;;  %v10201_v38 = vpop.eup %10200  ;;  %4468 = vadd.xlane.f32.xlu0 %v4467_v51  ;;  %10210 = vpow2.f32 %v4359_v8  ;;  %v14689_v55 = vadd.f32 %v10935_v62, %v5181_v10  ;;  %v14692_v35 = vadd.f32 %v10936_v32, %v5183_v33  ;;  %v5330_v31 = vmax.f32 %v14678_v0, %v14681_v4  ;;  %v18224_v32 = vld [vmem:[#allocation163_spill] sm:$0xff] }
 0x428   : > { %v4281_v27 = vsub.f32 %v18215_v7, %v4196_v42  ;;  %v4282_v28 = vsub.f32 %v18216_v16, %v4196_v42  ;;  %v5187_v41 = vpop.f32.mrb[12].mxu1  ;;  %4672 = vmatprep.mubr.f32.mxu0 %v10201_v38  ;;  %9802 = vmatprep.subr.bf16.mxu0 %v17628_v29  ;;  %v4470_v13 = vadd.f32 %v10201_v38, %v10199_v6  ;;  %10212 = vpow2.f32 %v4361_v2  ;;  %v18221_v42 = vld [vmem:[#allocation76_spill] sm:$0xff]  ;;  %v18223_v38 = vld [vmem:[#allocation162_spill] sm:$0xff] }
 0x429   : > { %18217 = vst [vmem:[#allocation72_spill] sm:$0xff] %v14689_v55  ;;  %18218 = vst [vmem:[#allocation71_spill] sm:$0xff] %v14692_v35  ;;  %v14694_v18 = vpop.f32.mrb[80].mxu0  ;;  %v5189_v44 = vpop.f32.mrb[13].mxu1  ;;  %v18222_v33 = vpack.c.bf16 %v18220_v61, %v18221_v42  ;;  %v10937_v42 = vld [vmem:[%s11296_s25 + $0xe0] sm:$0xff] }
 0x42a   : > { %18219 = vst [vmem:[#allocation81_spill] sm:$0xff] %v14694_v18  ;;  %v4363_v58 = vmul.f32 1.442695, %v4281_v27  ;;  %v4365_v51 = vmul.f32 1.442695, %v4282_v28  ;;  %v2477_v8 = vpop.f32.mrb[81].mxu0  ;;  %4673 = vmatmul.mubr.f32.gmra.mrb[186].mxu0 %v10199_v6  ;;  %v10203_v10 = vpop.eup %10202  ;;  %4471 = vadd.xlane.f32.xlu1 %v4470_v13  ;;  %v5333_v6 = vmax.f32 %v14689_v55, %v14692_v35 }
 0x42b   : > { %9804 = vmatpush1.bf16.msra.mxu0 %v18222_v33  ;;  %v4199_v7 = vpop.xlane.xlu0 %4198  ;;  %v10205_v16 = vpop.eup %10204  ;;  %5331 = vmax.xlane.f32.xlu0 %v5330_v31  ;;  %v10938_v13 = vld [vmem:[%s11296_s25 + $0xe8] sm:$0xff] }
 0x42c   : > { %10214 = vpow2.f32 %v4363_v58  ;;  %v4283_v62 = vsub.f32 %v18223_v38, %v4199_v7  ;;  %v4284_v2 = vsub.f32 %v18224_v32, %v4199_v7  ;;  %v5193_v27 = vpop.f32.mrb[14].mxu1  ;;  %4677 = vmatprep.mubr.f32.mxu0 %v10205_v16  ;;  %9805 = vmatprep.subr.bf16.mxu0 %v17628_v29  ;;  %v4473_v61 = vadd.f32 %v10205_v16, %v10203_v10  ;;  %v18228_v32 = vld [vmem:[#allocation88_spill] sm:$0xff] }
 0x42d   : > { %10216 = vpow2.f32 %v4365_v51  ;;  %v14706_v28 = vpop.f32.mrb[82].mxu0  ;;  %v5195_v8 = vpop.f32.mrb[15].mxu1  ;;  %v14710_v58 = vadd.f32 %v10937_v42, %v5187_v41  ;;  %v14713_v31 = vadd.f32 %v10938_v13, %v5189_v44  ;;  %v18231_v44 = vld [vmem:[#allocation127_spill] sm:$0xff] }
 0x42e   : > { %18225 = vst [vmem:[#allocation80_spill] sm:$0xff] %v14706_v28  ;;  %v4367_v33 = vmul.f32 1.442695, %v4283_v62  ;;  %v4369_v7 = vmul.f32 1.442695, %v4284_v2  ;;  %v2482_v38 = vpop.f32.mrb[83].mxu0  ;;  %4678 = vmatmul.mubr.f32.gmra.mrb[188].mxu0 %v10203_v10  ;;  %v10207_v51 = vpop.eup %10206  ;;  %5334 = vmax.xlane.f32.xlu1 %v5333_v6 }
 0x42f   : > { %18226 = vst [vmem:[#allocation90_spill] sm:$0xff] %v14710_v58  ;;  %18227 = vst [vmem:[#allocation89_spill] sm:$0xff] %v14713_v31  ;;  %v18229_v28 = vld [vmem:[#allocation87_spill] sm:$0xff]  ;;  %v4202_v35 = vpop.xlane.xlu1 %4201  ;;  %v10209_v55 = vpop.eup %10208  ;;  %4474 = vadd.xlane.f32.xlu0 %v4473_v61  ;;  %v10939_v62 = vld [vmem:[%s11296_s25 + $0xf0] sm:$0xff] }
 0x430   : > { %v18230_v18 = vpack.c.bf16 %v18228_v32, %v18229_v28  ;;  %10218 = vpow2.f32 %v4367_v33  ;;  %v4285_v41 = vsub.f32 %v14149_v54, %v4202_v35  ;;  %v4286_v16 = vsub.f32 %v18231_v44, %v4202_v35  ;;  %v5199_v42 = vpop.f32.mrb[16].mxu1  ;;  %v10940_v10 = vld [vmem:[%s11296_s25 + $0xf8] sm:$0xff]  ;;  %4682 = vmatprep.mubr.f32.mxu0 %v10209_v55 }
 0x431   : > { %10220 = vpow2.f32 %v4369_v7  ;;  %v14721_v2 = vadd.f32 %v10939_v62, %v5193_v27  ;;  %v14724_v13 = vadd.f32 %v10940_v10, %v5195_v8  ;;  %v14726_v38 = vpop.f32.mrb[84].mxu0  ;;  %v4476_v6 = vadd.f32 %v10209_v55, %v10207_v51  ;;  %v10211_v33 = vpop.eup %10210  ;;  %v18235_v27 = vld [vmem:[#allocation96_spill] sm:$0xff]  ;;  %v18236_v7 = vld [vmem:[#allocation95_spill] sm:$0xff]  ;;  %v18238_v55 = vld [vmem:[#allocation126_spill] sm:$0xff] }
 0x432   : > { %9807 = vmatpush1.bf16.msra.mxu0 %v18230_v18  ;;  %18234 = vst [vmem:[#allocation106_spill] sm:$0xff] %v14726_v38  ;;  %v5201_v18 = vpop.f32.mrb[17].mxu1  ;;  %v5336_v54 = vmax.f32 %v14710_v58, %v14713_v31  ;;  %v4371_v28 = vmul.f32 1.442695, %v4285_v41  ;;  %v4373_v35 = vmul.f32 1.442695, %v4286_v16  ;;  %v18237_v32 = vpack.c.bf16 %v18235_v27, %v18236_v7  ;;  %v4205_v8 = vpop.xlane.xlu0 %4204 }
 0x433   : > { %18232 = vst [vmem:[#allocation98_spill] sm:$0xff] %v14721_v2  ;;  %18233 = vst [vmem:[#allocation97_spill] sm:$0xff] %v14724_v13  ;;  %9808 = vmatprep.subr.bf16.mxu0 %v17628_v29  ;;  %v2487_v61 = vpop.f32.mrb[85].mxu0  ;;  %4683 = vmatmul.mubr.f32.gmra.mrb[190].mxu0 %v10207_v51  ;;  %v10213_v44 = vpop.eup %10212  ;;  %v4287_v62 = vsub.f32 %v18238_v55, %v4205_v8  ;;  %v18239_v10 = vld [vmem:[#allocation29_spill] sm:$0xff]  ;;  %v5339_v51 = vmax.f32 %v14721_v2, %v14724_v13 }
 0x434   : > { %10222 = vpow2.f32 %v4371_v28  ;;  %4477 = vadd.xlane.f32.xlu1 %v4476_v6  ;;  %5337 = vmax.xlane.f32.xlu0 %v5336_v54  ;;  %v4288_v38 = vsub.f32 %v18239_v10, %v4205_v8  ;;  %v5205_v41 = vpop.f32.mrb[18].mxu1  ;;  %v10941_v28 = vld [vmem:[%s11296_s25 + $0x100] sm:$0xff]  ;;  %v10942_v54 = vld [vmem:[%s11296_s25 + $0x108] sm:$0xff]  ;;  %v18241_v10 = vld [vmem:[#allocation104_spill] sm:$0xff] }
 0x435   : > { %10224 = vpow2.f32 %v4373_v35  ;;  %v14738_v16 = vpop.f32.mrb[86].mxu0  ;;  %4687 = vmatprep.mubr.f32.mxu0 %v10213_v44  ;;  %v5207_v61 = vpop.f32.mrb[19].mxu1  ;;  %v14744_v6 = vadd.f32 %v10941_v28, %v5199_v42  ;;  %v14747_v7 = vadd.f32 %v10942_v54, %v5201_v18  ;;  %v18244_v18 = vld [vmem:[#allocation165_spill] sm:$0xff] }
 0x436   : > { %9810 = vmatpush1.bf16.msra.mxu0 %v18237_v32  ;;  %18240 = vst [vmem:[#allocation105_spill] sm:$0xff] %v14738_v16  ;;  %v14741_v27 = vpop.eup %10214  ;;  %v4375_v32 = vmul.f32 1.442695, %v4287_v62  ;;  %v4377_v8 = vmul.f32 1.442695, %v4288_v38  ;;  %v2492_v55 = vpop.f32.mrb[87].mxu0 }
 0x437   : > { %9811 = vmatprep.subr.bf16.mxu0 %v17628_v29  ;;  %4688 = vmatmul.mubr.f32.gmra.mrb[192].mxu0 %v10211_v33  ;;  %v14749_v35 = vpop.eup %10216  ;;  %v18242_v16 = vld [vmem:[#allocation103_spill] sm:$0xff]  ;;  %v4208_v2 = vpop.xlane.xlu1 %4207  ;;  %v10943_v38 = vld [vmem:[%s11296_s25 + $0x110] sm:$0xff]  ;;  %v10944_v55 = vld [vmem:[%s11296_s25 + $0x118] sm:$0xff] }
 0x438   : > { %v18243_v13 = vpack.c.bf16 %v18241_v10, %v18242_v16  ;;  %10226 = vpow2.f32 %v4375_v32  ;;  %5340 = vmax.xlane.f32.xlu1 %v5339_v51  ;;  %3356 = vadd.xlane.f32.xlu0 %v14266_v19  ;;  %v4289_v42 = vsub.f32 %v14183_v43, %v4208_v2  ;;  %v4290_v28 = vsub.f32 %v18244_v18, %v4208_v2  ;;  %v5211_v62 = vpop.f32.mrb[20].mxu1  ;;  %v18248_v32 = vld [vmem:[#allocation113_spill] sm:$0xff] }
 0x439   : > { %10228 = vpow2.f32 %v4377_v8  ;;  %v14758_v54 = vadd.f32 %v10943_v38, %v5205_v41  ;;  %v14761_v31 = vadd.f32 %v10944_v55, %v5207_v61  ;;  %v14763_v58 = vpop.f32.mrb[88].mxu0  ;;  %4692 = vmatprep.mubr.f32.mxu0 %v14749_v35  ;;  %v5342_v43 = vmax.f32 %v14744_v6, %v14747_v7  ;;  %v18249_v8 = vld [vmem:[#allocation107_spill] sm:$0xff] }
 0x43a   : > { %9813 = vmatpush1.bf16.msra.mxu0 %v18243_v13  ;;  %18247 = vst [vmem:[#allocation124_spill] sm:$0xff] %v14763_v58  ;;  %v5213_v13 = vpop.f32.mrb[21].mxu1  ;;  %v14767_v19 = vpop.eup %10218  ;;  %v4379_v2 = vmul.f32 1.442695, %v4289_v42  ;;  %v4381_v51 = vmul.f32 1.442695, %v4290_v28  ;;  %v4479_v41 = vadd.f32 %v10213_v44, %v10211_v33  ;;  %v18250_v10 = vpack.c.bf16 %v18248_v32, %v18249_v8 }
 0x43b   : > { %18245 = vst [vmem:[#allocation115_spill] sm:$0xff] %v14758_v54  ;;  %18246 = vst [vmem:[#allocation114_spill] sm:$0xff] %v14761_v31  ;;  %9814 = vmatprep.subr.bf16.mxu0 %v17628_v29  ;;  %v2497_v16 = vpop.f32.mrb[89].mxu0  ;;  %4693 = vmatmul.mubr.f32.gmra.mrb[194].mxu0 %v14741_v27  ;;  %v14772_v61 = vpop.eup %10220  ;;  %v18251_v42 = vld [vmem:[#allocation166_spill] sm:$0xff]  ;;  %v6031_v33 = vmax.f32 %v14476_v17, %v14484_v56  ;;  %v5345_v44 = vmax.f32 %v14758_v54, %v14761_v31  ;;  %v10946_v32 = vld [vmem:[%s11296_s25 + $0x128] sm:$0xff] }
 0x43c   : > { %v4211_v18 = vpop.xlane.xlu0 %4210  ;;  %10230 = vpow2.f32 %v4379_v2  ;;  %5343 = vmax.xlane.f32.xlu0 %v5342_v43  ;;  %4480 = vadd.xlane.f32.xlu1 %v4479_v41  ;;  %v5217_v55 = vpop.f32.mrb[22].mxu1  ;;  %v14793_v8 = vadd.f32 %v10946_v32, %v5213_v13  ;;  %v18256_v13 = vld [vmem:[#allocation133_spill] sm:$0xff] }
 0x43d   : > { %v4291_v38 = vsub.f32 %v14199_v11, %v4211_v18  ;;  %v4292_v28 = vsub.f32 %v18251_v42, %v4211_v18  ;;  %10232 = vpow2.f32 %v4381_v51  ;;  %v14783_v16 = vpop.f32.mrb[90].mxu0  ;;  %4697 = vmatprep.mubr.f32.mxu0 %v14772_v61  ;;  %v5219_v43 = vpop.f32.mrb[23].mxu1  ;;  %v10945_v11 = vld [vmem:[%s11296_s25 + $0x120] sm:$0xff]  ;;  %v18254_v42 = vld [vmem:[#allocation116_spill] sm:$0xff] }
 0x43e   : > { %9816 = vmatpush1.bf16.msra.mxu0 %v18250_v10  ;;  %18252 = vst [vmem:[#allocation123_spill] sm:$0xff] %v14783_v16  ;;  %v14787_v2 = vpop.eup %10222  ;;  %v14790_v41 = vadd.f32 %v10945_v11, %v5211_v62  ;;  %v2502_v51 = vpop.f32.mrb[91].mxu0  ;;  %v18253_v18 = vld [vmem:[#allocation122_spill] sm:$0xff] }
 0x43f   : > { %9817 = vmatprep.subr.bf16.mxu0 %v17628_v29  ;;  %v4383_v56 = vmul.f32 1.442695, %v4291_v38  ;;  %v4385_v17 = vmul.f32 1.442695, %v4292_v28  ;;  %4698 = vmatmul.mubr.f32.gmra.mrb[196].mxu0 %v14767_v19  ;;  %v14796_v10 = vpop.eup %10224  ;;  %v18255_v16 = vpack.c.bf16 %v18253_v18, %v18254_v42  ;;  %v4214_v58 = vpop.xlane.xlu1 %4213  ;;  %v10947_v28 = vld [vmem:[%s11296_s25 + $0x130] sm:$0xff]  ;;  %v10948_v51 = vld [vmem:[%s11296_s25 + $0x138] sm:$0xff] }
 0x440   : > { %6032 = vmax.xlane.f32.xlu0 %v6031_v33  ;;  %5346 = vmax.xlane.f32.xlu1 %v5345_v44  ;;  %v4293_v62 = vsub.f32 %v14215_v9, %v4214_v58  ;;  %v4294_v11 = vsub.f32 %v18256_v13, %v4214_v58  ;;  %v5223_v38 = vpop.f32.mrb[24].mxu1  ;;  %v14804_v32 = vadd.f32 %v10947_v28, %v5217_v55  ;;  %v18260_v18 = vld [vmem:[#allocation125_spill] sm:$0xff] }
 0x441   : > { %10234 = vpow2.f32 %v4383_v56  ;;  %v14807_v31 = vadd.f32 %v10948_v51, %v5219_v43  ;;  %v14809_v54 = vpop.f32.mrb[92].mxu0  ;;  %4702 = vmatprep.mubr.f32.mxu0 %v14796_v10  ;;  %v5225_v33 = vpop.f32.mrb[25].mxu1  ;;  %v5348_v9 = vmax.f32 %v14790_v41, %v14793_v8  ;;  %v4482_v55 = vadd.f32 %v14749_v35, %v14741_v27 }
 0x442   : > { %9819 = vmatpush1.bf16.msra.mxu0 %v18255_v16  ;;  %10236 = vpow2.f32 %v4385_v17  ;;  %18258 = vst [vmem:[#allocation129_spill] sm:$0xff] %v14809_v54  ;;  %v14813_v44 = vpop.eup %10226  ;;  %v4387_v58 = vmul.f32 1.442695, %v4293_v62  ;;  %v4389_v16 = vmul.f32 1.442695, %v4294_v11  ;;  %v2507_v56 = vpop.f32.mrb[93].mxu0  ;;  %v6034_v27 = vmax.f32 %v14497_v5, %v14505_v15 }
 0x443   : > { %18257 = vst [vmem:[#allocation130_spill] sm:$0xff] %v14807_v31  ;;  %9820 = vmatprep.subr.bf16.mxu0 %v17628_v29  ;;  %4703 = vmatmul.mubr.f32.gmra.mrb[198].mxu0 %v14787_v2  ;;  %v14820_v43 = vpop.eup %10228  ;;  %v18259_v17 = vld [vmem:[#allocation128_spill] sm:$0xff]  ;;  %v4217_v13 = vpop.xlane.xlu0 %4216  ;;  %v5351_v35 = vmax.f32 %v14804_v32, %v14807_v31 }
 0x444   : > { %v18261_v42 = vpack.c.bf16 %v18259_v17, %v18260_v18  ;;  %10238 = vpow2.f32 %v4387_v58  ;;  %5349 = vmax.xlane.f32.xlu0 %v5348_v9  ;;  %4483 = vadd.xlane.f32.xlu1 %v4482_v55  ;;  %v4295_v62 = vsub.f32 %v14231_v26, %v4217_v13  ;;  %v18262_v11 = vld [vmem:[#allocation132_spill] sm:$0xff]  ;;  %v5229_v51 = vpop.f32.mrb[26].mxu1  ;;  %v10949_v26 = vld [vmem:[%s11296_s25 + $0x140] sm:$0xff]  ;;  %v10950_v17 = vld [vmem:[%s11296_s25 + $0x148] sm:$0xff] }
 0x445   : > { %v4296_v28 = vsub.f32 %v18262_v11, %v4217_v13  ;;  %10240 = vpow2.f32 %v4389_v16  ;;  %v14831_v56 = vpop.f32.mrb[94].mxu0  ;;  %4707 = vmatprep.mubr.f32.mxu0 %v14820_v43  ;;  %v5231_v9 = vpop.f32.mrb[27].mxu1  ;;  %v14838_v55 = vadd.f32 %v10949_v26, %v5223_v38  ;;  %v14841_v18 = vadd.f32 %v10950_v17, %v5225_v33  ;;  %v18266_v13 = vld [vmem:[#allocation134_spill] sm:$0xff]  ;;  %v18267_v11 = vld [vmem:[#allocation131_spill] sm:$0xff]  ;;  %v10952_v17 = vld [vmem:[%s11296_s25 + $0x158] sm:$0xff] }
 0x446   : > { %9822 = vmatpush1.bf16.msra.mxu0 %v18261_v42  ;;  %18263 = vst [vmem:[#allocation136_spill] sm:$0xff] %v14831_v56  ;;  %v14835_v58 = vpop.eup %10230  ;;  %v4391_v15 = vmul.f32 1.442695, %v4295_v62  ;;  %v2512_v16 = vpop.f32.mrb[95].mxu0  ;;  %v18268_v56 = vpack.c.bf16 %v18266_v13, %v18267_v11  ;;  %v18275_v11 = vld [vmem:[#allocation28_spill] sm:$0xff] }
 0x447   : > { %9823 = vmatprep.subr.bf16.mxu0 %v17628_v29  ;;  %18264 = vst [vmem:[#allocation135_spill] sm:$0xff] %v14838_v55  ;;  %18265 = vst [vmem:[#allocation142_spill] sm:$0xff] %v14841_v18  ;;  %v4393_v5 = vmul.f32 1.442695, %v4296_v28  ;;  %4708 = vmatmul.mubr.f32.gmra.mrb[200].mxu0 %v14813_v44  ;;  %v14844_v42 = vpop.eup %10232  ;;  %v4220_v54 = vpop.xlane.xlu1 %4219  ;;  %v10951_v28 = vld [vmem:[%s11296_s25 + $0x150] sm:$0xff]  ;;  %v14855_v16 = vadd.f32 %v10952_v17, %v5231_v9  ;;  %v18273_v9 = vld [vmem:[#allocation137_spill] sm:$0xff] }
 0x448   : > { %10242 = vpow2.f32 %v4391_v15  ;;  %6035 = vmax.xlane.f32.xlu0 %v6034_v27  ;;  %5352 = vmax.xlane.f32.xlu1 %v5351_v35  ;;  %v4297_v38 = vsub.f32 %v14245_v60, %v4220_v54  ;;  %v4298_v33 = vsub.f32 %v14248_v3, %v4220_v54  ;;  %v5235_v62 = vpop.f32.mrb[28].mxu1  ;;  %v14852_v26 = vadd.f32 %v10951_v28, %v5229_v51  ;;  %v18272_v15 = vld [vmem:[#allocation140_spill] sm:$0xff]  ;;  %v18276_v17 = vld [vmem:[#allocation169_spill] sm:$0xff] }
 0x449   : > { %10244 = vpow2.f32 %v4393_v5  ;;  %18270 = vst [vmem:[#allocation146_spill] sm:$0xff] %v14855_v16  ;;  %v14857_v31 = vpop.f32.mrb[96].mxu0  ;;  %4712 = vmatprep.mubr.f32.mxu0 %v14844_v42  ;;  %v5237_v27 = vpop.f32.mrb[29].mxu1  ;;  %v5354_v60 = vmax.f32 %v14838_v55, %v14841_v18  ;;  %v18274_v5 = vpack.c.bf16 %v18272_v15, %v18273_v9  ;;  %v10953_v9 = vld [vmem:[%s11296_s25 + $0x160] sm:$0xff] }
 0x44a   : > { %9825 = vmatpush1.bf16.msra.mxu0 %v18268_v56  ;;  %18269 = vst [vmem:[#allocation141_spill] sm:$0xff] %v14852_v26  ;;  %18271 = vst [vmem:[#allocation145_spill] sm:$0xff] %v14857_v31  ;;  %v4395_v3 = vmul.f32 1.442695, %v4297_v38  ;;  %v4397_v54 = vmul.f32 1.442695, %v4298_v33  ;;  %v4223_v13 = vpop.xlane.xlu0 %4222 }
 0x44b   : > { %9826 = vmatprep.subr.bf16.mxu0 %v17628_v29  ;;  %v10235_v35 = vpop.eup %10234  ;;  %v2517_v56 = vpop.f32.mrb[97].mxu0  ;;  %4713 = vmatmul.mubr.f32.gmra.mrb[202].mxu0 %v14835_v58  ;;  %v4299_v28 = vsub.f32 %v18275_v11, %v4223_v13  ;;  %v4300_v38 = vsub.f32 %v18276_v17, %v4223_v13  ;;  %v18281_v55 = vld [vmem:[#allocation94_spill] sm:$0xff] }
 0x44c   : > { %v10237_v51 = vpop.eup %10236  ;;  %10246 = vpow2.f32 %v4395_v3  ;;  %5355 = vmax.xlane.f32.xlu0 %v5354_v60  ;;  %3359 = vadd.xlane.f32.xlu1 %v14282_v1  ;;  %v5241_v33 = vpop.f32.mrb[30].mxu1  ;;  %v5357_v56 = vmax.f32 %v14852_v26, %v14855_v16  ;;  %v14878_v1 = vadd.f32 %v10953_v9, %v5235_v62  ;;  %v18278_v16 = vld [vmem:[#allocation144_spill] sm:$0xff]  ;;  %v18279_v26 = vld [vmem:[#allocation143_spill] sm:$0xff] }
 0x44d   : > { %10248 = vpow2.f32 %v4397_v54  ;;  %v14872_v31 = vpop.f32.mrb[98].mxu0  ;;  %4717 = vmatprep.mubr.f32.mxu0 %v10237_v51  ;;  %v5243_v15 = vpop.f32.mrb[31].mxu1  ;;  %v14875_v3 = vadd.f32 %v10237_v51, %v10235_v35  ;;  %v4399_v11 = vmul.f32 1.442695, %v4299_v28  ;;  %v4401_v17 = vmul.f32 1.442695, %v4300_v38 }
 0x44e   : > { %9828 = vmatpush1.bf16.msra.mxu0 %v18274_v5  ;;  %18277 = vst [vmem:[#allocation25_spill] sm:$0xff] %v14872_v31  ;;  %v10239_v60 = vpop.eup %10238  ;;  %v10954_v5 = vld [vmem:[%s11296_s25 + $0x168] sm:$0xff]  ;;  %v2522_v54 = vpop.f32.mrb[99].mxu0  ;;  %v18280_v18 = vpack.c.bf16 %v18278_v16, %v18279_v26  ;;  %v10955_v28 = vld [vmem:[%s11296_s25 + $0x170] sm:$0xff] }
 0x44f   : > { %9829 = vmatprep.subr.bf16.mxu0 %v17628_v29  ;;  %v14881_v13 = vadd.f32 %v10954_v5, %v5237_v27  ;;  %4718 = vmatmul.mubr.f32.gmra.mrb[204].mxu0 %v10235_v35  ;;  %v10241_v31 = vpop.eup %10240  ;;  %v4226_v51 = vpop.xlane.xlu1 %4225  ;;  %10250 = vpow2.f32 %v4399_v11  ;;  %v14890_v38 = vadd.f32 %v10955_v28, %v5241_v33  ;;  %v10956_v35 = vld [vmem:[%s11296_s25 + $0x178] sm:$0xff] }
 0x450   : > { %2232 = vadd.xlane.f32.xlu0 %v18281_v55  ;;  %5358 = vmax.xlane.f32.xlu1 %v5357_v56  ;;  %v4301_v62 = vsub.f32 %v14277_v52, %v4226_v51  ;;  %v4302_v27 = vsub.f32 %v14280_v24, %v4226_v51  ;;  %v5247_v9 = vpop.f32.mrb[32].mxu1  ;;  %10252 = vpow2.f32 %v4401_v17  ;;  %v14893_v5 = vadd.f32 %v10956_v35, %v5243_v15  ;;  %v18285_v11 = vld [vmem:[#allocation149_spill] sm:$0xff]  ;;  %v18286_v15 = vld [vmem:[#allocation147_spill] sm:$0xff] }
 0x451   : > { %18282 = vst [vmem:[#allocation112_spill] sm:$0xff] %v14890_v38  ;;  %v14895_v54 = vpop.f32.mrb[100].mxu0  ;;  %4722 = vmatprep.mubr.f32.mxu0 %v10241_v31  ;;  %v14898_v55 = vadd.f32 %v10241_v31, %v10239_v60  ;;  %v5360_v52 = vmax.f32 %v14878_v1, %v14881_v13  ;;  %v18287_v17 = vpack.c.bf16 %v18285_v11, %v18286_v15  ;;  %v10957_v11 = vld [vmem:[%s11296_s25 + $0x180] sm:$0xff] }
 0x452   : > { %9831 = vmatpush1.bf16.msra.mxu0 %v18280_v18  ;;  %18283 = vst [vmem:[#allocation108_spill] sm:$0xff] %v14893_v5  ;;  %18284 = vst [vmem:[#allocation10_spill] sm:$0xff] %v14895_v54  ;;  %v5249_v18 = vpop.f32.mrb[33].mxu1  ;;  %v10243_v26 = vpop.eup %10242  ;;  %v4403_v24 = vmul.f32 1.442695, %v4301_v62  ;;  %v14917_v15 = vadd.f32 %v10957_v11, %v5247_v9 }
 0x453   : > { %9832 = vmatprep.subr.bf16.mxu0 %v17628_v29  ;;  %v4405_v16 = vmul.f32 1.442695, %v4302_v27  ;;  %v2527_v56 = vpop.f32.mrb[101].mxu0  ;;  %4723 = vmatmul.mubr.f32.gmra.mrb[206].mxu0 %v10239_v60  ;;  %v10245_v33 = vpop.eup %10244  ;;  %v18288_v29 = vld [vmem:[#allocation99_spill] sm:$0xff]  ;;  %v5363_v60 = vmax.f32 %v14890_v38, %v14893_v5 }
 0x454   : > { %v4229_v51 = vpop.xlane.xlu0 %4228  ;;  %10254 = vpow2.f32 %v4403_v24  ;;  %5361 = vmax.xlane.f32.xlu0 %v5360_v52  ;;  %2235 = vadd.xlane.f32.xlu1 %v18288_v29  ;;  %v14906_v31 = vpop.xlane.xlu1 %3329  ;;  %v14914_v56 = vadd.f32 %v10245_v33, %v10243_v26 }
 0x455   : > { %v4303_v28 = vsub.f32 %v14293_v22, %v4229_v51  ;;  %v4304_v62 = vsub.f32 %v14296_v20, %v4229_v51  ;;  %v5253_v27 = vpop.f32.mrb[34].mxu1  ;;  %10256 = vpow2.f32 %v4405_v16  ;;  %v14912_v35 = vpop.f32.mrb[102].mxu0  ;;  %4727 = vmatprep.mubr.f32.mxu0 %v10245_v33  ;;  %v18290_v33 = vld [vmem:[#allocation170_spill] sm:$0xff] }
 0x456   : > { %9834 = vmatpush1.bf16.msra.mxu0 %v18287_v17  ;;  %18289 = vst [vmem:[#allocation117_spill] sm:$0xff] %v14912_v35  ;;  %v5255_v24 = vpop.f32.mrb[35].mxu1  ;;  %v10247_v52 = vpop.eup %10246  ;;  %v10958_v17 = vld [vmem:[%s11296_s25 + $0x188] sm:$0xff]  ;;  %v10959_v35 = vld [vmem:[%s11296_s25 + $0x190] sm:$0xff] }
 0x457   : > { %v14920_v22 = vadd.f32 %v10958_v17, %v5249_v18  ;;  %v4407_v20 = vmul.f32 1.442695, %v4303_v28  ;;  %v4409_v51 = vmul.f32 1.442695, %v4304_v62  ;;  %v2532_v29 = vpop.f32.mrb[103].mxu0  ;;  %4728 = vmatmul.mubr.f32.gmra.mrb[208].mxu0 %v10243_v26  ;;  %v10249_v16 = vpop.eup %10248  ;;  %v14923_v5 = vadd.f32 %v10959_v35, %v5253_v27  ;;  %v10960_v18 = vld [vmem:[%s11296_s25 + $0x198] sm:$0xff] }
 0x458   : > { %v2203_v54 = vpop.xlane.xlu0 %2202  ;;  %3362 = vadd.xlane.f32.xlu0 %v18290_v33  ;;  %5364 = vmax.xlane.f32.xlu1 %v5363_v60  ;;  %v4232_v38 = vpop.xlane.xlu1 %4231  ;;  %v14926_v11 = vadd.f32 %v10249_v16, %v10247_v52  ;;  %v14929_v17 = vadd.f32 %v10960_v18, %v5255_v24  ;;  %v4485_v24 = vadd.f32 %v14772_v61, %v14767_v19  ;;  %v10963_v61 = vld [vmem:[%s11296_s25 + $0x1a0] sm:$0xff] }
 0x459   : > { %10258 = vpow2.f32 %v4407_v20  ;;  %v5259_v9 = vpop.f32.mrb[36].mxu1  ;;  %v14931_v28 = vpop.f32.mrb[104].mxu0  ;;  %v4305_v26 = vsub.f32 %v14311_v46, %v4232_v38  ;;  %v4306_v62 = vsub.f32 %v14314_v48, %v4232_v38  ;;  %4732 = vmatprep.mubr.f32.mxu0 %v10249_v16  ;;  %v5366_v60 = vmax.f32 %v14917_v15, %v14920_v22 }
 0x45a   : > { %10260 = vpow2.f32 %v4409_v51  ;;  %18291 = vst [vmem:[#allocation120_spill] sm:$0xff] %v14929_v17  ;;  %18292 = vst [vmem:[#allocation44_spill] sm:$0xff] %v14931_v28  ;;  %v5261_v27 = vpop.f32.mrb[37].mxu1  ;;  %v10251_v35 = vpop.eup %10250  ;;  %v5369_v19 = vmax.f32 %v14923_v5, %v14929_v17 }
 0x45b   : > { %10262 = vrcp.f32 %v2203_v54  ;;  %v2537_v20 = vpop.f32.mrb[105].mxu0  ;;  %4733 = vmatmul.mubr.f32.gmra.mrb[210].mxu0 %v10247_v52  ;;  %v10253_v51 = vpop.eup %10252  ;;  %v4411_v29 = vmul.f32 1.442695, %v4305_v26  ;;  %v4413_v46 = vmul.f32 1.442695, %v4306_v62  ;;  %v10961_v54 = vld [vmem:[%s11296_s25 + $0x20] sm:$0xff]  ;;  %v14946_v26 = vadd.f32 %v10963_v61, %v5259_v9 }
 0x45c   : > { %v4235_v33 = vpop.xlane.xlu0 %4234  ;;  %5367 = vmax.xlane.f32.xlu0 %v5366_v60  ;;  %4486 = vadd.xlane.f32.xlu1 %v4485_v24  ;;  %v3333_v48 = vpop.xlane.xlu1 %3332  ;;  %v10962_v20 = vld [vmem:[%s11296_s25 + $0x28] sm:$0xff]  ;;  %v14950_v24 = vadd.f32 %v10253_v51, %v10251_v35 }
 0x45d   : > { %v4307_v38 = vsub.f32 %v14327_v39, %v4235_v33  ;;  %v4308_v16 = vsub.f32 %v14330_v25, %v4235_v33  ;;  %v5265_v18 = vpop.f32.mrb[38].mxu1  ;;  %v6037_v52 = vmax.f32 %v10961_v54, %v10962_v20  ;;  %10264 = vpow2.f32 %v4411_v29  ;;  %18293 = vst [vmem:[#allocation22_spill] sm:$0xff] %v14946_v26  ;;  %v14948_v62 = vpop.f32.mrb[106].mxu0  ;;  %4737 = vmatprep.mubr.f32.mxu0 %v10253_v51  ;;  %v10964_v25 = vld [vmem:[%s11296_s25 + $0x1a8] sm:$0xff] }
 0x45e   : > { %18294 = vst [vmem:[#allocation49_spill] sm:$0xff] %v14948_v62  ;;  %v5267_v60 = vpop.f32.mrb[39].mxu1  ;;  %v10255_v39 = vpop.eup %10254  ;;  %10266 = vpow2.f32 %v4413_v46  ;;  %v14953_v33 = vadd.f32 %v10964_v25, %v5261_v27  ;;  %v10965_v46 = vld [vmem:[%s11296_s25 + $0x30] sm:$0xff]  ;;  %v10966_v62 = vld [vmem:[%s11296_s25 + $0x38] sm:$0xff] }
 0x45f   : > { %v4415_v54 = vmul.f32 1.442695, %v4307_v38  ;;  %v4417_v20 = vmul.f32 1.442695, %v4308_v16  ;;  %v2542_v28 = vpop.f32.mrb[107].mxu0  ;;  %4738 = vmatmul.mubr.f32.gmra.mrb[212].mxu0 %v10251_v35  ;;  %v10257_v29 = vpop.eup %10256  ;;  %10268 = vrcp.f32 %v14906_v31  ;;  %v6040_v17 = vmax.f32 %v10965_v46, %v10966_v62  ;;  %v10967_v62 = vld [vmem:[%s11296_s25 + $0x1b0] sm:$0xff] }
 0x460   : > { %18295 = vst [vmem:[#allocation56_spill] sm:$0xff] %v14953_v33  ;;  %v2206_v9 = vpop.xlane.xlu0 %2205  ;;  %6038 = vmax.xlane.f32.xlu0 %v6037_v52  ;;  %5370 = vmax.xlane.f32.xlu1 %v5369_v19  ;;  %v4238_v51 = vpop.xlane.xlu1 %4237  ;;  %v14958_v27 = vadd.f32 %v10257_v29, %v10255_v39  ;;  %v4488_v16 = vadd.f32 %v14796_v10, %v14787_v2  ;;  %v10969_v46 = vld [vmem:[%s11296_s25 + $0x1c0] sm:$0xff] }
 0x461   : > { %10270 = vpow2.f32 %v4415_v54  ;;  %v5271_v61 = vpop.f32.mrb[40].mxu1  ;;  %v14960_v38 = vpop.f32.mrb[108].mxu0  ;;  %v4309_v28 = vsub.f32 %v14346_v34, %v4238_v51  ;;  %v4310_v31 = vsub.f32 %v14349_v50, %v4238_v51  ;;  %4742 = vmatprep.mubr.f32.mxu0 %v10257_v29  ;;  %v5372_v19 = vmax.f32 %v14946_v26, %v14953_v33  ;;  %v10968_v54 = vld [vmem:[%s11296_s25 + $0x1b8] sm:$0xff]  ;;  %v10970_v33 = vld [vmem:[%s11296_s25 + $0x1c8] sm:$0xff] }
 0x462   : > { %10272 = vpow2.f32 %v4417_v20  ;;  %18296 = vst [vmem:[#allocation82_spill] sm:$0xff] %v14960_v38  ;;  %v5273_v35 = vpop.f32.mrb[41].mxu1  ;;  %v14969_v25 = vadd.f32 %v10967_v62, %v5265_v18  ;;  %v14972_v20 = vadd.f32 %v10968_v54, %v5267_v60  ;;  %v2547_v34 = vpop.f32.mrb[109].mxu0  ;;  %v14975_v2 = vadd.f32 %v10969_v46, %v5271_v61 }
 0x463   : > { %v10259_v52 = vpop.eup %10258  ;;  %10274 = vrcp.f32 %v2206_v9  ;;  %4743 = vmatmul.mubr.f32.gmra.mrb[214].mxu0 %v10255_v39  ;;  %v4419_v29 = vmul.f32 1.442695, %v4309_v28  ;;  %v4421_v51 = vmul.f32 1.442695, %v4310_v31  ;;  %v14978_v26 = vadd.f32 %v10970_v33, %v5273_v35 }
 0x464   : > { %v10261_v50 = vpop.eup %10260  ;;  %10276 = vrcp.f32 %v3333_v48  ;;  %18297 = vst [vmem:[#allocation55_spill] sm:$0xff] %v14975_v2  ;;  %v4241_v10 = vpop.xlane.xlu0 %4240  ;;  %5373 = vmax.xlane.f32.xlu0 %v5372_v19  ;;  %4489 = vadd.xlane.f32.xlu1 %v4488_v16  ;;  %v5375_v33 = vmax.f32 %v14969_v25, %v14972_v20 }
 0x465   : > { %v10263_v38 = vpop.eup %10262  ;;  %18298 = vst [vmem:[#allocation62_spill] sm:$0xff] %v14978_v26  ;;  %v3336_v18 = vpop.xlane.xlu1 %3335  ;;  %v4311_v60 = vsub.f32 %v14362_v45, %v4241_v10  ;;  %v4312_v9 = vsub.f32 %v14365_v53, %v4241_v10  ;;  %10278 = vpow2.f32 %v4419_v29  ;;  %4747 = vmatprep.mubr.f32.mxu0 %v10261_v50  ;;  %v14985_v31 = vadd.f32 %v10261_v50, %v10259_v52  ;;  %v10971_v50 = vld [vmem:[%s11296_s25 + $0x1d0] sm:$0xff] }
 0x466   : > { %v5277_v39 = vpop.f32.mrb[42].mxu1  ;;  %v14982_v48 = vpop.f32.mrb[110].mxu0  ;;  %v2586_v61 = vmul.f32 %v10263_v38, %v14441_v23  ;;  %10280 = vpow2.f32 %v4421_v51  ;;  %v5378_v54 = vmax.f32 %v14975_v2, %v14978_v26  ;;  %v10974_v26 = vld [vmem:[%s11296_s25 + $0x1e8] sm:$0xff] }
 0x467   : > { %18299 = vst [vmem:[#allocation67_spill] sm:$0xff] %v14982_v48  ;;  %v5279_v28 = vpop.f32.mrb[43].mxu1  ;;  %v4423_v35 = vmul.f32 1.442695, %v4311_v60  ;;  %v4425_v16 = vmul.f32 1.442695, %v4312_v9  ;;  %4748 = vmatmul.mubr.f32.gmra.mrb[216].mxu0 %v10259_v52  ;;  %v10265_v53 = vpop.eup %10264  ;;  %10282 = vrcp.f32 %v3336_v18  ;;  %v14992_v29 = vadd.f32 %v10971_v50, %v5277_v39 }
 0x468   : > { %v2552_v45 = vpop.f32.mrb[111].mxu0  ;;  %v2209_v19 = vpop.xlane.xlu0 %2208  ;;  %6041 = vmax.xlane.f32.xlu0 %v6040_v17  ;;  %5376 = vmax.xlane.f32.xlu1 %v5375_v33  ;;  %v10972_v60 = vld [vmem:[%s11296_s25 + $0x1d8] sm:$0xff]  ;;  %v10973_v50 = vld [vmem:[%s11296_s25 + $0x1e0] sm:$0xff] }
 0x469   : > { %v10267_v62 = vpop.eup %10266  ;;  %10284 = vpow2.f32 %v4423_v35  ;;  %v4244_v23 = vpop.xlane.xlu1 %4243  ;;  %v14997_v17 = vadd.f32 %v10972_v60, %v5279_v28 }
 0x46a   : > { %v5283_v38 = vpop.f32.mrb[44].mxu1  ;;  %v10269_v34 = vpop.eup %10268  ;;  %10286 = vpow2.f32 %v4425_v16  ;;  %v4313_v52 = vsub.f32 %v14379_v59, %v4244_v23  ;;  %v4314_v46 = vsub.f32 %v14382_v30, %v4244_v23  ;;  %4752 = vmatprep.mubr.f32.mxu0 %v10267_v62  ;;  %v14999_v35 = vadd.f32 %v10267_v62, %v10265_v53 }
 0x46b   : > { %v3522_v51 = vpop.f32.mrb[112].mxu0  ;;  %v5285_v10 = vpop.f32.mrb[45].mxu1  ;;  %10288 = vrcp.f32 %v2209_v19  ;;  %4753 = vmatmul.mubr.f32.gmra.mrb[218].mxu0 %v10265_v53  ;;  %v15002_v59 = vadd.f32 %v10973_v50, %v5283_v38 }
 0x46c   : > { %v10271_v18 = vpop.eup %10270  ;;  %v3713_v9 = vmul.f32 %v10269_v34, %v3522_v51  ;;  %v3524_v33 = vpop.f32.mrb[113].mxu0  ;;  %v4427_v16 = vmul.f32 1.442695, %v4313_v52  ;;  %v4429_v45 = vmul.f32 1.442695, %v4314_v46  ;;  %v15007_v2 = vadd.f32 %v10974_v26, %v5285_v10  ;;  %5379 = vmax.xlane.f32.xlu0 %v5378_v54  ;;  %3365 = vadd.xlane.f32.xlu1 %v14316_v12 }
 0x46d   : > { %v10273_v39 = vpop.eup %10272  ;;  %v4247_v30 = vpop.xlane.xlu0 %4246  ;;  %v5381_v26 = vmax.f32 %v14992_v29, %v14997_v17  ;;  %v18300_v33 = vld [vmem:[#allocation102_spill] sm:$0xff] }
 0x46e   : > { %v10275_v23 = vpop.eup %10274  ;;  %v15004_v48 = vadd.f32 %v3713_v9, %v2586_v61  ;;  %v2212_v28 = vpop.xlane.xlu1 %2211  ;;  %v4315_v53 = vsub.f32 %v14392_v49, %v4247_v30  ;;  %10290 = vpow2.f32 %v4427_v16  ;;  %4757 = vmatprep.mubr.f32.mxu0 %v10273_v39  ;;  %v4316_v51 = vsub.f32 %v14395_v40, %v4247_v30 }
 0x46f   : > { %v5289_v19 = vpop.f32.mrb[46].mxu1  ;;  %v10277_v62 = vpop.eup %10276  ;;  %v2587_v34 = vmul.f32 %v10275_v23, %v14454_v36  ;;  %10292 = vpow2.f32 %v4429_v45  ;;  %4758 = vmatmul.mubr.f32.gmra.mrb[220].mxu0 %v10271_v18  ;;  %v15015_v60 = vadd.f32 %v10273_v39, %v10271_v18  ;;  %v5384_v40 = vmax.f32 %v15002_v59, %v15007_v2 }
 0x470   : > { %v3527_v38 = vpop.f32.mrb[114].mxu0  ;;  %v5291_v61 = vpop.f32.mrb[47].mxu1  ;;  %v4431_v52 = vmul.f32 1.442695, %v4315_v53  ;;  %10294 = vrcp.f32 %v2212_v28  ;;  %v4433_v49 = vmul.f32 1.442695, %v4316_v51  ;;  %2238 = vadd.xlane.f32.xlu0 %v18300_v33  ;;  %5382 = vmax.xlane.f32.xlu1 %v5381_v26 }
 0x471   : > { %v3714_v54 = vmul.f32 %v10277_v62, %v3527_v38  ;;  %v3529_v12 = vpop.f32.mrb[115].mxu0  ;;  %v10279_v46 = vpop.eup %10278  ;;  %v10975_v28 = vld [vmem:[%s11296_s25 + $0x1f0] sm:$0xff]  ;;  %v10976_v62 = vld [vmem:[%s11296_s25 + $0x1f8] sm:$0xff] }
 0x472   : > { %v3339_v10 = vpop.xlane.xlu0 %3338  ;;  %v10281_v36 = vpop.eup %10280  ;;  %10296 = vpow2.f32 %v4431_v52  ;;  %v15027_v53 = vadd.f32 %v10975_v28, %v5289_v19  ;;  %v10978_v28 = vld [vmem:[%s11296_s25 + $0x48] sm:$0xff] }
 0x473   : > { %v15019_v9 = vadd.f32 %v3714_v54, %v2587_v34  ;;  %v4250_v16 = vpop.xlane.xlu1 %4249  ;;  %v10283_v45 = vpop.eup %10282  ;;  %10298 = vpow2.f32 %v4433_v49  ;;  %4762 = vmatprep.mubr.f32.mxu0 %v10281_v36  ;;  %v15024_v39 = vadd.f32 %v10281_v36, %v10279_v46  ;;  %v15030_v34 = vadd.f32 %v10976_v62, %v5291_v61 }
 0x474   : > { %v3532_v50 = vpop.f32.mrb[116].mxu0  ;;  %v4317_v30 = vsub.f32 %v14405_v57, %v4250_v16  ;;  %v4318_v18 = vsub.f32 %v14408_v21, %v4250_v16  ;;  %v10285_v23 = vpop.eup %10284  ;;  %18301 = vst [vmem:[#allocation37_spill] sm:$0xff] %v15027_v53  ;;  %10300 = vrcp.f32 %v3339_v10  ;;  %4763 = vmatmul.mubr.f32.gmra.mrb[222].mxu0 %v10279_v46  ;;  %5385 = vmax.xlane.f32.xlu0 %v5384_v40  ;;  %v18303_v21 = vld [vmem:[#allocation23_spill] sm:$0xff] }
 0x475   : > { %18302 = vst [vmem:[#allocation85_spill] sm:$0xff] %v15030_v34  ;;  %v3715_v38 = vmul.f32 %v10283_v45, %v3532_v50  ;;  %v3534_v51 = vpop.f32.mrb[117].mxu0  ;;  %v10287_v26 = vpop.eup %10286  ;;  %2241 = vadd.xlane.f32.xlu1 %v18303_v21  ;;  %v5387_v46 = vmax.f32 %v15027_v53, %v15030_v34  ;;  %v18306_v21 = vld [vmem:[#allocation178_spill] sm:$0xff] }
 0x476   : > { %v4435_v54 = vmul.f32 1.442695, %v4317_v30  ;;  %v4437_v52 = vmul.f32 1.442695, %v4318_v18  ;;  %v4253_v57 = vpop.xlane.xlu0 %4252  ;;  %v10289_v12 = vpop.eup %10288  ;;  %v15035_v33 = vadd.f32 %v10287_v26, %v10285_v23  ;;  %4767 = vmatprep.mubr.f32.mxu0 %v10287_v26  ;;  %v10977_v18 = vld [vmem:[%s11296_s25 + $0x40] sm:$0xff] }
 0x477   : > { %v3342_v49 = vpop.xlane.xlu1 %3341  ;;  %v4319_v36 = vsub.f32 %v14418_v37, %v4253_v57  ;;  %v4320_v19 = vsub.f32 %v14421_v63, %v4253_v57  ;;  %v2588_v61 = vmul.f32 %v10289_v12, %v14469_v14  ;;  %v3537_v10 = vpop.f32.mrb[118].mxu0  ;;  %v6043_v62 = vmax.f32 %v10977_v18, %v10978_v28 }
 0x478   : > { %10302 = vpow2.f32 %v4435_v54  ;;  %v3539_v45 = vpop.f32.mrb[119].mxu0  ;;  %4768 = vmatmul.mubr.f32.gmra.mrb[224].mxu0 %v10285_v23  ;;  %v10291_v37 = vpop.eup %10290  ;;  %3368 = vadd.xlane.f32.xlu0 %v14333_v47  ;;  %v18304_v54 = vld [vmem:[#allocation175_spill] sm:$0xff]  ;;  %v18305_v23 = vld [vmem:[#allocation9_spill] sm:$0xff] }
 0x479   : > { %10304 = vpow2.f32 %v4437_v52  ;;  %v4439_v40 = vmul.f32 1.442695, %v4319_v36  ;;  %v4441_v16 = vmul.f32 1.442695, %v4320_v19  ;;  %v15040_v50 = vadd.f32 %v3715_v38, %v2588_v61  ;;  %v10293_v30 = vpop.eup %10292  ;;  %5388 = vmax.xlane.f32.xlu1 %v5387_v46  ;;  %v3542_v26 = vpop.f32.mrb[120].mxu0 }
 0x47a   : > { %10306 = vrcp.f32 %v3342_v49  ;;  %v2215_v63 = vpop.xlane.xlu0 %2214  ;;  %v10295_v51 = vpop.eup %10294  ;;  %4772 = vmatprep.mubr.f32.mxu0 %v10293_v30  ;;  %v15047_v38 = vadd.f32 %v10293_v30, %v10291_v37  ;;  %v4491_v36 = vadd.f32 %v14820_v43, %v14813_v44  ;;  %v10979_v30 = vld [vmem:[%s11296_s25 + $0x50] sm:$0xff] }
 0x47b   : > { %10308 = vpow2.f32 %v4439_v40  ;;  %v4256_v14 = vpop.xlane.xlu1 %4255  ;;  %v2589_v47 = vmul.f32 %v10295_v51, %v18306_v21  ;;  %v3544_v49 = vpop.f32.mrb[121].mxu0  ;;  %v18308_v43 = vld [vmem:[#allocation176_spill] sm:$0xff] }
 0x47c   : > { %10310 = vpow2.f32 %v4441_v16  ;;  %v4321_v52 = vsub.f32 %v18304_v54, %v4256_v14  ;;  %v4322_v57 = vsub.f32 %v18305_v23, %v4256_v14  ;;  %v10297_v12 = vpop.eup %10296  ;;  %4773 = vmatmul.mubr.f32.gmra.mrb[226].mxu0 %v10291_v37  ;;  %6044 = vmax.xlane.f32.xlu0 %v6043_v62  ;;  %v10980_v14 = vld [vmem:[%s11296_s25 + $0x58] sm:$0xff]  ;;  %v18307_v37 = vld [vmem:[#allocation35_spill] sm:$0xff]  ;;  %v4494_v62 = vadd.f32 %v14844_v42, %v14835_v58 }
 0x47d   : > { %10312 = vrcp.f32 %v2215_v63  ;;  %v10299_v19 = vpop.eup %10298  ;;  %4492 = vadd.xlane.f32.xlu1 %v4491_v36  ;;  %v6046_v18 = vmax.f32 %v10979_v30, %v10980_v14  ;;  %v15056_v63 = vpop.f32.mrb[122].mxu0 }
 0x47e   : > { %v4443_v61 = vmul.f32 1.442695, %v4321_v52  ;;  %v4445_v46 = vmul.f32 1.442695, %v4322_v57  ;;  %v10301_v40 = vpop.eup %10300  ;;  %v4259_v45 = vpop.xlane.xlu0 %4258  ;;  %v15054_v28 = vadd.f32 %v10299_v19, %v10297_v12  ;;  %4777 = vmatprep.mubr.f32.mxu0 %v10299_v19 }
 0x47f   : > { %v2218_v16 = vpop.xlane.xlu1 %2217  ;;  %v3716_v51 = vmul.f32 %v10301_v40, %v3537_v10  ;;  %v4323_v44 = vsub.f32 %v18307_v37, %v4259_v45  ;;  %v4324_v54 = vsub.f32 %v18308_v43, %v4259_v45  ;;  %v3549_v52 = vpop.f32.mrb[123].mxu0  ;;  %v18309_v40 = vld [vmem:[#allocation177_spill] sm:$0xff]  ;;  %v18312_v43 = vld [vmem:[#allocation111_spill] sm:$0xff] }
 0x480   : > { %10314 = vpow2.f32 %v4443_v61  ;;  %4778 = vmatmul.mubr.f32.gmra.mrb[228].mxu0 %v10297_v12  ;;  %6047 = vmax.xlane.f32.xlu0 %v6046_v18  ;;  %v18310_v45 = vld [vmem:[#allocation33_spill] sm:$0xff] }
 0x481   : > { %10316 = vpow2.f32 %v4445_v46  ;;  %v15062_v57 = vadd.f32 %v3716_v51, %v2589_v47  ;;  %v4447_v21 = vmul.f32 1.442695, %v4323_v44  ;;  %v4449_v10 = vmul.f32 1.442695, %v4324_v54  ;;  %4495 = vadd.xlane.f32.xlu1 %v4494_v62  ;;  %v15066_v30 = vpop.f32.mrb[124].mxu0  ;;  %v18311_v44 = vld [vmem:[#allocation139_spill] sm:$0xff] }
 0x482   : > { %v10303_v23 = vpop.eup %10302  ;;  %10318 = vrcp.f32 %v2218_v16  ;;  %v3345_v19 = vpop.xlane.xlu0 %3344 }
 0x483   : > { %v10305_v49 = vpop.eup %10304  ;;  %v4262_v36 = vpop.xlane.xlu1 %4261  ;;  %10320 = vpow2.f32 %v4447_v21 }
 0x484   : > { %v10307_v61 = vpop.eup %10306  ;;  %v4325_v46 = vsub.f32 %v18309_v40, %v4262_v36  ;;  %v4326_v12 = vsub.f32 %v18310_v45, %v4262_v36  ;;  %4782 = vmatprep.mubr.f32.mxu0 %v10305_v49  ;;  %v15068_v58 = vadd.f32 %v10305_v49, %v10303_v23  ;;  %10322 = vpow2.f32 %v4449_v10  ;;  %v3554_v16 = vpop.f32.mrb[125].mxu0  ;;  %2244 = vadd.xlane.f32.xlu0 %v18312_v43  ;;  %v18315_v36 = vld [vmem:[#allocation180_spill] sm:$0xff] }
 0x485   : > { %v10309_v42 = vpop.eup %10308  ;;  %v3717_v47 = vmul.f32 %v10307_v61, %v3542_v26  ;;  %4783 = vmatmul.mubr.f32.gmra.mrb[230].mxu0 %v10303_v23  ;;  %10324 = vrcp.f32 %v3345_v19  ;;  %3371 = vadd.xlane.f32.xlu1 %v18311_v44  ;;  %v15074_v21 = vpop.f32.mrb[126].mxu0  ;;  %v18313_v26 = vld [vmem:[#allocation36_spill] sm:$0xff]  ;;  %v18314_v23 = vld [vmem:[#allocation31_spill] sm:$0xff] }
 0x486   : > { %v10311_v14 = vpop.eup %10310  ;;  %v4451_v18 = vmul.f32 1.442695, %v4325_v46  ;;  %v4453_v51 = vmul.f32 1.442695, %v4326_v12  ;;  %v5296_v52 = vpop.xlane.xlu0 %5295 }
 0x487   : > { %v10313_v37 = vpop.eup %10312  ;;  %v3348_v54 = vpop.xlane.xlu1 %3347  ;;  %v15072_v62 = vadd.f32 %v10311_v14, %v10309_v42  ;;  %4787 = vmatprep.mubr.f32.mxu0 %v10311_v14  ;;  %v5390_v10 = vsub.f32 %v18313_v26, %v5296_v52  ;;  %v5391_v49 = vsub.f32 %v18314_v23, %v5296_v52  ;;  %v18317_v14 = vld [vmem:[#allocation138_spill] sm:$0xff]  ;;  %v10982_v26 = vld [vmem:[%s11296_s25 + $0x68] sm:$0xff] }
 0x488   : > { %10326 = vpow2.f32 %v4451_v18  ;;  %v2590_v19 = vmul.f32 %v10313_v37, %v18315_v36  ;;  %v3559_v61 = vpop.f32.mrb[127].mxu0  ;;  %v18316_v18 = vld [vmem:[#allocation7_spill] sm:$0xff]  ;;  %3374 = vadd.xlane.f32.xlu0 %v18317_v14  ;;  %v10981_v52 = vld [vmem:[%s11296_s25 + $0x60] sm:$0xff]  ;;  %v18319_v36 = vld [vmem:[#allocation13_spill] sm:$0xff] }
 0x489   : > { %10328 = vpow2.f32 %v4453_v51  ;;  %4788 = vmatmul.mubr.f32.gmra.mrb[232].mxu0 %v10309_v42  ;;  %v5454_v46 = vmul.f32 1.442695, %v5390_v10  ;;  %v5456_v45 = vmul.f32 1.442695, %v5391_v49  ;;  %2247 = vadd.xlane.f32.xlu1 %v18316_v18  ;;  %v6049_v23 = vmax.f32 %v10981_v52, %v10982_v26  ;;  %v18318_v51 = vld [vmem:[#allocation34_spill] sm:$0xff]  ;;  %v15087_v10 = vpop.f32.mrb[128].mxu0 }
 0x48a   : > { %v10315_v40 = vpop.eup %10314  ;;  %10330 = vrcp.f32 %v3348_v54  ;;  %v15079_v12 = vadd.f32 %v3717_v47, %v2590_v19  ;;  %v2221_v43 = vpop.xlane.xlu0 %2220  ;;  %v18321_v19 = vld [vmem:[#allocation183_spill] sm:$0xff] }
 0x48b   : > { %v10317_v16 = vpop.eup %10316  ;;  %v5299_v44 = vpop.xlane.xlu1 %5298  ;;  %10332 = vpow2.f32 %v5454_v46 }
 0x48c   : > { %v10319_v37 = vpop.eup %10318  ;;  %v5392_v42 = vsub.f32 %v18318_v51, %v5299_v44  ;;  %v5393_v54 = vsub.f32 %v18319_v36, %v5299_v44  ;;  %4792 = vmatprep.mubr.f32.mxu0 %v10317_v16  ;;  %v15089_v47 = vadd.f32 %v10317_v16, %v10315_v40  ;;  %10334 = vpow2.f32 %v5456_v45  ;;  %v3564_v49 = vpop.f32.mrb[129].mxu0  ;;  %6050 = vmax.xlane.f32.xlu0 %v6049_v23  ;;  %v10983_v51 = vld [vmem:[%s11296_s25 + $0x70] sm:$0xff]  ;;  %v10984_v36 = vld [vmem:[%s11296_s25 + $0x78] sm:$0xff] }
 0x48d   : > { %4793 = vmatmul.mubr.f32.gmra.mrb[234].mxu0 %v10315_v40  ;;  %v2591_v61 = vmul.f32 %v10319_v37, %v18321_v19  ;;  %v10321_v18 = vpop.eup %10320  ;;  %10336 = vrcp.f32 %v2221_v43  ;;  %4498 = vadd.xlane.f32.xlu1 %v14875_v3  ;;  %v6052_v34 = vmax.f32 %v10983_v51, %v10984_v36  ;;  %v15095_v45 = vpop.f32.mrb[130].mxu0  ;;  %v18322_v40 = vld [vmem:[#allocation181_spill] sm:$0xff]  ;;  %v18323_v49 = vld [vmem:[#allocation182_spill] sm:$0xff] }
 0x48e   : > { %18320 = vst [vmem:[#allocation75_spill] sm:$0xff] %v15089_v47  ;;  %v5458_v14 = vmul.f32 1.442695, %v5392_v42  ;;  %v5460_v52 = vmul.f32 1.442695, %v5393_v54  ;;  %v10323_v46 = vpop.eup %10322  ;;  %v5302_v26 = vpop.xlane.xlu0 %5301 }
 0x48f   : > { %v2224_v44 = vpop.xlane.xlu1 %2223  ;;  %v10325_v16 = vpop.eup %10324  ;;  %4797 = vmatprep.mubr.f32.mxu0 %v10323_v46  ;;  %v5394_v37 = vsub.f32 %v18322_v40, %v5302_v26  ;;  %v5395_v42 = vsub.f32 %v18323_v49, %v5302_v26  ;;  %v15099_v54 = vadd.f32 %v10323_v46, %v10321_v18  ;;  %v18325_v46 = vld [vmem:[#allocation184_spill] sm:$0xff]  ;;  %v18326_v49 = vld [vmem:[#allocation18_spill] sm:$0xff] }
 0x490   : > { %10338 = vpow2.f32 %v5458_v14  ;;  %v3569_v43 = vpop.f32.mrb[131].mxu0  ;;  %v3718_v3 = vmul.f32 %v10325_v16, %v15056_v63  ;;  %6053 = vmax.xlane.f32.xlu0 %v6052_v34 }
 0x491   : > { %18324 = vst [vmem:[#allocation74_spill] sm:$0xff] %v15099_v54  ;;  %10340 = vpow2.f32 %v5460_v52  ;;  %4798 = vmatmul.mubr.f32.gmra.mrb[236].mxu0 %v10321_v18  ;;  %v5462_v19 = vmul.f32 1.442695, %v5394_v37  ;;  %v5464_v51 = vmul.f32 1.442695, %v5395_v42  ;;  %4501 = vadd.xlane.f32.xlu1 %v14898_v55  ;;  %v15107_v43 = vpop.f32.mrb[132].mxu0 }
 0x492   : > { %v10327_v23 = vpop.eup %10326  ;;  %10342 = vrcp.f32 %v2224_v44  ;;  %v3351_v47 = vpop.xlane.xlu0 %3350  ;;  %v15103_v40 = vadd.f32 %v3718_v3, %v2591_v61  ;;  %v18328_v42 = vld [vmem:[#allocation172_spill] sm:$0xff]  ;;  %v18329_v3 = vld [vmem:[#allocation43_spill] sm:$0xff]  ;;  %v18335_v54 = vld [vmem:[#allocation173_spill] sm:$0xff] }
 0x493   : > { %v10329_v36 = vpop.eup %10328  ;;  %v5305_v14 = vpop.xlane.xlu1 %5304  ;;  %10344 = vpow2.f32 %v5462_v19 }
 0x494   : > { %v10331_v26 = vpop.eup %10330  ;;  %v5396_v52 = vsub.f32 %v18325_v46, %v5305_v14  ;;  %v5397_v18 = vsub.f32 %v18326_v49, %v5305_v14  ;;  %4802 = vmatprep.mubr.f32.mxu0 %v10329_v36  ;;  %v15109_v63 = vadd.f32 %v10329_v36, %v10327_v23  ;;  %10346 = vpow2.f32 %v5464_v51  ;;  %v3574_v44 = vpop.f32.mrb[133].mxu0  ;;  %2250 = vadd.xlane.f32.xlu0 %v18329_v3  ;;  %v18330_v51 = vld [vmem:[#allocation187_spill] sm:$0xff]  ;;  %v18331_v49 = vld [vmem:[#allocation17_spill] sm:$0xff] }
 0x495   : > { %4803 = vmatmul.mubr.f32.gmra.mrb[238].mxu0 %v10327_v23  ;;  %v3719_v55 = vmul.f32 %v10331_v26, %v15066_v30  ;;  %v10333_v34 = vpop.eup %10332  ;;  %10348 = vrcp.f32 %v3351_v47  ;;  %3377 = vadd.xlane.f32.xlu1 %v18328_v42  ;;  %v15114_v36 = vpop.f32.mrb[134].mxu0 }
 0x496   : > { %18327 = vst [vmem:[#allocation121_spill] sm:$0xff] %v15109_v63  ;;  %v5466_v16 = vmul.f32 1.442695, %v5396_v52  ;;  %v5468_v61 = vmul.f32 1.442695, %v5397_v18  ;;  %v10335_v37 = vpop.eup %10334  ;;  %v5308_v14 = vpop.xlane.xlu0 %5307  ;;  %v18333_v52 = vld [vmem:[#allocation186_spill] sm:$0xff] }
 0x497   : > { %v3354_v19 = vpop.xlane.xlu1 %3353  ;;  %v10337_v46 = vpop.eup %10336  ;;  %5774 = vmatprep.mubr.f32.mxu0 %v10335_v37  ;;  %v5398_v23 = vsub.f32 %v18330_v51, %v5308_v14  ;;  %v5399_v30 = vsub.f32 %v18331_v49, %v5308_v14  ;;  %v15118_v26 = vadd.f32 %v10335_v37, %v10333_v34  ;;  %v18334_v63 = vld [vmem:[#allocation50_spill] sm:$0xff]  ;;  %v10986_v49 = vld [vmem:[%s11296_s25 + $0x88] sm:$0xff] }
 0x498   : > { %10350 = vpow2.f32 %v5466_v16  ;;  %v3579_v47 = vpop.f32.mrb[135].mxu0  ;;  %v2592_v18 = vmul.f32 %v10337_v46, %v18333_v52  ;;  %3380 = vadd.xlane.f32.xlu0 %v18335_v54  ;;  %v10985_v14 = vld [vmem:[%s11296_s25 + $0x80] sm:$0xff] }
 0x499   : > { %18332 = vst [vmem:[#allocation151_spill] sm:$0xff] %v15118_v26  ;;  %10352 = vpow2.f32 %v5468_v61  ;;  %5775 = vmatmul.mubr.f32.vlgmr.msra.gmra.mrb[240].mxu0 %v10333_v34  ;;  %v5470_v42 = vmul.f32 1.442695, %v5398_v23  ;;  %v5472_v16 = vmul.f32 1.442695, %v5399_v30  ;;  %2253 = vadd.xlane.f32.xlu1 %v18334_v63  ;;  %v6055_v37 = vmax.f32 %v10985_v14, %v10986_v49  ;;  %v18336_v34 = vld [vmem:[#allocation189_spill] sm:$0xff] }
 0x49a   : > { %v10339_v44 = vpop.eup %10338  ;;  %10354 = vrcp.f32 %v3354_v19  ;;  %v2227_v53 = vpop.xlane.xlu0 %2226  ;;  %v15125_v26 = vadd.f32 %v3719_v55, %v2592_v18  ;;  %v18337_v47 = vld [vmem:[#allocation19_spill] sm:$0xff]  ;;  %v18340_v30 = vld [vmem:[#allocation188_spill] sm:$0xff] }
 0x49b   : > { %v10341_v3 = vpop.eup %10340  ;;  %v5311_v51 = vpop.xlane.xlu1 %5310  ;;  %10356 = vpow2.f32 %v5470_v42 }
 0x49c   : > { %v10343_v61 = vpop.eup %10342  ;;  %v5400_v46 = vsub.f32 %v18336_v34, %v5311_v51  ;;  %v5401_v19 = vsub.f32 %v18337_v47, %v5311_v51  ;;  %v15129_v23 = vpop.f32.mrb[136].mxu0  ;;  %5779 = vmatprep.mubr.f32.mxu0 %v10341_v3  ;;  %v15131_v63 = vadd.f32 %v10341_v3, %v10339_v44  ;;  %10358 = vpow2.f32 %v5472_v16  ;;  %6056 = vmax.xlane.f32.xlu0 %v6055_v37  ;;  %v10987_v34 = vld [vmem:[%s11296_s25 + $0x90] sm:$0xff]  ;;  %v10988_v47 = vld [vmem:[%s11296_s25 + $0x98] sm:$0xff] }
 0x49d   : > { %18338 = vst [vmem:[#allocation84_spill] sm:$0xff] %v15129_v23  ;;  %v3584_v54 = vpop.f32.mrb[137].mxu0  ;;  %5780 = vmatmul.mubr.f32.gmra.mrb[242].mxu0 %v10339_v44  ;;  %v2593_v52 = vmul.f32 %v10343_v61, %v18340_v30  ;;  %v10345_v55 = vpop.eup %10344  ;;  %10360 = vrcp.f32 %v2227_v53  ;;  %4504 = vadd.xlane.f32.xlu1 %v14914_v56  ;;  %v6058_v23 = vmax.f32 %v10987_v34, %v10988_v47  ;;  %v18342_v44 = vld [vmem:[#allocation192_spill] sm:$0xff] }
 0x49e   : > { %18339 = vst [vmem:[#allocation161_spill] sm:$0xff] %v15131_v63  ;;  %v5474_v18 = vmul.f32 1.442695, %v5400_v46  ;;  %v5476_v14 = vmul.f32 1.442695, %v5401_v19  ;;  %v10347_v42 = vpop.eup %10346  ;;  %v5314_v49 = vpop.xlane.xlu0 %5313  ;;  %v18343_v54 = vld [vmem:[#allocation78_spill] sm:$0xff] }
 0x49f   : > { %v2230_v51 = vpop.xlane.xlu1 %2229  ;;  %v10349_v3 = vpop.eup %10348  ;;  %5784 = vmatprep.mubr.f32.mxu0 %v10347_v42  ;;  %v5402_v61 = vsub.f32 %v18342_v44, %v5314_v49  ;;  %v5403_v46 = vsub.f32 %v18343_v54, %v5314_v49  ;;  %v15141_v19 = vadd.f32 %v10347_v42, %v10345_v55  ;;  %v18345_v42 = vld [vmem:[#allocation86_spill] sm:$0xff] }
 0x4a0   : > { %10362 = vpow2.f32 %v5474_v18  ;;  %v15137_v16 = vpop.f32.mrb[138].mxu0  ;;  %v3720_v56 = vmul.f32 %v10349_v3, %v15074_v21  ;;  %6059 = vmax.xlane.f32.xlu0 %v6058_v23 }
 0x4a1   : > { %18341 = vst [vmem:[#allocation38_spill] sm:$0xff] %v15137_v16  ;;  %18344 = vst [vmem:[#allocation154_spill] sm:$0xff] %v15141_v19  ;;  %10364 = vpow2.f32 %v5476_v14  ;;  %v3589_v53 = vpop.f32.mrb[139].mxu0  ;;  %5785 = vmatmul.mubr.f32.gmra.mrb[244].mxu0 %v10345_v55  ;;  %v5478_v30 = vmul.f32 1.442695, %v5402_v61  ;;  %4507 = vadd.xlane.f32.xlu1 %v14926_v11  ;;  %v18346_v14 = vld [vmem:[#allocation195_spill] sm:$0xff] }
 0x4a2   : > { %v10351_v37 = vpop.eup %10350  ;;  %10366 = vrcp.f32 %v2230_v51  ;;  %v5480_v34 = vmul.f32 1.442695, %v5403_v46  ;;  %v15145_v63 = vadd.f32 %v3720_v56, %v2593_v52  ;;  %v15149_v55 = vpop.f32.mrb[140].mxu0  ;;  %v18349_v46 = vld [vmem:[#allocation30_spill] sm:$0xff]  ;;  %v18350_v53 = vld [vmem:[#allocation61_spill] sm:$0xff] }
 0x4a3   : > { %v10353_v47 = vpop.eup %10352  ;;  %v5317_v18 = vpop.xlane.xlu1 %5316  ;;  %10368 = vpow2.f32 %v5478_v30  ;;  %18347 = vst [vmem:[#allocation21_spill] sm:$0xff] %v15149_v55 }
 0x4a4   : > { %v10355_v44 = vpop.eup %10354  ;;  %v5404_v49 = vsub.f32 %v18345_v42, %v5317_v18  ;;  %v5405_v54 = vsub.f32 %v18346_v14, %v5317_v18  ;;  %5789 = vmatprep.mubr.f32.mxu0 %v10353_v47  ;;  %v15151_v21 = vadd.f32 %v10353_v47, %v10351_v37  ;;  %10370 = vpow2.f32 %v5480_v34  ;;  %v3594_v51 = vpop.f32.mrb[141].mxu0  ;;  %2256 = vadd.xlane.f32.xlu0 %v18350_v53  ;;  %v18353_v34 = vld [vmem:[#allocation191_spill] sm:$0xff]  ;;  %v18355_v14 = vld [vmem:[#allocation174_spill] sm:$0xff] }
 0x4a5   : > { %5790 = vmatmul.mubr.f32.gmra.mrb[246].mxu0 %v10351_v37  ;;  %v3721_v11 = vmul.f32 %v10355_v44, %v15087_v10  ;;  %v10357_v23 = vpop.eup %10356  ;;  %3383 = vadd.xlane.f32.xlu1 %v18349_v46  ;;  %v15156_v30 = vpop.xlane.xlu0 %4456  ;;  %v10990_v51 = vld [vmem:[%s11296_s25 + $0xa8] sm:$0xff] }
 0x4a6   : > { %18348 = vst [vmem:[#allocation93_spill] sm:$0xff] %v15151_v21  ;;  %v5482_v3 = vmul.f32 1.442695, %v5404_v49  ;;  %v5484_v52 = vmul.f32 1.442695, %v5405_v54  ;;  %v10359_v61 = vpop.eup %10358  ;;  %v15158_v47 = vpop.f32.mrb[142].mxu0 }
 0x4a7   : > { %v10361_v56 = vpop.eup %10360  ;;  %18351 = vst [vmem:[#allocation164_spill] sm:$0xff] %v15158_v47  ;;  %5794 = vmatprep.mubr.f32.mxu0 %v10359_v61  ;;  %v15160_v37 = vadd.f32 %v10359_v61, %v10357_v23  ;;  %v3599_v10 = vpop.f32.mrb[143].mxu0  ;;  %v18354_v49 = vld [vmem:[#allocation68_spill] sm:$0xff]  ;;  %v10989_v54 = vld [vmem:[%s11296_s25 + $0xa0] sm:$0xff] }
 0x4a8   : > { %10372 = vpow2.f32 %v5482_v3  ;;  %v2594_v18 = vmul.f32 %v10361_v56, %v18353_v34  ;;  %3386 = vadd.xlane.f32.xlu0 %v18355_v14  ;;  %v6061_v3 = vmax.f32 %v10989_v54, %v10990_v51  ;;  %v15169_v47 = vpop.xlane.xlu1 %4459  ;;  %v18357_v61 = vld [vmem:[#allocation70_spill] sm:$0xff]  ;;  %v18360_v14 = vld [vmem:[#allocation193_spill] sm:$0xff] }
 0x4a9   : > { %18352 = vst [vmem:[#allocation91_spill] sm:$0xff] %v15160_v37  ;;  %10374 = vpow2.f32 %v5484_v52  ;;  %5795 = vmatmul.mubr.f32.gmra.mrb[248].mxu0 %v10357_v23  ;;  %2259 = vadd.xlane.f32.xlu1 %v18354_v49  ;;  %v5320_v52 = vpop.xlane.xlu0 %5319  ;;  %v18358_v10 = vld [vmem:[#allocation46_spill] sm:$0xff]  ;;  %v15175_v49 = vpop.f32.mrb[144].mxu0 }
 0x4aa   : > { %v10363_v44 = vpop.eup %10362  ;;  %v15167_v46 = vadd.f32 %v3721_v11, %v2594_v18  ;;  %v5406_v56 = vsub.f32 %v18357_v61, %v5320_v52  ;;  %v5407_v34 = vsub.f32 %v18358_v10, %v5320_v52  ;;  %18359 = vst [vmem:[#allocation156_spill] sm:$0xff] %v15175_v49  ;;  %v3604_v18 = vpop.f32.mrb[145].mxu0  ;;  %v18363_v10 = vld [vmem:[#allocation52_spill] sm:$0xff]  ;;  %v10994_v49 = vld [vmem:[%s11296_s25 + $0xc8] sm:$0xff] }
 0x4ab   : > { %v10365_v42 = vpop.eup %10364 }
 0x4ac   : > { %v10367_v53 = vpop.eup %10366  ;;  %5799 = vmatprep.mubr.f32.mxu0 %v10365_v42  ;;  %v15171_v23 = vadd.f32 %v10365_v42, %v10363_v44  ;;  %v5486_v55 = vmul.f32 1.442695, %v5406_v56  ;;  %v5488_v37 = vmul.f32 1.442695, %v5407_v34  ;;  %6062 = vmax.xlane.f32.xlu0 %v6061_v3  ;;  %v10991_v42 = vld [vmem:[%s11296_s25 + $0xb0] sm:$0xff]  ;;  %v5323_v61 = vpop.xlane.xlu1 %5322 }
 0x4ad   : > { %5800 = vmatmul.mubr.f32.gmra.mrb[250].mxu0 %v10363_v44  ;;  %v15178_v54 = vmul.f32 %v10367_v53, %v18360_v14  ;;  %v10369_v11 = vpop.eup %10368  ;;  %4510 = vadd.xlane.f32.xlu1 %v14950_v24  ;;  %v15183_v21 = vpop.xlane.xlu0 %4462  ;;  %v18362_v44 = vld [vmem:[#allocation45_spill] sm:$0xff]  ;;  %v5409_v14 = vsub.f32 %v18363_v10, %v5323_v61 }
 0x4ae   : > { %18356 = vst [vmem:[#allocation155_spill] sm:$0xff] %v15171_v23  ;;  %v10371_v51 = vpop.eup %10370  ;;  %v10992_v23 = vld [vmem:[%s11296_s25 + $0xb8] sm:$0xff]  ;;  %10376 = vpow2.f32 %v5486_v55  ;;  %v5408_v53 = vsub.f32 %v18362_v44, %v5323_v61  ;;  %v15189_v18 = vpop.f32.mrb[146].mxu0 }
 0x4af   : > { %v6064_v19 = vmax.f32 %v10991_v42, %v10992_v23  ;;  %5804 = vmatprep.mubr.f32.mxu0 %v10371_v51  ;;  %v15185_v52 = vadd.f32 %v10371_v51, %v10369_v11  ;;  %18364 = vst [vmem:[#allocation42_spill] sm:$0xff] %v15189_v18  ;;  %10378 = vpow2.f32 %v5488_v37  ;;  %v3609_v24 = vpop.f32.mrb[147].mxu0  ;;  %v5492_v23 = vmul.f32 1.442695, %v5409_v14  ;;  %v18366_v61 = vld [vmem:[#allocation73_spill] sm:$0xff] }
 0x4b0   : > { %v5490_v34 = vmul.f32 1.442695, %v5408_v53  ;;  %v15192_v42 = vpop.xlane.xlu1 %4465  ;;  %v18367_v10 = vld [vmem:[#allocation77_spill] sm:$0xff] }
 0x4b1   : > { %18361 = vst [vmem:[#allocation101_spill] sm:$0xff] %v15185_v52  ;;  %5805 = vmatmul.mubr.f32.gmra.mrb[252].mxu0 %v10369_v11  ;;  %4513 = vadd.xlane.f32.xlu1 %v14958_v27  ;;  %v5326_v51 = vpop.xlane.xlu0 %5325  ;;  %v15198_v18 = vpop.f32.mrb[148].mxu0  ;;  %v18369_v27 = vld [vmem:[#allocation32_spill] sm:$0xff] }
 0x4b2   : > { %v10373_v56 = vpop.eup %10372  ;;  %6065 = vmax.xlane.f32.xlu0 %v6064_v19  ;;  %10380 = vpow2.f32 %v5490_v34  ;;  %v5410_v44 = vsub.f32 %v18366_v61, %v5326_v51  ;;  %v5411_v11 = vsub.f32 %v18367_v10, %v5326_v51  ;;  %18368 = vst [vmem:[#allocation100_spill] sm:$0xff] %v15198_v18  ;;  %v3614_v37 = vpop.f32.mrb[149].mxu0  ;;  %v18370_v19 = vld [vmem:[#allocation148_spill] sm:$0xff]  ;;  %v18371_v34 = vld [vmem:[#allocation58_spill] sm:$0xff]  ;;  %v18372_v51 = vld [vmem:[#allocation57_spill] sm:$0xff] }
 0x4b3   : > { %v10375_v3 = vpop.eup %10374  ;;  %10382 = vpow2.f32 %v5492_v23  ;;  %v18374_v37 = vld [vmem:[#allocation150_spill] sm:$0xff] }
 0x4b4   : > { %5809 = vmatprep.mubr.f32.mxu0 %v10375_v3  ;;  %v15194_v55 = vadd.f32 %v10375_v3, %v10373_v56  ;;  %v5494_v53 = vmul.f32 1.442695, %v5410_v44  ;;  %v5496_v14 = vmul.f32 1.442695, %v5411_v11  ;;  %v5329_v24 = vpop.xlane.xlu1 %5328 }
 0x4b5   : > { %5810 = vmatmul.mubr.f32.gmra.mrb[254].mxu0 %v10373_v56  ;;  %3389 = vadd.xlane.f32.xlu1 %v18369_v27  ;;  %v15202_v3 = vpop.xlane.xlu0 %4468  ;;  %v5412_v61 = vsub.f32 %v18371_v34, %v5329_v24  ;;  %v5413_v10 = vsub.f32 %v18372_v51, %v5329_v24  ;;  %v15206_v18 = vpop.f32.mrb[150].mxu0  ;;  %v18375_v27 = vld [vmem:[#allocation8_spill] sm:$0xff] }
 0x4b6   : > { %18365 = vst [vmem:[#allocation41_spill] sm:$0xff] %v15194_v55  ;;  %2262 = vadd.xlane.f32.xlu0 %v18370_v19  ;;  %10384 = vpow2.f32 %v5494_v53  ;;  %18373 = vst [vmem:[#allocation24_spill] sm:$0xff] %v15206_v18  ;;  %v3619_v56 = vpop.f32.mrb[151].mxu0  ;;  %v10993_v19 = vld [vmem:[%s11296_s25 + $0xc0] sm:$0xff] }
 0x4b7   : > { %10386 = vpow2.f32 %v5496_v14  ;;  %v5498_v44 = vmul.f32 1.442695, %v5412_v61  ;;  %v5500_v11 = vmul.f32 1.442695, %v5413_v10  ;;  %v6067_v52 = vmax.f32 %v10993_v19, %v10994_v49 }
 0x4b8   : > { %v10377_v23 = vpop.eup %10376  ;;  %v15212_v53 = vpop.xlane.xlu1 %4471 }
 0x4b9   : > { %2265 = vadd.xlane.f32.xlu1 %v18374_v37  ;;  %v10379_v55 = vpop.eup %10378  ;;  %v5332_v34 = vpop.xlane.xlu0 %5331  ;;  %10388 = vpow2.f32 %v5498_v44  ;;  %v10996_v44 = vld [vmem:[%s11296_s25 + $0xd8] sm:$0xff] }
 0x4ba   : > { %3392 = vadd.xlane.f32.xlu0 %v18375_v27  ;;  %5814 = vmatprep.mubr.f32.mxu0 %v10379_v55  ;;  %v5414_v14 = vsub.f32 %v14678_v0, %v5332_v34  ;;  %v5415_v24 = vsub.f32 %v14681_v4, %v5332_v34  ;;  %v15216_v61 = vpop.f32.mrb[152].mxu0  ;;  %v15218_v51 = vadd.f32 %v10379_v55, %v10377_v23  ;;  %10390 = vpow2.f32 %v5500_v11  ;;  %v10995_v27 = vld [vmem:[%s11296_s25 + $0xd0] sm:$0xff]  ;;  %v18379_v34 = vld [vmem:[#allocation71_spill] sm:$0xff] }
 0x4bb   : > { %18376 = vst [vmem:[#allocation48_spill] sm:$0xff] %v15216_v61  ;;  %5815 = vmatmul.mubr.f32.gmra.mrb[0].mxu0 %v10377_v23  ;;  %v3624_v10 = vpop.f32.mrb[153].mxu0  ;;  %v6070_v19 = vmax.f32 %v10995_v27, %v10996_v44  ;;  %v18378_v4 = vld [vmem:[#allocation72_spill] sm:$0xff] }
 0x4bc   : > { %18377 = vst [vmem:[#allocation47_spill] sm:$0xff] %v15218_v51  ;;  %v10381_v49 = vpop.eup %10380  ;;  %v5502_v56 = vmul.f32 1.442695, %v5414_v14  ;;  %v5504_v37 = vmul.f32 1.442695, %v5415_v24  ;;  %v5335_v0 = vpop.xlane.xlu1 %5334 }
 0x4bd   : > { %4516 = vadd.xlane.f32.xlu1 %v14985_v31  ;;  %v10383_v18 = vpop.eup %10382  ;;  %v15223_v16 = vpop.xlane.xlu0 %4474  ;;  %v5416_v55 = vsub.f32 %v18378_v4, %v5335_v0  ;;  %v5417_v11 = vsub.f32 %v18379_v34, %v5335_v0  ;;  %v18381_v0 = vld [vmem:[#allocation90_spill] sm:$0xff]  ;;  %v18382_v34 = vld [vmem:[#allocation89_spill] sm:$0xff] }
 0x4be   : > { %6068 = vmax.xlane.f32.xlu0 %v6067_v52  ;;  %10392 = vpow2.f32 %v5502_v56  ;;  %5819 = vmatprep.mubr.f32.mxu0 %v10383_v18  ;;  %v15227_v23 = vpop.f32.mrb[154].mxu0  ;;  %v15229_v14 = vadd.f32 %v10383_v18, %v10381_v49 }
 0x4bf   : > { %18380 = vst [vmem:[#allocation157_spill] sm:$0xff] %v15227_v23  ;;  %10394 = vpow2.f32 %v5504_v37  ;;  %5820 = vmatmul.mubr.f32.gmra.mrb[2].mxu0 %v10381_v49  ;;  %v3629_v31 = vpop.f32.mrb[155].mxu0  ;;  %v5506_v24 = vmul.f32 1.442695, %v5416_v55  ;;  %v5508_v10 = vmul.f32 1.442695, %v5417_v11 }
 0x4c0   : > { %v10385_v52 = vpop.eup %10384  ;;  %v18385_v11 = vld [vmem:[#allocation12_spill] sm:$0xff] }
 0x4c1   : > { %4519 = vadd.xlane.f32.xlu1 %v14999_v35  ;;  %v10387_v27 = vpop.eup %10386  ;;  %v15232_v56 = vpop.xlane.xlu1 %4477  ;;  %10396 = vpow2.f32 %v5506_v24  ;;  %v18386_v31 = vld [vmem:[#allocation152_spill] sm:$0xff] }
 0x4c2   : > { %6071 = vmax.xlane.f32.xlu0 %v6070_v19  ;;  %v5338_v44 = vpop.xlane.xlu0 %5337  ;;  %5824 = vmatprep.mubr.f32.mxu0 %v10387_v27  ;;  %v15236_v23 = vpop.f32.mrb[156].mxu0  ;;  %v15238_v49 = vadd.f32 %v10387_v27, %v10385_v52  ;;  %10398 = vpow2.f32 %v5508_v10  ;;  %v18388_v27 = vld [vmem:[#allocation97_spill] sm:$0xff] }
 0x4c3   : > { %v5418_v4 = vsub.f32 %v18381_v0, %v5338_v44  ;;  %v5419_v18 = vsub.f32 %v18382_v34, %v5338_v44  ;;  %18383 = vst [vmem:[#allocation171_spill] sm:$0xff] %v15236_v23  ;;  %5825 = vmatmul.mubr.f32.gmra.mrb[4].mxu0 %v10385_v52  ;;  %v3634_v37 = vpop.f32.mrb[157].mxu0  ;;  %v10389_v55 = vpop.eup %10388  ;;  %v18387_v44 = vld [vmem:[#allocation98_spill] sm:$0xff] }
 0x4c4   : > { %18384 = vst [vmem:[#allocation54_spill] sm:$0xff] %v15238_v49  ;;  %v10391_v24 = vpop.eup %10390  ;;  %v10997_v23 = vld [vmem:[%s11296_s25 + $0xe0] sm:$0xff] }
 0x4c5   : > { %v5510_v35 = vmul.f32 1.442695, %v5418_v4  ;;  %v5512_v19 = vmul.f32 1.442695, %v5419_v18  ;;  %3395 = vadd.xlane.f32.xlu1 %v18385_v11  ;;  %v5341_v61 = vpop.xlane.xlu1 %5340  ;;  %5829 = vmatprep.mubr.f32.mxu0 %v10391_v24  ;;  %v15244_v52 = vpop.f32.mrb[158].mxu0  ;;  %v15246_v10 = vadd.f32 %v10391_v24, %v10389_v55 }
 0x4c6   : > { %2268 = vadd.xlane.f32.xlu0 %v18386_v31  ;;  %v3357_v51 = vpop.xlane.xlu0 %3356  ;;  %v5420_v0 = vsub.f32 %v18387_v44, %v5341_v61  ;;  %v5421_v34 = vsub.f32 %v18388_v27, %v5341_v61  ;;  %18389 = vst [vmem:[#allocation53_spill] sm:$0xff] %v15244_v52  ;;  %v3639_v4 = vpop.f32.mrb[159].mxu0  ;;  %v18391_v31 = vld [vmem:[#allocation83_spill] sm:$0xff] }
 0x4c7   : > { %10400 = vpow2.f32 %v5510_v35  ;;  %18390 = vst [vmem:[#allocation110_spill] sm:$0xff] %v15246_v10  ;;  %5830 = vmatmul.mubr.f32.gmra.mrb[6].mxu0 %v10389_v55  ;;  %v18392_v35 = vld [vmem:[#allocation11_spill] sm:$0xff] }
 0x4c8   : > { %10402 = vpow2.f32 %v5512_v19  ;;  %v10393_v18 = vpop.eup %10392  ;;  %v5514_v37 = vmul.f32 1.442695, %v5420_v0  ;;  %v5516_v11 = vmul.f32 1.442695, %v5421_v34  ;;  %v10998_v44 = vld [vmem:[%s11296_s25 + $0xe8] sm:$0xff] }
 0x4c9   : > { %10404 = vrcp.f32 %v3357_v51  ;;  %2271 = vadd.xlane.f32.xlu1 %v18391_v31  ;;  %v6073_v49 = vmax.f32 %v10997_v23, %v10998_v44  ;;  %v10395_v61 = vpop.eup %10394  ;;  %v15252_v27 = vpop.xlane.xlu1 %4480 }
 0x4ca   : > { %3398 = vadd.xlane.f32.xlu0 %v18392_v35  ;;  %v5344_v24 = vpop.xlane.xlu0 %5343  ;;  %10406 = vpow2.f32 %v5514_v37  ;;  %5834 = vmatprep.mubr.f32.mxu0 %v10395_v61  ;;  %v15256_v51 = vpop.f32.mrb[160].mxu0  ;;  %v15258_v0 = vadd.f32 %v10395_v61, %v10393_v18  ;;  %v10999_v35 = vld [vmem:[%s11296_s25 + $0xf0] sm:$0xff]  ;;  %v11000_v37 = vld [vmem:[%s11296_s25 + $0xf8] sm:$0xff] }
 0x4cb   : > { %v5422_v55 = vsub.f32 %v14744_v6, %v5344_v24  ;;  %v5423_v19 = vsub.f32 %v14747_v7, %v5344_v24  ;;  %18393 = vst [vmem:[#allocation27_spill] sm:$0xff] %v15256_v51  ;;  %10408 = vpow2.f32 %v5516_v11  ;;  %5835 = vmatmul.mubr.f32.gmra.mrb[8].mxu0 %v10393_v18  ;;  %v3644_v34 = vpop.f32.mrb[161].mxu0  ;;  %v10397_v23 = vpop.eup %10396  ;;  %v6076_v44 = vmax.f32 %v10999_v35, %v11000_v37  ;;  %v18395_v7 = vld [vmem:[#allocation115_spill] sm:$0xff]  ;;  %v18396_v24 = vld [vmem:[#allocation114_spill] sm:$0xff] }
 0x4cc   : > { %v10399_v52 = vpop.eup %10398 }
 0x4cd   : > { %v5518_v4 = vmul.f32 1.442695, %v5422_v55  ;;  %v5520_v31 = vmul.f32 1.442695, %v5423_v19  ;;  %4522 = vadd.xlane.f32.xlu1 %v15015_v60  ;;  %v5347_v6 = vpop.xlane.xlu1 %5346  ;;  %5839 = vmatprep.mubr.f32.mxu0 %v10399_v52  ;;  %v15267_v18 = vpop.f32.mrb[162].mxu0  ;;  %v15269_v60 = vadd.f32 %v10399_v52, %v10397_v23 }
 0x4ce   : > { %6074 = vmax.xlane.f32.xlu0 %v6073_v49  ;;  %v15263_v10 = vpop.xlane.xlu0 %6032  ;;  %v5424_v61 = vsub.f32 %v18395_v7, %v5347_v6  ;;  %v5425_v11 = vsub.f32 %v18396_v24, %v5347_v6  ;;  %18397 = vst [vmem:[#allocation59_spill] sm:$0xff] %v15267_v18  ;;  %v3649_v55 = vpop.f32.mrb[163].mxu0 }
 0x4cf   : > { %18394 = vst [vmem:[#allocation60_spill] sm:$0xff] %v15263_v10  ;;  %10410 = vpow2.f32 %v5518_v4  ;;  %5840 = vmatmul.mubr.f32.gmra.mrb[10].mxu0 %v10397_v23  ;;  %v18399_v55 = vld [vmem:[#allocation179_spill] sm:$0xff] }
 0x4d0   : > { %10412 = vpow2.f32 %v5520_v31  ;;  %v5522_v19 = vmul.f32 1.442695, %v5424_v61  ;;  %v5524_v34 = vmul.f32 1.442695, %v5425_v11 }
 0x4d1   : > { %v10401_v49 = vpop.eup %10400  ;;  %4525 = vadd.xlane.f32.xlu1 %v15024_v39  ;;  %v15272_v4 = vpop.xlane.xlu1 %4483 }
 0x4d2   : > { %6077 = vmax.xlane.f32.xlu0 %v6076_v44  ;;  %v10403_v35 = vpop.eup %10402  ;;  %v5350_v37 = vpop.xlane.xlu0 %5349  ;;  %10414 = vpow2.f32 %v5522_v19  ;;  %v18400_v19 = vld [vmem:[#allocation153_spill] sm:$0xff] }
 0x4d3   : > { %v10405_v7 = vpop.eup %10404  ;;  %5844 = vmatprep.mubr.f32.mxu0 %v10403_v35  ;;  %v5426_v6 = vsub.f32 %v14790_v41, %v5350_v37  ;;  %v5427_v31 = vsub.f32 %v14793_v8, %v5350_v37  ;;  %v15276_v24 = vpop.f32.mrb[164].mxu0  ;;  %v15278_v52 = vadd.f32 %v10403_v35, %v10401_v49  ;;  %10416 = vpow2.f32 %v5524_v34 }
 0x4d4   : > { %18398 = vst [vmem:[#allocation159_spill] sm:$0xff] %v15276_v24  ;;  %5845 = vmatmul.mubr.f32.gmra.mrb[12].mxu0 %v10401_v49  ;;  %v3654_v23 = vpop.f32.mrb[165].mxu0  ;;  %v3722_v39 = vmul.f32 %v10405_v7, %v15095_v45  ;;  %v10407_v44 = vpop.eup %10406  ;;  %v18402_v45 = vld [vmem:[#allocation130_spill] sm:$0xff] }
 0x4d5   : > { %v5526_v61 = vmul.f32 1.442695, %v5426_v6  ;;  %v5528_v11 = vmul.f32 1.442695, %v5427_v31  ;;  %3401 = vadd.xlane.f32.xlu1 %v18399_v55  ;;  %v10409_v10 = vpop.eup %10408  ;;  %v5353_v41 = vpop.xlane.xlu1 %5352  ;;  %v18404_v55 = vld [vmem:[#allocation92_spill] sm:$0xff] }
 0x4d6   : > { %2274 = vadd.xlane.f32.xlu0 %v18400_v19  ;;  %v15283_v18 = vpop.xlane.xlu0 %6035  ;;  %v15286_v8 = vadd.f32 %v3722_v39, %v15178_v54  ;;  %v5428_v49 = vsub.f32 %v14804_v32, %v5353_v41  ;;  %v5429_v34 = vsub.f32 %v18402_v45, %v5353_v41  ;;  %5849 = vmatprep.mubr.f32.mxu0 %v10409_v10  ;;  %v15290_v35 = vpop.f32.mrb[166].mxu0  ;;  %v18405_v54 = vld [vmem:[#allocation16_spill] sm:$0xff]  ;;  %v11001_v39 = vld [vmem:[%s11296_s25 + $0x100] sm:$0xff] }
 0x4d7   : > { %18401 = vst [vmem:[#allocation119_spill] sm:$0xff] %v15283_v18  ;;  %10418 = vpow2.f32 %v5526_v61  ;;  %18403 = vst [vmem:[#allocation69_spill] sm:$0xff] %v15290_v35  ;;  %v3659_v37 = vpop.f32.mrb[167].mxu0  ;;  %v15292_v7 = vadd.f32 %v10409_v10, %v10407_v44  ;;  %v11002_v61 = vld [vmem:[%s11296_s25 + $0x108] sm:$0xff]  ;;  %v18409_v18 = vld [vmem:[#allocation185_spill] sm:$0xff] }
 0x4d8   : > { %10420 = vpow2.f32 %v5528_v11  ;;  %5850 = vmatmul.mubr.f32.gmra.mrb[14].mxu0 %v10407_v44  ;;  %v5530_v31 = vmul.f32 1.442695, %v5428_v49  ;;  %v5532_v23 = vmul.f32 1.442695, %v5429_v34  ;;  %v6079_v32 = vmax.f32 %v11001_v39, %v11002_v61  ;;  %v18406_v11 = vld [vmem:[#allocation135_spill] sm:$0xff]  ;;  %v18407_v44 = vld [vmem:[#allocation142_spill] sm:$0xff] }
 0x4d9   : > { %v10411_v6 = vpop.eup %10410  ;;  %2277 = vadd.xlane.f32.xlu1 %v18404_v55  ;;  %v3360_v41 = vpop.xlane.xlu1 %3359  ;;  %v11004_v35 = vld [vmem:[%s11296_s25 + $0x118] sm:$0xff] }
 0x4da   : > { %3404 = vadd.xlane.f32.xlu0 %v18405_v54  ;;  %v10413_v19 = vpop.eup %10412  ;;  %v5356_v45 = vpop.xlane.xlu0 %5355  ;;  %10422 = vpow2.f32 %v5530_v31  ;;  %v11003_v31 = vld [vmem:[%s11296_s25 + $0x110] sm:$0xff] }
 0x4db   : > { %5854 = vmatprep.mubr.f32.mxu0 %v10413_v19  ;;  %v5430_v10 = vsub.f32 %v18406_v11, %v5356_v45  ;;  %v5431_v37 = vsub.f32 %v18407_v44, %v5356_v45  ;;  %v15300_v49 = vpop.f32.mrb[168].mxu0  ;;  %v15302_v34 = vadd.f32 %v10413_v19, %v10411_v6  ;;  %10424 = vpow2.f32 %v5532_v23  ;;  %v18410_v19 = vld [vmem:[#allocation141_spill] sm:$0xff] }
 0x4dc   : > { %18408 = vst [vmem:[#allocation65_spill] sm:$0xff] %v15300_v49  ;;  %5855 = vmatmul.mubr.f32.gmra.mrb[16].mxu0 %v10411_v6  ;;  %v3664_v55 = vpop.f32.mrb[169].mxu0  ;;  %v10415_v54 = vpop.eup %10414  ;;  %10426 = vrcp.f32 %v3360_v41  ;;  %v6082_v24 = vmax.f32 %v11003_v31, %v11004_v35  ;;  %v18411_v6 = vld [vmem:[#allocation146_spill] sm:$0xff] }
 0x4dd   : > { %v5534_v39 = vmul.f32 1.442695, %v5430_v10  ;;  %v5536_v61 = vmul.f32 1.442695, %v5431_v37  ;;  %3407 = vadd.xlane.f32.xlu1 %v18409_v18  ;;  %v10417_v11 = vpop.eup %10416  ;;  %10428 = vrcp.f32 %v15156_v30  ;;  %v5359_v45 = vpop.xlane.xlu1 %5358  ;;  %v18413_v30 = vld [vmem:[#allocation167_spill] sm:$0xff] }
 0x4de   : > { %6080 = vmax.xlane.f32.xlu0 %v6079_v32  ;;  %v2233_v44 = vpop.xlane.xlu0 %2232  ;;  %v5432_v23 = vsub.f32 %v18410_v19, %v5359_v45  ;;  %v5433_v55 = vsub.f32 %v18411_v6, %v5359_v45  ;;  %5859 = vmatprep.mubr.f32.mxu0 %v10417_v11  ;;  %v15310_v41 = vpop.f32.mrb[170].mxu0  ;;  %v15312_v10 = vadd.f32 %v10417_v11, %v10415_v54 }
 0x4df   : > { %10430 = vpow2.f32 %v5534_v39  ;;  %18412 = vst [vmem:[#allocation118_spill] sm:$0xff] %v15310_v41  ;;  %v3669_v18 = vpop.f32.mrb[171].mxu0 }
 0x4e0   : > { %10432 = vpow2.f32 %v5536_v61  ;;  %5860 = vmatmul.mubr.f32.gmra.mrb[18].mxu0 %v10415_v54  ;;  %v5538_v35 = vmul.f32 1.442695, %v5432_v23  ;;  %v5540_v37 = vmul.f32 1.442695, %v5433_v55  ;;  %v18416_v55 = vld [vmem:[#allocation6_spill] sm:$0xff] }
 0x4e1   : > { %v10419_v32 = vpop.eup %10418  ;;  %10434 = vrcp.f32 %v2233_v44  ;;  %2283 = vadd.xlane.f32.xlu1 %v18413_v30  ;;  %v2236_v31 = vpop.xlane.xlu1 %2235  ;;  %v18417_v30 = vld [vmem:[#allocation112_spill] sm:$0xff] }
 0x4e2   : > { %6083 = vmax.xlane.f32.xlu0 %v6082_v24  ;;  %v10421_v39 = vpop.eup %10420  ;;  %10436 = vrcp.f32 %v15169_v47  ;;  %v5362_v45 = vpop.xlane.xlu0 %5361  ;;  %v18415_v47 = vld [vmem:[#allocation190_spill] sm:$0xff] }
 0x4e3   : > { %10438 = vpow2.f32 %v5538_v35  ;;  %5864 = vmatprep.mubr.f32.mxu0 %v10421_v39  ;;  %v5434_v11 = vsub.f32 %v14878_v1, %v5362_v45  ;;  %v5435_v61 = vsub.f32 %v14881_v13, %v5362_v45  ;;  %v15318_v54 = vpop.f32.mrb[172].mxu0  ;;  %v15320_v19 = vadd.f32 %v10421_v39, %v10419_v32 }
 0x4e4   : > { %18414 = vst [vmem:[#allocation26_spill] sm:$0xff] %v15318_v54  ;;  %10440 = vpow2.f32 %v5540_v37  ;;  %5865 = vmatmul.mubr.f32.gmra.mrb[20].mxu0 %v10419_v32  ;;  %v3674_v44 = vpop.f32.mrb[173].mxu0  ;;  %v10423_v23 = vpop.eup %10422  ;;  %v18418_v37 = vld [vmem:[#allocation108_spill] sm:$0xff] }
 0x4e5   : > { %10442 = vrcp.f32 %v2236_v31  ;;  %v5542_v24 = vmul.f32 1.442695, %v5434_v11  ;;  %v5544_v6 = vmul.f32 1.442695, %v5435_v61  ;;  %3413 = vadd.xlane.f32.xlu1 %v18415_v47  ;;  %v10425_v18 = vpop.eup %10424  ;;  %v5365_v1 = vpop.xlane.xlu1 %5364 }
 0x4e6   : > { %2280 = vadd.xlane.f32.xlu0 %v18416_v55  ;;  %10444 = vrcp.f32 %v15183_v21  ;;  %v3363_v13 = vpop.xlane.xlu0 %3362  ;;  %v10427_v35 = vpop.eup %10426  ;;  %v5436_v39 = vsub.f32 %v18417_v30, %v5365_v1  ;;  %v5437_v32 = vsub.f32 %v18418_v37, %v5365_v1  ;;  %5869 = vmatprep.mubr.f32.mxu0 %v10425_v18  ;;  %v15329_v45 = vadd.f32 %v10425_v18, %v10423_v23  ;;  %v18420_v55 = vld [vmem:[#allocation158_spill] sm:$0xff]  ;;  %v11006_v37 = vld [vmem:[%s11296_s25 + $0x128] sm:$0xff] }
 0x4e7   : > { %10446 = vpow2.f32 %v5542_v24  ;;  %v15327_v31 = vpop.f32.mrb[174].mxu0  ;;  %v10429_v11 = vpop.eup %10428  ;;  %v3723_v21 = vmul.f32 %v10427_v35, %v15107_v43  ;;  %v18421_v30 = vld [vmem:[#allocation14_spill] sm:$0xff] }
 0x4e8   : > { %18419 = vst [vmem:[#allocation79_spill] sm:$0xff] %v15327_v31  ;;  %10448 = vpow2.f32 %v5544_v6  ;;  %5870 = vmatmul.mubr.f32.gmra.mrb[22].mxu0 %v10423_v23  ;;  %v3679_v61 = vpop.f32.mrb[175].mxu0  ;;  %v5546_v47 = vmul.f32 1.442695, %v5436_v39  ;;  %v5548_v24 = vmul.f32 1.442695, %v5437_v32 }
 0x4e9   : > { %v10431_v44 = vpop.eup %10430  ;;  %10450 = vrcp.f32 %v3363_v13  ;;  %2289 = vadd.xlane.f32.xlu1 %v18420_v55  ;;  %v11005_v1 = vld [vmem:[%s11296_s25 + $0x120] sm:$0xff]  ;;  %v15336_v18 = vpop.xlane.xlu1 %4486  ;;  %v18422_v55 = vld [vmem:[#allocation40_spill] sm:$0xff] }
 0x4ea   : > { %3410 = vadd.xlane.f32.xlu0 %v18421_v30  ;;  %v6085_v54 = vmax.f32 %v11005_v1, %v11006_v37  ;;  %v10433_v31 = vpop.eup %10432  ;;  %v5368_v41 = vpop.xlane.xlu0 %5367  ;;  %10452 = vpow2.f32 %v5546_v47 }
 0x4eb   : > { %v10435_v6 = vpop.eup %10434  ;;  %5874 = vmatprep.mubr.f32.mxu0 %v10433_v31  ;;  %v5438_v43 = vsub.f32 %v14917_v15, %v5368_v41  ;;  %v5439_v23 = vsub.f32 %v14920_v22, %v5368_v41  ;;  %v4649_v13 = vpop.f32.mrb[176].mxu0  ;;  %v15340_v35 = vadd.f32 %v10433_v31, %v10431_v44  ;;  %10454 = vpow2.f32 %v5548_v24  ;;  %v18423_v15 = vld [vmem:[#allocation194_spill] sm:$0xff]  ;;  %v11007_v22 = vld [vmem:[%s11296_s25 + $0x130] sm:$0xff]  ;;  %v11008_v41 = vld [vmem:[%s11296_s25 + $0x138] sm:$0xff] }
 0x4ec   : > { %v10437_v39 = vpop.eup %10436  ;;  %v4840_v32 = vmul.f32 %v10429_v11, %v4649_v13  ;;  %5875 = vmatmul.mubr.f32.gmra.mrb[24].mxu0 %v10431_v44  ;;  %v4651_v61 = vpop.f32.mrb[177].mxu0  ;;  %v2596_v30 = vmul.f32 %v10435_v6, %v18422_v55  ;;  %10456 = vrcp.f32 %v15192_v42  ;;  %v6088_v49 = vmax.f32 %v11007_v22, %v11008_v41  ;;  %v18426_v22 = vld [vmem:[#allocation160_spill] sm:$0xff] }
 0x4ed   : > { %v10439_v1 = vpop.eup %10438  ;;  %v5550_v47 = vmul.f32 1.442695, %v5438_v43  ;;  %v5552_v37 = vmul.f32 1.442695, %v5439_v23  ;;  %3419 = vadd.xlane.f32.xlu1 %v18423_v15  ;;  %v5371_v11 = vpop.xlane.xlu1 %5370  ;;  %v18424_v43 = vld [vmem:[#allocation120_spill] sm:$0xff] }
 0x4ee   : > { %6086 = vmax.xlane.f32.xlu0 %v6085_v54  ;;  %v10441_v31 = vpop.eup %10440  ;;  %v15348_v51 = vadd.f32 %v4840_v32, %v15004_v48  ;;  %v15350_v44 = vpop.xlane.xlu0 %6038  ;;  %v15352_v24 = vadd.f32 %v3723_v21, %v2596_v30  ;;  %v5440_v42 = vsub.f32 %v14923_v5, %v5371_v11  ;;  %v5441_v23 = vsub.f32 %v18424_v43, %v5371_v11  ;;  %v18425_v48 = vld [vmem:[#allocation66_spill] sm:$0xff] }
 0x4ef   : > { %v10443_v6 = vpop.eup %10442  ;;  %10458 = vpow2.f32 %v5550_v47  ;;  %5879 = vmatprep.mubr.f32.mxu0 %v10441_v31  ;;  %v4654_v54 = vpop.f32.mrb[178].mxu0  ;;  %v15359_v5 = vadd.f32 %v10441_v31, %v10439_v1  ;;  %vm6129_vm14 = vcmp.gt.f32.partialorder %v15350_v44, -1.0 }
 0x4f0   : > { %v10445_v13 = vpop.eup %10444  ;;  %10460 = vpow2.f32 %v5552_v37  ;;  %v4841_v61 = vmul.f32 %v10437_v39, %v4654_v54  ;;  %5880 = vmatmul.mubr.f32.gmra.mrb[26].mxu0 %v10439_v1  ;;  %v4656_v55 = vpop.f32.mrb[179].mxu0  ;;  %v2597_v32 = vmul.f32 %v10443_v6, %v18425_v48  ;;  %v5554_v21 = vmul.f32 1.442695, %v5440_v42  ;;  %v18427_v6 = vld [vmem:[#allocation22_spill] sm:$0xff]  ;;  %v18429_v48 = vld [vmem:[#allocation168_spill] sm:$0xff] }
 0x4f1   : > { %v10447_v15 = vpop.eup %10446  ;;  %10462 = vrcp.f32 %v15202_v3  ;;  %v5556_v30 = vmul.f32 1.442695, %v5441_v23  ;;  %2295 = vadd.xlane.f32.xlu1 %v18426_v22  ;;  %v15364_v37 = vpop.xlane.xlu1 %4489  ;;  %v18428_v3 = vld [vmem:[#allocation56_spill] sm:$0xff] }
 0x4f2   : > { %6089 = vmax.xlane.f32.xlu0 %v6088_v49  ;;  %v10449_v47 = vpop.eup %10448  ;;  %v15362_v41 = vadd.f32 %v4841_v61, %v15019_v9  ;;  %v5374_v39 = vpop.xlane.xlu0 %5373  ;;  %10464 = vpow2.f32 %v5554_v21 }
 0x4f3   : > { %v10451_v11 = vpop.eup %10450  ;;  %5884 = vmatprep.mubr.f32.mxu0 %v10449_v47  ;;  %v5442_v43 = vsub.f32 %v18427_v6, %v5374_v39  ;;  %v5443_v42 = vsub.f32 %v18428_v3, %v5374_v39  ;;  %v4659_v23 = vpop.f32.mrb[180].mxu0  ;;  %v15368_v54 = vadd.f32 %v10449_v47, %v10447_v15  ;;  %10466 = vpow2.f32 %v5556_v30  ;;  %v18430_v3 = vld [vmem:[#allocation15_spill] sm:$0xff] }
 0x4f4   : > { %v4842_v49 = vmul.f32 %v10445_v13, %v4659_v23  ;;  %5885 = vmatmul.mubr.f32.gmra.mrb[28].mxu0 %v10447_v15  ;;  %v4661_v1 = vpop.f32.mrb[181].mxu0  ;;  %v3724_v9 = vmul.f32 %v10451_v11, %v15114_v36  ;;  %v10453_v31 = vpop.eup %10452  ;;  %10468 = vrcp.f32 %v15212_v53 }
 0x4f5   : > { %v5558_v61 = vmul.f32 1.442695, %v5442_v43  ;;  %v5560_v55 = vmul.f32 1.442695, %v5443_v42  ;;  %4528 = vadd.xlane.f32.xlu1 %v15035_v33  ;;  %v10455_v21 = vpop.eup %10454  ;;  %v5377_v47 = vpop.xlane.xlu1 %5376  ;;  %v11010_v42 = vld [vmem:[%s11296_s25 + $0x148] sm:$0xff] }
 0x4f6   : > { %2286 = vadd.xlane.f32.xlu0 %v18429_v48  ;;  %v15375_v22 = vadd.f32 %v4842_v49, %v15040_v50  ;;  %v15377_v30 = vpop.xlane.xlu0 %6041  ;;  %v15379_v13 = vadd.f32 %v3724_v9, %v2597_v32  ;;  %v10457_v15 = vpop.eup %10456  ;;  %v5444_v36 = vsub.f32 %v14969_v25, %v5377_v47  ;;  %v5445_v53 = vsub.f32 %v14972_v20, %v5377_v47  ;;  %v11009_v25 = vld [vmem:[%s11296_s25 + $0x140] sm:$0xff] }
 0x4f7   : > { %10470 = vpow2.f32 %v5558_v61  ;;  %5889 = vmatprep.mubr.f32.mxu0 %v10455_v21  ;;  %v4664_v33 = vpop.f32.mrb[182].mxu0  ;;  %v15383_v11 = vadd.f32 %v10455_v21, %v10453_v31  ;;  %v6091_v20 = vmax.f32 %v11009_v25, %v11010_v42  ;;  %v18432_v61 = vld [vmem:[#allocation62_spill] sm:$0xff]  ;;  %vm6130_vm15 = vcmp.gt.f32.partialorder %v15377_v30, -1.0 }
 0x4f8   : > { %10472 = vpow2.f32 %v5560_v55  ;;  %v4843_v39 = vmul.f32 %v10457_v15, %v4664_v33  ;;  %5890 = vmatmul.mubr.f32.gmra.mrb[30].mxu0 %v10453_v31  ;;  %v4666_v50 = vpop.f32.mrb[183].mxu0  ;;  %v5562_v32 = vmul.f32 1.442695, %v5444_v36  ;;  %v5564_v43 = vmul.f32 1.442695, %v5445_v53  ;;  %v11011_v53 = vld [vmem:[%s11296_s25 + $0x150] sm:$0xff] }
 0x4f9   : > { %v10459_v6 = vpop.eup %10458  ;;  %10474 = vrcp.f32 %v15223_v16  ;;  %4531 = vadd.xlane.f32.xlu1 %v15047_v38  ;;  %v3366_v1 = vpop.xlane.xlu1 %3365  ;;  %v18431_v16 = vld [vmem:[#allocation55_spill] sm:$0xff]  ;;  %v11012_v33 = vld [vmem:[%s11296_s25 + $0x158] sm:$0xff] }
 0x4fa   : > { %3416 = vadd.xlane.f32.xlu0 %v18430_v3  ;;  %v10461_v23 = vpop.eup %10460  ;;  %10476 = vrcp.f32 %v15232_v56  ;;  %v15392_v49 = vadd.f32 %v4843_v39, %v15062_v57  ;;  %v5380_v9 = vpop.xlane.xlu0 %5379  ;;  %v6094_v39 = vmax.f32 %v11011_v53, %v11012_v33 }
 0x4fb   : > { %v10463_v31 = vpop.eup %10462  ;;  %10478 = vpow2.f32 %v5562_v32  ;;  %5894 = vmatprep.mubr.f32.mxu0 %v10461_v23  ;;  %v5446_v38 = vsub.f32 %v18431_v16, %v5380_v9  ;;  %v5447_v55 = vsub.f32 %v18432_v61, %v5380_v9  ;;  %v4669_v48 = vpop.f32.mrb[184].mxu0  ;;  %v15396_v21 = vadd.f32 %v10461_v23, %v10459_v6 }
 0x4fc   : > { %10480 = vpow2.f32 %v5564_v43  ;;  %v4844_v47 = vmul.f32 %v10463_v31, %v4669_v48  ;;  %5895 = vmatmul.mubr.f32.gmra.mrb[32].mxu0 %v10459_v6  ;;  %v4671_v56 = vpop.f32.mrb[185].mxu0  ;;  %v10465_v57 = vpop.eup %10464 }
 0x4fd   : > { %10482 = vrcp.f32 %v3366_v1  ;;  %v5566_v15 = vmul.f32 1.442695, %v5446_v38  ;;  %v5568_v36 = vmul.f32 1.442695, %v5447_v55  ;;  %4534 = vadd.xlane.f32.xlu1 %v15054_v28  ;;  %v10467_v50 = vpop.eup %10466  ;;  %v5383_v43 = vpop.xlane.xlu1 %5382 }
 0x4fe   : > { %6092 = vmax.xlane.f32.xlu0 %v6091_v20  ;;  %10484 = vrcp.f32 %v15252_v27  ;;  %v15403_v32 = vadd.f32 %v4844_v47, %v15079_v12  ;;  %v2239_v3 = vpop.xlane.xlu0 %2238  ;;  %v10469_v6 = vpop.eup %10468  ;;  %v5448_v25 = vsub.f32 %v14992_v29, %v5383_v43  ;;  %v5449_v42 = vsub.f32 %v14997_v17, %v5383_v43  ;;  %5899 = vmatprep.mubr.f32.mxu0 %v10467_v50 }
 0x4ff   : > { %10486 = vpow2.f32 %v5566_v15  ;;  %v4674_v28 = vpop.f32.mrb[186].mxu0  ;;  %v15407_v20 = vadd.f32 %v10467_v50, %v10465_v57  ;;  %v18434_v50 = vld [vmem:[#allocation37_spill] sm:$0xff] }
 0x500   : > { %10488 = vpow2.f32 %v5568_v36  ;;  %v4845_v23 = vmul.f32 %v10469_v6, %v4674_v28  ;;  %5900 = vmatmul.mubr.f32.gmra.mrb[34].mxu0 %v10465_v57  ;;  %v4676_v1 = vpop.f32.mrb[187].mxu0  ;;  %v5570_v9 = vmul.f32 1.442695, %v5448_v25  ;;  %v5572_v12 = vmul.f32 1.442695, %v5449_v42  ;;  %v18433_v36 = vld [vmem:[#allocation109_spill] sm:$0xff] }
 0x501   : > { %v10471_v27 = vpop.eup %10470  ;;  %10490 = vrcp.f32 %v2239_v3  ;;  %4537 = vadd.xlane.f32.xlu1 %v15068_v58  ;;  %v4679_v48 = vpop.f32.mrb[188].mxu0  ;;  %v18435_v3 = vld [vmem:[#allocation85_spill] sm:$0xff]  ;;  %v18436_v28 = vld [vmem:[#allocation84_spill] sm:$0xff] }
 0x502   : > { %6095 = vmax.xlane.f32.xlu0 %v6094_v39  ;;  %v10473_v31 = vpop.eup %10472  ;;  %10492 = vrcp.f32 %v15272_v4  ;;  %v15412_v29 = vadd.f32 %v4845_v23, %v15103_v40  ;;  %v2242_v17 = vpop.xlane.xlu1 %2241 }
 0x503   : > { %v5386_v16 = vpop.xlane.xlu0 %5385  ;;  %v10475_v38 = vpop.eup %10474  ;;  %10494 = vpow2.f32 %v5570_v9  ;;  %5904 = vmatprep.mubr.f32.mxu0 %v10473_v31  ;;  %v15416_v47 = vadd.f32 %v10473_v31, %v10471_v27  ;;  %v18438_v31 = vld [vmem:[#allocation39_spill] sm:$0xff] }
 0x504   : > { %v5450_v61 = vsub.f32 %v15002_v59, %v5386_v16  ;;  %v5451_v55 = vsub.f32 %v15007_v2, %v5386_v16  ;;  %v10477_v58 = vpop.eup %10476  ;;  %10496 = vpow2.f32 %v5572_v12  ;;  %v4846_v56 = vmul.f32 %v10475_v38, %v4679_v48  ;;  %5905 = vmatmul.mubr.f32.gmra.mrb[36].mxu0 %v10471_v27  ;;  %v4681_v4 = vpop.f32.mrb[189].mxu0  ;;  %v18437_v12 = vld [vmem:[#allocation75_spill] sm:$0xff] }
 0x505   : > { %v10479_v57 = vpop.eup %10478  ;;  %10498 = vrcp.f32 %v2242_v17  ;;  %4540 = vadd.xlane.f32.xlu1 %v15072_v62  ;;  %v11013_v17 = vld [vmem:[%s11296_s25 + $0x160] sm:$0xff]  ;;  %v11014_v16 = vld [vmem:[%s11296_s25 + $0x168] sm:$0xff] }
 0x506   : > { %v5574_v40 = vmul.f32 1.442695, %v5450_v61  ;;  %v5576_v15 = vmul.f32 1.442695, %v5451_v55  ;;  %2292 = vadd.xlane.f32.xlu0 %v18433_v36  ;;  %v10481_v53 = vpop.eup %10480  ;;  %10500 = vrcp.f32 %v15336_v18  ;;  %v15422_v2 = vadd.f32 %v4846_v56, %v15125_v26  ;;  %v5389_v59 = vpop.xlane.xlu1 %5388 }
 0x507   : > { %v3369_v33 = vpop.xlane.xlu0 %3368  ;;  %v10483_v39 = vpop.eup %10482  ;;  %v5452_v43 = vsub.f32 %v18434_v50, %v5389_v59  ;;  %v5453_v6 = vsub.f32 %v18435_v3, %v5389_v59  ;;  %5909 = vmatprep.mubr.f32.mxu0 %v10481_v53  ;;  %v15426_v25 = vadd.f32 %v10481_v53, %v10479_v57  ;;  %v6097_v38 = vmax.f32 %v11013_v17, %v11014_v16  ;;  %v18439_v53 = vld [vmem:[#allocation20_spill] sm:$0xff]  ;;  %v11016_v50 = vld [vmem:[%s11296_s25 + $0x178] sm:$0xff] }
 0x508   : > { %10502 = vpow2.f32 %v5574_v40  ;;  %v4684_v62 = vpop.f32.mrb[190].mxu0  ;;  %v10485_v42 = vpop.eup %10484  ;;  %5910 = vmatmul.mubr.f32.gmra.mrb[38].mxu0 %v10479_v57  ;;  %v3725_v23 = vmul.f32 %v10483_v39, %v18436_v28  ;;  %v11015_v39 = vld [vmem:[%s11296_s25 + $0x170] sm:$0xff]  ;;  %v18442_v16 = vld [vmem:[#allocation121_spill] sm:$0xff] }
 0x509   : > { %10504 = vpow2.f32 %v5576_v15  ;;  %v4847_v18 = vmul.f32 %v10477_v58, %v4684_v62  ;;  %v4686_v26 = vpop.f32.mrb[191].mxu0  ;;  %v10487_v1 = vpop.eup %10486  ;;  %v5578_v27 = vmul.f32 1.442695, %v5452_v43  ;;  %v5580_v9 = vmul.f32 1.442695, %v5453_v6  ;;  %4543 = vadd.xlane.f32.xlu1 %v18437_v12  ;;  %v18441_v12 = vld [vmem:[#allocation51_spill] sm:$0xff] }
 0x50a   : > { %10506 = vrcp.f32 %v3369_v33  ;;  %3422 = vadd.xlane.f32.xlu0 %v18438_v31  ;;  %v10489_v61 = vpop.eup %10488  ;;  %v4493_v48 = vpop.xlane.xlu1 %4492  ;;  %v18440_v33 = vld [vmem:[#allocation74_spill] sm:$0xff]  ;;  %v6100_v43 = vmax.f32 %v11015_v39, %v11016_v50 }
 0x50b   : > { %v15434_v55 = vadd.f32 %v4847_v18, %v15145_v63  ;;  %v15436_v58 = vpop.xlane.xlu0 %6044  ;;  %v10491_v56 = vpop.eup %10490  ;;  %10508 = vpow2.f32 %v5578_v27  ;;  %5914 = vmatprep.mubr.f32.mxu0 %v10489_v61  ;;  %v15438_v57 = vadd.f32 %v10489_v61, %v10487_v1 }
 0x50c   : > { %v4689_v4 = vpop.f32.mrb[192].mxu0  ;;  %v10493_v40 = vpop.eup %10492  ;;  %10510 = vpow2.f32 %v5580_v9  ;;  %5915 = vmatmul.mubr.f32.gmra.mrb[40].mxu0 %v10487_v1  ;;  %v2598_v59 = vmul.f32 %v10491_v56, %v18439_v53  ;;  %vm6131_vm1 = vcmp.gt.f32.partialorder %v15436_v58, -1.0 }
 0x50d   : > { %v4848_v15 = vmul.f32 %v10485_v42, %v4689_v4  ;;  %v4691_v36 = vpop.f32.mrb[193].mxu0  ;;  %v10495_v63 = vpop.eup %10494  ;;  %10512 = vrcp.f32 %v15364_v37  ;;  %4546 = vadd.xlane.f32.xlu1 %v18440_v33 }
 0x50e   : > { %6098 = vmax.xlane.f32.xlu0 %v6097_v38  ;;  %v10497_v3 = vpop.eup %10496  ;;  %v4496_v62 = vpop.xlane.xlu1 %4495  ;;  %v3757_v42 = vadd.f32 %v3725_v23, %v2598_v59  ;;  %10514 = vrcp.f32 %v4493_v48  ;;  %v18443_v48 = vld [vmem:[#allocation38_spill] sm:$0xff] }
 0x50f   : > { %v15446_v6 = vadd.f32 %v4848_v15, %v15167_v46  ;;  %v15448_v18 = vpop.xlane.xlu0 %6047  ;;  %v10499_v26 = vpop.eup %10498  ;;  %5919 = vmatprep.mubr.f32.mxu0 %v10497_v3  ;;  %v15450_v1 = vadd.f32 %v10497_v3, %v10495_v63 }
 0x510   : > { %v4694_v28 = vpop.f32.mrb[194].mxu0  ;;  %v10501_v37 = vpop.eup %10500  ;;  %5920 = vmatmul.mubr.f32.gmra.mrb[42].mxu0 %v10495_v63  ;;  %v2599_v31 = vmul.f32 %v10499_v26, %v18441_v12  ;;  %v18444_v63 = vld [vmem:[#allocation161_spill] sm:$0xff]  ;;  %v18447_v12 = vld [vmem:[#allocation154_spill] sm:$0xff]  ;;  %vm6132_vm2 = vcmp.gt.f32.partialorder %v15448_v18, -1.0 }
 0x511   : > { %v4849_v27 = vmul.f32 %v10493_v40, %v4694_v28  ;;  %v4696_v9 = vpop.f32.mrb[195].mxu0  ;;  %4549 = vadd.xlane.f32.xlu1 %v18442_v16 }
 0x512   : > { %v10503_v17 = vpop.eup %10502  ;;  %6101 = vmax.xlane.f32.xlu0 %v6100_v43  ;;  %v3372_v23 = vpop.xlane.xlu1 %3371  ;;  %v18446_v9 = vld [vmem:[#allocation93_spill] sm:$0xff] }
 0x513   : > { %v10505_v46 = vpop.eup %10504  ;;  %v15455_v38 = vadd.f32 %v4849_v27, %v15286_v8  ;;  %v2245_v61 = vpop.xlane.xlu0 %2244  ;;  %10516 = vrcp.f32 %v3372_v23  ;;  %v18445_v8 = vld [vmem:[#allocation151_spill] sm:$0xff] }
 0x514   : > { %v10507_v56 = vpop.eup %10506  ;;  %5924 = vmatprep.mubr.f32.mxu0 %v10505_v46  ;;  %v4699_v4 = vpop.f32.mrb[196].mxu0  ;;  %v15457_v40 = vadd.f32 %v10505_v46, %v10503_v17  ;;  %10518 = vrcp.f32 %v2245_v61 }
 0x515   : > { %v4850_v15 = vmul.f32 %v10501_v37, %v4699_v4  ;;  %5925 = vmatmul.mubr.f32.gmra.mrb[44].mxu0 %v10503_v17  ;;  %v4701_v36 = vpop.f32.mrb[197].mxu0  ;;  %v3726_v53 = vmul.f32 %v10507_v56, %v18443_v48  ;;  %v10509_v59 = vpop.eup %10508  ;;  %10520 = vrcp.f32 %v4496_v62  ;;  %5586 = vadd.xlane.f32.xlu1 %v18444_v63  ;;  %v18448_v4 = vld [vmem:[#allocation155_spill] sm:$0xff] }
 0x516   : > { %5583 = vadd.xlane.f32.xlu0 %v18445_v8  ;;  %v10511_v33 = vpop.eup %10510  ;;  %v2248_v50 = vpop.xlane.xlu1 %2247 }
 0x517   : > { %v15463_v39 = vadd.f32 %v4850_v15, %v15352_v24  ;;  %v3375_v43 = vpop.xlane.xlu0 %3374  ;;  %v3758_v3 = vadd.f32 %v3726_v53, %v2599_v31  ;;  %v10513_v26 = vpop.eup %10512  ;;  %10522 = vrcp.f32 %v2248_v50  ;;  %5929 = vmatprep.mubr.f32.mxu0 %v10511_v33  ;;  %v15465_v37 = vadd.f32 %v10511_v33, %v10509_v59  ;;  %v18449_v15 = vld [vmem:[#allocation91_spill] sm:$0xff]  ;;  %v18452_v50 = vld [vmem:[#allocation64_spill] sm:$0xff] }
 0x518   : > { %v4704_v28 = vpop.f32.mrb[198].mxu0  ;;  %10524 = vrcp.f32 %v3375_v43  ;;  %v10515_v31 = vpop.eup %10514 }
 0x519   : > { %v4851_v27 = vmul.f32 %v10513_v26, %v4704_v28  ;;  %5930 = vmatmul.mubr.f32.gmra.mrb[46].mxu0 %v10509_v59  ;;  %v4706_v62 = vpop.f32.mrb[199].mxu0  ;;  %5592 = vadd.xlane.f32.xlu1 %v18446_v9  ;;  %v18454_v9 = vld [vmem:[#allocation101_spill] sm:$0xff] }
 0x51a   : > { %5589 = vadd.xlane.f32.xlu0 %v18447_v12  ;;  %v4499_v17 = vpop.xlane.xlu1 %4498  ;;  %v4709_v46 = vpop.f32.mrb[200].mxu0  ;;  %v18453_v62 = vld [vmem:[#allocation41_spill] sm:$0xff] }
 0x51b   : > { %v15470_v24 = vadd.f32 %v4851_v27, %v15379_v13  ;;  %v15472_v16 = vpop.xlane.xlu0 %6050  ;;  %10526 = vrcp.f32 %v4499_v17  ;;  %v4852_v23 = vmul.f32 %v10515_v31, %v4709_v46  ;;  %v4711_v61 = vpop.f32.mrb[201].mxu0  ;;  %v18451_v13 = vld [vmem:[#allocation21_spill] sm:$0xff] }
 0x51c   : > { %vm6133_vm3 = vcmp.gt.f32.partialorder %v15472_v16, -1.0 }
 0x51d   : > { %v10517_v56 = vpop.eup %10516  ;;  %5598 = vadd.xlane.f32.xlu1 %v18448_v4  ;;  %v15476_v48 = vadd.f32 %v4852_v23, %v3757_v42  ;;  %v18456_v23 = vld [vmem:[#allocation63_spill] sm:$0xff]  ;;  %v18457_v4 = vld [vmem:[#allocation164_spill] sm:$0xff] }
 0x51e   : > { %5595 = vadd.xlane.f32.xlu0 %v18449_v15  ;;  %v10519_v36 = vpop.eup %10518  ;;  %v4502_v53 = vpop.xlane.xlu1 %4501  ;;  %v3727_v63 = vmul.f32 %v10517_v56, %v18451_v13  ;;  %v18458_v13 = vld [vmem:[#allocation47_spill] sm:$0xff] }
 0x51f   : > { %18450 = vst [vmem:[#allocation76_spill] sm:$0xff] %v15476_v48  ;;  %v15478_v59 = vpop.xlane.xlu0 %6053  ;;  %v10521_v8 = vpop.eup %10520  ;;  %10528 = vrcp.f32 %v4502_v53  ;;  %v2600_v43 = vmul.f32 %v10519_v36, %v18452_v50 }
 0x520   : > { %v4714_v33 = vpop.f32.mrb[202].mxu0  ;;  %vm6134_vm4 = vcmp.gt.f32.partialorder %v15478_v59, -1.0 }
 0x521   : > { %v4853_v26 = vmul.f32 %v10521_v8, %v4714_v33  ;;  %v4716_v28 = vpop.f32.mrb[203].mxu0  ;;  %v10523_v27 = vpop.eup %10522  ;;  %5604 = vadd.xlane.f32.xlu1 %v18453_v62  ;;  %v3759_v12 = vadd.f32 %v3727_v63, %v2600_v43  ;;  %v18461_v62 = vld [vmem:[#allocation54_spill] sm:$0xff] }
 0x522   : > { %5601 = vadd.xlane.f32.xlu0 %v18454_v9  ;;  %v10525_v42 = vpop.eup %10524  ;;  %v3378_v31 = vpop.xlane.xlu1 %3377  ;;  %v2601_v61 = vmul.f32 %v10523_v27, %v18456_v23  ;;  %v18460_v27 = vld [vmem:[#allocation110_spill] sm:$0xff] }
 0x523   : > { %v15484_v17 = vadd.f32 %v4853_v26, %v3758_v3  ;;  %v2251_v46 = vpop.xlane.xlu0 %2250  ;;  %10530 = vrcp.f32 %v3378_v31  ;;  %v4719_v56 = vpop.f32.mrb[204].mxu0  ;;  %v3728_v15 = vmul.f32 %v10525_v42, %v18457_v4 }
 0x524   : > { %10532 = vrcp.f32 %v2251_v46  ;;  %v4721_v36 = vpop.f32.mrb[205].mxu0 }
 0x525   : > { %18455 = vst [vmem:[#allocation162_spill] sm:$0xff] %v15484_v17  ;;  %v10527_v53 = vpop.eup %10526  ;;  %5610 = vadd.xlane.f32.xlu1 %v15229_v14  ;;  %v3760_v8 = vadd.f32 %v3728_v15, %v2601_v61 }
 0x526   : > { %5607 = vadd.xlane.f32.xlu0 %v18458_v13  ;;  %v4854_v63 = vmul.f32 %v10527_v53, %v4719_v56  ;;  %v2254_v33 = vpop.xlane.xlu1 %2253  ;;  %v4724_v50 = vpop.f32.mrb[206].mxu0  ;;  %v18463_v56 = vld [vmem:[#allocation156_spill] sm:$0xff]  ;;  %v18464_v53 = vld [vmem:[#allocation81_spill] sm:$0xff] }
 0x527   : > { %v3381_v3 = vpop.xlane.xlu0 %3380  ;;  %10534 = vrcp.f32 %v2254_v33  ;;  %v4726_v26 = vpop.f32.mrb[207].mxu0 }
 0x528   : > { %v15490_v43 = vadd.f32 %v4854_v63, %v3759_v12  ;;  %10536 = vrcp.f32 %v3381_v3 }
 0x529   : > { %v10529_v28 = vpop.eup %10528  ;;  %5616 = vadd.xlane.f32.xlu1 %v18460_v27  ;;  %v18466_v27 = vld [vmem:[#allocation42_spill] sm:$0xff] }
 0x52a   : > { %18459 = vst [vmem:[#allocation163_spill] sm:$0xff] %v15490_v43  ;;  %5613 = vadd.xlane.f32.xlu0 %v18461_v62  ;;  %v4855_v9 = vmul.f32 %v10529_v28, %v4724_v50  ;;  %v4505_v42 = vpop.xlane.xlu1 %4504  ;;  %v4729_v31 = vpop.f32.mrb[208].mxu0  ;;  %v18465_v50 = vld [vmem:[#allocation80_spill] sm:$0xff] }
 0x52b   : > { %v15494_v14 = vpop.xlane.xlu0 %6056  ;;  %10538 = vrcp.f32 %v4505_v42  ;;  %v4731_v23 = vpop.f32.mrb[209].mxu0 }
 0x52c   : > { %v15496_v46 = vadd.f32 %v4855_v9, %v3760_v8  ;;  %vm6135_vm5 = vcmp.gt.f32.partialorder %v15494_v14, -1.0 }
 0x52d   : > { %v10531_v61 = vpop.eup %10530  ;;  %5622 = vadd.xlane.f32.xlu1 %v15269_v60 }
 0x52e   : > { %18462 = vst [vmem:[#allocation88_spill] sm:$0xff] %v15496_v46  ;;  %5619 = vadd.xlane.f32.xlu0 %v15258_v0  ;;  %v10533_v12 = vpop.eup %10532  ;;  %v3729_v4 = vmul.f32 %v10531_v61, %v18463_v56  ;;  %v4508_v15 = vpop.xlane.xlu1 %4507 }
 0x52f   : > { %v15501_v36 = vpop.xlane.xlu0 %6059  ;;  %v2602_v13 = vmul.f32 %v10533_v12, %v18464_v53  ;;  %10540 = vrcp.f32 %v4508_v15  ;;  %v4734_v63 = vpop.f32.mrb[210].mxu0 }
 0x530   : > { %v4736_v33 = vpop.f32.mrb[211].mxu0  ;;  %vm6136_vm6 = vcmp.gt.f32.partialorder %v15501_v36, -1.0 }
 0x531   : > { %v10535_v3 = vpop.eup %10534  ;;  %v3761_v8 = vadd.f32 %v3729_v4, %v2602_v13  ;;  %5628 = vadd.xlane.f32.xlu1 %v15292_v7 }
 0x532   : > { %5625 = vadd.xlane.f32.xlu0 %v15278_v52  ;;  %v10537_v60 = vpop.eup %10536  ;;  %v2603_v0 = vmul.f32 %v10535_v3, %v18465_v50  ;;  %v3384_v26 = vpop.xlane.xlu1 %3383  ;;  %v18469_v50 = vld [vmem:[#allocation100_spill] sm:$0xff] }
 0x533   : > { %v2257_v28 = vpop.xlane.xlu0 %2256  ;;  %v3730_v62 = vmul.f32 %v10537_v60, %v18466_v27  ;;  %10542 = vrcp.f32 %v3384_v26  ;;  %v4739_v9 = vpop.f32.mrb[212].mxu0 }
 0x534   : > { %10544 = vrcp.f32 %v2257_v28  ;;  %v4741_v42 = vpop.f32.mrb[213].mxu0 }
 0x535   : > { %v10539_v23 = vpop.eup %10538  ;;  %v3762_v61 = vadd.f32 %v3730_v62, %v2603_v0  ;;  %5634 = vadd.xlane.f32.xlu1 %v15312_v10 }
 0x536   : > { %5631 = vadd.xlane.f32.xlu0 %v15302_v34  ;;  %v4856_v7 = vmul.f32 %v10539_v23, %v4729_v31  ;;  %v2260_v12 = vpop.xlane.xlu1 %2259  ;;  %v4744_v56 = vpop.f32.mrb[214].mxu0 }
 0x537   : > { %v3387_v52 = vpop.xlane.xlu0 %3386  ;;  %10546 = vrcp.f32 %v2260_v12  ;;  %v4746_v15 = vpop.f32.mrb[215].mxu0  ;;  %v18472_v12 = vld [vmem:[#allocation24_spill] sm:$0xff] }
 0x538   : > { %v15510_v4 = vadd.f32 %v4856_v7, %v3761_v8  ;;  %10548 = vrcp.f32 %v3387_v52 }
 0x539   : > { %v10541_v53 = vpop.eup %10540  ;;  %5640 = vadd.xlane.f32.xlu1 %v15329_v45 }
 0x53a   : > { %18467 = vst [vmem:[#allocation87_spill] sm:$0xff] %v15510_v4  ;;  %5637 = vadd.xlane.f32.xlu0 %v15320_v19  ;;  %v4857_v13 = vmul.f32 %v10541_v53, %v4734_v63  ;;  %v4511_v33 = vpop.xlane.xlu1 %4510  ;;  %v15516_v34 = vpop.f32.mrb[216].mxu0  ;;  %v18470_v63 = vld [vmem:[#allocation106_spill] sm:$0xff] }
 0x53b   : > { %v15514_v3 = vpop.xlane.xlu0 %6062  ;;  %10550 = vrcp.f32 %v4511_v33  ;;  %v4751_v31 = vpop.f32.mrb[217].mxu0 }
 0x53c   : > { %v15518_v10 = vadd.f32 %v4857_v13, %v3762_v61  ;;  %vm6137_vm7 = vcmp.gt.f32.partialorder %v15514_v3, -1.0 }
 0x53d   : > { %v10543_v60 = vpop.eup %10542  ;;  %5646 = vadd.xlane.f32.xlu1 %v15359_v5 }
 0x53e   : > { %18468 = vst [vmem:[#allocation127_spill] sm:$0xff] %v15518_v10  ;;  %5643 = vadd.xlane.f32.xlu0 %v15340_v35  ;;  %v10545_v8 = vpop.eup %10544  ;;  %v3731_v45 = vmul.f32 %v10543_v60, %v18469_v50  ;;  %v4514_v0 = vpop.xlane.xlu1 %4513  ;;  %v18471_v35 = vld [vmem:[#allocation105_spill] sm:$0xff] }
 0x53f   : > { %v15523_v19 = vpop.xlane.xlu0 %6065  ;;  %v2604_v26 = vmul.f32 %v10545_v8, %v18470_v63  ;;  %10552 = vrcp.f32 %v4514_v0  ;;  %v15526_v28 = vpop.f32.mrb[218].mxu0 }
 0x540   : > { %v4756_v27 = vpop.f32.mrb[219].mxu0  ;;  %vm6138_vm8 = vcmp.gt.f32.partialorder %v15523_v19, -1.0 }
 0x541   : > { %v10547_v62 = vpop.eup %10546  ;;  %5652 = vadd.xlane.f32.xlu1 %v15383_v11  ;;  %v3763_v5 = vadd.f32 %v3731_v45, %v2604_v26 }
 0x542   : > { %5649 = vadd.xlane.f32.xlu0 %v15368_v54  ;;  %v10549_v42 = vpop.eup %10548  ;;  %v2605_v23 = vmul.f32 %v10547_v62, %v18471_v35  ;;  %v3390_v61 = vpop.xlane.xlu1 %3389 }
 0x543   : > { %v2263_v7 = vpop.xlane.xlu0 %2262  ;;  %v3732_v52 = vmul.f32 %v10549_v42, %v18472_v12  ;;  %10554 = vrcp.f32 %v3390_v61  ;;  %v15532_v15 = vpop.f32.mrb[220].mxu0  ;;  %v18476_v42 = vld [vmem:[#allocation124_spill] sm:$0xff] }
 0x544   : > { %10556 = vrcp.f32 %v2263_v7  ;;  %v4761_v53 = vpop.f32.mrb[221].mxu0 }
 0x545   : > { %v10551_v13 = vpop.eup %10550  ;;  %5658 = vadd.xlane.f32.xlu1 %v15407_v20  ;;  %v3764_v11 = vadd.f32 %v3732_v52, %v2605_v23  ;;  %v11019_v52 = vld [vmem:[%s11296_s25 + $0x180] sm:$0xff]  ;;  %v11020_v53 = vld [vmem:[%s11296_s25 + $0x188] sm:$0xff] }
 0x546   : > { %5655 = vadd.xlane.f32.xlu0 %v15396_v21  ;;  %v2266_v54 = vpop.xlane.xlu1 %2265  ;;  %v4858_v31 = vmul.f32 %v10551_v13, %v4739_v9  ;;  %v6103_v13 = vmax.f32 %v11019_v52, %v11020_v53 }
 0x547   : > { %v3393_v33 = vpop.xlane.xlu0 %3392  ;;  %10558 = vrcp.f32 %v2266_v54  ;;  %v15536_v60 = vpop.f32.mrb[222].mxu0 }
 0x548   : > { %10560 = vrcp.f32 %v3393_v33  ;;  %v4766_v8 = vpop.f32.mrb[223].mxu0  ;;  %v15538_v50 = vadd.f32 %v4858_v31, %v3763_v5  ;;  %v18477_v33 = vld [vmem:[#allocation123_spill] sm:$0xff] }
 0x549   : > { %v10553_v45 = vpop.eup %10552  ;;  %5664 = vadd.xlane.f32.xlu1 %v15426_v25  ;;  %v18475_v25 = vld [vmem:[#allocation48_spill] sm:$0xff] }
 0x54a   : > { %18473 = vst [vmem:[#allocation96_spill] sm:$0xff] %v15538_v50  ;;  %5661 = vadd.xlane.f32.xlu0 %v15416_v47  ;;  %v4517_v0 = vpop.xlane.xlu1 %4516  ;;  %v4859_v21 = vmul.f32 %v10553_v45, %v4744_v56 }
 0x54b   : > { %v15542_v20 = vpop.xlane.xlu0 %6068  ;;  %10562 = vrcp.f32 %v4517_v0  ;;  %v15544_v63 = vpop.f32.mrb[224].mxu0  ;;  %v18478_v0 = vld [vmem:[#allocation157_spill] sm:$0xff] }
 0x54c   : > { %v4771_v9 = vpop.f32.mrb[225].mxu0  ;;  %v15546_v26 = vadd.f32 %v4859_v21, %v3764_v11  ;;  %vm6139_vm9 = vcmp.gt.f32.partialorder %v15542_v20, -1.0  ;;  %v18520_v20 = vld [vmem:[#allocation76_spill] sm:$0xff] }
 0x54d   : > { %v10555_v27 = vpop.eup %10554  ;;  %5670 = vadd.xlane.f32.xlu1 %v15450_v1  ;;  %v11017_v1 = vld [vmem:[%s11296_s25 + $0x190] sm:$0xff] }
 0x54e   : > { %18474 = vst [vmem:[#allocation95_spill] sm:$0xff] %v15546_v26  ;;  %5667 = vadd.xlane.f32.xlu0 %v15438_v57  ;;  %v10557_v47 = vpop.eup %10556  ;;  %v3733_v62 = vmul.f32 %v10555_v27, %v18475_v25  ;;  %v4520_v5 = vpop.xlane.xlu1 %4519  ;;  %v11018_v57 = vld [vmem:[%s11296_s25 + $0x198] sm:$0xff]  ;;  %v11021_v27 = vld [vmem:[%s11296_s25 + $0x1b0] sm:$0xff] }
 0x54f   : > { %v15551_v56 = vpop.xlane.xlu0 %6071  ;;  %v2606_v35 = vmul.f32 %v10557_v47, %v18476_v42  ;;  %10564 = vrcp.f32 %v4520_v5  ;;  %v15554_v23 = vpop.f32.mrb[226].mxu0  ;;  %v6106_v12 = vmax.f32 %v11017_v1, %v11018_v57  ;;  %v11022_v47 = vld [vmem:[%s11296_s25 + $0x1b8] sm:$0xff]  ;;  %v11024_v5 = vld [vmem:[%s11296_s25 + $0x1a8] sm:$0xff] }
 0x550   : > { %v4776_v61 = vpop.f32.mrb[227].mxu0  ;;  %v6112_v25 = vmax.f32 %v11021_v27, %v11022_v47  ;;  %v11029_v47 = vld [vmem:[%s11296_s25 + $0x1f0] sm:$0xff]  ;;  %vm6140_vm10 = vcmp.gt.f32.partialorder %v15551_v56, -1.0 }
 0x551   : > { %v10559_v7 = vpop.eup %10558  ;;  %5676 = vadd.xlane.f32.xlu1 %v15465_v37  ;;  %v3765_v11 = vadd.f32 %v3733_v62, %v2606_v35  ;;  %v11023_v62 = vld [vmem:[%s11296_s25 + $0x1a0] sm:$0xff] }
 0x552   : > { %5673 = vadd.xlane.f32.xlu0 %v15457_v40  ;;  %v10561_v54 = vpop.eup %10560  ;;  %v2607_v31 = vmul.f32 %v10559_v7, %v18477_v33  ;;  %v3396_v8 = vpop.xlane.xlu1 %3395  ;;  %v6109_v42 = vmax.f32 %v11023_v62, %v11024_v5  ;;  %v11031_v5 = vld [vmem:[%s11296_s25 + $0x1e0] sm:$0xff] }
 0x553   : > { %v2269_v45 = vpop.xlane.xlu0 %2268  ;;  %v3734_v37 = vmul.f32 %v10561_v54, %v18478_v0  ;;  %10566 = vrcp.f32 %v3396_v8  ;;  %v15564_v40 = vpop.f32.mrb[228].mxu0  ;;  %v11026_v54 = vld [vmem:[%s11296_s25 + $0x1d8] sm:$0xff]  ;;  %v11028_v8 = vld [vmem:[%s11296_s25 + $0x1c8] sm:$0xff] }
 0x554   : > { %10568 = vrcp.f32 %v2269_v45  ;;  %v4781_v21 = vpop.f32.mrb[229].mxu0 }
 0x555   : > { %v10563_v9 = vpop.eup %10562  ;;  %6107 = vmax.xlane.f32.xlu1 %v6106_v12  ;;  %v3766_v35 = vadd.f32 %v3734_v37, %v2607_v31  ;;  %v11027_v31 = vld [vmem:[%s11296_s25 + $0x1c0] sm:$0xff] }
 0x556   : > { %6104 = vmax.xlane.f32.xlu0 %v6103_v13  ;;  %v2272_v61 = vpop.xlane.xlu1 %2271  ;;  %v4860_v1 = vmul.f32 %v10563_v9, %v15516_v34  ;;  %v11025_v13 = vld [vmem:[%s11296_s25 + $0x1d0] sm:$0xff]  ;;  %v6115_v34 = vmax.f32 %v11027_v31, %v11028_v8 }
 0x557   : > { %v3399_v7 = vpop.xlane.xlu0 %3398  ;;  %10570 = vrcp.f32 %v2272_v61  ;;  %v6118_v33 = vmax.f32 %v11025_v13, %v11026_v54 }
 0x558   : > { %v15571_v57 = vpop.f32.mrb[230].mxu0  ;;  %10572 = vrcp.f32 %v3399_v7  ;;  %v15573_v52 = vadd.f32 %v4860_v1, %v3765_v11  ;;  %v18482_v1 = vld [vmem:[#allocation171_spill] sm:$0xff] }
 0x559   : > { %v4786_v12 = vpop.f32.mrb[231].mxu0  ;;  %v10565_v53 = vpop.eup %10564  ;;  %6113 = vmax.xlane.f32.xlu1 %v6112_v25  ;;  %v11030_v25 = vld [vmem:[%s11296_s25 + $0x1f8] sm:$0xff] }
 0x55a   : > { %18479 = vst [vmem:[#allocation126_spill] sm:$0xff] %v15573_v52  ;;  %6110 = vmax.xlane.f32.xlu0 %v6109_v42  ;;  %v4523_v45 = vpop.xlane.xlu1 %4522  ;;  %v4861_v37 = vmul.f32 %v10565_v53, %v15526_v28  ;;  %v6124_v62 = vmax.f32 %v11029_v47, %v11030_v25  ;;  %v11032_v42 = vld [vmem:[%s11296_s25 + $0x1e8] sm:$0xff]  ;;  %v18484_v53 = vld [vmem:[#allocation129_spill] sm:$0xff] }
 0x55b   : > { %v15579_v0 = vpop.xlane.xlu0 %6074  ;;  %10574 = vrcp.f32 %v4523_v45  ;;  %v6121_v61 = vmax.f32 %v11031_v5, %v11032_v42  ;;  %v18485_v45 = vld [vmem:[#allocation136_spill] sm:$0xff]  ;;  %v18486_v25 = vld [vmem:[#allocation53_spill] sm:$0xff] }
 0x55c   : > { %18480 = vst [vmem:[#allocation29_spill] sm:$0xff] %v15579_v0  ;;  %v15582_v11 = vpop.f32.mrb[232].mxu0  ;;  %v15584_v9 = vadd.f32 %v4861_v37, %v3766_v35 }
 0x55d   : > { %v4791_v21 = vpop.f32.mrb[233].mxu0  ;;  %v10567_v27 = vpop.eup %10566  ;;  %6119 = vmax.xlane.f32.xlu1 %v6118_v33 }
 0x55e   : > { %18481 = vst [vmem:[#allocation104_spill] sm:$0xff] %v15584_v9  ;;  %6116 = vmax.xlane.f32.xlu0 %v6115_v34  ;;  %v10569_v7 = vpop.eup %10568  ;;  %v3735_v12 = vmul.f32 %v10567_v27, %v18482_v1  ;;  %v4526_v13 = vpop.xlane.xlu1 %4525  ;;  %v18494_v9 = vld [vmem:[#allocation59_spill] sm:$0xff] }
 0x55f   : > { %v15591_v28 = vpop.xlane.xlu0 %6077  ;;  %v2608_v54 = vmul.f32 %v10569_v7, %v18484_v53  ;;  %10576 = vrcp.f32 %v4526_v13 }
 0x560   : > { %18483 = vst [vmem:[#allocation103_spill] sm:$0xff] %v15591_v28  ;;  %v15594_v35 = vpop.f32.mrb[234].mxu0  ;;  %v18500_v28 = vld [vmem:[#allocation69_spill] sm:$0xff] }
 0x561   : > { %v4796_v31 = vpop.f32.mrb[235].mxu0  ;;  %v10571_v33 = vpop.eup %10570  ;;  %6125 = vmax.xlane.f32.xlu1 %v6124_v62  ;;  %v3767_v8 = vadd.f32 %v3735_v12, %v2608_v54 }
 0x562   : > { %6122 = vmax.xlane.f32.xlu0 %v6121_v61  ;;  %v10573_v34 = vpop.eup %10572  ;;  %v2609_v37 = vmul.f32 %v10571_v33, %v18485_v45  ;;  %v3402_v21 = vpop.xlane.xlu1 %3401 }
 0x563   : > { %v2275_v47 = vpop.xlane.xlu0 %2274  ;;  %v3736_v27 = vmul.f32 %v10573_v34, %v18486_v25  ;;  %10578 = vrcp.f32 %v3402_v21 }
 0x564   : > { %v15598_v5 = vpop.f32.mrb[236].mxu0  ;;  %10580 = vrcp.f32 %v2275_v47 }
 0x565   : > { %v4801_v42 = vpop.f32.mrb[237].mxu0  ;;  %v10575_v7 = vpop.eup %10574  ;;  %v3768_v1 = vadd.f32 %v3736_v27, %v2609_v37 }
 0x566   : > { %v2278_v13 = vpop.xlane.xlu1 %2277  ;;  %v4862_v62 = vmul.f32 %v10575_v7, %v15532_v15  ;;  %v18491_v7 = vld [vmem:[#allocation27_spill] sm:$0xff] }
 0x567   : > { %v3405_v53 = vpop.xlane.xlu0 %3404  ;;  %10582 = vrcp.f32 %v2278_v13 }
 0x568   : > { %v15601_v61 = vpop.f32.mrb[238].mxu0  ;;  %10584 = vrcp.f32 %v3405_v53  ;;  %v15603_v54 = vadd.f32 %v4862_v62, %v3767_v8  ;;  %v18492_v53 = vld [vmem:[#allocation145_spill] sm:$0xff] }
 0x569   : > { %v4806_v12 = vpop.f32.mrb[239].mxu0  ;;  %v10577_v31 = vpop.eup %10576 }
 0x56a   : > { %18487 = vst [vmem:[#allocation165_spill] sm:$0xff] %v15603_v54  ;;  %v3408_v33 = vpop.xlane.xlu1 %3407  ;;  %v4863_v45 = vmul.f32 %v10577_v31, %v15536_v60 }
 0x56b   : > { %v15605_v34 = vpop.xlane.xlu0 %6080  ;;  %10586 = vrcp.f32 %v3408_v33 }
 0x56c   : > { %18488 = vst [vmem:[#allocation113_spill] sm:$0xff] %v15605_v34  ;;  %v15608_v21 = vpop.f32.mrb[240].mxu0  ;;  %v15610_v47 = vadd.f32 %v4863_v45, %v3768_v1  ;;  %v18493_v45 = vld [vmem:[#allocation25_spill] sm:$0xff] }
 0x56d   : > { %v5778_v37 = vpop.f32.mrb[241].mxu0  ;;  %v10579_v25 = vpop.eup %10578 }
 0x56e   : > { %18489 = vst [vmem:[#allocation107_spill] sm:$0xff] %v15610_v47  ;;  %v10581_v15 = vpop.eup %10580  ;;  %v2284_v27 = vpop.xlane.xlu1 %2283  ;;  %v3737_v13 = vmul.f32 %v10579_v25, %v18491_v7 }
 0x56f   : > { %v15612_v42 = vpop.xlane.xlu0 %6083  ;;  %v2610_v62 = vmul.f32 %v10581_v15, %v18492_v53 }
 0x570   : > { %18490 = vst [vmem:[#allocation166_spill] sm:$0xff] %v15612_v42  ;;  %v15615_v8 = vpop.f32.mrb[242].mxu0 }
 0x571   : > { %v5783_v12 = vpop.f32.mrb[243].mxu0  ;;  %v10583_v54 = vpop.eup %10582  ;;  %v15618_v52 = vadd.f32 %v3737_v13, %v2610_v62 }
 0x572   : > { %v10585_v60 = vpop.eup %10584  ;;  %v3414_v31 = vpop.xlane.xlu1 %3413  ;;  %v2611_v37 = vmul.f32 %v10583_v54, %v18493_v45 }
 0x573   : > { %v2281_v1 = vpop.xlane.xlu0 %2280  ;;  %v3738_v50 = vmul.f32 %v10585_v60, %v18494_v9 }
 0x574   : > { %v15621_v47 = vpop.f32.mrb[244].mxu0  ;;  %10588 = vrcp.f32 %v2281_v1 }
 0x575   : > { %v5788_v25 = vpop.f32.mrb[245].mxu0  ;;  %v15624_v7 = vadd.f32 %v3738_v50, %v2611_v37  ;;  %10590 = vrcp.f32 %v2284_v27  ;;  %v10587_v54 = vpop.eup %10586  ;;  %v18497_v27 = vld [vmem:[#allocation10_spill] sm:$0xff]  ;;  %v18498_v37 = vld [vmem:[#allocation159_spill] sm:$0xff] }
 0x576   : > { %v2290_v15 = vpop.xlane.xlu1 %2289  ;;  %v3739_v25 = vmul.f32 %v10587_v54, %v18498_v37 }
 0x577   : > { %v3411_v53 = vpop.xlane.xlu0 %3410 }
 0x578   : > { %v15626_v12 = vpop.f32.mrb[246].mxu0  ;;  %10592 = vrcp.f32 %v3411_v53 }
 0x579   : > { %v5793_v13 = vpop.f32.mrb[247].mxu0  ;;  %10594 = vrcp.f32 %v3414_v31 }
 0x57a   : > { %v3420_v33 = vpop.xlane.xlu1 %3419 }
 0x57b   : > { %v15628_v62 = vpop.xlane.xlu0 %6086 }
 0x57c   : > { %18495 = vst [vmem:[#allocation122_spill] sm:$0xff] %v15628_v62  ;;  %v15630_v26 = vpop.f32.mrb[248].mxu0 }
 0x57d   : > { %v5798_v45 = vpop.f32.mrb[249].mxu0 }
 0x57e   : > { %v10589_v4 = vpop.eup %10588  ;;  %v2296_v9 = vpop.xlane.xlu1 %2295  ;;  %v18499_v45 = vld [vmem:[#allocation117_spill] sm:$0xff] }
 0x57f   : > { %v15632_v60 = vpop.xlane.xlu0 %6089  ;;  %v2612_v1 = vmul.f32 %v10589_v4, %v18497_v27  ;;  %v10591_v10 = vpop.eup %10590 }
 0x580   : > { %18496 = vst [vmem:[#allocation116_spill] sm:$0xff] %v15632_v60  ;;  %v15634_v50 = vpop.f32.mrb[250].mxu0  ;;  %v2613_v46 = vmul.f32 %v10591_v10, %v18499_v45 }
 0x581   : > { %v5803_v53 = vpop.f32.mrb[251].mxu0  ;;  %v3771_v13 = vadd.f32 %v3739_v25, %v2612_v1 }
 0x582   : > { %v10593_v42 = vpop.eup %10592  ;;  %v4529_v62 = vpop.xlane.xlu1 %4528 }
 0x583   : > { %v2287_v43 = vpop.xlane.xlu0 %2286  ;;  %10596 = vrcp.f32 %v4529_v62  ;;  %v3740_v60 = vmul.f32 %v10593_v42, %v18500_v28  ;;  %v10595_v62 = vpop.eup %10594 }
 0x584   : > { %v15638_v34 = vpop.f32.mrb[252].mxu0  ;;  %10598 = vrcp.f32 %v2287_v43 }
 0x585   : > { %v5808_v48 = vpop.f32.mrb[253].mxu0  ;;  %v3772_v0 = vadd.f32 %v3740_v60, %v2613_v46  ;;  %10600 = vrcp.f32 %v2290_v15  ;;  %v18503_v46 = vld [vmem:[#allocation44_spill] sm:$0xff]  ;;  %v18504_v15 = vld [vmem:[#allocation65_spill] sm:$0xff] }
 0x586   : > { %v4532_v4 = vpop.xlane.xlu1 %4531  ;;  %v3741_v60 = vmul.f32 %v10595_v62, %v18504_v15 }
 0x587   : > { %v3417_v54 = vpop.xlane.xlu0 %3416  ;;  %10602 = vrcp.f32 %v4532_v4 }
 0x588   : > { %v15642_v27 = vpop.f32.mrb[254].mxu0  ;;  %10604 = vrcp.f32 %v3417_v54 }
 0x589   : > { %v5813_v31 = vpop.f32.mrb[255].mxu0 }
 0x58a   : > { %v4535_v1 = vpop.xlane.xlu1 %4534 }
 0x58b   : > { %v15644_v37 = vpop.xlane.xlu0 %6092  ;;  %10606 = vrcp.f32 %v4535_v1 }
 0x58c   : > { %18501 = vst [vmem:[#allocation133_spill] sm:$0xff] %v15644_v37 }
 0x58d   : > { %v10597_v25 = vpop.eup %10596 }
 0x58e   : > { %v10599_v10 = vpop.eup %10598  ;;  %v4538_v53 = vpop.xlane.xlu1 %4537  ;;  %v4864_v48 = vmul.f32 %v10597_v25, %v15544_v63 }
 0x58f   : > { %v15646_v28 = vpop.xlane.xlu0 %6095  ;;  %10608 = vrcp.f32 %v4538_v53  ;;  %v15649_v43 = vpop.f32.mrb[0].mxu0  ;;  %v2614_v42 = vmul.f32 %v10599_v10, %v18503_v46  ;;  %v18506_v53 = vld [vmem:[#allocation49_spill] sm:$0xff]  ;;  %v18507_v46 = vld [vmem:[#allocation118_spill] sm:$0xff] }
 0x590   : > { %18502 = vst [vmem:[#allocation128_spill] sm:$0xff] %v15646_v28  ;;  %v10601_v45 = vpop.eup %10600  ;;  %v5818_v4 = vpop.f32.mrb[1].mxu0  ;;  %v15654_v54 = vadd.f32 %v4864_v48, %v15618_v52  ;;  %10610 = vrcp.f32 %v3420_v33 }
 0x591   : > { %v10603_v31 = vpop.eup %10602  ;;  %v3773_v1 = vadd.f32 %v3741_v60, %v2614_v42  ;;  %v2615_v10 = vmul.f32 %v10601_v45, %v18506_v53 }
 0x592   : > { %18505 = vst [vmem:[#allocation125_spill] sm:$0xff] %v15654_v54  ;;  %v10605_v37 = vpop.eup %10604  ;;  %v4541_v17 = vpop.xlane.xlu1 %4540  ;;  %v4865_v63 = vmul.f32 %v10603_v31, %v15554_v23 }
 0x593   : > { %v2293_v28 = vpop.xlane.xlu0 %2292  ;;  %10612 = vrcp.f32 %v4541_v17  ;;  %v15657_v25 = vpop.f32.mrb[2].mxu0  ;;  %v3742_v62 = vmul.f32 %v10605_v37, %v18507_v46 }
 0x594   : > { %10614 = vrcp.f32 %v2293_v28  ;;  %v5823_v15 = vpop.f32.mrb[3].mxu0  ;;  %v15662_v52 = vadd.f32 %v4865_v63, %v15624_v7 }
 0x595   : > { %v10607_v48 = vpop.eup %10606  ;;  %v3774_v42 = vadd.f32 %v3742_v62, %v2615_v10  ;;  %10616 = vrcp.f32 %v2296_v9 }
 0x596   : > { %18508 = vst [vmem:[#allocation132_spill] sm:$0xff] %v15662_v52  ;;  %v4544_v33 = vpop.xlane.xlu1 %4543  ;;  %v4866_v4 = vmul.f32 %v10607_v48, %v15564_v40  ;;  %v15665_v17 = vpop.f32.mrb[4].mxu0  ;;  %v18514_v52 = vld [vmem:[#allocation79_spill] sm:$0xff] }
 0x597   : > { %v3423_v60 = vpop.xlane.xlu0 %3422  ;;  %10618 = vrcp.f32 %v4544_v33  ;;  %v5828_v23 = vpop.f32.mrb[5].mxu0  ;;  %v18511_v33 = vld [vmem:[#allocation82_spill] sm:$0xff] }
 0x598   : > { %10620 = vrcp.f32 %v3423_v60  ;;  %v15667_v45 = vadd.f32 %v4866_v4, %v3771_v13 }
 0x599   : > { %v10609_v37 = vpop.eup %10608 }
 0x59a   : > { %18509 = vst [vmem:[#allocation134_spill] sm:$0xff] %v15667_v45  ;;  %v4547_v28 = vpop.xlane.xlu1 %4546  ;;  %v4867_v7 = vmul.f32 %v10609_v37, %v15571_v57  ;;  %v15672_v63 = vpop.f32.mrb[6].mxu0  ;;  %v18512_v57 = vld [vmem:[#allocation26_spill] sm:$0xff] }
 0x59b   : > { %v15669_v31 = vpop.xlane.xlu0 %6098  ;;  %10622 = vrcp.f32 %v4547_v28  ;;  %v10611_v9 = vpop.eup %10610 }
 0x59c   : > { %v5833_v53 = vpop.f32.mrb[7].mxu0  ;;  %v15674_v10 = vadd.f32 %v4867_v7, %v3772_v0  ;;  %v3743_v4 = vmul.f32 %v10611_v9, %v18512_v57 }
 0x59d   : > { %v10613_v40 = vpop.eup %10612 }
 0x59e   : > { %18510 = vst [vmem:[#allocation131_spill] sm:$0xff] %v15674_v10  ;;  %v10615_v46 = vpop.eup %10614  ;;  %v4550_v62 = vpop.xlane.xlu1 %4549  ;;  %v4868_v13 = vmul.f32 %v10613_v40, %v15582_v11  ;;  %v18513_v40 = vld [vmem:[#allocation67_spill] sm:$0xff] }
 0x59f   : > { %v15676_v15 = vpop.xlane.xlu0 %6101  ;;  %10624 = vrcp.f32 %v4550_v62  ;;  %v15679_v48 = vpop.f32.mrb[8].mxu0  ;;  %v2616_v60 = vmul.f32 %v10615_v46, %v18511_v33 }
 0x5a0   : > { %v10617_v23 = vpop.eup %10616  ;;  %v5838_v37 = vpop.f32.mrb[9].mxu0  ;;  %v15683_v28 = vadd.f32 %v4868_v13, %v3773_v1 }
 0x5a1   : > { %v10619_v0 = vpop.eup %10618  ;;  %v3775_v7 = vadd.f32 %v3743_v4, %v2616_v60  ;;  %v2617_v62 = vmul.f32 %v10617_v23, %v18513_v40 }
 0x5a2   : > { %v10621_v53 = vpop.eup %10620  ;;  %v5587_v45 = vpop.xlane.xlu1 %5586  ;;  %v4869_v54 = vmul.f32 %v10619_v0, %v15594_v35 }
 0x5a3   : > { %v5584_v10 = vpop.xlane.xlu0 %5583  ;;  %10626 = vrcp.f32 %v5587_v45  ;;  %v15686_v11 = vpop.f32.mrb[10].mxu0  ;;  %v3744_v46 = vmul.f32 %v10621_v53, %v18514_v52 }
 0x5a4   : > { %10628 = vrcp.f32 %v5584_v10  ;;  %v5843_v9 = vpop.f32.mrb[11].mxu0  ;;  %v15690_v33 = vadd.f32 %v4869_v54, %v3774_v42 }
 0x5a5   : > { %v10623_v1 = vpop.eup %10622  ;;  %v3776_v13 = vadd.f32 %v3744_v46, %v2617_v62  ;;  %v18515_v62 = vld [vmem:[#allocation119_spill] sm:$0xff] }
 0x5a6   : > { %v5593_v57 = vpop.xlane.xlu1 %5592  ;;  %v4870_v4 = vmul.f32 %v10623_v1, %v15598_v5  ;;  %vm6128_vm12 = vcmp.gt.f32.partialorder %v18515_v62, -1.0  ;;  %v18516_v1 = vld [vmem:[#allocation60_spill] sm:$0xff] }
 0x5a7   : > { %v5590_v60 = vpop.xlane.xlu0 %5589  ;;  %10630 = vrcp.f32 %v5593_v57  ;;  %v15693_v37 = vpop.f32.mrb[12].mxu0  ;;  %vm6127_vm13 = vcmp.gt.f32.partialorder %v18516_v1, -1.0 }
 0x5a8   : > { %10632 = vrcp.f32 %v5590_v60  ;;  %v5848_v35 = vpop.f32.mrb[13].mxu0  ;;  %v15695_v45 = vadd.f32 %v4870_v4, %v3775_v7 }
 0x5a9   : > { %v10625_v23 = vpop.eup %10624  ;;  %v18517_v35 = vmov 0.0  }
 0x5aa   : > { %v5599_v0 = vpop.xlane.xlu1 %5598  ;;  %v4871_v10 = vmul.f32 %v10625_v23, %v15601_v61  ;;  %v8473_v23 = vsel %vm6128_vm12, 1.0, %v18517_v35  ;;  %v8474_v62 = vsel %vm6129_vm14, 1.0, %v18517_v35 }
 0x5ab   : > { %v5596_v52 = vpop.xlane.xlu0 %5595  ;;  %10634 = vrcp.f32 %v5599_v0  ;;  %v15698_v54 = vpop.f32.mrb[14].mxu0 }
 0x5ac   : > { %10636 = vrcp.f32 %v5596_v52  ;;  %v5853_v42 = vpop.f32.mrb[15].mxu0  ;;  %v15700_v53 = vadd.f32 %v4871_v10, %v3776_v13  ;;  %v8472_v52 = vsel %vm6127_vm13, 1.0, %v18517_v35 }
 0x5ad   : > { %v10627_v5 = vpop.eup %10626 }
 0x5ae   : > { %v10629_v40 = vpop.eup %10628  ;;  %v5605_v46 = vpop.xlane.xlu1 %5604  ;;  %v5968_v7 = vmul.f32 %v10627_v5, %v15615_v8 }
 0x5af   : > { %v5602_v9 = vpop.xlane.xlu0 %5601  ;;  %10638 = vrcp.f32 %v5605_v46  ;;  %v15705_v57 = vpop.f32.mrb[16].mxu0  ;;  %v5967_v61 = vmul.f32 %v10629_v40, %v15608_v21  ;;  %v11033_v46 = vld [vmem:[%s11312_s26 + $0x8] sm:$0xff] }
 0x5b0   : > { %10640 = vrcp.f32 %v5602_v9  ;;  %v5858_v60 = vpop.f32.mrb[17].mxu0  ;;  %v6000_v13 = vadd.f32 %v5968_v7, %v15362_v41 }
 0x5b1   : > { %v10631_v4 = vpop.eup %10630  ;;  %v5999_v0 = vadd.f32 %v5967_v61, %v15348_v51  ;;  %v11034_v61 = vld [vmem:[%s11312_s26] sm:$0xff] }
 0x5b2   : > { %v10633_v8 = vpop.eup %10632  ;;  %v5611_v10 = vpop.xlane.xlu1 %5610  ;;  %v6224_v21 = vmul.f32 %v8473_v23, %v6000_v13  ;;  %v5970_v5 = vmul.f32 %v10631_v4, %v15626_v12  ;;  %v8475_v12 = vsel %vm6130_vm15, 1.0, %v18517_v35 }
 0x5b3   : > { %v5608_v42 = vpop.xlane.xlu0 %5607  ;;  %10642 = vrcp.f32 %v5611_v10  ;;  %v15715_v41 = vpop.f32.mrb[18].mxu0  ;;  %v6223_v40 = vmul.f32 %v8472_v52, %v5999_v0  ;;  %v5969_v44 = vmul.f32 %v10633_v8, %v15621_v47 }
 0x5b4   : > { %10644 = vrcp.f32 %v5608_v42  ;;  %v5863_v51 = vpop.f32.mrb[19].mxu0  ;;  %v15720_v9 = vadd.f32 %v11033_v46, %v6224_v21  ;;  %v6002_v7 = vadd.f32 %v5970_v5, %v15392_v49  ;;  %v8476_v42 = vsel %vm6131_vm1, 1.0, %v18517_v35  ;;  %v11035_v5 = vld [vmem:[%s11312_s26 + $0x18] sm:$0xff] }
 0x5b5   : > { %v10635_v1 = vpop.eup %10634  ;;  %v15728_v60 = vadd.f32 %v11034_v61, %v6223_v40  ;;  %v6001_v47 = vadd.f32 %v5969_v44, %v15375_v22  ;;  %v8477_v51 = vsel %vm6132_vm2, 1.0, %v18517_v35 }
 0x5b6   : > { %v10637_v13 = vpop.eup %10636  ;;  %v5617_v4 = vpop.xlane.xlu1 %5616  ;;  %v6292_v49 = vsel %vm613_vm0, %v15720_v9, 0.0  ;;  %v6226_v0 = vmul.f32 %v8475_v12, %v6002_v7  ;;  %v5972_v30 = vmul.f32 %v10635_v1, %v15634_v50 }
 0x5b7   : > { %v5614_v23 = vpop.xlane.xlu0 %5613  ;;  %10646 = vrcp.f32 %v5617_v4  ;;  %v15735_v8 = vpop.f32.mrb[20].mxu0  ;;  %6293 = vadd.xlane.f32.xlu1 %v6292_v49  ;;  %v6289_v22 = vsel %vm613_vm0, %v15728_v60, 0.0  ;;  %v6225_v52 = vmul.f32 %v8474_v62, %v6001_v47  ;;  %v5971_v10 = vmul.f32 %v10637_v13, %v15630_v26  ;;  %v11036_v26 = vld [vmem:[%s11312_s26 + $0x10] sm:$0xff]  ;;  %v11037_v49 = vld [vmem:[%s11312_s26 + $0x28] sm:$0xff] }
 0x5b8   : > { %10648 = vrcp.f32 %v5614_v23  ;;  %v5868_v21 = vpop.f32.mrb[21].mxu0  ;;  %6290 = vadd.xlane.f32.xlu0 %v6289_v22  ;;  %v15744_v50 = vadd.f32 %v11035_v5, %v6226_v0  ;;  %v6004_v40 = vadd.f32 %v5972_v30, %v15412_v29  ;;  %v8478_v4 = vsel %vm6133_vm3, 1.0, %v18517_v35 }
 0x5b9   : > { %v10639_v44 = vpop.eup %10638  ;;  %v15752_v62 = vadd.f32 %v11036_v26, %v6225_v52  ;;  %v6003_v58 = vadd.f32 %v5971_v10, %v15403_v32  ;;  %v8479_v22 = vsel %vm6134_vm4, 1.0, %v18517_v35  ;;  %v8480_v26 = vsel %vm6135_vm5, 1.0, %v18517_v35 }
 0x5ba   : > { %v10641_v46 = vpop.eup %10640  ;;  %v5623_v7 = vpop.xlane.xlu1 %5622  ;;  %v6298_v29 = vsel %vm613_vm0, %v15744_v50, 0.0  ;;  %v6228_v12 = vmul.f32 %v8477_v51, %v6004_v40  ;;  %v5974_v18 = vmul.f32 %v10639_v44, %v15642_v27  ;;  %vm6149_vm4 = vcmp.gt.f32.partialorder %v15669_v31, -1.0 }
 0x5bb   : > { %v5620_v1 = vpop.xlane.xlu0 %5619  ;;  %10650 = vrcp.f32 %v5623_v7  ;;  %v15759_v61 = vpop.f32.mrb[22].mxu0  ;;  %6299 = vadd.xlane.f32.xlu1 %v6298_v29  ;;  %v6295_v32 = vsel %vm613_vm0, %v15752_v62, 0.0  ;;  %v6227_v47 = vmul.f32 %v8476_v42, %v6003_v58  ;;  %v5973_v13 = vmul.f32 %v10641_v46, %v15638_v34  ;;  %v11038_v34 = vld [vmem:[%s11312_s26 + $0x20] sm:$0xff]  ;;  %v11039_v46 = vld [vmem:[%s11312_s26 + $0x38] sm:$0xff] }
 0x5bc   : > { %10652 = vrcp.f32 %v5620_v1  ;;  %v5873_v23 = vpop.f32.mrb[23].mxu0  ;;  %6296 = vadd.xlane.f32.xlu0 %v6295_v32  ;;  %v15768_v27 = vadd.f32 %v11037_v49, %v6228_v12  ;;  %v6006_v0 = vadd.f32 %v5974_v18, %v15434_v55  ;;  %v8481_v29 = vsel %vm6136_vm6, 1.0, %v18517_v35 }
 0x5bd   : > { %v10643_v30 = vpop.eup %10642  ;;  %v15776_v52 = vadd.f32 %v11038_v34, %v6227_v47  ;;  %v6005_v16 = vadd.f32 %v5973_v13, %v15422_v2  ;;  %vm6150_vm5 = vcmp.gt.f32.partialorder %v15676_v15, -1.0 }
 0x5be   : > { %v10645_v10 = vpop.eup %10644  ;;  %v5629_v42 = vpop.xlane.xlu1 %5628  ;;  %v6304_v55 = vsel %vm613_vm0, %v15768_v27, 0.0  ;;  %v6230_v5 = vmul.f32 %v8479_v22, %v6006_v0  ;;  %v5976_v59 = vmul.f32 %v10643_v30, %v15657_v25  ;;  %v8482_v0 = vsel %vm6137_vm7, 1.0, %v18517_v35  ;;  %v11041_v22 = vld [vmem:[%s11312_s26 + $0x48] sm:$0xff] }
 0x5bf   : > { %v5626_v21 = vpop.xlane.xlu0 %5625  ;;  %10654 = vrcp.f32 %v5629_v42  ;;  %v15783_v40 = vpop.f32.mrb[24].mxu0  ;;  %6305 = vadd.xlane.f32.xlu1 %v6304_v55  ;;  %v6301_v2 = vsel %vm613_vm0, %v15776_v52, 0.0  ;;  %v6229_v44 = vmul.f32 %v8478_v4, %v6005_v16  ;;  %v5975_v51 = vmul.f32 %v10645_v10, %v15649_v43  ;;  %v11040_v43 = vld [vmem:[%s11312_s26 + $0x30] sm:$0xff] }
 0x5c0   : > { %10656 = vrcp.f32 %v5626_v21  ;;  %v5878_v58 = vpop.f32.mrb[25].mxu0  ;;  %6302 = vadd.xlane.f32.xlu0 %v6301_v2  ;;  %v15792_v25 = vadd.f32 %v11039_v46, %v6230_v5  ;;  %v6008_v7 = vadd.f32 %v5976_v59, %v15455_v38  ;;  %v8483_v10 = vsel %vm6138_vm8, 1.0, %v18517_v35  ;;  %v11043_v46 = vld [vmem:[%s11312_s26 + $0x58] sm:$0xff] }
 0x5c1   : > { %v10647_v1 = vpop.eup %10646  ;;  %v15800_v12 = vadd.f32 %v11040_v43, %v6229_v44  ;;  %v6007_v14 = vadd.f32 %v5975_v51, %v15446_v6  ;;  %v8485_v43 = vsel %vm6140_vm10, 1.0, %v18517_v35 }
 0x5c2   : > { %v10649_v18 = vpop.eup %10648  ;;  %v5635_v32 = vpop.xlane.xlu1 %5634  ;;  %v6310_v38 = vsel %vm613_vm0, %v15792_v25, 0.0  ;;  %v6232_v13 = vmul.f32 %v8481_v29, %v6008_v7  ;;  %v5978_v36 = vmul.f32 %v10647_v1, %v15672_v63  ;;  %v18518_v7 = vld [vmem:[#allocation162_spill] sm:$0xff] }
 0x5c3   : > { %v5632_v47 = vpop.xlane.xlu0 %5631  ;;  %10658 = vrcp.f32 %v5635_v32  ;;  %v15807_v4 = vpop.f32.mrb[26].mxu0  ;;  %6311 = vadd.xlane.f32.xlu1 %v6310_v38  ;;  %v6307_v6 = vsel %vm613_vm0, %v15800_v12, 0.0  ;;  %v6231_v23 = vmul.f32 %v8480_v26, %v6007_v14  ;;  %v5977_v49 = vmul.f32 %v10649_v18, %v15665_v17  ;;  %v11042_v17 = vld [vmem:[%s11312_s26 + $0x40] sm:$0xff]  ;;  %v18519_v14 = vld [vmem:[#allocation29_spill] sm:$0xff]  ;;  %v18521_v38 = vld [vmem:[#allocation103_spill] sm:$0xff] }
 0x5c4   : > { %10660 = vrcp.f32 %v5632_v47  ;;  %v5883_v30 = vpop.f32.mrb[27].mxu0  ;;  %6308 = vadd.xlane.f32.xlu0 %v6307_v6  ;;  %v15816_v63 = vadd.f32 %v11041_v22, %v6232_v13  ;;  %v6010_v34 = vadd.f32 %v5978_v36, %v15470_v24  ;;  %v8484_v26 = vsel %vm6139_vm9, 1.0, %v18517_v35 }
 0x5c5   : > { %v10651_v16 = vpop.eup %10650  ;;  %v15824_v42 = vadd.f32 %v11042_v17, %v6231_v23  ;;  %v6009_v3 = vadd.f32 %v5977_v49, %v15463_v39  ;;  %vm6141_vm11 = vcmp.gt.f32.partialorder %v18519_v14, -1.0  ;;  %vm6142_vm12 = vcmp.gt.f32.partialorder %v18521_v38, -1.0  ;;  %v18522_v17 = vld [vmem:[#allocation88_spill] sm:$0xff] }
 0x5c6   : > { %v10653_v21 = vpop.eup %10652  ;;  %v5641_v55 = vpop.xlane.xlu1 %5640  ;;  %v6316_v24 = vsel %vm613_vm0, %v15816_v63, 0.0  ;;  %v6234_v59 = vmul.f32 %v8483_v10, %v6010_v34  ;;  %v5980_v19 = vmul.f32 %v10651_v16, %v15686_v11  ;;  %v8486_v34 = vsel %vm6141_vm11, 1.0, %v18517_v35  ;;  %v11045_v10 = vld [vmem:[%s11312_s26 + $0x68] sm:$0xff] }
 0x5c7   : > { %v5638_v5 = vpop.xlane.xlu0 %5637  ;;  %10662 = vrcp.f32 %v5641_v55  ;;  %v15831_v2 = vpop.f32.mrb[28].mxu0  ;;  %6317 = vadd.xlane.f32.xlu1 %v6316_v24  ;;  %v6313_v39 = vsel %vm613_vm0, %v15824_v42, 0.0  ;;  %v6233_v44 = vmul.f32 %v8482_v0, %v6009_v3  ;;  %v5979_v51 = vmul.f32 %v10653_v21, %v15679_v48  ;;  %v11044_v48 = vld [vmem:[%s11312_s26 + $0x50] sm:$0xff] }
 0x5c8   : > { %10664 = vrcp.f32 %v5638_v5  ;;  %v5888_v58 = vpop.f32.mrb[29].mxu0  ;;  %6314 = vadd.xlane.f32.xlu0 %v6313_v39  ;;  %v15840_v11 = vadd.f32 %v11043_v46, %v6234_v59  ;;  %v6012_v1 = vadd.f32 %v5980_v19, %v18518_v7  ;;  %v8487_v55 = vsel %vm6142_vm12, 1.0, %v18517_v35  ;;  %v18523_v5 = vld [vmem:[#allocation113_spill] sm:$0xff]  ;;  %v18524_v59 = vld [vmem:[#allocation163_spill] sm:$0xff] }
 0x5c9   : > { %v10655_v29 = vpop.eup %10654  ;;  %v15848_v18 = vadd.f32 %v11044_v48, %v6233_v44  ;;  %v6011_v32 = vadd.f32 %v5979_v51, %v18520_v20  ;;  %vm6143_vm13 = vcmp.gt.f32.partialorder %v18523_v5, -1.0  ;;  %v18525_v44 = vld [vmem:[#allocation166_spill] sm:$0xff] }
 0x5ca   : > { %v10657_v47 = vpop.eup %10656  ;;  %v5647_v13 = vpop.xlane.xlu1 %5646  ;;  %v6322_v6 = vsel %vm613_vm0, %v15840_v11, 0.0  ;;  %v6236_v23 = vmul.f32 %v8485_v43, %v6012_v1  ;;  %v5982_v56 = vmul.f32 %v10655_v29, %v15698_v54  ;;  %vm6144_vm14 = vcmp.gt.f32.partialorder %v18525_v44, -1.0  ;;  %v18530_v44 = vld [vmem:[#allocation95_spill] sm:$0xff] }
 0x5cb   : > { %v5644_v36 = vpop.xlane.xlu0 %5643  ;;  %10666 = vrcp.f32 %v5647_v13  ;;  %v15855_v49 = vpop.f32.mrb[30].mxu0  ;;  %6323 = vadd.xlane.f32.xlu1 %v6322_v6  ;;  %v6319_v0 = vsel %vm613_vm0, %v15848_v18, 0.0  ;;  %v6235_v30 = vmul.f32 %v8484_v26, %v6011_v32  ;;  %v5981_v22 = vmul.f32 %v10657_v47, %v15693_v37  ;;  %v11046_v37 = vld [vmem:[%s11312_s26 + $0x60] sm:$0xff]  ;;  %v11047_v32 = vld [vmem:[%s11312_s26 + $0x78] sm:$0xff]  ;;  %v18526_v47 = vld [vmem:[#allocation127_spill] sm:$0xff] }
 0x5cc   : > { %10668 = vrcp.f32 %v5644_v36  ;;  %v5893_v16 = vpop.f32.mrb[31].mxu0  ;;  %6320 = vadd.xlane.f32.xlu0 %v6319_v0  ;;  %v15864_v54 = vadd.f32 %v11045_v10, %v6236_v23  ;;  %v6014_v3 = vadd.f32 %v5982_v56, %v18522_v17  ;;  %v8488_v48 = vsel %vm6143_vm13, 1.0, %v18517_v35  ;;  %v18527_v6 = vld [vmem:[#allocation122_spill] sm:$0xff]  ;;  %v18528_v56 = vld [vmem:[#allocation87_spill] sm:$0xff] }
 0x5cd   : > { %v10659_v21 = vpop.eup %10658  ;;  %v15872_v24 = vadd.f32 %v11046_v37, %v6235_v30  ;;  %v6013_v19 = vadd.f32 %v5981_v22, %v18524_v59  ;;  %v8489_v36 = vsel %vm6144_vm14, 1.0, %v18517_v35  ;;  %vm6145_vm15 = vcmp.gt.f32.partialorder %v18527_v6, -1.0  ;;  %v18529_v22 = vld [vmem:[#allocation116_spill] sm:$0xff] }
 0x5ce   : > { %v10661_v39 = vpop.eup %10660  ;;  %v5653_v51 = vpop.xlane.xlu1 %5652  ;;  %v6328_v58 = vsel %vm613_vm0, %v15864_v54, 0.0  ;;  %v6238_v46 = vmul.f32 %v8487_v55, %v6014_v3  ;;  %v5984_v7 = vmul.f32 %v10659_v21, %v15715_v41  ;;  %vm6146_vm1 = vcmp.gt.f32.partialorder %v18529_v22, -1.0  ;;  %v11051_v22 = vld [vmem:[%s11312_s26 + $0x98] sm:$0xff] }
 0x5cf   : > { %v5650_v26 = vpop.xlane.xlu0 %5649  ;;  %10670 = vrcp.f32 %v5653_v51  ;;  %v15879_v1 = vpop.f32.mrb[32].mxu0  ;;  %6329 = vadd.xlane.f32.xlu1 %v6328_v58  ;;  %v6325_v29 = vsel %vm613_vm0, %v15872_v24, 0.0  ;;  %v6237_v43 = vmul.f32 %v8486_v34, %v6013_v19  ;;  %v5983_v14 = vmul.f32 %v10661_v39, %v15705_v57  ;;  %v11048_v57 = vld [vmem:[%s11312_s26 + $0x70] sm:$0xff]  ;;  %v11049_v39 = vld [vmem:[%s11312_s26 + $0x88] sm:$0xff] }
 0x5d0   : > { %10672 = vrcp.f32 %v5650_v26  ;;  %v5898_v20 = vpop.f32.mrb[33].mxu0  ;;  %6326 = vadd.xlane.f32.xlu0 %v6325_v29  ;;  %v15888_v41 = vadd.f32 %v11047_v32, %v6238_v46  ;;  %v6016_v38 = vadd.f32 %v5984_v7, %v18526_v47  ;;  %v8490_v59 = vsel %vm6145_vm15, 1.0, %v18517_v35  ;;  %v18531_v46 = vld [vmem:[#allocation133_spill] sm:$0xff]  ;;  %v18532_v29 = vld [vmem:[#allocation96_spill] sm:$0xff] }
 0x5d1   : > { %v10663_v13 = vpop.eup %10662  ;;  %v15896_v23 = vadd.f32 %v11048_v57, %v6237_v43  ;;  %v6015_v0 = vadd.f32 %v5983_v14, %v18528_v56  ;;  %v8491_v58 = vsel %vm6146_vm1, 1.0, %v18517_v35  ;;  %vm6147_vm2 = vcmp.gt.f32.partialorder %v18531_v46, -1.0 }
 0x5d2   : > { %v10665_v30 = vpop.eup %10664  ;;  %v5659_v34 = vpop.xlane.xlu1 %5658  ;;  %v6334_v10 = vsel %vm613_vm0, %v15888_v41, 0.0  ;;  %v6240_v17 = vmul.f32 %v8489_v36, %v6016_v38  ;;  %v5986_v3 = vmul.f32 %v10663_v13, %v15759_v61 }
 0x5d3   : > { %v5656_v16 = vpop.xlane.xlu0 %5655  ;;  %10674 = vrcp.f32 %v5659_v34  ;;  %v15903_v21 = vpop.f32.mrb[34].mxu0  ;;  %6335 = vadd.xlane.f32.xlu1 %v6334_v10  ;;  %v6331_v55 = vsel %vm613_vm0, %v15896_v23, 0.0  ;;  %v6239_v5 = vmul.f32 %v8488_v48, %v6015_v0  ;;  %v5985_v37 = vmul.f32 %v10665_v30, %v15735_v8  ;;  %v11050_v8 = vld [vmem:[%s11312_s26 + $0x80] sm:$0xff]  ;;  %v18533_v48 = vld [vmem:[#allocation128_spill] sm:$0xff] }
 0x5d4   : > { %10676 = vrcp.f32 %v5656_v16  ;;  %v5903_v19 = vpop.f32.mrb[35].mxu0  ;;  %6332 = vadd.xlane.f32.xlu0 %v6331_v55  ;;  %v15912_v61 = vadd.f32 %v11049_v39, %v6240_v17  ;;  %v6018_v51 = vadd.f32 %v5986_v3, %v18530_v44  ;;  %vm6148_vm3 = vcmp.gt.f32.partialorder %v18533_v48, -1.0  ;;  %v18534_v34 = vld [vmem:[#allocation104_spill] sm:$0xff]  ;;  %v18535_v55 = vld [vmem:[#allocation126_spill] sm:$0xff]  ;;  %v18536_v48 = vld [vmem:[#allocation107_spill] sm:$0xff] }
 0x5d5   : > { %v10667_v26 = vpop.eup %10666  ;;  %v15920_v7 = vadd.f32 %v11050_v8, %v6239_v5  ;;  %v6017_v43 = vadd.f32 %v5985_v37, %v18532_v29  ;;  %v8492_v0 = vsel %vm6147_vm2, 1.0, %v18517_v35  ;;  %v8493_v17 = vsel %vm6148_vm3, 1.0, %v18517_v35 }
 0x5d6   : > { %v10669_v14 = vpop.eup %10668  ;;  %v5665_v20 = vpop.xlane.xlu1 %5664  ;;  %v6340_v47 = vsel %vm613_vm0, %v15912_v61, 0.0  ;;  %v6242_v38 = vmul.f32 %v8491_v58, %v6018_v51  ;;  %v5988_v13 = vmul.f32 %v10667_v26, %v15807_v4 }
 0x5d7   : > { %v5662_v32 = vpop.xlane.xlu0 %5661  ;;  %10678 = vrcp.f32 %v5665_v20  ;;  %v15927_v36 = vpop.f32.mrb[36].mxu0  ;;  %6341 = vadd.xlane.f32.xlu1 %v6340_v47  ;;  %v6337_v6 = vsel %vm613_vm0, %v15920_v7, 0.0  ;;  %v6241_v57 = vmul.f32 %v8490_v59, %v6017_v43  ;;  %v5987_v56 = vmul.f32 %v10669_v14, %v15783_v40  ;;  %v11052_v40 = vld [vmem:[%s11312_s26 + $0x90] sm:$0xff]  ;;  %v11053_v43 = vld [vmem:[%s11312_s26 + $0xa8] sm:$0xff]  ;;  %v11054_v47 = vld [vmem:[%s11312_s26 + $0xa0] sm:$0xff] }
 0x5d8   : > { %10680 = vrcp.f32 %v5662_v32  ;;  %v5908_v30 = vpop.f32.mrb[37].mxu0  ;;  %6338 = vadd.xlane.f32.xlu0 %v6337_v6  ;;  %v15936_v4 = vadd.f32 %v11051_v22, %v6242_v38  ;;  %v6020_v16 = vadd.f32 %v5988_v13, %v18534_v34  ;;  %v18537_v13 = vld [vmem:[#allocation165_spill] sm:$0xff] }
 0x5d9   : > { %v10671_v10 = vpop.eup %10670  ;;  %v15944_v3 = vadd.f32 %v11052_v40, %v6241_v57  ;;  %v6019_v5 = vadd.f32 %v5987_v56, %v18535_v55  ;;  %v11055_v55 = vld [vmem:[%s11312_s26 + $0xb8] sm:$0xff] }
 0x5da   : > { %v10673_v37 = vpop.eup %10672  ;;  %v5671_v59 = vpop.xlane.xlu1 %5670  ;;  %v6346_v39 = vsel %vm613_vm0, %v15936_v4, 0.0  ;;  %v6244_v44 = vmul.f32 %v8493_v17, %v6020_v16  ;;  %v5990_v51 = vmul.f32 %v10671_v10, %v15855_v49  ;;  %v8495_v49 = vsel %vm6150_vm5, 1.0, %v18517_v35  ;;  %v18538_v17 = vld [vmem:[#allocation132_spill] sm:$0xff] }
 0x5db   : > { %v5668_v19 = vpop.xlane.xlu0 %5667  ;;  %10682 = vrcp.f32 %v5671_v59  ;;  %v5911_v26 = vpop.f32.mrb[38].mxu0  ;;  %6347 = vadd.xlane.f32.xlu1 %v6346_v39  ;;  %v6343_v58 = vsel %vm613_vm0, %v15944_v3, 0.0  ;;  %v6243_v46 = vmul.f32 %v8492_v0, %v6019_v5  ;;  %v5989_v8 = vmul.f32 %v10673_v37, %v15831_v2  ;;  %v18539_v59 = vld [vmem:[#allocation125_spill] sm:$0xff]  ;;  %v11056_v39 = vld [vmem:[%s11312_s26 + $0xb0] sm:$0xff] }
 0x5dc   : > { %10684 = vrcp.f32 %v5668_v19  ;;  %v5913_v29 = vpop.f32.mrb[39].mxu0  ;;  %6344 = vadd.xlane.f32.xlu0 %v6343_v58  ;;  %v15955_v14 = vadd.f32 %v11053_v43, %v6244_v44  ;;  %v6022_v20 = vadd.f32 %v5990_v51, %v18536_v48  ;;  %v8494_v2 = vsel %vm6149_vm4, 1.0, %v18517_v35 }
 0x5dd   : > { %v10675_v32 = vpop.eup %10674  ;;  %v15962_v38 = vadd.f32 %v11054_v47, %v6243_v46  ;;  %v6021_v6 = vadd.f32 %v5989_v8, %v18537_v13 }
 0x5de   : > { %v10677_v57 = vpop.eup %10676  ;;  %v5992_v56 = vmul.f32 %v10675_v32, %v15903_v21  ;;  %v5677_v0 = vpop.xlane.xlu1 %5676  ;;  %v6352_v22 = vsel %vm613_vm0, %v15955_v14, 0.0  ;;  %v6246_v15 = vmul.f32 %v8495_v49, %v6022_v20  ;;  %v18540_v20 = vld [vmem:[#allocation131_spill] sm:$0xff] }
 0x5df   : > { %v5674_v30 = vpop.xlane.xlu0 %5673  ;;  %10686 = vrcp.f32 %v5677_v0  ;;  %v5916_v34 = vpop.f32.mrb[40].mxu0  ;;  %6353 = vadd.xlane.f32.xlu1 %v6352_v22  ;;  %v6349_v16 = vsel %vm613_vm0, %v15962_v38, 0.0  ;;  %v5991_v10 = vmul.f32 %v10677_v57, %v15879_v1  ;;  %v6245_v31 = vmul.f32 %v8494_v2, %v6021_v6  ;;  %v18541_v2 = vld [vmem:[#allocation134_spill] sm:$0xff] }
 0x5e0   : > { %v6024_v40 = vadd.f32 %v5992_v56, %v18538_v17  ;;  %10688 = vrcp.f32 %v5674_v30  ;;  %v5918_v21 = vpop.f32.mrb[41].mxu0  ;;  %6350 = vadd.xlane.f32.xlu0 %v6349_v16  ;;  %v15976_v5 = vadd.f32 %v11055_v55, %v6246_v15 }
 0x5e1   : > { %v10679_v37 = vpop.eup %10678  ;;  %v6023_v19 = vadd.f32 %v5991_v10, %v18539_v59  ;;  %v15980_v44 = vadd.f32 %v11056_v39, %v6245_v31  ;;  %v11057_v10 = vld [vmem:[%s11312_s26 + $0xc8] sm:$0xff] }
 0x5e2   : > { %v10681_v51 = vpop.eup %10680  ;;  %v5994_v58 = vmul.f32 %v10679_v37, %v5911_v26  ;;  %v6108_v46 = vpop.xlane.xlu1 %6107  ;;  %v6358_v1 = vsel %vm613_vm0, %v15976_v5, 0.0  ;;  %v11058_v37 = vld [vmem:[%s11312_s26 + $0xc0] sm:$0xff] }
 0x5e3   : > { %v6105_v8 = vpop.xlane.xlu0 %6104  ;;  %vm6152_vm6 = vcmp.gt.f32.partialorder %v6108_v46, -1.0  ;;  %v5921_v29 = vpop.f32.mrb[42].mxu0  ;;  %6359 = vadd.xlane.f32.xlu1 %v6358_v1  ;;  %v6355_v43 = vsel %vm613_vm0, %v15980_v44, 0.0  ;;  %v5993_v48 = vmul.f32 %v10681_v51, %v15927_v36 }
 0x5e4   : > { %vm6151_vm7 = vcmp.gt.f32.partialorder %v6105_v8, -1.0  ;;  %v6026_v32 = vadd.f32 %v5994_v58, %v18540_v20  ;;  %v8497_v49 = vsel %vm6152_vm6, 1.0, %v18517_v35  ;;  %v5923_v47 = vpop.f32.mrb[43].mxu0  ;;  %6356 = vadd.xlane.f32.xlu0 %v6355_v43 }
 0x5e5   : > { %v8496_v26 = vsel %vm6151_vm7, 1.0, %v18517_v35  ;;  %v10683_v13 = vpop.eup %10682  ;;  %v6248_v6 = vmul.f32 %v8497_v49, %v6024_v40  ;;  %v6025_v56 = vadd.f32 %v5993_v48, %v18541_v2  ;;  %v11059_v48 = vld [vmem:[%s11312_s26 + $0xd8] sm:$0xff]  ;;  %v11060_v47 = vld [vmem:[%s11312_s26 + $0xd0] sm:$0xff] }
 0x5e6   : > { %v6247_v57 = vmul.f32 %v8496_v26, %v6023_v19  ;;  %v10685_v0 = vpop.eup %10684  ;;  %v5996_v30 = vmul.f32 %v10683_v13, %v5921_v29  ;;  %v6114_v22 = vpop.xlane.xlu1 %6113 }
 0x5e7   : > { %v6111_v15 = vpop.xlane.xlu0 %6110  ;;  %v5995_v36 = vmul.f32 %v10685_v0, %v5916_v34  ;;  %vm6154_vm8 = vcmp.gt.f32.partialorder %v6114_v22, -1.0  ;;  %v15992_v31 = vadd.f32 %v11057_v10, %v6248_v6 }
 0x5e8   : > { %v5926_v16 = vpop.f32.mrb[44].mxu0  ;;  %vm6153_vm9 = vcmp.gt.f32.partialorder %v6111_v15, -1.0  ;;  %v6028_v17 = vadd.f32 %v5996_v30, %v15690_v33  ;;  %v8499_v21 = vsel %vm6154_vm8, 1.0, %v18517_v35  ;;  %v15998_v59 = vadd.f32 %v11058_v37, %v6247_v57 }
 0x5e9   : > { %v8498_v40 = vsel %vm6153_vm9, 1.0, %v18517_v35  ;;  %v5928_v55 = vpop.f32.mrb[45].mxu0  ;;  %v10687_v19 = vpop.eup %10686  ;;  %v6027_v34 = vadd.f32 %v5995_v36, %v15683_v28  ;;  %v6250_v39 = vmul.f32 %v8499_v21, %v6026_v32  ;;  %v6364_v58 = vsel %vm613_vm0, %v15992_v31, 0.0  ;;  %v11061_v36 = vld [vmem:[%s11312_s26 + $0xe8] sm:$0xff] }
 0x5ea   : > { %v6249_v51 = vmul.f32 %v8498_v40, %v6025_v56  ;;  %v10689_v46 = vpop.eup %10688  ;;  %v6120_v33 = vpop.xlane.xlu1 %6119  ;;  %6365 = vadd.xlane.f32.xlu1 %v6364_v58  ;;  %v6361_v8 = vsel %vm613_vm0, %v15998_v59, 0.0  ;;  %v6783_v58 = vld [vmem:[%s17189_s9 + $0x8] sm:$0xff] }
 0x5eb   : > { %v6117_v1 = vpop.xlane.xlu0 %6116  ;;  %v5997_v29 = vmul.f32 %v10689_v46, %v5926_v16  ;;  %vm6156_vm10 = vcmp.gt.f32.partialorder %v6120_v33, -1.0  ;;  %6362 = vadd.xlane.f32.xlu0 %v6361_v8  ;;  %v16006_v28 = vadd.f32 %v11059_v48, %v6250_v39  ;;  %v11062_v16 = vld [vmem:[%s11312_s26 + $0xe0] sm:$0xff]  ;;  %v11064_v39 = vld [vmem:[%s11312_s26 + $0xf0] sm:$0xff] }
 0x5ec   : > { %v5931_v43 = vpop.f32.mrb[46].mxu0  ;;  %vm6155_vm11 = vcmp.gt.f32.partialorder %v6117_v1, -1.0  ;;  %v8501_v20 = vsel %vm6156_vm10, 1.0, %v18517_v35  ;;  %v16011_v13 = vadd.f32 %v11060_v47, %v6249_v51  ;;  %v6784_v1 = vld [vmem:[%s17189_s9 + $0x10] sm:$0xff] }
 0x5ed   : > { %v5998_v32 = vmul.f32 %v10687_v19, %v5931_v43  ;;  %v8500_v49 = vsel %vm6155_vm11, 1.0, %v18517_v35  ;;  %v5933_v26 = vpop.f32.mrb[47].mxu0  ;;  %v6029_v6 = vadd.f32 %v5997_v29, %v15695_v45  ;;  %v6252_v57 = vmul.f32 %v8501_v20, %v6028_v17  ;;  %v11063_v19 = vld [vmem:[%s11312_s26 + $0xf8] sm:$0xff] }
 0x5ee   : > { %v6251_v2 = vmul.f32 %v8500_v49, %v6027_v34  ;;  %v6370_v56 = vsel %vm613_vm0, %v16006_v28, 0.0  ;;  %v6126_v30 = vpop.xlane.xlu1 %6125  ;;  %v6367_v22 = vsel %vm613_vm0, %v16011_v13, 0.0  ;;  %v6785_v29 = vld [vmem:[%s17189_s9 + $0x18] sm:$0xff] }
 0x5ef   : > { %v6030_v0 = vadd.f32 %v5998_v32, %v15700_v53  ;;  %6371 = vadd.xlane.f32.xlu1 %v6370_v56  ;;  %v6123_v15 = vpop.xlane.xlu0 %6122  ;;  %vm6158_vm12 = vcmp.gt.f32.partialorder %v6126_v30, -1.0  ;;  %6368 = vadd.xlane.f32.xlu0 %v6367_v22  ;;  %v16020_v45 = vadd.f32 %v11061_v36, %v6252_v57  ;;  %v9839_v43 = vpack.c.bf16 %v6785_v29, %v6784_v1 }
 0x5f0   : > { %vm6157_vm13 = vcmp.gt.f32.partialorder %v6123_v15, -1.0  ;;  %v16023_v10 = vadd.f32 %v11062_v16, %v6251_v2  ;;  %v8503_v17 = vsel %vm6158_vm12, 1.0, %v18517_v35 }
 0x5f1   : > { %v8502_v53 = vsel %vm6157_vm13, 1.0, %v18517_v35  ;;  %v6254_v21 = vmul.f32 %v8503_v17, %v6030_v0  ;;  %v6376_v55 = vsel %vm613_vm0, %v16020_v45, 0.0  ;;  %v6782_v35 = vld [vmem:[%s17189_s9] sm:$0xff] }
 0x5f2   : > { %v6253_v40 = vmul.f32 %v8502_v53, %v6029_v6  ;;  %v6373_v37 = vsel %vm613_vm0, %v16023_v10, 0.0  ;;  %v9835_v8 = vpack.c.bf16 %v6783_v58, %v6782_v35 }
 0x5f3   : > { %6377 = vadd.xlane.f32.xlu1 %v6376_v55  ;;  %6374 = vadd.xlane.f32.xlu0 %v6373_v37  ;;  %v16032_v34 = vadd.f32 %v11063_v19, %v6254_v21 }
 0x5f4   : > { %v16035_v51 = vadd.f32 %v11064_v39, %v6253_v40  ;;  %9836 = vmatprep.subr.bf16.mxu1 %v9835_v8 }
 0x5f5   : > { %v6382_v46 = vsel %vm613_vm0, %v16032_v34, 0.0  ;;  %9838 = vmatpush3.bf16.msra.mxu1 %v9835_v8 }
 0x5f6   : > { %v6379_v33 = vsel %vm613_vm0, %v16035_v51, 0.0  ;;  %9840 = vmatprep.subr.bf16.mxu1 %v9839_v43 }
 0x5f7   : > { %6383 = vadd.xlane.f32.xlu1 %v6382_v46  ;;  %6380 = vadd.xlane.f32.xlu0 %v6379_v33 }
 0x5f9   : > { %9842 = vmatpush3.bf16.msra.mxu1 %v9839_v43 }
 0x644   : > { %v6294_v48 = vpop.xlane.xlu1 %6293 }
 0x645   : > { %v6387_v20 = vmul.f32 0.03125, %v6294_v48  ;;  %v6291_v32 = vpop.xlane.xlu0 %6290 }
 0x646   : > { %v6386_v49 = vmul.f32 0.03125, %v6291_v32 }
 0x647   : > { %v16054_v26 = vsub.f32 %v15720_v9, %v6387_v20 }
 0x648   : > { %v16057_v47 = vsub.f32 %v15728_v60, %v6386_v49  ;;  %v6300_v6 = vpop.xlane.xlu1 %6299 }
 0x649   : > { %v6389_v57 = vmul.f32 0.03125, %v6300_v6  ;;  %v6297_v2 = vpop.xlane.xlu0 %6296  ;;  %v6451_v56 = vmul.f32 %v16054_v26, %v16054_v26 }
 0x64a   : > { %v6388_v0 = vmul.f32 0.03125, %v6297_v2  ;;  %v6450_v30 = vmul.f32 %v16057_v47, %v16057_v47 }
 0x64b   : > { %v16064_v22 = vsub.f32 %v15744_v50, %v6389_v57  ;;  %v6485_v15 = vsel %vm613_vm0, %v6451_v56, 0.0 }
 0x64c   : > { %v16068_v9 = vsub.f32 %v15752_v62, %v6388_v0  ;;  %v6306_v60 = vpop.xlane.xlu1 %6305  ;;  %6486 = vadd.xlane.f32.xlu1 %v6485_v15  ;;  %v6482_v36 = vsel %vm613_vm0, %v6450_v30, 0.0 }
 0x64d   : > { %v6391_v16 = vmul.f32 0.03125, %v6306_v60  ;;  %6483 = vadd.xlane.f32.xlu0 %v6482_v36  ;;  %v6303_v17 = vpop.xlane.xlu0 %6302  ;;  %v6453_v53 = vmul.f32 %v16064_v22, %v16064_v22 }
 0x64e   : > { %v6390_v21 = vmul.f32 0.03125, %v6303_v17  ;;  %v6452_v50 = vmul.f32 %v16068_v9, %v16068_v9 }
 0x64f   : > { %v16076_v40 = vsub.f32 %v15768_v27, %v6391_v16  ;;  %v6491_v62 = vsel %vm613_vm0, %v6453_v53, 0.0 }
 0x650   : > { %v16080_v55 = vsub.f32 %v15776_v52, %v6390_v21  ;;  %v6312_v37 = vpop.xlane.xlu1 %6311  ;;  %6492 = vadd.xlane.f32.xlu1 %v6491_v62  ;;  %v6488_v19 = vsel %vm613_vm0, %v6452_v50, 0.0 }
 0x651   : > { %v6393_v39 = vmul.f32 0.03125, %v6312_v37  ;;  %6489 = vadd.xlane.f32.xlu0 %v6488_v19  ;;  %v6309_v35 = vpop.xlane.xlu0 %6308  ;;  %v6455_v58 = vmul.f32 %v16076_v40, %v16076_v40 }
 0x652   : > { %v6392_v46 = vmul.f32 0.03125, %v6309_v35  ;;  %v6454_v27 = vmul.f32 %v16080_v55, %v16080_v55 }
 0x653   : > { %v16088_v33 = vsub.f32 %v15792_v25, %v6393_v39  ;;  %v6497_v52 = vsel %vm613_vm0, %v6455_v58, 0.0 }
 0x654   : > { %v16092_v8 = vsub.f32 %v15800_v12, %v6392_v46  ;;  %v6318_v1 = vpop.xlane.xlu1 %6317  ;;  %6498 = vadd.xlane.f32.xlu1 %v6497_v52  ;;  %v6494_v29 = vsel %vm613_vm0, %v6454_v27, 0.0 }
 0x655   : > { %v6395_v43 = vmul.f32 0.03125, %v6318_v1  ;;  %6495 = vadd.xlane.f32.xlu0 %v6494_v29  ;;  %v6315_v48 = vpop.xlane.xlu0 %6314  ;;  %v6457_v20 = vmul.f32 %v16088_v33, %v16088_v33 }
 0x656   : > { %v6394_v32 = vmul.f32 0.03125, %v6315_v48  ;;  %v6456_v25 = vmul.f32 %v16092_v8, %v16092_v8 }
 0x657   : > { %v16100_v49 = vsub.f32 %v15816_v63, %v6395_v43  ;;  %v6503_v12 = vsel %vm613_vm0, %v6457_v20, 0.0 }
 0x658   : > { %v16104_v6 = vsub.f32 %v15824_v42, %v6394_v32  ;;  %v6324_v57 = vpop.xlane.xlu1 %6323  ;;  %6504 = vadd.xlane.f32.xlu1 %v6503_v12  ;;  %v6500_v2 = vsel %vm613_vm0, %v6456_v25, 0.0 }
 0x659   : > { %v6397_v56 = vmul.f32 0.03125, %v6324_v57  ;;  %6501 = vadd.xlane.f32.xlu0 %v6500_v2  ;;  %v6321_v0 = vpop.xlane.xlu0 %6320  ;;  %v6459_v30 = vmul.f32 %v16100_v49, %v16100_v49 }
 0x65a   : > { %v6396_v15 = vmul.f32 0.03125, %v6321_v0  ;;  %v6458_v63 = vmul.f32 %v16104_v6, %v16104_v6 }
 0x65b   : > { %v16112_v60 = vsub.f32 %v15840_v11, %v6397_v56  ;;  %v6509_v42 = vsel %vm613_vm0, %v6459_v30, 0.0 }
 0x65c   : > { %v16116_v36 = vsub.f32 %v15848_v18, %v6396_v15  ;;  %v6330_v16 = vpop.xlane.xlu1 %6329  ;;  %6510 = vadd.xlane.f32.xlu1 %v6509_v42  ;;  %v6506_v17 = vsel %vm613_vm0, %v6458_v63, 0.0 }
 0x65d   : > { %v6399_v53 = vmul.f32 0.03125, %v6330_v16  ;;  %6507 = vadd.xlane.f32.xlu0 %v6506_v17  ;;  %v6327_v21 = vpop.xlane.xlu0 %6326  ;;  %v6461_v50 = vmul.f32 %v16112_v60, %v16112_v60 }
 0x65e   : > { %v6398_v62 = vmul.f32 0.03125, %v6327_v21  ;;  %v6460_v11 = vmul.f32 %v16116_v36, %v16116_v36 }
 0x65f   : > { %v16124_v37 = vsub.f32 %v15864_v54, %v6399_v53  ;;  %v6515_v18 = vsel %vm613_vm0, %v6461_v50, 0.0 }
 0x660   : > { %v16128_v19 = vsub.f32 %v15872_v24, %v6398_v62  ;;  %v6336_v39 = vpop.xlane.xlu1 %6335  ;;  %6516 = vadd.xlane.f32.xlu1 %v6515_v18  ;;  %v6512_v35 = vsel %vm613_vm0, %v6460_v11, 0.0 }
 0x661   : > { %v6401_v58 = vmul.f32 0.03125, %v6336_v39  ;;  %6513 = vadd.xlane.f32.xlu0 %v6512_v35  ;;  %v6333_v46 = vpop.xlane.xlu0 %6332  ;;  %v6463_v27 = vmul.f32 %v16124_v37, %v16124_v37 }
 0x662   : > { %v6400_v52 = vmul.f32 0.03125, %v6333_v46  ;;  %v6462_v54 = vmul.f32 %v16128_v19, %v16128_v19 }
 0x663   : > { %v16136_v1 = vsub.f32 %v15888_v41, %v6401_v58  ;;  %v6521_v24 = vsel %vm613_vm0, %v6463_v27, 0.0 }
 0x664   : > { %v16140_v29 = vsub.f32 %v15896_v23, %v6400_v52  ;;  %v6342_v43 = vpop.xlane.xlu1 %6341  ;;  %6522 = vadd.xlane.f32.xlu1 %v6521_v24  ;;  %v6518_v48 = vsel %vm613_vm0, %v6462_v54, 0.0 }
 0x665   : > { %v6403_v20 = vmul.f32 0.03125, %v6342_v43  ;;  %6519 = vadd.xlane.f32.xlu0 %v6518_v48  ;;  %v6339_v32 = vpop.xlane.xlu0 %6338  ;;  %v6465_v25 = vmul.f32 %v16136_v1, %v16136_v1 }
 0x666   : > { %v6402_v12 = vmul.f32 0.03125, %v6339_v32  ;;  %v6464_v41 = vmul.f32 %v16140_v29, %v16140_v29 }
 0x667   : > { %v16148_v57 = vsub.f32 %v15912_v61, %v6403_v20  ;;  %v6527_v23 = vsel %vm613_vm0, %v6465_v25, 0.0 }
 0x668   : > { %v16152_v2 = vsub.f32 %v15920_v7, %v6402_v12  ;;  %v6348_v56 = vpop.xlane.xlu1 %6347  ;;  %6528 = vadd.xlane.f32.xlu1 %v6527_v23  ;;  %v6524_v0 = vsel %vm613_vm0, %v6464_v41, 0.0 }
 0x669   : > { %v6405_v30 = vmul.f32 0.03125, %v6348_v56  ;;  %6525 = vadd.xlane.f32.xlu0 %v6524_v0  ;;  %v6345_v15 = vpop.xlane.xlu0 %6344  ;;  %v6467_v63 = vmul.f32 %v16148_v57, %v16148_v57 }
 0x66a   : > { %v6404_v42 = vmul.f32 0.03125, %v6345_v15  ;;  %v6466_v61 = vmul.f32 %v16152_v2, %v16152_v2 }
 0x66b   : > { %v16160_v16 = vsub.f32 %v15936_v4, %v6405_v30  ;;  %v6533_v7 = vsel %vm613_vm0, %v6467_v63, 0.0 }
 0x66c   : > { %v16164_v17 = vsub.f32 %v15944_v3, %v6404_v42  ;;  %v6354_v53 = vpop.xlane.xlu1 %6353  ;;  %6534 = vadd.xlane.f32.xlu1 %v6533_v7  ;;  %v6530_v21 = vsel %vm613_vm0, %v6466_v61, 0.0 }
 0x66d   : > { %v6407_v50 = vmul.f32 0.03125, %v6354_v53  ;;  %6531 = vadd.xlane.f32.xlu0 %v6530_v21  ;;  %v6351_v62 = vpop.xlane.xlu0 %6350  ;;  %v6469_v11 = vmul.f32 %v16160_v16, %v16160_v16 }
 0x66e   : > { %v6406_v18 = vmul.f32 0.03125, %v6351_v62  ;;  %v6468_v4 = vmul.f32 %v16164_v17, %v16164_v17 }
 0x66f   : > { %v16172_v39 = vsub.f32 %v15955_v14, %v6407_v50  ;;  %v6539_v3 = vsel %vm613_vm0, %v6469_v11, 0.0 }
 0x670   : > { %v16176_v35 = vsub.f32 %v15962_v38, %v6406_v18  ;;  %6540 = vadd.xlane.f32.xlu1 %v6539_v3  ;;  %v6360_v58 = vpop.xlane.xlu1 %6359  ;;  %v6536_v46 = vsel %vm613_vm0, %v6468_v4, 0.0 }
 0x671   : > { %v6409_v27 = vmul.f32 0.03125, %v6360_v58  ;;  %6537 = vadd.xlane.f32.xlu0 %v6536_v46  ;;  %v6357_v52 = vpop.xlane.xlu0 %6356  ;;  %v6471_v54 = vmul.f32 %v16172_v39, %v16172_v39 }
 0x672   : > { %v6408_v24 = vmul.f32 0.03125, %v6357_v52  ;;  %v6470_v14 = vmul.f32 %v16176_v35, %v16176_v35 }
 0x673   : > { %v16184_v43 = vsub.f32 %v15976_v5, %v6409_v27  ;;  %v6545_v38 = vsel %vm613_vm0, %v6471_v54, 0.0 }
 0x674   : > { %v16188_v48 = vsub.f32 %v15980_v44, %v6408_v24  ;;  %6546 = vadd.xlane.f32.xlu1 %v6545_v38  ;;  %v6542_v20 = vsel %vm613_vm0, %v6470_v14, 0.0 }
 0x675   : > { %6543 = vadd.xlane.f32.xlu0 %v6542_v20  ;;  %v6473_v32 = vmul.f32 %v16184_v43, %v16184_v43 }
 0x676   : > { %v6472_v25 = vmul.f32 %v16188_v48, %v16188_v48 }
 0x677   : > { %v6366_v12 = vpop.xlane.xlu1 %6365  ;;  %v6551_v41 = vsel %vm613_vm0, %v6473_v32, 0.0 }
 0x678   : > { %v6411_v5 = vmul.f32 0.03125, %v6366_v12  ;;  %v6363_v23 = vpop.xlane.xlu0 %6362  ;;  %6552 = vadd.xlane.f32.xlu1 %v6551_v41  ;;  %v6548_v56 = vsel %vm613_vm0, %v6472_v25, 0.0 }
 0x679   : > { %v6410_v44 = vmul.f32 0.03125, %v6363_v23  ;;  %6549 = vadd.xlane.f32.xlu0 %v6548_v56  ;;  %v7218_v23 = vld [vmem:[%s17192_s12 + $0x8] sm:$0xff]  ;;  %v7219_v56 = vld [vmem:[%s17192_s12 + $0x10] sm:$0xff] }
 0x67a   : > { %v16198_v0 = vsub.f32 %v15992_v31, %v6411_v5 }
 0x67b   : > { %v16201_v30 = vsub.f32 %v15998_v59, %v6410_v44 }
 0x67c   : > { %v6372_v15 = vpop.xlane.xlu1 %6371  ;;  %v6369_v42 = vpop.xlane.xlu0 %6368  ;;  %v6475_v61 = vmul.f32 %v16198_v0, %v16198_v0 }
 0x67d   : > { %v6413_v63 = vmul.f32 0.03125, %v6372_v15  ;;  %v6412_v7 = vmul.f32 0.03125, %v6369_v42  ;;  %v6474_v53 = vmul.f32 %v16201_v30, %v16201_v30  ;;  %v7220_v15 = vld [vmem:[%s17192_s12 + $0x18] sm:$0xff]  ;;  %v7221_v42 = vld [vmem:[%s17192_s12 + $0x20] sm:$0xff] }
 0x67e   : > { %v6557_v50 = vsel %vm613_vm0, %v6475_v61, 0.0  ;;  %v7222_v61 = vld [vmem:[%s17192_s12 + $0x28] sm:$0xff] }
 0x67f   : > { %v16208_v21 = vsub.f32 %v16006_v28, %v6413_v63  ;;  %v16212_v31 = vsub.f32 %v16011_v13, %v6412_v7  ;;  %6558 = vadd.xlane.f32.xlu1 %v6557_v50  ;;  %v6554_v62 = vsel %vm613_vm0, %v6474_v53, 0.0  ;;  %v9847_v63 = vpack.c.bf16 %v7220_v15, %v7219_v56  ;;  %v7223_v53 = vld [vmem:[%s17192_s12 + $0x30] sm:$0xff]  ;;  %v7224_v50 = vld [vmem:[%s17192_s12 + $0x38] sm:$0xff] }
 0x680   : > { %v6378_v59 = vpop.xlane.xlu1 %6377  ;;  %6555 = vadd.xlane.f32.xlu0 %v6554_v62  ;;  %v6375_v18 = vpop.xlane.xlu0 %6374  ;;  %v9851_v7 = vpack.c.bf16 %v7222_v61, %v7221_v42  ;;  %v7225_v62 = vld [vmem:[%s17192_s12 + $0x40] sm:$0xff] }
 0x681   : > { %v6415_v11 = vmul.f32 0.03125, %v6378_v59  ;;  %v6477_v4 = vmul.f32 %v16208_v21, %v16208_v21  ;;  %v6414_v3 = vmul.f32 0.03125, %v6375_v18  ;;  %v6476_v28 = vmul.f32 %v16212_v31, %v16212_v31 }
 0x682   : > { %v9855_v59 = vpack.c.bf16 %v7224_v50, %v7223_v53 }
 0x683   : > { %v16220_v58 = vsub.f32 %v16020_v45, %v6415_v11  ;;  %v6563_v13 = vsel %vm613_vm0, %v6477_v4, 0.0  ;;  %v16224_v46 = vsub.f32 %v16023_v10, %v6414_v3  ;;  %v6560_v52 = vsel %vm613_vm0, %v6476_v28, 0.0  ;;  %v7226_v11 = vld [vmem:[%s17192_s12 + $0x48] sm:$0xff]  ;;  %v7227_v4 = vld [vmem:[%s17192_s12 + $0x50] sm:$0xff]  ;;  %v7228_v3 = vld [vmem:[%s17192_s12 + $0x58] sm:$0xff] }
 0x684   : > { %6564 = vadd.xlane.f32.xlu1 %v6563_v13  ;;  %v6384_v27 = vpop.xlane.xlu1 %6383  ;;  %6561 = vadd.xlane.f32.xlu0 %v6560_v52  ;;  %v6381_v24 = vpop.xlane.xlu0 %6380  ;;  %v9859_v18 = vpack.c.bf16 %v7226_v11, %v7225_v62  ;;  %v9863_v28 = vpack.c.bf16 %v7228_v3, %v7227_v4  ;;  %v7229_v13 = vld [vmem:[%s17192_s12 + $0x60] sm:$0xff] }
 0x685   : > { %v6417_v54 = vmul.f32 0.03125, %v6384_v27  ;;  %v6479_v14 = vmul.f32 %v16220_v58, %v16220_v58  ;;  %v6416_v38 = vmul.f32 0.03125, %v6381_v24  ;;  %v6478_v45 = vmul.f32 %v16224_v46, %v16224_v46  ;;  %v7230_v27 = vld [vmem:[%s17192_s12 + $0x68] sm:$0xff]  ;;  %v7232_v24 = vld [vmem:[%s17192_s12 + $0x78] sm:$0xff]  ;;  %v16296_v4 = vld [vmem:[%s17185_s5] ss:$0 sm:$0xff] }
 0x686   : > { %v9867_v52 = vpack.c.bf16 %v7230_v27, %v7229_v13 }
 0x687   : > { %v16232_v20 = vsub.f32 %v16032_v34, %v6417_v54  ;;  %v6569_v10 = vsel %vm613_vm0, %v6479_v14, 0.0  ;;  %v16236_v32 = vsub.f32 %v16035_v51, %v6416_v38  ;;  %v6566_v25 = vsel %vm613_vm0, %v6478_v45, 0.0  ;;  %v7217_v51 = vld [vmem:[%s17192_s12] sm:$0xff]  ;;  %v7231_v54 = vld [vmem:[%s17192_s12 + $0x70] sm:$0xff] }
 0x688   : > { %6570 = vadd.xlane.f32.xlu1 %v6569_v10  ;;  %6567 = vadd.xlane.f32.xlu0 %v6566_v25  ;;  %v9843_v44 = vpack.c.bf16 %v7218_v23, %v7217_v51  ;;  %v9871_v14 = vpack.c.bf16 %v7232_v24, %v7231_v54  ;;  %v16302_v54 = vld [vmem:[%s17186_s6] ss:$0 sm:$0xff] }
 0x689   : > { %v6481_v12 = vmul.f32 %v16232_v20, %v16232_v20  ;;  %v6480_v41 = vmul.f32 %v16236_v32, %v16236_v32 }
 0x68a   : > { %9844 = vmatprep.subr.bf16.mxu0 %v9843_v44 }
 0x68b   : > { %v6575_v5 = vsel %vm613_vm0, %v6481_v12, 0.0  ;;  %v6572_v34 = vsel %vm613_vm0, %v6480_v41, 0.0  ;;  %9846 = vmatpush3.bf16.msra.mxu0 %v9843_v44 }
 0x68c   : > { %6576 = vadd.xlane.f32.xlu1 %v6575_v5  ;;  %6573 = vadd.xlane.f32.xlu0 %v6572_v34 }
 0x68d   : > { %9848 = vmatprep.subr.bf16.mxu0 %v9847_v63 }
 0x68f   : > { %9850 = vmatpush3.bf16.msra.mxu0 %v9847_v63 }
 0x690   : > { %9852 = vmatprep.subr.bf16.mxu0 %v9851_v7 }
 0x693   : > { %9854 = vmatpush3.bf16.msra.mxu0 %v9851_v7 }
 0x694   : > { %9856 = vmatprep.subr.bf16.mxu0 %v9855_v59 }
 0x697   : > { %9858 = vmatpush3.bf16.msra.mxu0 %v9855_v59 }
 0x698   : > { %9860 = vmatprep.subr.bf16.mxu0 %v9859_v18 }
 0x69b   : > { %9862 = vmatpush3.bf16.msra.mxu0 %v9859_v18 }
 0x69c   : > { %9864 = vmatprep.subr.bf16.mxu0 %v9863_v28 }
 0x69f   : > { %9866 = vmatpush3.bf16.msra.mxu0 %v9863_v28 }
 0x6a0   : > { %9868 = vmatprep.subr.bf16.mxu0 %v9867_v52 }
 0x6a3   : > { %9870 = vmatpush3.bf16.msra.mxu0 %v9867_v52 }
 0x6a4   : > { %9872 = vmatprep.subr.bf16.mxu0 %v9871_v14 }
 0x6a7   : > { %9874 = vmatpush3.bf16.msra.mxu0 %v9871_v14 }
 0x6d9   : > { %v6487_v38 = vpop.xlane.xlu1 %6486 }
 0x6da   : > { %v6579_v45 = vmul.f32 0.03125, %v6487_v38  ;;  %v6484_v10 = vpop.xlane.xlu0 %6483 }
 0x6db   : > { %v6578_v25 = vmul.f32 0.03125, %v6484_v10 }
 0x6dc   : > { %v6611_v12 = vadd.f32 1e-05, %v6579_v45 }
 0x6dd   : > { %v6610_v41 = vadd.f32 1e-05, %v6578_v25  ;;  %v6493_v5 = vpop.xlane.xlu1 %6492 }
 0x6de   : > { %10690 = vrsqrt.f32 %v6611_v12  ;;  %v6581_v34 = vmul.f32 0.03125, %v6493_v5  ;;  %v6490_v51 = vpop.xlane.xlu0 %6489 }
 0x6df   : > { %10692 = vrsqrt.f32 %v6610_v41  ;;  %v6580_v23 = vmul.f32 0.03125, %v6490_v51 }
 0x6e0   : > { %v6613_v56 = vadd.f32 1e-05, %v6581_v34 }
 0x6e1   : > { %v6612_v44 = vadd.f32 1e-05, %v6580_v23  ;;  %v6499_v15 = vpop.xlane.xlu1 %6498 }
 0x6e2   : > { %10694 = vrsqrt.f32 %v6613_v56  ;;  %v6583_v63 = vmul.f32 0.03125, %v6499_v15  ;;  %v6496_v42 = vpop.xlane.xlu0 %6495 }
 0x6e3   : > { %10696 = vrsqrt.f32 %v6612_v44  ;;  %v6582_v61 = vmul.f32 0.03125, %v6496_v42 }
 0x6e4   : > { %v6615_v7 = vadd.f32 1e-05, %v6583_v63 }
 0x6e5   : > { %v6614_v53 = vadd.f32 1e-05, %v6582_v61  ;;  %v6505_v50 = vpop.xlane.xlu1 %6504 }
 0x6e6   : > { %10698 = vrsqrt.f32 %v6615_v7  ;;  %v6585_v59 = vmul.f32 0.03125, %v6505_v50  ;;  %v6502_v62 = vpop.xlane.xlu0 %6501 }
 0x6e7   : > { %10700 = vrsqrt.f32 %v6614_v53  ;;  %v6584_v11 = vmul.f32 0.03125, %v6502_v62 }
 0x6e8   : > { %v10691_v18 = vpop.eup %10690  ;;  %v6617_v3 = vadd.f32 1e-05, %v6585_v59 }
 0x6e9   : > { %v10693_v28 = vpop.eup %10692  ;;  %v6675_v13 = vmul.f32 %v10691_v18, %v16054_v26  ;;  %v6616_v27 = vadd.f32 1e-05, %v6584_v11  ;;  %v6511_v52 = vpop.xlane.xlu1 %6510 }
 0x6ea   : > { %10702 = vrsqrt.f32 %v6617_v3  ;;  %v6587_v24 = vmul.f32 0.03125, %v6511_v52  ;;  %v6508_v14 = vpop.xlane.xlu0 %6507  ;;  %v6674_v38 = vmul.f32 %v10693_v28, %v16057_v47 }
 0x6eb   : > { %v6713_v45 = vmul.f32 %v16296_v4, %v6675_v13  ;;  %10704 = vrsqrt.f32 %v6616_v27  ;;  %v6586_v10 = vmul.f32 0.03125, %v6508_v14 }
 0x6ec   : > { %v10695_v25 = vpop.eup %10694  ;;  %v6619_v12 = vadd.f32 1e-05, %v6587_v24  ;;  %v6712_v26 = vmul.f32 %v16296_v4, %v6674_v38 }
 0x6ed   : > { %v10697_v41 = vpop.eup %10696  ;;  %v16308_v5 = vadd.f32 %v16302_v54, %v6713_v45  ;;  %v6677_v34 = vmul.f32 %v10695_v25, %v16064_v22  ;;  %v6618_v51 = vadd.f32 1e-05, %v6586_v10  ;;  %v6517_v23 = vpop.xlane.xlu1 %6516 }
 0x6ee   : > { %10706 = vrsqrt.f32 %v6619_v12  ;;  %v6589_v56 = vmul.f32 0.03125, %v6517_v23  ;;  %v6514_v44 = vpop.xlane.xlu0 %6513  ;;  %v16312_v47 = vadd.f32 %v16302_v54, %v6712_v26  ;;  %v6676_v15 = vmul.f32 %v10697_v41, %v16068_v9 }
 0x6ef   : > { %v6715_v63 = vmul.f32 %v16296_v4, %v6677_v34  ;;  %10708 = vrsqrt.f32 %v6618_v51  ;;  %v6588_v42 = vmul.f32 0.03125, %v6514_v44 }
 0x6f0   : > { %v10699_v61 = vpop.eup %10698  ;;  %v6621_v7 = vadd.f32 1e-05, %v6589_v56  ;;  %9299 = vmatprep.mubr.msk.f32.mxu1 %vm613_vm0, %v16312_v47  ;;  %v6714_v22 = vmul.f32 %v16296_v4, %v6676_v15 }
 0x6f1   : > { %v10701_v53 = vpop.eup %10700  ;;  %v16320_v50 = vadd.f32 %v16302_v54, %v6715_v63  ;;  %v6679_v59 = vmul.f32 %v10699_v61, %v16076_v40  ;;  %v6620_v62 = vadd.f32 1e-05, %v6588_v42  ;;  %9300 = vmatmul.mubr.msk.f32.vlgmr.msra.gmra.mrb[48].mxu1 %vm613_vm0, %v16308_v5  ;;  %v6523_v9 = vpop.xlane.xlu1 %6522 }
 0x6f2   : > { %10710 = vrsqrt.f32 %v6621_v7  ;;  %v6591_v11 = vmul.f32 0.03125, %v6523_v9  ;;  %v6520_v18 = vpop.xlane.xlu0 %6519  ;;  %v16326_v3 = vadd.f32 %v16302_v54, %v6714_v22  ;;  %v6678_v28 = vmul.f32 %v10701_v53, %v16080_v55 }
 0x6f3   : > { %v6717_v13 = vmul.f32 %v16296_v4, %v6679_v59  ;;  %10712 = vrsqrt.f32 %v6620_v62  ;;  %v6590_v27 = vmul.f32 0.03125, %v6520_v18 }
 0x6f4   : > { %v10703_v52 = vpop.eup %10702  ;;  %v6623_v24 = vadd.f32 1e-05, %v6591_v11  ;;  %9302 = vmatprep.mubr.msk.f32.mxu1 %vm613_vm0, %v16326_v3  ;;  %v6716_v40 = vmul.f32 %v16296_v4, %v6678_v28 }
 0x6f5   : > { %v10705_v14 = vpop.eup %10704  ;;  %v16334_v38 = vadd.f32 %v16302_v54, %v6717_v13  ;;  %v6681_v45 = vmul.f32 %v10703_v52, %v16088_v33  ;;  %v6622_v10 = vadd.f32 1e-05, %v6590_v27  ;;  %9303 = vmatmul.mubr.msk.f32.gmra.mrb[50].mxu1 %vm613_vm0, %v16320_v50  ;;  %v6529_v55 = vpop.xlane.xlu1 %6528 }
 0x6f6   : > { %10714 = vrsqrt.f32 %v6623_v24  ;;  %v6593_v25 = vmul.f32 0.03125, %v6529_v55  ;;  %v6526_v12 = vpop.xlane.xlu0 %6525  ;;  %v16340_v26 = vadd.f32 %v16302_v54, %v6716_v40  ;;  %v6680_v41 = vmul.f32 %v10705_v14, %v16092_v8 }
 0x6f7   : > { %v6719_v34 = vmul.f32 %v16296_v4, %v6681_v45  ;;  %10716 = vrsqrt.f32 %v6622_v10  ;;  %v6592_v51 = vmul.f32 0.03125, %v6526_v12 }
 0x6f8   : > { %v10707_v23 = vpop.eup %10706  ;;  %v6625_v56 = vadd.f32 1e-05, %v6593_v25  ;;  %9305 = vmatprep.mubr.msk.f32.mxu1 %vm613_vm0, %v16340_v26  ;;  %v6718_v33 = vmul.f32 %v16296_v4, %v6680_v41 }
 0x6f9   : > { %v10709_v44 = vpop.eup %10708  ;;  %v16348_v15 = vadd.f32 %v16302_v54, %v6719_v34  ;;  %v6683_v63 = vmul.f32 %v10707_v23, %v16100_v49  ;;  %v6624_v42 = vadd.f32 1e-05, %v6592_v51  ;;  %9306 = vmatmul.mubr.msk.f32.gmra.mrb[52].mxu1 %vm613_vm0, %v16334_v38  ;;  %v6535_v8 = vpop.xlane.xlu1 %6534 }
 0x6fa   : > { %10718 = vrsqrt.f32 %v6625_v56  ;;  %v6595_v61 = vmul.f32 0.03125, %v6535_v8  ;;  %v6532_v7 = vpop.xlane.xlu0 %6531  ;;  %v16354_v22 = vadd.f32 %v16302_v54, %v6718_v33  ;;  %v6682_v53 = vmul.f32 %v10709_v44, %v16104_v6 }
 0x6fb   : > { %v6721_v59 = vmul.f32 %v16296_v4, %v6683_v63  ;;  %10720 = vrsqrt.f32 %v6624_v42  ;;  %v6594_v62 = vmul.f32 0.03125, %v6532_v7 }
 0x6fc   : > { %v10711_v9 = vpop.eup %10710  ;;  %v6627_v11 = vadd.f32 1e-05, %v6595_v61  ;;  %9308 = vmatprep.mubr.msk.f32.mxu1 %vm613_vm0, %v16354_v22  ;;  %v6720_v49 = vmul.f32 %v16296_v4, %v6682_v53 }
 0x6fd   : > { %v10713_v18 = vpop.eup %10712  ;;  %v16362_v28 = vadd.f32 %v16302_v54, %v6721_v59  ;;  %v6685_v13 = vmul.f32 %v10711_v9, %v16112_v60  ;;  %v6626_v27 = vadd.f32 1e-05, %v6594_v62  ;;  %9309 = vmatmul.mubr.msk.f32.gmra.mrb[54].mxu1 %vm613_vm0, %v16348_v15  ;;  %v6541_v6 = vpop.xlane.xlu1 %6540 }
 0x6fe   : > { %10722 = vrsqrt.f32 %v6627_v11  ;;  %v6597_v52 = vmul.f32 0.03125, %v6541_v6  ;;  %v6538_v24 = vpop.xlane.xlu0 %6537  ;;  %v16368_v40 = vadd.f32 %v16302_v54, %v6720_v49  ;;  %v6684_v14 = vmul.f32 %v10713_v18, %v16116_v36 }
 0x6ff   : > { %v6723_v45 = vmul.f32 %v16296_v4, %v6685_v13  ;;  %10724 = vrsqrt.f32 %v6626_v27  ;;  %v6596_v10 = vmul.f32 0.03125, %v6538_v24 }
 0x700   : > { %v10715_v55 = vpop.eup %10714  ;;  %v6629_v25 = vadd.f32 1e-05, %v6597_v52  ;;  %9311 = vmatprep.mubr.msk.f32.mxu1 %vm613_vm0, %v16368_v40  ;;  %v6722_v60 = vmul.f32 %v16296_v4, %v6684_v14 }
 0x701   : > { %v10717_v12 = vpop.eup %10716  ;;  %v16376_v41 = vadd.f32 %v16302_v54, %v6723_v45  ;;  %v6687_v34 = vmul.f32 %v10715_v55, %v16124_v37  ;;  %v6628_v51 = vadd.f32 1e-05, %v6596_v10  ;;  %9312 = vmatmul.mubr.msk.f32.gmra.mrb[56].mxu1 %vm613_vm0, %v16362_v28  ;;  %v6547_v36 = vpop.xlane.xlu1 %6546 }
 0x702   : > { %10726 = vrsqrt.f32 %v6629_v25  ;;  %v6599_v23 = vmul.f32 0.03125, %v6547_v36  ;;  %v6544_v56 = vpop.xlane.xlu0 %6543  ;;  %v16382_v33 = vadd.f32 %v16302_v54, %v6722_v60  ;;  %v6686_v44 = vmul.f32 %v10717_v12, %v16128_v19 }
 0x703   : > { %v6725_v63 = vmul.f32 %v16296_v4, %v6687_v34  ;;  %10728 = vrsqrt.f32 %v6628_v51  ;;  %v6598_v42 = vmul.f32 0.03125, %v6544_v56 }
 0x704   : > { %v10719_v8 = vpop.eup %10718  ;;  %v6631_v61 = vadd.f32 1e-05, %v6599_v23  ;;  %9314 = vmatprep.mubr.msk.f32.mxu1 %vm613_vm0, %v16382_v33  ;;  %v6724_v37 = vmul.f32 %v16296_v4, %v6686_v44 }
 0x705   : > { %v10721_v7 = vpop.eup %10720  ;;  %v16390_v53 = vadd.f32 %v16302_v54, %v6725_v63  ;;  %v6689_v59 = vmul.f32 %v10719_v8, %v16136_v1  ;;  %v6630_v62 = vadd.f32 1e-05, %v6598_v42  ;;  %9315 = vmatmul.mubr.msk.f32.gmra.mrb[58].mxu1 %vm613_vm0, %v16376_v41  ;;  %v6553_v19 = vpop.xlane.xlu1 %6552 }
 0x706   : > { %10730 = vrsqrt.f32 %v6631_v61  ;;  %v6601_v9 = vmul.f32 0.03125, %v6553_v19  ;;  %v6550_v11 = vpop.xlane.xlu0 %6549  ;;  %v16396_v49 = vadd.f32 %v16302_v54, %v6724_v37  ;;  %v6688_v18 = vmul.f32 %v10721_v7, %v16140_v29 }
 0x707   : > { %v6727_v13 = vmul.f32 %v16296_v4, %v6689_v59  ;;  %10732 = vrsqrt.f32 %v6630_v62  ;;  %v6600_v27 = vmul.f32 0.03125, %v6550_v11 }
 0x708   : > { %v10723_v6 = vpop.eup %10722  ;;  %v6633_v52 = vadd.f32 1e-05, %v6601_v9  ;;  %9317 = vmatprep.mubr.msk.f32.mxu1 %vm613_vm0, %v16396_v49  ;;  %v6726_v1 = vmul.f32 %v16296_v4, %v6688_v18 }
 0x709   : > { %v10725_v24 = vpop.eup %10724  ;;  %v16404_v14 = vadd.f32 %v16302_v54, %v6727_v13  ;;  %v6691_v45 = vmul.f32 %v10723_v6, %v16148_v57  ;;  %v6632_v10 = vadd.f32 1e-05, %v6600_v27  ;;  %9318 = vmatmul.mubr.msk.f32.gmra.mrb[60].mxu1 %vm613_vm0, %v16390_v53 }
 0x70a   : > { %10734 = vrsqrt.f32 %v6633_v52  ;;  %v16410_v29 = vadd.f32 %v16302_v54, %v6726_v1  ;;  %v6690_v55 = vmul.f32 %v10725_v24, %v16152_v2 }
 0x70b   : > { %v6729_v25 = vmul.f32 %v16296_v4, %v6691_v45  ;;  %10736 = vrsqrt.f32 %v6632_v10 }
 0x70c   : > { %v10727_v60 = vpop.eup %10726  ;;  %9320 = vmatprep.mubr.msk.f32.mxu1 %vm613_vm0, %v16410_v29  ;;  %v6559_v12 = vpop.xlane.xlu1 %6558  ;;  %v6728_v57 = vmul.f32 %v16296_v4, %v6690_v55 }
 0x70d   : > { %v10729_v34 = vpop.eup %10728  ;;  %v16418_v51 = vadd.f32 %v16302_v54, %v6729_v25  ;;  %v6693_v36 = vmul.f32 %v10727_v60, %v16160_v16  ;;  %v6603_v23 = vmul.f32 0.03125, %v6559_v12  ;;  %9321 = vmatmul.mubr.msk.f32.gmra.mrb[62].mxu1 %vm613_vm0, %v16404_v14  ;;  %v6556_v2 = vpop.xlane.xlu0 %6555 }
 0x70e   : > { %v6602_v56 = vmul.f32 0.03125, %v6556_v2  ;;  %v16424_v44 = vadd.f32 %v16302_v54, %v6728_v57  ;;  %v6692_v63 = vmul.f32 %v10729_v34, %v16164_v17 }
 0x70f   : > { %v6731_v42 = vmul.f32 %v16296_v4, %v6693_v36  ;;  %v6635_v8 = vadd.f32 1e-05, %v6603_v23 }
 0x710   : > { %v10731_v61 = vpop.eup %10730  ;;  %v6634_v37 = vadd.f32 1e-05, %v6602_v56  ;;  %9323 = vmatprep.mubr.msk.f32.mxu1 %vm613_vm0, %v16424_v44  ;;  %v6730_v7 = vmul.f32 %v16296_v4, %v6692_v63 }
 0x711   : > { %v6565_v16 = vpop.xlane.xlu1 %6564  ;;  %v10733_v59 = vpop.eup %10732  ;;  %v16432_v62 = vadd.f32 %v16302_v54, %v6731_v42  ;;  %v6695_v19 = vmul.f32 %v10731_v61, %v16172_v39  ;;  %10738 = vrsqrt.f32 %v6635_v8  ;;  %9324 = vmatmul.mubr.msk.f32.gmra.mrb[64].mxu1 %vm613_vm0, %v16418_v51 }
 0x712   : > { %v6605_v9 = vmul.f32 0.03125, %v6565_v16  ;;  %v6562_v17 = vpop.xlane.xlu0 %6561  ;;  %10740 = vrsqrt.f32 %v6634_v37  ;;  %v16438_v18 = vadd.f32 %v16302_v54, %v6730_v7  ;;  %v6694_v13 = vmul.f32 %v10733_v59, %v16176_v35 }
 0x713   : > { %v6604_v11 = vmul.f32 0.03125, %v6562_v17  ;;  %v6733_v27 = vmul.f32 %v16296_v4, %v6695_v19 }
 0x714   : > { %v6637_v6 = vadd.f32 1e-05, %v6605_v9  ;;  %v10735_v52 = vpop.eup %10734  ;;  %9326 = vmatprep.mubr.msk.f32.mxu1 %vm613_vm0, %v16438_v18  ;;  %v6732_v24 = vmul.f32 %v16296_v4, %v6694_v13 }
 0x715   : > { %v6636_v1 = vadd.f32 1e-05, %v6604_v11  ;;  %v6571_v39 = vpop.xlane.xlu1 %6570  ;;  %v10737_v45 = vpop.eup %10736  ;;  %v16446_v10 = vadd.f32 %v16302_v54, %v6733_v27  ;;  %v6697_v55 = vmul.f32 %v10735_v52, %v16184_v43  ;;  %9327 = vmatmul.mubr.msk.f32.gmra.mrb[66].mxu1 %vm613_vm0, %v16432_v62 }
 0x716   : > { %10742 = vrsqrt.f32 %v6637_v6  ;;  %v6607_v25 = vmul.f32 0.03125, %v6571_v39  ;;  %v6568_v35 = vpop.xlane.xlu0 %6567  ;;  %v16452_v12 = vadd.f32 %v16302_v54, %v6732_v24  ;;  %v6696_v57 = vmul.f32 %v10737_v45, %v16188_v48 }
 0x717   : > { %10744 = vrsqrt.f32 %v6636_v1  ;;  %v6606_v60 = vmul.f32 0.03125, %v6568_v35  ;;  %v6735_v34 = vmul.f32 %v16296_v4, %v6697_v55 }
 0x718   : > { %v6639_v36 = vadd.f32 1e-05, %v6607_v25  ;;  %9329 = vmatprep.mubr.msk.f32.mxu1 %vm613_vm0, %v16452_v12  ;;  %v6734_v2 = vmul.f32 %v16296_v4, %v6696_v57 }
 0x719   : > { %v6638_v23 = vadd.f32 1e-05, %v6606_v60  ;;  %v6577_v43 = vpop.xlane.xlu1 %6576  ;;  %v16460_v56 = vadd.f32 %v16302_v54, %v6735_v34  ;;  %9330 = vmatmul.mubr.msk.f32.gmra.mrb[68].mxu1 %vm613_vm0, %v16446_v10 }
 0x71a   : > { %10746 = vrsqrt.f32 %v6639_v36  ;;  %v6609_v63 = vmul.f32 0.03125, %v6577_v43  ;;  %v6574_v42 = vpop.xlane.xlu0 %6573  ;;  %v16465_v8 = vadd.f32 %v16302_v54, %v6734_v2 }
 0x71b   : > { %10748 = vrsqrt.f32 %v6638_v23  ;;  %v6608_v48 = vmul.f32 0.03125, %v6574_v42  ;;  %v10739_v61 = vpop.eup %10738 }
 0x71c   : > { %v6641_v37 = vadd.f32 1e-05, %v6609_v63  ;;  %v10741_v16 = vpop.eup %10740  ;;  %v6699_v7 = vmul.f32 %v10739_v61, %v16198_v0  ;;  %9332 = vmatprep.mubr.msk.f32.mxu1 %vm613_vm0, %v16465_v8  ;;  %v16535_v63 = vld [vmem:[%s17191_s11] ss:$0 sm:$0xff] }
 0x71d   : > { %v6640_v59 = vadd.f32 1e-05, %v6608_v48  ;;  %9333 = vmatmul.mubr.msk.f32.gmra.mrb[70].mxu1 %vm613_vm0, %v16460_v56  ;;  %v6698_v19 = vmul.f32 %v10741_v16, %v16201_v30 }
 0x71e   : > { %10750 = vrsqrt.f32 %v6641_v37  ;;  %v6737_v9 = vmul.f32 %v16296_v4, %v6699_v7 }
 0x71f   : > { %10752 = vrsqrt.f32 %v6640_v59  ;;  %v6736_v11 = vmul.f32 %v16296_v4, %v6698_v19 }
 0x720   : > { %v10743_v17 = vpop.eup %10742  ;;  %v16476_v27 = vadd.f32 %v16302_v54, %v6737_v9 }
 0x721   : > { %v10745_v13 = vpop.eup %10744  ;;  %v6701_v0 = vmul.f32 %v10743_v17, %v16208_v21  ;;  %v16480_v6 = vadd.f32 %v16302_v54, %v6736_v11 }
 0x722   : > { %v6700_v52 = vmul.f32 %v10745_v13, %v16212_v31 }
 0x723   : > { %v6739_v1 = vmul.f32 %v16296_v4, %v6701_v0  ;;  %9335 = vmatprep.mubr.msk.f32.mxu1 %vm613_vm0, %v16480_v6 }
 0x724   : > { %v10747_v30 = vpop.eup %10746  ;;  %v6738_v39 = vmul.f32 %v16296_v4, %v6700_v52  ;;  %9336 = vmatmul.mubr.msk.f32.gmra.mrb[72].mxu1 %vm613_vm0, %v16476_v27 }
 0x725   : > { %v10749_v24 = vpop.eup %10748  ;;  %v16488_v45 = vadd.f32 %v16302_v54, %v6739_v1  ;;  %v6703_v55 = vmul.f32 %v10747_v30, %v16220_v58 }
 0x726   : > { %v16494_v21 = vadd.f32 %v16302_v54, %v6738_v39  ;;  %v6702_v31 = vmul.f32 %v10749_v24, %v16224_v46 }
 0x727   : > { %v6741_v25 = vmul.f32 %v16296_v4, %v6703_v55 }
 0x728   : > { %v10751_v35 = vpop.eup %10750  ;;  %9338 = vmatprep.mubr.msk.f32.mxu1 %vm613_vm0, %v16494_v21  ;;  %v6740_v60 = vmul.f32 %v16296_v4, %v6702_v31 }
 0x729   : > { %v10753_v57 = vpop.eup %10752  ;;  %v16502_v34 = vadd.f32 %v16302_v54, %v6741_v25  ;;  %v6705_v58 = vmul.f32 %v10751_v35, %v16232_v20  ;;  %9339 = vmatmul.mubr.msk.f32.gmra.mrb[74].mxu1 %vm613_vm0, %v16488_v45 }
 0x72a   : > { %v16508_v36 = vadd.f32 %v16302_v54, %v6740_v60  ;;  %v6704_v46 = vmul.f32 %v10753_v57, %v16236_v32  ;;  %v16530_v32 = vld [vmem:[%s17190_s10] ss:$0 sm:$0xff] }
 0x72b   : > { %v6743_v23 = vmul.f32 %v16296_v4, %v6705_v58 }
 0x72c   : > { %9341 = vmatprep.mubr.msk.f32.mxu1 %vm613_vm0, %v16508_v36  ;;  %v6742_v43 = vmul.f32 %v16296_v4, %v6704_v46 }
 0x72d   : > { %v16516_v2 = vadd.f32 %v16302_v54, %v6743_v23  ;;  %9342 = vmatmul.mubr.msk.f32.gmra.mrb[76].mxu1 %vm613_vm0, %v16502_v34 }
 0x72e   : > { %v16521_v20 = vadd.f32 %v16302_v54, %v6742_v43 }
 0x730   : > { %9344 = vmatprep.mubr.msk.f32.mxu1 %vm613_vm0, %v16521_v20 }
 0x731   : > { %9345 = vmatmul.mubr.msk.f32.gmra.mrb[78].mxu1 %vm613_vm0, %v16516_v2 }
 0x7c4   : > { %v9301_v4 = vpop.f32.mrb[48].mxu1 }
 0x7c5   : > { %v6961_v54 = vadd.f32 %v9301_v4, %v16530_v32  ;;  %v6955_v42 = vpop.f32.mrb[49].mxu1 }
 0x7c6   : > { %v6956_v48 = vadd.f32 %v16530_v32, %v6955_v42 }
 0x7c7   : > { %v7154_v61 = vmul.f32 %v16535_v63, %v6961_v54  ;;  %vm7115_vm14 = vcmp.ge.f32.partialorder %v6961_v54, 0.0 }
 0x7c8   : > { %v7153_v37 = vmul.f32 %v16535_v63, %v6956_v48  ;;  %v9304_v16 = vpop.f32.mrb[50].mxu1  ;;  %vm7114_vm15 = vcmp.ge.f32.partialorder %v6956_v48, 0.0 }
 0x7c9   : > { %v6971_v7 = vadd.f32 %v9304_v16, %v16530_v32  ;;  %v6965_v59 = vpop.f32.mrb[51].mxu1  ;;  %v7186_v17 = vsel %vm7115_vm14, %v6961_v54, %v7154_v61 }
 0x7ca   : > { %v6966_v19 = vadd.f32 %v16530_v32, %v6965_v59  ;;  %v7185_v9 = vsel %vm7114_vm15, %v6956_v48, %v7153_v37 }
 0x7cb   : > { %v7156_v11 = vmul.f32 %v16535_v63, %v6971_v7  ;;  %9379 = vmatprep.mubr.f32.mxu0 %v7185_v9  ;;  %vm7117_vm1 = vcmp.ge.f32.partialorder %v6971_v7, 0.0 }
 0x7cc   : > { %v7155_v13 = vmul.f32 %v16535_v63, %v6966_v19  ;;  %v9307_v0 = vpop.f32.mrb[52].mxu1  ;;  %9380 = vmatmul.mubr.f32.vlgmr.msra.gmra.mrb[48].mxu0 %v7186_v17  ;;  %vm7116_vm2 = vcmp.ge.f32.partialorder %v6966_v19, 0.0 }
 0x7cd   : > { %v6981_v52 = vadd.f32 %v9307_v0, %v16530_v32  ;;  %v6975_v1 = vpop.f32.mrb[53].mxu1  ;;  %v7188_v24 = vsel %vm7117_vm1, %v6971_v7, %v7156_v11 }
 0x7ce   : > { %v6976_v30 = vadd.f32 %v16530_v32, %v6975_v1  ;;  %v7187_v39 = vsel %vm7116_vm2, %v6966_v19, %v7155_v13 }
 0x7cf   : > { %v7158_v55 = vmul.f32 %v16535_v63, %v6981_v52  ;;  %9382 = vmatprep.mubr.f32.mxu0 %v7187_v39  ;;  %vm7119_vm3 = vcmp.ge.f32.partialorder %v6981_v52, 0.0 }
 0x7d0   : > { %v7157_v31 = vmul.f32 %v16535_v63, %v6976_v30  ;;  %v9310_v25 = vpop.f32.mrb[54].mxu1  ;;  %9383 = vmatmul.mubr.f32.gmra.mrb[50].mxu0 %v7188_v24  ;;  %vm7118_vm4 = vcmp.ge.f32.partialorder %v6976_v30, 0.0 }
 0x7d1   : > { %v6991_v35 = vadd.f32 %v9310_v25, %v16530_v32  ;;  %v6985_v60 = vpop.f32.mrb[55].mxu1  ;;  %v7190_v46 = vsel %vm7119_vm3, %v6981_v52, %v7158_v55 }
 0x7d2   : > { %v6986_v57 = vadd.f32 %v16530_v32, %v6985_v60  ;;  %v7189_v58 = vsel %vm7118_vm4, %v6976_v30, %v7157_v31 }
 0x7d3   : > { %v7160_v23 = vmul.f32 %v16535_v63, %v6991_v35  ;;  %9385 = vmatprep.mubr.f32.mxu0 %v7189_v58  ;;  %vm7121_vm5 = vcmp.ge.f32.partialorder %v6991_v35, 0.0 }
 0x7d4   : > { %v7159_v43 = vmul.f32 %v16535_v63, %v6986_v57  ;;  %v9313_v4 = vpop.f32.mrb[56].mxu1  ;;  %9386 = vmatmul.mubr.f32.gmra.mrb[52].mxu0 %v7190_v46  ;;  %vm7120_vm6 = vcmp.ge.f32.partialorder %v6986_v57, 0.0 }
 0x7d5   : > { %v7001_v54 = vadd.f32 %v9313_v4, %v16530_v32  ;;  %v6995_v42 = vpop.f32.mrb[57].mxu1  ;;  %v7192_v37 = vsel %vm7121_vm5, %v6991_v35, %v7160_v23 }
 0x7d6   : > { %v6996_v48 = vadd.f32 %v16530_v32, %v6995_v42  ;;  %v7191_v61 = vsel %vm7120_vm6, %v6986_v57, %v7159_v43 }
 0x7d7   : > { %v7162_v16 = vmul.f32 %v16535_v63, %v7001_v54  ;;  %9388 = vmatprep.mubr.f32.mxu0 %v7191_v61  ;;  %vm7123_vm7 = vcmp.ge.f32.partialorder %v7001_v54, 0.0 }
 0x7d8   : > { %v7161_v7 = vmul.f32 %v16535_v63, %v6996_v48  ;;  %v9316_v59 = vpop.f32.mrb[58].mxu1  ;;  %9389 = vmatmul.mubr.f32.gmra.mrb[54].mxu0 %v7192_v37  ;;  %vm7122_vm8 = vcmp.ge.f32.partialorder %v6996_v48, 0.0 }
 0x7d9   : > { %v7011_v19 = vadd.f32 %v9316_v59, %v16530_v32  ;;  %v7005_v9 = vpop.f32.mrb[59].mxu1  ;;  %v7194_v13 = vsel %vm7123_vm7, %v7001_v54, %v7162_v16 }
 0x7da   : > { %v7006_v17 = vadd.f32 %v16530_v32, %v7005_v9  ;;  %v7193_v11 = vsel %vm7122_vm8, %v6996_v48, %v7161_v7 }
 0x7db   : > { %v7164_v0 = vmul.f32 %v16535_v63, %v7011_v19  ;;  %9391 = vmatprep.mubr.f32.mxu0 %v7193_v11  ;;  %vm7125_vm9 = vcmp.ge.f32.partialorder %v7011_v19, 0.0 }
 0x7dc   : > { %v7163_v52 = vmul.f32 %v16535_v63, %v7006_v17  ;;  %v9319_v1 = vpop.f32.mrb[60].mxu1  ;;  %9392 = vmatmul.mubr.f32.gmra.mrb[56].mxu0 %v7194_v13  ;;  %vm7124_vm10 = vcmp.ge.f32.partialorder %v7006_v17, 0.0 }
 0x7dd   : > { %v7021_v30 = vadd.f32 %v9319_v1, %v16530_v32  ;;  %v7015_v39 = vpop.f32.mrb[61].mxu1  ;;  %v7196_v31 = vsel %vm7125_vm9, %v7011_v19, %v7164_v0 }
 0x7de   : > { %v7016_v24 = vadd.f32 %v16530_v32, %v7015_v39  ;;  %v7195_v55 = vsel %vm7124_vm10, %v7006_v17, %v7163_v52 }
 0x7df   : > { %v7166_v25 = vmul.f32 %v16535_v63, %v7021_v30  ;;  %9394 = vmatprep.mubr.f32.mxu0 %v7195_v55  ;;  %vm7127_vm11 = vcmp.ge.f32.partialorder %v7021_v30, 0.0 }
 0x7e0   : > { %v7165_v35 = vmul.f32 %v16535_v63, %v7016_v24  ;;  %v9322_v60 = vpop.f32.mrb[62].mxu1  ;;  %9395 = vmatmul.mubr.f32.gmra.mrb[58].mxu0 %v7196_v31  ;;  %vm7126_vm12 = vcmp.ge.f32.partialorder %v7016_v24, 0.0 }
 0x7e1   : > { %v7031_v57 = vadd.f32 %v9322_v60, %v16530_v32  ;;  %v7025_v58 = vpop.f32.mrb[63].mxu1  ;;  %v7198_v43 = vsel %vm7127_vm11, %v7021_v30, %v7166_v25 }
 0x7e2   : > { %v7026_v46 = vadd.f32 %v16530_v32, %v7025_v58  ;;  %v7197_v23 = vsel %vm7126_vm12, %v7016_v24, %v7165_v35 }
 0x7e3   : > { %v7168_v4 = vmul.f32 %v16535_v63, %v7031_v57  ;;  %9397 = vmatprep.mubr.f32.mxu0 %v7197_v23  ;;  %vm7129_vm13 = vcmp.ge.f32.partialorder %v7031_v57, 0.0 }
 0x7e4   : > { %v7167_v54 = vmul.f32 %v16535_v63, %v7026_v46  ;;  %v9325_v42 = vpop.f32.mrb[64].mxu1  ;;  %9398 = vmatmul.mubr.f32.gmra.mrb[60].mxu0 %v7198_v43  ;;  %vm7128_vm14 = vcmp.ge.f32.partialorder %v7026_v46, 0.0 }
 0x7e5   : > { %v7041_v48 = vadd.f32 %v9325_v42, %v16530_v32  ;;  %v7035_v61 = vpop.f32.mrb[65].mxu1  ;;  %v7200_v7 = vsel %vm7129_vm13, %v7031_v57, %v7168_v4 }
 0x7e6   : > { %v7036_v37 = vadd.f32 %v16530_v32, %v7035_v61  ;;  %v7199_v16 = vsel %vm7128_vm14, %v7026_v46, %v7167_v54 }
 0x7e7   : > { %v7170_v59 = vmul.f32 %v16535_v63, %v7041_v48  ;;  %9400 = vmatprep.mubr.f32.mxu0 %v7199_v16  ;;  %vm7131_vm15 = vcmp.ge.f32.partialorder %v7041_v48, 0.0 }
 0x7e8   : > { %v7169_v19 = vmul.f32 %v16535_v63, %v7036_v37  ;;  %v9328_v9 = vpop.f32.mrb[66].mxu1  ;;  %9401 = vmatmul.mubr.f32.gmra.mrb[62].mxu0 %v7200_v7  ;;  %vm7130_vm1 = vcmp.ge.f32.partialorder %v7036_v37, 0.0 }
 0x7e9   : > { %v7051_v17 = vadd.f32 %v9328_v9, %v16530_v32  ;;  %v7045_v11 = vpop.f32.mrb[67].mxu1  ;;  %v7202_v52 = vsel %vm7131_vm15, %v7041_v48, %v7170_v59 }
 0x7ea   : > { %v7046_v13 = vadd.f32 %v16530_v32, %v7045_v11  ;;  %v7201_v0 = vsel %vm7130_vm1, %v7036_v37, %v7169_v19 }
 0x7eb   : > { %v7172_v1 = vmul.f32 %v16535_v63, %v7051_v17  ;;  %9403 = vmatprep.mubr.f32.mxu0 %v7201_v0  ;;  %vm7133_vm2 = vcmp.ge.f32.partialorder %v7051_v17, 0.0 }
 0x7ec   : > { %v7171_v30 = vmul.f32 %v16535_v63, %v7046_v13  ;;  %v9331_v39 = vpop.f32.mrb[68].mxu1  ;;  %9404 = vmatmul.mubr.f32.gmra.mrb[64].mxu0 %v7202_v52  ;;  %vm7132_vm3 = vcmp.ge.f32.partialorder %v7046_v13, 0.0 }
 0x7ed   : > { %v7061_v24 = vadd.f32 %v9331_v39, %v16530_v32  ;;  %v7055_v55 = vpop.f32.mrb[69].mxu1  ;;  %v7204_v35 = vsel %vm7133_vm2, %v7051_v17, %v7172_v1 }
 0x7ee   : > { %v7056_v31 = vadd.f32 %v16530_v32, %v7055_v55  ;;  %v7203_v25 = vsel %vm7132_vm3, %v7046_v13, %v7171_v30 }
 0x7ef   : > { %v7174_v60 = vmul.f32 %v16535_v63, %v7061_v24  ;;  %9406 = vmatprep.mubr.f32.mxu0 %v7203_v25  ;;  %vm7135_vm4 = vcmp.ge.f32.partialorder %v7061_v24, 0.0 }
 0x7f0   : > { %v7173_v57 = vmul.f32 %v16535_v63, %v7056_v31  ;;  %v9334_v58 = vpop.f32.mrb[70].mxu1  ;;  %9407 = vmatmul.mubr.f32.gmra.mrb[66].mxu0 %v7204_v35  ;;  %vm7134_vm5 = vcmp.ge.f32.partialorder %v7056_v31, 0.0 }
 0x7f1   : > { %v7071_v46 = vadd.f32 %v9334_v58, %v16530_v32  ;;  %v7065_v23 = vpop.f32.mrb[71].mxu1  ;;  %v7206_v54 = vsel %vm7135_vm4, %v7061_v24, %v7174_v60 }
 0x7f2   : > { %v7066_v43 = vadd.f32 %v16530_v32, %v7065_v23  ;;  %v7205_v4 = vsel %vm7134_vm5, %v7056_v31, %v7173_v57 }
 0x7f3   : > { %v7176_v42 = vmul.f32 %v16535_v63, %v7071_v46  ;;  %9409 = vmatprep.mubr.f32.mxu0 %v7205_v4  ;;  %vm7137_vm6 = vcmp.ge.f32.partialorder %v7071_v46, 0.0 }
 0x7f4   : > { %v7175_v48 = vmul.f32 %v16535_v63, %v7066_v43  ;;  %9410 = vmatmul.mubr.f32.gmra.mrb[68].mxu0 %v7206_v54  ;;  %vm7136_vm7 = vcmp.ge.f32.partialorder %v7066_v43, 0.0 }
 0x7f5   : > { %v7208_v37 = vsel %vm7137_vm6, %v7071_v46, %v7176_v42 }
 0x7f6   : > { %v7207_v61 = vsel %vm7136_vm7, %v7066_v43, %v7175_v48 }
 0x7f7   : > { %v9337_v16 = vpop.f32.mrb[72].mxu1  ;;  %9412 = vmatprep.mubr.f32.mxu0 %v7207_v61 }
 0x7f8   : > { %v7081_v7 = vadd.f32 %v9337_v16, %v16530_v32  ;;  %v7075_v59 = vpop.f32.mrb[73].mxu1  ;;  %9413 = vmatmul.mubr.f32.gmra.mrb[70].mxu0 %v7208_v37 }
 0x7f9   : > { %v7076_v19 = vadd.f32 %v16530_v32, %v7075_v59  ;;  %v16604_v59 = vld [vmem:[%s17193_s13] ss:$0 sm:$0xff] }
 0x7fa   : > { %v7178_v9 = vmul.f32 %v16535_v63, %v7081_v7  ;;  %vm7139_vm8 = vcmp.ge.f32.partialorder %v7081_v7, 0.0 }
 0x7fb   : > { %v7177_v17 = vmul.f32 %v16535_v63, %v7076_v19  ;;  %vm7138_vm9 = vcmp.ge.f32.partialorder %v7076_v19, 0.0 }
 0x7fc   : > { %v9340_v11 = vpop.f32.mrb[74].mxu1  ;;  %v7210_v30 = vsel %vm7139_vm8, %v7081_v7, %v7178_v9 }
 0x7fd   : > { %v7091_v13 = vadd.f32 %v9340_v11, %v16530_v32  ;;  %v7085_v0 = vpop.f32.mrb[75].mxu1  ;;  %v7209_v1 = vsel %vm7138_vm9, %v7076_v19, %v7177_v17 }
 0x7fe   : > { %v7086_v52 = vadd.f32 %v16530_v32, %v7085_v0  ;;  %9415 = vmatprep.mubr.f32.mxu0 %v7209_v1 }
 0x7ff   : > { %v7180_v39 = vmul.f32 %v16535_v63, %v7091_v13  ;;  %vm7141_vm10 = vcmp.ge.f32.partialorder %v7091_v13, 0.0  ;;  %9416 = vmatmul.mubr.f32.gmra.mrb[72].mxu0 %v7210_v30 }
 0x800   : > { %v7179_v24 = vmul.f32 %v16535_v63, %v7086_v52  ;;  %v9343_v55 = vpop.f32.mrb[76].mxu1  ;;  %vm7140_vm11 = vcmp.ge.f32.partialorder %v7086_v52, 0.0 }
 0x801   : > { %v7101_v31 = vadd.f32 %v9343_v55, %v16530_v32  ;;  %v7095_v25 = vpop.f32.mrb[77].mxu1  ;;  %v7212_v57 = vsel %vm7141_vm10, %v7091_v13, %v7180_v39 }
 0x802   : > { %v7096_v35 = vadd.f32 %v16530_v32, %v7095_v25  ;;  %v7211_v60 = vsel %vm7140_vm11, %v7086_v52, %v7179_v24 }
 0x803   : > { %v7182_v58 = vmul.f32 %v16535_v63, %v7101_v31  ;;  %9418 = vmatprep.mubr.f32.mxu0 %v7211_v60  ;;  %vm7143_vm12 = vcmp.ge.f32.partialorder %v7101_v31, 0.0 }
 0x804   : > { %v7181_v46 = vmul.f32 %v16535_v63, %v7096_v35  ;;  %v9346_v23 = vpop.f32.mrb[78].mxu1  ;;  %9419 = vmatmul.mubr.f32.gmra.mrb[74].mxu0 %v7212_v57  ;;  %vm7142_vm13 = vcmp.ge.f32.partialorder %v7096_v35, 0.0 }
 0x805   : > { %v7111_v43 = vadd.f32 %v9346_v23, %v16530_v32  ;;  %v7105_v4 = vpop.f32.mrb[79].mxu1  ;;  %v7214_v48 = vsel %vm7143_vm12, %v7101_v31, %v7182_v58 }
 0x806   : > { %v7106_v54 = vadd.f32 %v16530_v32, %v7105_v4  ;;  %v7213_v42 = vsel %vm7142_vm13, %v7096_v35, %v7181_v46 }
 0x807   : > { %vm7145_vm14 = vcmp.ge.f32.partialorder %v7111_v43, 0.0  ;;  %v7184_v61 = vmul.f32 %v16535_v63, %v7111_v43  ;;  %9421 = vmatprep.mubr.f32.mxu0 %v7213_v42 }
 0x808   : > { %v7183_v37 = vmul.f32 %v16535_v63, %v7106_v54  ;;  %9422 = vmatmul.mubr.f32.gmra.mrb[76].mxu0 %v7214_v48  ;;  %vm7144_vm15 = vcmp.ge.f32.partialorder %v7106_v54, 0.0 }
 0x809   : > { %v7216_v16 = vsel %vm7145_vm14, %v7111_v43, %v7184_v61 }
 0x80a   : > { %v7215_v7 = vsel %vm7144_vm15, %v7106_v54, %v7183_v37 }
 0x80b   : > { %9424 = vmatprep.mubr.f32.mxu0 %v7215_v7 }
 0x80c   : > { %9425 = vmatmul.mubr.f32.gmra.mrb[78].mxu0 %v7216_v16 }
 0x89f   : > { %v9381_v32 = vpop.f32.mrb[48].mxu0 }
 0x8a0   : > { %v7312_v19 = vadd.f32 %v9381_v32, %v16604_v59  ;;  %v7306_v9 = vpop.f32.mrb[49].mxu0 }
 0x8a1   : > { %v7307_v17 = vadd.f32 %v16604_v59, %v7306_v9 }
 0x8a2   : > { %v16609_v11 = vadd.f32 %v7312_v19, %v16308_v5 }
 0x8a3   : > { %v16612_v63 = vadd.f32 %v7307_v17, %v16312_v47  ;;  %v9384_v13 = vpop.f32.mrb[50].mxu0 }
 0x8a4   : > { %v7322_v0 = vadd.f32 %v9384_v13, %v16604_v59  ;;  %v7316_v52 = vpop.f32.mrb[51].mxu0  ;;  %v7502_v1 = vsel %vm613_vm0, %v16609_v11, 0.0 }
 0x8a5   : > { %v7317_v30 = vadd.f32 %v16604_v59, %v7316_v52  ;;  %7503 = vadd.xlane.f32.xlu1 %v7502_v1  ;;  %v7499_v39 = vsel %vm613_vm0, %v16612_v63, 0.0 }
 0x8a6   : > { %v16621_v24 = vadd.f32 %v7322_v0, %v16320_v50  ;;  %7500 = vadd.xlane.f32.xlu0 %v7499_v39 }
 0x8a7   : > { %v16624_v5 = vadd.f32 %v7317_v30, %v16326_v3  ;;  %v9387_v47 = vpop.f32.mrb[52].mxu0 }
 0x8a8   : > { %v7332_v55 = vadd.f32 %v9387_v47, %v16604_v59  ;;  %v7326_v31 = vpop.f32.mrb[53].mxu0  ;;  %v7508_v25 = vsel %vm613_vm0, %v16621_v24, 0.0 }
 0x8a9   : > { %v7327_v35 = vadd.f32 %v16604_v59, %v7326_v31  ;;  %7509 = vadd.xlane.f32.xlu1 %v7508_v25  ;;  %v7505_v60 = vsel %vm613_vm0, %v16624_v5, 0.0 }
 0x8aa   : > { %v16633_v50 = vadd.f32 %v7332_v55, %v16334_v38  ;;  %7506 = vadd.xlane.f32.xlu0 %v7505_v60 }
 0x8ab   : > { %v16636_v3 = vadd.f32 %v7327_v35, %v16340_v26  ;;  %v9390_v57 = vpop.f32.mrb[54].mxu0 }
 0x8ac   : > { %v7342_v58 = vadd.f32 %v9390_v57, %v16604_v59  ;;  %v7336_v46 = vpop.f32.mrb[55].mxu0  ;;  %v7514_v23 = vsel %vm613_vm0, %v16633_v50, 0.0 }
 0x8ad   : > { %v7337_v43 = vadd.f32 %v16604_v59, %v7336_v46  ;;  %7515 = vadd.xlane.f32.xlu1 %v7514_v23  ;;  %v7511_v4 = vsel %vm613_vm0, %v16636_v3, 0.0 }
 0x8ae   : > { %v16645_v38 = vadd.f32 %v7342_v58, %v16348_v15  ;;  %7512 = vadd.xlane.f32.xlu0 %v7511_v4 }
 0x8af   : > { %v16648_v26 = vadd.f32 %v7337_v43, %v16354_v22  ;;  %v9393_v54 = vpop.f32.mrb[56].mxu0 }
 0x8b0   : > { %v7352_v42 = vadd.f32 %v9393_v54, %v16604_v59  ;;  %v7346_v48 = vpop.f32.mrb[57].mxu0  ;;  %v7520_v61 = vsel %vm613_vm0, %v16645_v38, 0.0 }
 0x8b1   : > { %v7347_v37 = vadd.f32 %v16604_v59, %v7346_v48  ;;  %7521 = vadd.xlane.f32.xlu1 %v7520_v61  ;;  %v7517_v16 = vsel %vm613_vm0, %v16648_v26, 0.0 }
 0x8b2   : > { %v16657_v15 = vadd.f32 %v7352_v42, %v16362_v28  ;;  %7518 = vadd.xlane.f32.xlu0 %v7517_v16 }
 0x8b3   : > { %v16660_v22 = vadd.f32 %v7347_v37, %v16368_v40  ;;  %v9396_v7 = vpop.f32.mrb[58].mxu0 }
 0x8b4   : > { %v7362_v32 = vadd.f32 %v9396_v7, %v16604_v59  ;;  %v7356_v19 = vpop.f32.mrb[59].mxu0  ;;  %v7526_v9 = vsel %vm613_vm0, %v16657_v15, 0.0 }
 0x8b5   : > { %v7357_v17 = vadd.f32 %v16604_v59, %v7356_v19  ;;  %7527 = vadd.xlane.f32.xlu1 %v7526_v9  ;;  %v7523_v13 = vsel %vm613_vm0, %v16660_v22, 0.0 }
 0x8b6   : > { %v16669_v28 = vadd.f32 %v7362_v32, %v16376_v41  ;;  %7524 = vadd.xlane.f32.xlu0 %v7523_v13 }
 0x8b7   : > { %v16672_v40 = vadd.f32 %v7357_v17, %v16382_v33  ;;  %v9399_v0 = vpop.f32.mrb[60].mxu0 }
 0x8b8   : > { %v7372_v52 = vadd.f32 %v9399_v0, %v16604_v59  ;;  %v7366_v1 = vpop.f32.mrb[61].mxu0  ;;  %v7532_v30 = vsel %vm613_vm0, %v16669_v28, 0.0 }
 0x8b9   : > { %v7367_v39 = vadd.f32 %v16604_v59, %v7366_v1  ;;  %7533 = vadd.xlane.f32.xlu1 %v7532_v30  ;;  %v7529_v47 = vsel %vm613_vm0, %v16672_v40, 0.0 }
 0x8ba   : > { %v16681_v41 = vadd.f32 %v7372_v52, %v16390_v53  ;;  %7530 = vadd.xlane.f32.xlu0 %v7529_v47 }
 0x8bb   : > { %v16684_v33 = vadd.f32 %v7367_v39, %v16396_v49  ;;  %v9402_v55 = vpop.f32.mrb[62].mxu0 }
 0x8bc   : > { %v7382_v31 = vadd.f32 %v9402_v55, %v16604_v59  ;;  %v7376_v25 = vpop.f32.mrb[63].mxu0  ;;  %v7538_v35 = vsel %vm613_vm0, %v16681_v41, 0.0 }
 0x8bd   : > { %v7377_v60 = vadd.f32 %v16604_v59, %v7376_v25  ;;  %7539 = vadd.xlane.f32.xlu1 %v7538_v35  ;;  %v7535_v57 = vsel %vm613_vm0, %v16684_v33, 0.0 }
 0x8be   : > { %v16693_v53 = vadd.f32 %v7382_v31, %v16404_v14  ;;  %7536 = vadd.xlane.f32.xlu0 %v7535_v57 }
 0x8bf   : > { %v16696_v49 = vadd.f32 %v7377_v60, %v16410_v29  ;;  %v9405_v58 = vpop.f32.mrb[64].mxu0 }
 0x8c0   : > { %v7392_v46 = vadd.f32 %v9405_v58, %v16604_v59  ;;  %v7386_v23 = vpop.f32.mrb[65].mxu0  ;;  %v7544_v43 = vsel %vm613_vm0, %v16693_v53, 0.0 }
 0x8c1   : > { %v7387_v4 = vadd.f32 %v16604_v59, %v7386_v23  ;;  %7545 = vadd.xlane.f32.xlu1 %v7544_v43  ;;  %v7541_v54 = vsel %vm613_vm0, %v16696_v49, 0.0 }
 0x8c2   : > { %v16705_v14 = vadd.f32 %v7392_v46, %v16418_v51  ;;  %7542 = vadd.xlane.f32.xlu0 %v7541_v54 }
 0x8c3   : > { %v16708_v29 = vadd.f32 %v7387_v4, %v16424_v44  ;;  %v9408_v42 = vpop.f32.mrb[66].mxu0 }
 0x8c4   : > { %v7402_v48 = vadd.f32 %v9408_v42, %v16604_v59  ;;  %v7396_v61 = vpop.f32.mrb[67].mxu0  ;;  %v7550_v37 = vsel %vm613_vm0, %v16705_v14, 0.0 }
 0x8c5   : > { %v7397_v16 = vadd.f32 %v16604_v59, %v7396_v61  ;;  %7551 = vadd.xlane.f32.xlu1 %v7550_v37  ;;  %v7547_v7 = vsel %vm613_vm0, %v16708_v29, 0.0 }
 0x8c6   : > { %v16717_v51 = vadd.f32 %v7402_v48, %v16432_v62  ;;  %7548 = vadd.xlane.f32.xlu0 %v7547_v7 }
 0x8c7   : > { %v16720_v44 = vadd.f32 %v7397_v16, %v16438_v18  ;;  %v9411_v32 = vpop.f32.mrb[68].mxu0 }
 0x8c8   : > { %v7412_v19 = vadd.f32 %v9411_v32, %v16604_v59  ;;  %v7406_v9 = vpop.f32.mrb[69].mxu0  ;;  %v7556_v17 = vsel %vm613_vm0, %v16717_v51, 0.0 }
 0x8c9   : > { %v7407_v13 = vadd.f32 %v16604_v59, %v7406_v9  ;;  %7557 = vadd.xlane.f32.xlu1 %v7556_v17  ;;  %v7553_v0 = vsel %vm613_vm0, %v16720_v44, 0.0 }
 0x8ca   : > { %v16729_v62 = vadd.f32 %v7412_v19, %v16446_v10  ;;  %7554 = vadd.xlane.f32.xlu0 %v7553_v0 }
 0x8cb   : > { %v16732_v18 = vadd.f32 %v7407_v13, %v16452_v12  ;;  %v9414_v52 = vpop.f32.mrb[70].mxu0 }
 0x8cc   : > { %v7422_v1 = vadd.f32 %v9414_v52, %v16604_v59  ;;  %v7416_v30 = vpop.f32.mrb[71].mxu0  ;;  %v7562_v39 = vsel %vm613_vm0, %v16729_v62, 0.0 }
 0x8cd   : > { %v7417_v47 = vadd.f32 %v16604_v59, %v7416_v30  ;;  %7563 = vadd.xlane.f32.xlu1 %v7562_v39  ;;  %v7559_v55 = vsel %vm613_vm0, %v16732_v18, 0.0 }
 0x8ce   : > { %v16741_v10 = vadd.f32 %v7422_v1, %v16460_v56  ;;  %7560 = vadd.xlane.f32.xlu0 %v7559_v55 }
 0x8cf   : > { %v16744_v12 = vadd.f32 %v7417_v47, %v16465_v8 }
 0x8d0   : > { %v7568_v31 = vsel %vm613_vm0, %v16741_v10, 0.0 }
 0x8d1   : > { %7569 = vadd.xlane.f32.xlu1 %v7568_v31  ;;  %v7565_v25 = vsel %vm613_vm0, %v16744_v12, 0.0 }
 0x8d2   : > { %7566 = vadd.xlane.f32.xlu0 %v7565_v25  ;;  %v9417_v35 = vpop.f32.mrb[72].mxu0 }
 0x8d3   : > { %v7432_v60 = vadd.f32 %v9417_v35, %v16604_v59  ;;  %v7426_v57 = vpop.f32.mrb[73].mxu0 }
 0x8d4   : > { %v7427_v58 = vadd.f32 %v16604_v59, %v7426_v57 }
 0x8d5   : > { %v16753_v56 = vadd.f32 %v7432_v60, %v16476_v27 }
 0x8d6   : > { %v16756_v8 = vadd.f32 %v7427_v58, %v16480_v6 }
 0x8d7   : > { %v9420_v46 = vpop.f32.mrb[74].mxu0  ;;  %v7574_v4 = vsel %vm613_vm0, %v16753_v56, 0.0 }
 0x8d8   : > { %v7442_v23 = vadd.f32 %v9420_v46, %v16604_v59  ;;  %v7436_v43 = vpop.f32.mrb[75].mxu0  ;;  %7575 = vadd.xlane.f32.xlu1 %v7574_v4  ;;  %v7571_v42 = vsel %vm613_vm0, %v16756_v8, 0.0 }
 0x8d9   : > { %v7437_v54 = vadd.f32 %v16604_v59, %v7436_v43  ;;  %7572 = vadd.xlane.f32.xlu0 %v7571_v42 }
 0x8da   : > { %v16765_v48 = vadd.f32 %v7442_v23, %v16488_v45 }
 0x8db   : > { %v16768_v27 = vadd.f32 %v7437_v54, %v16494_v21  ;;  %v9423_v6 = vpop.f32.mrb[76].mxu0 }
 0x8dc   : > { %v7452_v61 = vadd.f32 %v9423_v6, %v16604_v59  ;;  %v7446_v37 = vpop.f32.mrb[77].mxu0  ;;  %v7580_v16 = vsel %vm613_vm0, %v16765_v48, 0.0 }
 0x8dd   : > { %v7447_v7 = vadd.f32 %v16604_v59, %v7446_v37  ;;  %7581 = vadd.xlane.f32.xlu1 %v7580_v16  ;;  %v7577_v32 = vsel %vm613_vm0, %v16768_v27, 0.0 }
 0x8de   : > { %v16777_v45 = vadd.f32 %v7452_v61, %v16502_v34  ;;  %7578 = vadd.xlane.f32.xlu0 %v7577_v32 }
 0x8df   : > { %v16780_v21 = vadd.f32 %v7447_v7, %v16508_v36  ;;  %v9426_v19 = vpop.f32.mrb[78].mxu0 }
 0x8e0   : > { %v7462_v9 = vadd.f32 %v9426_v19, %v16604_v59  ;;  %v7456_v17 = vpop.f32.mrb[79].mxu0  ;;  %v7586_v13 = vsel %vm613_vm0, %v16777_v45, 0.0 }
 0x8e1   : > { %v7457_v0 = vadd.f32 %v16604_v59, %v7456_v17  ;;  %7587 = vadd.xlane.f32.xlu1 %v7586_v13  ;;  %v7583_v52 = vsel %vm613_vm0, %v16780_v21, 0.0 }
 0x8e2   : > { %v16789_v34 = vadd.f32 %v7462_v9, %v16516_v2  ;;  %7584 = vadd.xlane.f32.xlu0 %v7583_v52 }
 0x8e3   : > { %v16792_v36 = vadd.f32 %v7457_v0, %v16521_v20 }
 0x8e4   : > { %v7592_v1 = vsel %vm613_vm0, %v16789_v34, 0.0 }
 0x8e5   : > { %7593 = vadd.xlane.f32.xlu1 %v7592_v1  ;;  %v7589_v30 = vsel %vm613_vm0, %v16792_v36, 0.0 }
 0x8e6   : > { %7590 = vadd.xlane.f32.xlu0 %v7589_v30 }
 0x932   : > { %v7504_v59 = vpop.xlane.xlu1 %7503 }
 0x933   : > { %v7596_v39 = vmul.f32 0.03125, %v7504_v59  ;;  %v7501_v47 = vpop.xlane.xlu0 %7500 }
 0x934   : > { %v7595_v55 = vmul.f32 0.03125, %v7501_v47 }
 0x935   : > { %v16799_v31 = vsub.f32 %v16609_v11, %v7596_v39 }
 0x936   : > { %v16802_v2 = vsub.f32 %v16612_v63, %v7595_v55  ;;  %v7510_v20 = vpop.xlane.xlu1 %7509 }
 0x937   : > { %v7598_v25 = vmul.f32 0.03125, %v7510_v20  ;;  %v7507_v35 = vpop.xlane.xlu0 %7506  ;;  %v7660_v60 = vmul.f32 %v16799_v31, %v16799_v31 }
 0x938   : > { %v7597_v57 = vmul.f32 0.03125, %v7507_v35  ;;  %v7659_v58 = vmul.f32 %v16802_v2, %v16802_v2 }
 0x939   : > { %v16809_v46 = vsub.f32 %v16621_v24, %v7598_v25  ;;  %v7694_v23 = vsel %vm613_vm0, %v7660_v60, 0.0 }
 0x93a   : > { %v16813_v11 = vsub.f32 %v16624_v5, %v7597_v57  ;;  %v7516_v63 = vpop.xlane.xlu1 %7515  ;;  %7695 = vadd.xlane.f32.xlu1 %v7694_v23  ;;  %v7691_v43 = vsel %vm613_vm0, %v7659_v58, 0.0 }
 0x93b   : > { %v7600_v4 = vmul.f32 0.03125, %v7516_v63  ;;  %7692 = vadd.xlane.f32.xlu0 %v7691_v43  ;;  %v7513_v54 = vpop.xlane.xlu0 %7512  ;;  %v7662_v42 = vmul.f32 %v16809_v46, %v16809_v46 }
 0x93c   : > { %v7599_v6 = vmul.f32 0.03125, %v7513_v54  ;;  %v7661_v24 = vmul.f32 %v16813_v11, %v16813_v11 }
 0x93d   : > { %v16821_v61 = vsub.f32 %v16633_v50, %v7600_v4  ;;  %v7700_v5 = vsel %vm613_vm0, %v7662_v42, 0.0 }
 0x93e   : > { %v16825_v37 = vsub.f32 %v16636_v3, %v7599_v6  ;;  %v7522_v16 = vpop.xlane.xlu1 %7521  ;;  %7701 = vadd.xlane.f32.xlu1 %v7700_v5  ;;  %v7697_v7 = vsel %vm613_vm0, %v7661_v24, 0.0 }
 0x93f   : > { %v7602_v32 = vmul.f32 0.03125, %v7522_v16  ;;  %7698 = vadd.xlane.f32.xlu0 %v7697_v7  ;;  %v7519_v19 = vpop.xlane.xlu0 %7518  ;;  %v7664_v9 = vmul.f32 %v16821_v61, %v16821_v61 }
 0x940   : > { %v7601_v17 = vmul.f32 0.03125, %v7519_v19  ;;  %v7663_v50 = vmul.f32 %v16825_v37, %v16825_v37 }
 0x941   : > { %v16833_v13 = vsub.f32 %v16645_v38, %v7602_v32  ;;  %v7706_v3 = vsel %vm613_vm0, %v7664_v9, 0.0 }
 0x942   : > { %v16837_v0 = vsub.f32 %v16648_v26, %v7601_v17  ;;  %v7528_v52 = vpop.xlane.xlu1 %7527  ;;  %7707 = vadd.xlane.f32.xlu1 %v7706_v3  ;;  %v7703_v1 = vsel %vm613_vm0, %v7663_v50, 0.0 }
 0x943   : > { %v7604_v30 = vmul.f32 0.03125, %v7528_v52  ;;  %7704 = vadd.xlane.f32.xlu0 %v7703_v1  ;;  %v7525_v59 = vpop.xlane.xlu0 %7524  ;;  %v7666_v39 = vmul.f32 %v16833_v13, %v16833_v13 }
 0x944   : > { %v7603_v47 = vmul.f32 0.03125, %v7525_v59  ;;  %v7665_v38 = vmul.f32 %v16837_v0, %v16837_v0 }
 0x945   : > { %v16845_v55 = vsub.f32 %v16657_v15, %v7604_v30  ;;  %v7712_v26 = vsel %vm613_vm0, %v7666_v39, 0.0 }
 0x946   : > { %v16849_v20 = vsub.f32 %v16660_v22, %v7603_v47  ;;  %v7534_v25 = vpop.xlane.xlu1 %7533  ;;  %7713 = vadd.xlane.f32.xlu1 %v7712_v26  ;;  %v7709_v35 = vsel %vm613_vm0, %v7665_v38, 0.0 }
 0x947   : > { %v7606_v60 = vmul.f32 0.03125, %v7534_v25  ;;  %7710 = vadd.xlane.f32.xlu0 %v7709_v35  ;;  %v7531_v57 = vpop.xlane.xlu0 %7530  ;;  %v7668_v58 = vmul.f32 %v16845_v55, %v16845_v55 }
 0x948   : > { %v7605_v23 = vmul.f32 0.03125, %v7531_v57  ;;  %v7667_v15 = vmul.f32 %v16849_v20, %v16849_v20 }
 0x949   : > { %v16857_v63 = vsub.f32 %v16669_v28, %v7606_v60  ;;  %v7718_v22 = vsel %vm613_vm0, %v7668_v58, 0.0 }
 0x94a   : > { %v16861_v43 = vsub.f32 %v16672_v40, %v7605_v23  ;;  %v7540_v4 = vpop.xlane.xlu1 %7539  ;;  %7719 = vadd.xlane.f32.xlu1 %v7718_v22  ;;  %v7715_v54 = vsel %vm613_vm0, %v7667_v15, 0.0 }
 0x94b   : > { %v7608_v42 = vmul.f32 0.03125, %v7540_v4  ;;  %7716 = vadd.xlane.f32.xlu0 %v7715_v54  ;;  %v7537_v6 = vpop.xlane.xlu0 %7536  ;;  %v7670_v24 = vmul.f32 %v16857_v63, %v16857_v63 }
 0x94c   : > { %v7607_v5 = vmul.f32 0.03125, %v7537_v6  ;;  %v7669_v28 = vmul.f32 %v16861_v43, %v16861_v43 }
 0x94d   : > { %v16869_v16 = vsub.f32 %v16681_v41, %v7608_v42  ;;  %v7724_v40 = vsel %vm613_vm0, %v7670_v24, 0.0 }
 0x94e   : > { %v16873_v7 = vsub.f32 %v16684_v33, %v7607_v5  ;;  %v7546_v32 = vpop.xlane.xlu1 %7545  ;;  %7725 = vadd.xlane.f32.xlu1 %v7724_v40  ;;  %v7721_v19 = vsel %vm613_vm0, %v7669_v28, 0.0 }
 0x94f   : > { %v7610_v9 = vmul.f32 0.03125, %v7546_v32  ;;  %7722 = vadd.xlane.f32.xlu0 %v7721_v19  ;;  %v7543_v17 = vpop.xlane.xlu0 %7542  ;;  %v7672_v50 = vmul.f32 %v16869_v16, %v16869_v16 }
 0x950   : > { %v7609_v3 = vmul.f32 0.03125, %v7543_v17  ;;  %v7671_v41 = vmul.f32 %v16873_v7, %v16873_v7 }
 0x951   : > { %v16881_v52 = vsub.f32 %v16693_v53, %v7610_v9  ;;  %v7730_v33 = vsel %vm613_vm0, %v7672_v50, 0.0 }
 0x952   : > { %v16885_v1 = vsub.f32 %v16696_v49, %v7609_v3  ;;  %v7552_v30 = vpop.xlane.xlu1 %7551  ;;  %7731 = vadd.xlane.f32.xlu1 %v7730_v33  ;;  %v7727_v59 = vsel %vm613_vm0, %v7671_v41, 0.0 }
 0x953   : > { %v7612_v39 = vmul.f32 0.03125, %v7552_v30  ;;  %7728 = vadd.xlane.f32.xlu0 %v7727_v59  ;;  %v7549_v47 = vpop.xlane.xlu0 %7548  ;;  %v7674_v38 = vmul.f32 %v16881_v52, %v16881_v52 }
 0x954   : > { %v7611_v26 = vmul.f32 0.03125, %v7549_v47  ;;  %v7673_v53 = vmul.f32 %v16885_v1, %v16885_v1 }
 0x955   : > { %v16893_v25 = vsub.f32 %v16705_v14, %v7612_v39  ;;  %v7736_v49 = vsel %vm613_vm0, %v7674_v38, 0.0 }
 0x956   : > { %v16897_v35 = vsub.f32 %v16708_v29, %v7611_v26  ;;  %v7558_v60 = vpop.xlane.xlu1 %7557  ;;  %7737 = vadd.xlane.f32.xlu1 %v7736_v49  ;;  %v7733_v57 = vsel %vm613_vm0, %v7673_v53, 0.0 }
 0x957   : > { %v7614_v58 = vmul.f32 0.03125, %v7558_v60  ;;  %7734 = vadd.xlane.f32.xlu0 %v7733_v57  ;;  %v7555_v23 = vpop.xlane.xlu0 %7554  ;;  %v7676_v15 = vmul.f32 %v16893_v25, %v16893_v25 }
 0x958   : > { %v7613_v22 = vmul.f32 0.03125, %v7555_v23  ;;  %v7675_v14 = vmul.f32 %v16897_v35, %v16897_v35 }
 0x959   : > { %v16905_v4 = vsub.f32 %v16717_v51, %v7614_v58  ;;  %v7742_v29 = vsel %vm613_vm0, %v7676_v15, 0.0 }
 0x95a   : > { %v16909_v54 = vsub.f32 %v16720_v44, %v7613_v22  ;;  %v7564_v42 = vpop.xlane.xlu1 %7563  ;;  %7743 = vadd.xlane.f32.xlu1 %v7742_v29  ;;  %v7739_v6 = vsel %vm613_vm0, %v7675_v14, 0.0 }
 0x95b   : > { %v7616_v24 = vmul.f32 0.03125, %v7564_v42  ;;  %7740 = vadd.xlane.f32.xlu0 %v7739_v6  ;;  %v7561_v5 = vpop.xlane.xlu0 %7560  ;;  %v7678_v28 = vmul.f32 %v16905_v4, %v16905_v4 }
 0x95c   : > { %v7615_v40 = vmul.f32 0.03125, %v7561_v5  ;;  %v7677_v51 = vmul.f32 %v16909_v54, %v16909_v54 }
 0x95d   : > { %v16917_v32 = vsub.f32 %v16729_v62, %v7616_v24  ;;  %v7748_v44 = vsel %vm613_vm0, %v7678_v28, 0.0 }
 0x95e   : > { %v16921_v19 = vsub.f32 %v16732_v18, %v7615_v40  ;;  %v7570_v9 = vpop.xlane.xlu1 %7569  ;;  %7749 = vadd.xlane.f32.xlu1 %v7748_v44  ;;  %v7745_v17 = vsel %vm613_vm0, %v7677_v51, 0.0 }
 0x95f   : > { %v7618_v50 = vmul.f32 0.03125, %v7570_v9  ;;  %7746 = vadd.xlane.f32.xlu0 %v7745_v17  ;;  %v7567_v3 = vpop.xlane.xlu0 %7566  ;;  %v7680_v41 = vmul.f32 %v16917_v32, %v16917_v32 }
 0x960   : > { %v7617_v33 = vmul.f32 0.03125, %v7567_v3  ;;  %v7679_v62 = vmul.f32 %v16921_v19, %v16921_v19 }
 0x961   : > { %v16929_v30 = vsub.f32 %v16741_v10, %v7618_v50  ;;  %v7754_v18 = vsel %vm613_vm0, %v7680_v41, 0.0 }
 0x962   : > { %v16933_v59 = vsub.f32 %v16744_v12, %v7617_v33  ;;  %7755 = vadd.xlane.f32.xlu1 %v7754_v18  ;;  %v7751_v39 = vsel %vm613_vm0, %v7679_v62, 0.0 }
 0x963   : > { %7752 = vadd.xlane.f32.xlu0 %v7751_v39  ;;  %v7682_v47 = vmul.f32 %v16929_v30, %v16929_v30 }
 0x964   : > { %v7681_v38 = vmul.f32 %v16933_v59, %v16933_v59 }
 0x965   : > { %v7576_v26 = vpop.xlane.xlu1 %7575  ;;  %v7760_v53 = vsel %vm613_vm0, %v7682_v47, 0.0 }
 0x966   : > { %v7620_v10 = vmul.f32 0.03125, %v7576_v26  ;;  %7761 = vadd.xlane.f32.xlu1 %v7760_v53  ;;  %v7573_v49 = vpop.xlane.xlu0 %7572  ;;  %v7757_v60 = vsel %vm613_vm0, %v7681_v38, 0.0 }
 0x967   : > { %v7619_v12 = vmul.f32 0.03125, %v7573_v49  ;;  %7758 = vadd.xlane.f32.xlu0 %v7757_v60 }
 0x968   : > { %v16943_v57 = vsub.f32 %v16753_v56, %v7620_v10 }
 0x969   : > { %v16946_v58 = vsub.f32 %v16756_v8, %v7619_v12 }
 0x96a   : > { %v7582_v23 = vpop.xlane.xlu1 %7581  ;;  %v7684_v14 = vmul.f32 %v16943_v57, %v16943_v57 }
 0x96b   : > { %v7622_v15 = vmul.f32 0.03125, %v7582_v23  ;;  %v7579_v22 = vpop.xlane.xlu0 %7578  ;;  %v7683_v42 = vmul.f32 %v16946_v58, %v16946_v58 }
 0x96c   : > { %v7621_v29 = vmul.f32 0.03125, %v7579_v22  ;;  %v7766_v24 = vsel %vm613_vm0, %v7684_v14, 0.0 }
 0x96d   : > { %v16953_v6 = vsub.f32 %v16765_v48, %v7622_v15  ;;  %7767 = vadd.xlane.f32.xlu1 %v7766_v24  ;;  %v7763_v5 = vsel %vm613_vm0, %v7683_v42, 0.0 }
 0x96e   : > { %v16957_v56 = vsub.f32 %v16768_v27, %v7621_v29  ;;  %v7588_v8 = vpop.xlane.xlu1 %7587  ;;  %7764 = vadd.xlane.f32.xlu0 %v7763_v5 }
 0x96f   : > { %v7624_v28 = vmul.f32 0.03125, %v7588_v8  ;;  %v7585_v40 = vpop.xlane.xlu0 %7584  ;;  %v7686_v51 = vmul.f32 %v16953_v6, %v16953_v6 }
 0x970   : > { %v7623_v44 = vmul.f32 0.03125, %v7585_v40  ;;  %v7685_v48 = vmul.f32 %v16957_v56, %v16957_v56 }
 0x971   : > { %v16965_v9 = vsub.f32 %v16777_v45, %v7624_v28  ;;  %v7772_v27 = vsel %vm613_vm0, %v7686_v51, 0.0 }
 0x972   : > { %v16969_v17 = vsub.f32 %v16780_v21, %v7623_v44  ;;  %7773 = vadd.xlane.f32.xlu1 %v7772_v27  ;;  %v7594_v50 = vpop.xlane.xlu1 %7593  ;;  %v7769_v3 = vsel %vm613_vm0, %v7685_v48, 0.0 }
 0x973   : > { %v7626_v41 = vmul.f32 0.03125, %v7594_v50  ;;  %7770 = vadd.xlane.f32.xlu0 %v7769_v3  ;;  %v7591_v33 = vpop.xlane.xlu0 %7590  ;;  %v7688_v62 = vmul.f32 %v16965_v9, %v16965_v9 }
 0x974   : > { %v7625_v18 = vmul.f32 0.03125, %v7591_v33  ;;  %v7687_v45 = vmul.f32 %v16969_v17, %v16969_v17 }
 0x975   : > { %v16977_v39 = vsub.f32 %v16789_v34, %v7626_v41  ;;  %v7778_v21 = vsel %vm613_vm0, %v7688_v62, 0.0  ;;  %v16993_v62 = vld [vmem:[%s17187_s7] ss:$0 sm:$0xff] }
 0x976   : > { %v16981_v47 = vsub.f32 %v16792_v36, %v7625_v18  ;;  %7779 = vadd.xlane.f32.xlu1 %v7778_v21  ;;  %v7775_v38 = vsel %vm613_vm0, %v7687_v45, 0.0 }
 0x977   : > { %7776 = vadd.xlane.f32.xlu0 %v7775_v38  ;;  %v7690_v26 = vmul.f32 %v16977_v39, %v16977_v39 }
 0x978   : > { %v7689_v53 = vmul.f32 %v16981_v47, %v16981_v47 }
 0x979   : > { %v7784_v10 = vsel %vm613_vm0, %v7690_v26, 0.0 }
 0x97a   : > { %7785 = vadd.xlane.f32.xlu1 %v7784_v10  ;;  %v7781_v34 = vsel %vm613_vm0, %v7689_v53, 0.0  ;;  %v16999_v53 = vld [vmem:[%s17188_s8] ss:$0 sm:$0xff] }
 0x97b   : > { %7782 = vadd.xlane.f32.xlu0 %v7781_v34 }
 0x9c7   : > { %v7696_v49 = vpop.xlane.xlu1 %7695 }
 0x9c8   : > { %v7788_v60 = vmul.f32 0.03125, %v7696_v49  ;;  %v7693_v36 = vpop.xlane.xlu0 %7692 }
 0x9c9   : > { %v7787_v12 = vmul.f32 0.03125, %v7693_v36 }
 0x9ca   : > { %v7820_v23 = vadd.f32 1e-05, %v7788_v60 }
 0x9cb   : > { %v7819_v15 = vadd.f32 1e-05, %v7787_v12  ;;  %v7702_v22 = vpop.xlane.xlu1 %7701 }
 0x9cc   : > { %10754 = vrsqrt.f32 %v7820_v23  ;;  %v7790_v14 = vmul.f32 0.03125, %v7702_v22  ;;  %v7699_v29 = vpop.xlane.xlu0 %7698 }
 0x9cd   : > { %10756 = vrsqrt.f32 %v7819_v15  ;;  %v7789_v42 = vmul.f32 0.03125, %v7699_v29 }
 0x9ce   : > { %v7822_v24 = vadd.f32 1e-05, %v7790_v14 }
 0x9cf   : > { %v7821_v8 = vadd.f32 1e-05, %v7789_v42  ;;  %v7708_v5 = vpop.xlane.xlu1 %7707 }
 0x9d0   : > { %10758 = vrsqrt.f32 %v7822_v24  ;;  %v7792_v28 = vmul.f32 0.03125, %v7708_v5  ;;  %v7705_v40 = vpop.xlane.xlu0 %7704 }
 0x9d1   : > { %10760 = vrsqrt.f32 %v7821_v8  ;;  %v7791_v51 = vmul.f32 0.03125, %v7705_v40 }
 0x9d2   : > { %v7824_v44 = vadd.f32 1e-05, %v7792_v28 }
 0x9d3   : > { %v7823_v48 = vadd.f32 1e-05, %v7791_v51  ;;  %v7714_v27 = vpop.xlane.xlu1 %7713 }
 0x9d4   : > { %10762 = vrsqrt.f32 %v7824_v44  ;;  %v7794_v50 = vmul.f32 0.03125, %v7714_v27  ;;  %v7711_v3 = vpop.xlane.xlu0 %7710 }
 0x9d5   : > { %10764 = vrsqrt.f32 %v7823_v48  ;;  %v7793_v41 = vmul.f32 0.03125, %v7711_v3 }
 0x9d6   : > { %v10755_v33 = vpop.eup %10754  ;;  %v7826_v18 = vadd.f32 1e-05, %v7794_v50 }
 0x9d7   : > { %v10757_v45 = vpop.eup %10756  ;;  %v7884_v21 = vmul.f32 %v10755_v33, %v16799_v31  ;;  %v7825_v38 = vadd.f32 1e-05, %v7793_v41  ;;  %v7720_v26 = vpop.xlane.xlu1 %7719 }
 0x9d8   : > { %v7883_v10 = vmul.f32 %v10757_v45, %v16802_v2  ;;  %10766 = vrsqrt.f32 %v7826_v18  ;;  %v7796_v34 = vmul.f32 0.03125, %v7720_v26  ;;  %v7717_v49 = vpop.xlane.xlu0 %7716 }
 0x9d9   : > { %v7922_v60 = vmul.f32 %v16993_v62, %v7884_v21  ;;  %10768 = vrsqrt.f32 %v7825_v38  ;;  %v7795_v36 = vmul.f32 0.03125, %v7717_v49 }
 0x9da   : > { %v10759_v12 = vpop.eup %10758  ;;  %v7921_v31 = vmul.f32 %v16993_v62, %v7883_v10  ;;  %v7828_v23 = vadd.f32 1e-05, %v7796_v34 }
 0x9db   : > { %v10761_v2 = vpop.eup %10760  ;;  %v7960_v15 = vadd.f32 %v16999_v53, %v7922_v60  ;;  %v7886_v22 = vmul.f32 %v10759_v12, %v16809_v46  ;;  %v7827_v14 = vadd.f32 1e-05, %v7795_v36  ;;  %v7726_v29 = vpop.xlane.xlu1 %7725 }
 0x9dc   : > { %v7959_v42 = vadd.f32 %v16999_v53, %v7921_v31  ;;  %v7885_v24 = vmul.f32 %v10761_v2, %v16813_v11  ;;  %10770 = vrsqrt.f32 %v7828_v23  ;;  %v7798_v8 = vmul.f32 0.03125, %v7726_v29  ;;  %v7723_v5 = vpop.xlane.xlu0 %7722 }
 0x9dd   : > { %7992 = vst.msk [vmem:[%s17008_s27 + $0x8] sm:$0xff] %vm613_vm0, %v7960_v15  ;;  %v7924_v28 = vmul.f32 %v16993_v62, %v7886_v22  ;;  %10772 = vrsqrt.f32 %v7827_v14  ;;  %v7797_v40 = vmul.f32 0.03125, %v7723_v5 }
 0x9de   : > { %v10763_v51 = vpop.eup %10762  ;;  %7991 = vst.msk [vmem:[%s17008_s27] sm:$0xff] %vm613_vm0, %v7959_v42  ;;  %v7923_v46 = vmul.f32 %v16993_v62, %v7885_v24  ;;  %v7830_v44 = vadd.f32 1e-05, %v7798_v8 }
 0x9df   : > { %v10765_v48 = vpop.eup %10764  ;;  %v7962_v11 = vadd.f32 %v16999_v53, %v7924_v28  ;;  %v7888_v27 = vmul.f32 %v10763_v51, %v16821_v61  ;;  %v7829_v50 = vadd.f32 1e-05, %v7797_v40  ;;  %v7732_v3 = vpop.xlane.xlu1 %7731 }
 0x9e0   : > { %v7961_v41 = vadd.f32 %v16999_v53, %v7923_v46  ;;  %v7887_v33 = vmul.f32 %v10765_v48, %v16825_v37  ;;  %10774 = vrsqrt.f32 %v7830_v44  ;;  %v7800_v18 = vmul.f32 0.03125, %v7732_v3  ;;  %v7729_v45 = vpop.xlane.xlu0 %7728 }
 0x9e1   : > { %7994 = vst.msk [vmem:[%s17008_s27 + $0x18] sm:$0xff] %vm613_vm0, %v7962_v11  ;;  %v7926_v21 = vmul.f32 %v16993_v62, %v7888_v27  ;;  %10776 = vrsqrt.f32 %v7829_v50  ;;  %v7799_v38 = vmul.f32 0.03125, %v7729_v45 }
 0x9e2   : > { %v10767_v26 = vpop.eup %10766  ;;  %7993 = vst.msk [vmem:[%s17008_s27 + $0x10] sm:$0xff] %vm613_vm0, %v7961_v41  ;;  %v7925_v61 = vmul.f32 %v16993_v62, %v7887_v33  ;;  %v7832_v10 = vadd.f32 1e-05, %v7800_v18 }
 0x9e3   : > { %v10769_v34 = vpop.eup %10768  ;;  %v7964_v37 = vadd.f32 %v16999_v53, %v7926_v21  ;;  %v7890_v49 = vmul.f32 %v10767_v26, %v16833_v13  ;;  %v7831_v60 = vadd.f32 1e-05, %v7799_v38  ;;  %v7738_v36 = vpop.xlane.xlu1 %7737 }
 0x9e4   : > { %v7963_v12 = vadd.f32 %v16999_v53, %v7925_v61  ;;  %v7889_v31 = vmul.f32 %v10769_v34, %v16837_v0  ;;  %10778 = vrsqrt.f32 %v7832_v10  ;;  %v7802_v23 = vmul.f32 0.03125, %v7738_v36  ;;  %v7735_v2 = vpop.xlane.xlu0 %7734 }
 0x9e5   : > { %7996 = vst.msk [vmem:[%s17008_s27 + $0x28] sm:$0xff] %vm613_vm0, %v7964_v37  ;;  %v7928_v15 = vmul.f32 %v16993_v62, %v7890_v49  ;;  %10780 = vrsqrt.f32 %v7831_v60  ;;  %v7801_v22 = vmul.f32 0.03125, %v7735_v2 }
 0x9e6   : > { %v10771_v14 = vpop.eup %10770  ;;  %7995 = vst.msk [vmem:[%s17008_s27 + $0x20] sm:$0xff] %vm613_vm0, %v7963_v12  ;;  %v7927_v13 = vmul.f32 %v16993_v62, %v7889_v31  ;;  %v7834_v29 = vadd.f32 1e-05, %v7802_v23 }
 0x9e7   : > { %v10773_v42 = vpop.eup %10772  ;;  %v7966_v0 = vadd.f32 %v16999_v53, %v7928_v15  ;;  %v7892_v24 = vmul.f32 %v10771_v14, %v16845_v55  ;;  %v7833_v8 = vadd.f32 1e-05, %v7801_v22  ;;  %v7744_v5 = vpop.xlane.xlu1 %7743 }
 0x9e8   : > { %v7965_v28 = vadd.f32 %v16999_v53, %v7927_v13  ;;  %v7891_v40 = vmul.f32 %v10773_v42, %v16849_v20  ;;  %10782 = vrsqrt.f32 %v7834_v29  ;;  %v7804_v51 = vmul.f32 0.03125, %v7744_v5  ;;  %v7741_v46 = vpop.xlane.xlu0 %7740 }
 0x9e9   : > { %7998 = vst.msk [vmem:[%s17008_s27 + $0x38] sm:$0xff] %vm613_vm0, %v7966_v0  ;;  %v7930_v44 = vmul.f32 %v16993_v62, %v7892_v24  ;;  %10784 = vrsqrt.f32 %v7833_v8  ;;  %v7803_v48 = vmul.f32 0.03125, %v7741_v46 }
 0x9ea   : > { %v10775_v11 = vpop.eup %10774  ;;  %7997 = vst.msk [vmem:[%s17008_s27 + $0x30] sm:$0xff] %vm613_vm0, %v7965_v28  ;;  %v7929_v55 = vmul.f32 %v16993_v62, %v7891_v40  ;;  %v7836_v27 = vadd.f32 1e-05, %v7804_v51 }
 0x9eb   : > { %v10777_v50 = vpop.eup %10776  ;;  %v7968_v20 = vadd.f32 %v16999_v53, %v7930_v44  ;;  %v7894_v3 = vmul.f32 %v10775_v11, %v16857_v63  ;;  %v7835_v41 = vadd.f32 1e-05, %v7803_v48  ;;  %v7750_v33 = vpop.xlane.xlu1 %7749 }
 0x9ec   : > { %v7967_v18 = vadd.f32 %v16999_v53, %v7929_v55  ;;  %v7893_v45 = vmul.f32 %v10777_v50, %v16861_v43  ;;  %10786 = vrsqrt.f32 %v7836_v27  ;;  %v7806_v21 = vmul.f32 0.03125, %v7750_v33  ;;  %v7747_v38 = vpop.xlane.xlu0 %7746 }
 0x9ed   : > { %8000 = vst.msk [vmem:[%s17008_s27 + $0x48] sm:$0xff] %vm613_vm0, %v7968_v20  ;;  %v7932_v26 = vmul.f32 %v16993_v62, %v7894_v3  ;;  %10788 = vrsqrt.f32 %v7835_v41  ;;  %v7805_v61 = vmul.f32 0.03125, %v7747_v38 }
 0x9ee   : > { %v10779_v10 = vpop.eup %10778  ;;  %7999 = vst.msk [vmem:[%s17008_s27 + $0x40] sm:$0xff] %vm613_vm0, %v7967_v18  ;;  %v7931_v63 = vmul.f32 %v16993_v62, %v7893_v45  ;;  %v7838_v34 = vadd.f32 1e-05, %v7806_v21 }
 0x9ef   : > { %v10781_v37 = vpop.eup %10780  ;;  %v7970_v43 = vadd.f32 %v16999_v53, %v7932_v26  ;;  %v7896_v49 = vmul.f32 %v10779_v10, %v16869_v16  ;;  %v7837_v60 = vadd.f32 1e-05, %v7805_v61  ;;  %v7756_v36 = vpop.xlane.xlu1 %7755 }
 0x9f0   : > { %v7969_v12 = vadd.f32 %v16999_v53, %v7931_v63  ;;  %v7895_v31 = vmul.f32 %v10781_v37, %v16873_v7  ;;  %10790 = vrsqrt.f32 %v7838_v34  ;;  %v7808_v23 = vmul.f32 0.03125, %v7756_v36  ;;  %v7753_v2 = vpop.xlane.xlu0 %7752 }
 0x9f1   : > { %8002 = vst.msk [vmem:[%s17008_s27 + $0x58] sm:$0xff] %vm613_vm0, %v7970_v43  ;;  %v7934_v15 = vmul.f32 %v16993_v62, %v7896_v49  ;;  %10792 = vrsqrt.f32 %v7837_v60  ;;  %v7807_v22 = vmul.f32 0.03125, %v7753_v2 }
 0x9f2   : > { %v10783_v14 = vpop.eup %10782  ;;  %8001 = vst.msk [vmem:[%s17008_s27 + $0x50] sm:$0xff] %vm613_vm0, %v7969_v12  ;;  %v7933_v16 = vmul.f32 %v16993_v62, %v7895_v31  ;;  %v7840_v13 = vadd.f32 1e-05, %v7808_v23 }
 0x9f3   : > { %v10785_v29 = vpop.eup %10784  ;;  %v7972_v7 = vadd.f32 %v16999_v53, %v7934_v15  ;;  %v7898_v42 = vmul.f32 %v10783_v14, %v16881_v52  ;;  %v7839_v0 = vadd.f32 1e-05, %v7807_v22  ;;  %v7762_v24 = vpop.xlane.xlu1 %7761 }
 0x9f4   : > { %v7971_v8 = vadd.f32 %v16999_v53, %v7933_v16  ;;  %v7897_v5 = vmul.f32 %v10785_v29, %v16885_v1  ;;  %10794 = vrsqrt.f32 %v7840_v13  ;;  %v7810_v28 = vmul.f32 0.03125, %v7762_v24  ;;  %v7759_v40 = vpop.xlane.xlu0 %7758 }
 0x9f5   : > { %8004 = vst.msk [vmem:[%s17008_s27 + $0x68] sm:$0xff] %vm613_vm0, %v7972_v7  ;;  %v7936_v51 = vmul.f32 %v16993_v62, %v7898_v42  ;;  %10796 = vrsqrt.f32 %v7839_v0  ;;  %v7809_v46 = vmul.f32 0.03125, %v7759_v40 }
 0x9f6   : > { %v10787_v44 = vpop.eup %10786  ;;  %8003 = vst.msk [vmem:[%s17008_s27 + $0x60] sm:$0xff] %vm613_vm0, %v7971_v8  ;;  %v7935_v52 = vmul.f32 %v16993_v62, %v7897_v5  ;;  %v7842_v48 = vadd.f32 1e-05, %v7810_v28 }
 0x9f7   : > { %v10789_v11 = vpop.eup %10788  ;;  %v7974_v1 = vadd.f32 %v16999_v53, %v7936_v51  ;;  %v7900_v55 = vmul.f32 %v10787_v44, %v16893_v25  ;;  %v7841_v27 = vadd.f32 1e-05, %v7809_v46 }
 0x9f8   : > { %v7973_v50 = vadd.f32 %v16999_v53, %v7935_v52  ;;  %v7899_v20 = vmul.f32 %v10789_v11, %v16897_v35  ;;  %10798 = vrsqrt.f32 %v7842_v48 }
 0x9f9   : > { %8006 = vst.msk [vmem:[%s17008_s27 + $0x78] sm:$0xff] %vm613_vm0, %v7974_v1  ;;  %v7938_v3 = vmul.f32 %v16993_v62, %v7900_v55  ;;  %10800 = vrsqrt.f32 %v7841_v27 }
 0x9fa   : > { %v10791_v41 = vpop.eup %10790  ;;  %8005 = vst.msk [vmem:[%s17008_s27 + $0x70] sm:$0xff] %vm613_vm0, %v7973_v50  ;;  %v7937_v33 = vmul.f32 %v16993_v62, %v7899_v20  ;;  %v7768_v18 = vpop.xlane.xlu1 %7767 }
 0x9fb   : > { %v10793_v25 = vpop.eup %10792  ;;  %v7976_v45 = vadd.f32 %v16999_v53, %v7938_v3  ;;  %v7902_v21 = vmul.f32 %v10791_v41, %v16905_v4  ;;  %v7812_v35 = vmul.f32 0.03125, %v7768_v18  ;;  %v7765_v38 = vpop.xlane.xlu0 %7764 }
 0x9fc   : > { %v7975_v26 = vadd.f32 %v16999_v53, %v7937_v33  ;;  %v7901_v61 = vmul.f32 %v10793_v25, %v16909_v54  ;;  %v7811_v10 = vmul.f32 0.03125, %v7765_v38 }
 0x9fd   : > { %8008 = vst.msk [vmem:[%s17008_s27 + $0x88] sm:$0xff] %vm613_vm0, %v7976_v45  ;;  %v7940_v63 = vmul.f32 %v16993_v62, %v7902_v21  ;;  %v7844_v34 = vadd.f32 1e-05, %v7812_v35 }
 0x9fe   : > { %v10795_v37 = vpop.eup %10794  ;;  %8007 = vst.msk [vmem:[%s17008_s27 + $0x80] sm:$0xff] %vm613_vm0, %v7975_v26  ;;  %v7939_v43 = vmul.f32 %v16993_v62, %v7901_v61  ;;  %v7843_v49 = vadd.f32 1e-05, %v7811_v10 }
 0x9ff   : > { %v7774_v4 = vpop.xlane.xlu1 %7773  ;;  %v10797_v60 = vpop.eup %10796  ;;  %v7978_v36 = vadd.f32 %v16999_v53, %v7940_v63  ;;  %v7904_v54 = vmul.f32 %v10795_v37, %v16917_v32  ;;  %10802 = vrsqrt.f32 %v7844_v34 }
 0xa00   : > { %v7814_v12 = vmul.f32 0.03125, %v7774_v4  ;;  %v7771_v31 = vpop.xlane.xlu0 %7770  ;;  %v7977_v23 = vadd.f32 %v16999_v53, %v7939_v43  ;;  %v7903_v2 = vmul.f32 %v10797_v60, %v16921_v19  ;;  %10804 = vrsqrt.f32 %v7843_v49 }
 0xa01   : > { %v7813_v15 = vmul.f32 0.03125, %v7771_v31  ;;  %8010 = vst.msk [vmem:[%s17008_s27 + $0x98] sm:$0xff] %vm613_vm0, %v7978_v36  ;;  %v7942_v22 = vmul.f32 %v16993_v62, %v7904_v54 }
 0xa02   : > { %v7846_v14 = vadd.f32 1e-05, %v7814_v12  ;;  %v10799_v16 = vpop.eup %10798  ;;  %8009 = vst.msk [vmem:[%s17008_s27 + $0x90] sm:$0xff] %vm613_vm0, %v7977_v23  ;;  %v7941_v32 = vmul.f32 %v16993_v62, %v7903_v2 }
 0xa03   : > { %v7845_v13 = vadd.f32 1e-05, %v7813_v15  ;;  %v7780_v29 = vpop.xlane.xlu1 %7779  ;;  %v10801_v7 = vpop.eup %10800  ;;  %v7980_v42 = vadd.f32 %v16999_v53, %v7942_v22  ;;  %v7906_v19 = vmul.f32 %v10799_v16, %v16929_v30 }
 0xa04   : > { %10806 = vrsqrt.f32 %v7846_v14  ;;  %v7816_v0 = vmul.f32 0.03125, %v7780_v29  ;;  %v7777_v24 = vpop.xlane.xlu0 %7776  ;;  %v7979_v8 = vadd.f32 %v16999_v53, %v7941_v32  ;;  %v7905_v5 = vmul.f32 %v10801_v7, %v16933_v59 }
 0xa05   : > { %10808 = vrsqrt.f32 %v7845_v13  ;;  %v7815_v28 = vmul.f32 0.03125, %v7777_v24  ;;  %8012 = vst.msk [vmem:[%s17008_s27 + $0xa8] sm:$0xff] %vm613_vm0, %v7980_v42  ;;  %v7944_v40 = vmul.f32 %v16993_v62, %v7906_v19 }
 0xa06   : > { %v7848_v51 = vadd.f32 1e-05, %v7816_v0  ;;  %8011 = vst.msk [vmem:[%s17008_s27 + $0xa0] sm:$0xff] %vm613_vm0, %v7979_v8  ;;  %v7943_v30 = vmul.f32 %v16993_v62, %v7905_v5 }
 0xa07   : > { %v7847_v46 = vadd.f32 1e-05, %v7815_v28  ;;  %v7786_v44 = vpop.xlane.xlu1 %7785  ;;  %v7982_v52 = vadd.f32 %v16999_v53, %v7944_v40 }
 0xa08   : > { %10810 = vrsqrt.f32 %v7848_v51  ;;  %v7818_v48 = vmul.f32 0.03125, %v7786_v44  ;;  %v7783_v59 = vpop.xlane.xlu0 %7782  ;;  %v7981_v11 = vadd.f32 %v16999_v53, %v7943_v30 }
 0xa09   : > { %10812 = vrsqrt.f32 %v7847_v46  ;;  %v7817_v1 = vmul.f32 0.03125, %v7783_v59  ;;  %v10803_v55 = vpop.eup %10802  ;;  %8014 = vst.msk [vmem:[%s17008_s27 + $0xb8] sm:$0xff] %vm613_vm0, %v7982_v52 }
 0xa0a   : > { %v7850_v27 = vadd.f32 1e-05, %v7818_v48  ;;  %v10805_v50 = vpop.eup %10804  ;;  %8013 = vst.msk [vmem:[%s17008_s27 + $0xb0] sm:$0xff] %vm613_vm0, %v7981_v11  ;;  %v7908_v20 = vmul.f32 %v10803_v55, %v16943_v57 }
 0xa0b   : > { %v7849_v3 = vadd.f32 1e-05, %v7817_v1  ;;  %v7907_v41 = vmul.f32 %v10805_v50, %v16946_v58 }
 0xa0c   : > { %10814 = vrsqrt.f32 %v7850_v27  ;;  %v7946_v33 = vmul.f32 %v16993_v62, %v7908_v20 }
 0xa0d   : > { %10816 = vrsqrt.f32 %v7849_v3  ;;  %v7945_v25 = vmul.f32 %v16993_v62, %v7907_v41 }
 0xa0e   : > { %v10807_v18 = vpop.eup %10806  ;;  %v7984_v21 = vadd.f32 %v16999_v53, %v7946_v33 }
 0xa0f   : > { %v10809_v45 = vpop.eup %10808  ;;  %v7910_v35 = vmul.f32 %v10807_v18, %v16953_v6  ;;  %v7983_v57 = vadd.f32 %v16999_v53, %v7945_v25 }
 0xa10   : > { %v7909_v38 = vmul.f32 %v10809_v45, %v16957_v56  ;;  %8016 = vst.msk [vmem:[%s17008_s27 + $0xc8] sm:$0xff] %vm613_vm0, %v7984_v21 }
 0xa11   : > { %v7948_v58 = vmul.f32 %v16993_v62, %v7910_v35  ;;  %8015 = vst.msk [vmem:[%s17008_s27 + $0xc0] sm:$0xff] %vm613_vm0, %v7983_v57 }
 0xa12   : > { %v10811_v26 = vpop.eup %10810  ;;  %v7947_v61 = vmul.f32 %v16993_v62, %v7909_v38 }
 0xa13   : > { %v10813_v10 = vpop.eup %10812  ;;  %v7986_v63 = vadd.f32 %v16999_v53, %v7948_v58  ;;  %v7912_v6 = vmul.f32 %v10811_v26, %v16965_v9 }
 0xa14   : > { %v7985_v34 = vadd.f32 %v16999_v53, %v7947_v61  ;;  %v7911_v56 = vmul.f32 %v10813_v10, %v16969_v17 }
 0xa15   : > { %8018 = vst.msk [vmem:[%s17008_s27 + $0xd8] sm:$0xff] %vm613_vm0, %v7986_v63  ;;  %v7950_v37 = vmul.f32 %v16993_v62, %v7912_v6 }
 0xa16   : > { %v10815_v43 = vpop.eup %10814  ;;  %8017 = vst.msk [vmem:[%s17008_s27 + $0xd0] sm:$0xff] %vm613_vm0, %v7985_v34  ;;  %v7949_v49 = vmul.f32 %v16993_v62, %v7911_v56 }
 0xa17   : > { %v10817_v4 = vpop.eup %10816  ;;  %v7988_v60 = vadd.f32 %v16999_v53, %v7950_v37  ;;  %v7914_v9 = vmul.f32 %v10815_v43, %v16977_v39 }
 0xa18   : > { %v7987_v36 = vadd.f32 %v16999_v53, %v7949_v49  ;;  %v7913_v17 = vmul.f32 %v10817_v4, %v16981_v47 }
 0xa19   : > { %8020 = vst.msk [vmem:[%s17008_s27 + $0xe8] sm:$0xff] %vm613_vm0, %v7988_v60  ;;  %v7952_v54 = vmul.f32 %v16993_v62, %v7914_v9 }
 0xa1a   : > { %8019 = vst.msk [vmem:[%s17008_s27 + $0xe0] sm:$0xff] %vm613_vm0, %v7987_v36  ;;  %v7951_v12 = vmul.f32 %v16993_v62, %v7913_v17 }
 0xa1b   : > { %v7990_v31 = vadd.f32 %v16999_v53, %v7952_v54 }
 0xa1c   : > { %v7989_v23 = vadd.f32 %v16999_v53, %v7951_v12 }
 0xa1d   : > { %8022 = vst.msk [vmem:[%s17008_s27 + $0xf8] sm:$0xff] %vm613_vm0, %v7990_v31 }
 0xa1e   : > { %8021 = vst.msk [vmem:[%s17008_s27 + $0xf0] sm:$0xff] %vm613_vm0, %v7989_v23 }
 0xa1f PF: > { %s18542_s20 = sld [smem:[#allocation5_spill]]  ;;  %p24_p7 = scmp.ge.s32.totalorder %s11231_s18, 4  }
 0xa20   : > { %s18543_s29 = smov %s11121_s30  ;;  %s18544_s30 = smov %s11125_s15 }
 0xa21   : > { %s18546_s16 = smov %s11231_s18  ;;  %26 = sbr.rel (!%p24_p7) target bundleno = 5 (0x5), region = 119 }
 0xa25   : > { %s18545_s15 = smov %s18542_s20 }
 0xa28   :  { %8045 = vsyncpa [#allocation3], 1 }
 0xa29   :  { %8047 = vsyncpa [#allocation3 + $0x1], 1 }

</bundles_post_ra>
